<compile_context>
chip_gen: v7x
topology: tpu7x:2x2x1
jax: 0.10.0
libtpu: 0.0.40
codegen_flags: <defaults>
</compile_context>

<pallas_src>
import math
import jax
import jax.numpy as jnp
from jax.experimental import pallas as pl
from jax.experimental.pallas import tpu as pltpu

# hyperparams from the PyTorch module
d_k = d_v = 64
d_model = 512
n_heads = 8
d_ff = 1024
n_layers = 8
src_vocab_size = 22
MAX_LEN = 512                        # PE table length (torch uses 5000; 512 is ample here)
LN_EPS = 1e-5                        # torch.nn.LayerNorm default
_INV_SQRT_DK = 1.0 / math.sqrt(d_k)
_MASK_BIAS = -1e9                    # additive equivalent of masked_fill_(-1e9)


# ------------------------------ fused kernel -------------------------------

def _layer_norm(y, gamma, beta):
    mean = jnp.mean(y, axis=-1, keepdims=True)
    yc = y - mean
    var = jnp.mean(yc * yc, axis=-1, keepdims=True)
    return yc * jax.lax.rsqrt(var + LN_EPS) * gamma + beta


def _encoder_stack_kernel(x_in_ref, bias_ref, wqkv_ref, wfc_ref, w1_ref, w2_ref,
                          ln_ref, x_out_ref, attn_ref, x_sc):
    """grid = (n_layers, batch): layer outer (weights streamed once), batch inner.

    x_in_ref  : [1, S, D]  f32   embedding+PE for batch b (read at layer 0 only)
    bias_ref  : [1, 1, S]  f32   additive key-pad bias (-1e9 at PAD keys)
    wqkv_ref  : [1, D, 3D] bf16  fused W_Q|W_K|W_V of layer l
    wfc_ref   : [1, D, D]  bf16  attention output projection of layer l
    w1_ref    : [1, D, d_ff] bf16, w2_ref: [1, d_ff, D] bf16
    ln_ref    : [1, 4, D]  f32   rows: attn_gamma, attn_beta, ffn_gamma, ffn_beta
    x_out_ref : [1, S, D]  f32   encoder output for batch b (last layer's value wins)
    attn_ref  : [1, H, S, S] f32 attention probabilities of (layer l, batch b)
    x_sc      : [B, S, D]  f32   residual stream carried across layer grid steps
    """
    l = pl.program_id(0)
    b = pl.program_id(1)

    @pl.when(l == 0)
    def _():
        x_sc[b] = x_in_ref[0]

    x_f32 = x_sc[b]                                  # [S, D] f32 residual stream
    x_bf = x_f32.astype(jnp.bfloat16)
    bias = bias_ref[0]                               # [1, S] additive pad bias (hoisted)

    # ---------------- multi-head self-attention ----------------
    qkv = jnp.dot(x_bf, wqkv_ref[0],                 # [S, 3*D] packed Q|K|V
                  preferred_element_type=jnp.float32).astype(jnp.bfloat16)

    # Residual + sum_h ctx_h @ W_fc[h*64:(h+1)*64, :]  (no 8-way concat; fc weight
    # rows are sublane-aligned 64-row slices).
    acc = x_f32
    for h in range(n_heads):                         # static unroll over heads
        q_h = qkv[:, h * d_k:(h + 1) * d_k]
        k_h = qkv[:, d_model + h * d_k:d_model + (h + 1) * d_k]
        v_h = qkv[:, 2 * d_model + h * d_v:2 * d_model + (h + 1) * d_v]
        s = jax.lax.dot_general(q_h, k_h, (((1,), (1,)), ((), ())),
                                preferred_element_type=jnp.float32)      # [S, S]
        s = s * _INV_SQRT_DK + bias                  # masked_fill_ -> additive bias
        e = jnp.exp(s - jnp.max(s, axis=-1, keepdims=True))
        p = e / jnp.sum(e, axis=-1, keepdims=True)   # exact softmax (sums to 1)
        attn_ref[0, h] = p
        ctx_h = jnp.dot(p.astype(jnp.bfloat16), v_h,
                        preferred_element_type=jnp.float32)              # [S, 64]
        acc = acc + jnp.dot(ctx_h.astype(jnp.bfloat16),
                            wfc_ref[0, h * d_v:(h + 1) * d_v, :],
                            preferred_element_type=jnp.float32)

    ln = ln_ref[0]                                   # [4, D] f32
    y = _layer_norm(acc, ln[0:1], ln[1:2])           # [S, D] f32

    # ---------------- position-wise FFN + residual + LN ----------------
    y_bf = y.astype(jnp.bfloat16)
    h1 = jnp.maximum(
        jnp.dot(y_bf, w1_ref[0], preferred_element_type=jnp.float32), 0.0)
    z = jnp.dot(h1.astype(jnp.bfloat16), w2_ref[0],
                preferred_element_type=jnp.float32) + y
    z = _layer_norm(z, ln[2:3], ln[3:4])

    x_sc[b] = z                                      # carry residual stream to layer l+1
    x_out_ref[0] = z                                 # final HBM value = last layer's z


def _encoder_stack(x_emb, pad_bias, wqkv, wfc, w1, w2, ln):
    """x_emb: [B,S,512] f32, pad_bias: [B,1,S] f32; weights stacked over n_layers."""
    B, S, D = x_emb.shape
    L = n_layers
    x_out, attn_flat = pl.pallas_call(
        _encoder_stack_kernel,
        out_shape=(jax.ShapeDtypeStruct((B, S, D), jnp.float32),
                   jax.ShapeDtypeStruct((L * B, n_heads, S, S), jnp.float32)),
        grid=(L, B),
        in_specs=[
            pl.BlockSpec((1, S, D), lambda l, b: (b, 0, 0)),        # layer-0 input
            pl.BlockSpec((1, 1, S), lambda l, b: (b, 0, 0)),        # additive pad bias
            pl.BlockSpec((1, D, 3 * D), lambda l, b: (l, 0, 0)),    # fused W_Q|W_K|W_V
            pl.BlockSpec((1, D, D), lambda l, b: (l, 0, 0)),        # attention fc
            pl.BlockSpec((1, D, d_ff), lambda l, b: (l, 0, 0)),     # FFN w1
            pl.BlockSpec((1, d_ff, D), lambda l, b: (l, 0, 0)),     # FFN w2
            pl.BlockSpec((1, 4, D), lambda l, b: (l, 0, 0)),        # LN gamma/beta x2
        ],
        out_specs=(
            pl.BlockSpec((1, S, D), lambda l, b: (b, 0, 0)),
            pl.BlockSpec((1, n_heads, S, S), lambda l, b: (l * B + b, 0, 0, 0)),
        ),
        scratch_shapes=[pltpu.VMEM((B, S, D), jnp.float32)],        # residual carry
        compiler_params=pltpu.CompilerParams(
            # Layer axis is sequential (carry through scratch).  Batch stays
            # "arbitrary" too: the stack is weight-DMA-bound and splitting batch
            # across v7x's two cores would double weight traffic.  For large B,
            # make batch the leading axis and mark it "parallel".
            dimension_semantics=("arbitrary", "arbitrary"),
            vmem_limit_bytes=40 * 1024 * 1024,
        ),
    )(x_emb, pad_bias, wqkv, wfc, w1, w2, ln)
    return x_out, attn_flat.reshape(L, B, n_heads, S, S)


# ------------------------------ model (glue) -------------------------------

def positional_encoding(max_len, dm):
    position = jnp.arange(max_len, dtype=jnp.float32)[:, None]
    div_term = jnp.exp(jnp.arange(0, dm, 2, dtype=jnp.float32) *
                       (-math.log(10000.0) / dm))
    pe = jnp.zeros((max_len, dm), jnp.float32)
    pe = pe.at[:, 0::2].set(jnp.sin(position * div_term))
    pe = pe.at[:, 1::2].set(jnp.cos(position * div_term))
    return pe


def contact_map_forward(params, enc_inputs):
    """enc_inputs: int32 [B, S] -> (enc_outputs [B,S,3], list of attn [B,H,S,S])."""
    B, S = enc_inputs.shape
    x = params['emb'][enc_inputs] + params['pe'][:S][None, :, :]      # [B,S,512] f32
    # TODO(synk): dropout(p=0.1) in PositionalEncoding treated as identity (inference mode).
    pad_bias = jnp.where(enc_inputs == 0, _MASK_BIAS, 0.0
                         ).astype(jnp.float32)[:, None, :]            # [B,1,S]
    x_out, attn_all = _encoder_stack(x, pad_bias, params['wqkv'], params['wfc'],
                                     params['w1'], params['w2'], params['ln'])
    # Final 512->3 projection: left to XLA (N=3 is MXU/lane-sparse, review item).
    logits = jnp.dot(x_out.reshape(B * S, d_model), params['proj']).reshape(B, S, 3)
    return logits, [attn_all[i] for i in range(n_layers)]


# --------------------------- deterministic init ----------------------------

def init_params(key):
    def dense(k, shape, scale=0.02):
        return (scale * jax.random.normal(k, shape, dtype=jnp.float32)
                ).astype(jnp.bfloat16)

    keys = iter(jax.random.split(key, 6 * n_layers + 2))
    wqkv, wfc, w1, w2, ln = [], [], [], [], []
    for _ in range(n_layers):
        wq = dense(next(keys), (d_model, n_heads * d_k))
        wk = dense(next(keys), (d_model, n_heads * d_k))
        wv = dense(next(keys), (d_model, n_heads * d_v))
        wqkv.append(jnp.concatenate([wq, wk, wv], axis=1))            # [512, 1536]
        wfc.append(dense(next(keys), (n_heads * d_v, d_model)))
        w1.append(dense(next(keys), (d_model, d_ff)))
        w2.append(dense(next(keys), (d_ff, d_model)))
        ln.append(jnp.stack([jnp.ones((d_model,), jnp.float32),
                             jnp.zeros((d_model,), jnp.float32),
                             jnp.ones((d_model,), jnp.float32),
                             jnp.zeros((d_model,), jnp.float32)]))
    return {
        'emb': jax.random.normal(next(keys), (src_vocab_size, d_model),
                                 dtype=jnp.float32),
        'pe': positional_encoding(MAX_LEN, d_model),
        'proj': (0.02 * jax.random.normal(next(keys), (d_model, 3))
                 ).astype(jnp.float32),
        'wqkv': jnp.stack(wqkv),   # [L, 512, 1536] bf16
        'wfc':  jnp.stack(wfc),    # [L, 512, 512]  bf16
        'w1':   jnp.stack(w1),     # [L, 512, 1024] bf16
        'w2':   jnp.stack(w2),     # [L, 1024, 512] bf16
        'ln':   jnp.stack(ln),     # [L, 4, 512]    f32
    }


if __name__ == "__main__":
    key = jax.random.PRNGKey(0)
    pkey, ikey = jax.random.split(key)
    params = init_params(pkey)

    B, S = 2, 8
    enc_inputs = jax.random.randint(ikey, (B, S), 1, src_vocab_size, dtype=jnp.int32)
    enc_inputs = enc_inputs.at[:, -2:].set(0)   # PAD tokens -> exercises attention mask

    fwd = jax.jit(contact_map_forward)
    enc_outputs, enc_self_attns = fwd(params, enc_inputs)
    jax.block_until_ready(enc_outputs)
    jax.block_until_ready(enc_self_attns)

    assert enc_outputs.shape == (B, S, 3)
    assert len(enc_self_attns) == n_layers
    assert enc_self_attns[0].shape == (B, n_heads, S, S)
    assert bool(jnp.all(jnp.isfinite(enc_outputs)))
    assert bool(jnp.all(jnp.isfinite(enc_self_attns[0])))
    # softmax is exact, so attention rows sum to 1
    assert bool(jnp.allclose(enc_self_attns[0].sum(-1), 1.0, atol=1e-3))
    print("KERNEL_OK")
</pallas_src>

<mosaic_0001>
module attributes {stable_mosaic.version = 11 : i64} {
  func.func @_encoder_stack_kernel(%arg0: i32, %arg1: i32, %arg2: memref<1x8x512xf32, #tpu.memory_space<vmem>>, %arg3: memref<1x1x8xf32, #tpu.memory_space<vmem>>, %arg4: memref<1x512x1536xbf16, #tpu.memory_space<vmem>>, %arg5: memref<1x512x512xbf16, #tpu.memory_space<vmem>>, %arg6: memref<1x512x1024xbf16, #tpu.memory_space<vmem>>, %arg7: memref<1x1024x512xbf16, #tpu.memory_space<vmem>>, %arg8: memref<1x4x512xf32, #tpu.memory_space<vmem>>, %arg9: memref<1x8x512xf32, #tpu.memory_space<vmem>>, %arg10: memref<1x8x8x8xf32, #tpu.memory_space<vmem>>, %arg11: memref<2x8x512xf32, #tpu.memory_space<vmem>>) attributes {dimension_semantics = [#tpu.dimension_semantics<arbitrary>, #tpu.dimension_semantics<arbitrary>], iteration_bounds = array<i64: 8, 2>, scalar_prefetch = 0 : i64, scratch_operands = 1 : i64, tpu.core_type = #tpu.core_type<tc>, window_params = [{transform_indices = @transform_0, window_bounds = array<i64: 1, 8, 512>}, {transform_indices = @transform_1, window_bounds = array<i64: 1, 1, 8>}, {transform_indices = @transform_2, window_bounds = array<i64: 1, 512, 1536>}, {transform_indices = @transform_3, window_bounds = array<i64: 1, 512, 512>}, {transform_indices = @transform_4, window_bounds = array<i64: 1, 512, 1024>}, {transform_indices = @transform_5, window_bounds = array<i64: 1, 1024, 512>}, {transform_indices = @transform_6, window_bounds = array<i64: 1, 4, 512>}, {transform_indices = @transform_7, window_bounds = array<i64: 1, 8, 512>}, {transform_indices = @transform_8, window_bounds = array<i64: 1, 8, 8, 8>}]} {
    %c0_i32 = arith.constant 0 : i32
    %0 = arith.cmpi eq, %arg0, %c0_i32 : i32
    %1 = arith.extui %0 : i1 to i32
    %c0_i32_0 = arith.constant 0 : i32
    %2 = arith.cmpi ne, %1, %c0_i32_0 : i32
    scf.if %2 {
      %c0_125 = arith.constant 0 : index
      %c0_126 = arith.constant 0 : index
      %c0_127 = arith.constant 0 : index
      %293 = vector.load %arg2[%c0_125, %c0_126, %c0_127] : memref<1x8x512xf32, #tpu.memory_space<vmem>>, vector<1x8x512xf32>
      %294 = vector.shape_cast %293 : vector<1x8x512xf32> to vector<8x512xf32>
      %295 = arith.index_cast %arg1 : i32 to index
      %c0_128 = arith.constant 0 : index
      %c0_129 = arith.constant 0 : index
      %296 = vector.load %arg11[%295, %c0_128, %c0_129] : memref<2x8x512xf32, #tpu.memory_space<vmem>>, vector<1x8x512xf32>
      %297 = vector.shape_cast %296 : vector<1x8x512xf32> to vector<8x512xf32>
      %298 = vector.shape_cast %294 : vector<8x512xf32> to vector<1x8x512xf32>
      tpu.vector_store %arg11[%295, %c0_128, %c0_129], %298 {strides = array<i32>} : memref<2x8x512xf32, #tpu.memory_space<vmem>>, vector<1x8x512xf32>,
    } else {
    }
    %3 = arith.index_cast %arg1 : i32 to index
    %c0 = arith.constant 0 : index
    %c0_1 = arith.constant 0 : index
    %4 = vector.load %arg11[%3, %c0, %c0_1] : memref<2x8x512xf32, #tpu.memory_space<vmem>>, vector<1x8x512xf32>
    %5 = vector.shape_cast %4 : vector<1x8x512xf32> to vector<8x512xf32>
    %6 = arith.truncf %5 : vector<8x512xf32> to vector<8x512xbf16>
    %c0_2 = arith.constant 0 : index
    %c0_3 = arith.constant 0 : index
    %c0_4 = arith.constant 0 : index
    %7 = vector.load %arg3[%c0_2, %c0_3, %c0_4] : memref<1x1x8xf32, #tpu.memory_space<vmem>>, vector<1x1x8xf32>
    %8 = vector.shape_cast %7 : vector<1x1x8xf32> to vector<1x8xf32>
    %c0_5 = arith.constant 0 : index
    %c0_6 = arith.constant 0 : index
    %c0_7 = arith.constant 0 : index
    %9 = vector.load %arg4[%c0_5, %c0_6, %c0_7] : memref<1x512x1536xbf16, #tpu.memory_space<vmem>>, vector<1x512x1536xbf16>
    %10 = vector.shape_cast %9 : vector<1x512x1536xbf16> to vector<512x1536xbf16>
    %cst = arith.constant dense<0.000000e+00> : vector<8x1536xf32>
    %11 = tpu.matmul %6, %10, %cst {dimension_numbers = #tpu.dot_dimension_numbers<[1], [0], [0], [1], [0, 0, 1, 1], [], []>} : vector<8x512xbf16>, vector<512x1536xbf16>, vector<8x1536xf32> -> vector<8x1536xf32>
    %12 = arith.truncf %11 : vector<8x1536xf32> to vector<8x1536xbf16>
    %13 = vector.extract_strided_slice %12 {offsets = [0, 0], sizes = [8, 64], strides = [1, 1]} : vector<8x1536xbf16> to vector<8x64xbf16>
    %14 = vector.extract_strided_slice %12 {offsets = [0, 512], sizes = [8, 64], strides = [1, 1]} : vector<8x1536xbf16> to vector<8x64xbf16>
    %15 = vector.extract_strided_slice %12 {offsets = [0, 1024], sizes = [8, 64], strides = [1, 1]} : vector<8x1536xbf16> to vector<8x64xbf16>
    %cst_8 = arith.constant dense<0.000000e+00> : vector<8x8xf32>
    %16 = tpu.matmul %13, %14, %cst_8 {dimension_numbers = #tpu.dot_dimension_numbers<[1], [1], [0], [0], [0, 0, 1, 0], [], []>} : vector<8x64xbf16>, vector<8x64xbf16>, vector<8x8xf32> -> vector<8x8xf32>
    %cst_9 = arith.constant 1.250000e-01 : f32
    %17 = vector.broadcast %cst_9 : f32 to vector<8x8xf32>
    %18 = arith.mulf %16, %17 : vector<8x8xf32>
    %19 = vector.broadcast %8 : vector<1x8xf32> to vector<8x8xf32>
    %20 = arith.addf %18, %19 : vector<8x8xf32>
    %cst_10 = arith.constant dense<0xFF800000> : vector<8xf32>
    %21 = vector.multi_reduction <maximumf>, %20, %cst_10 [1] : vector<8x8xf32> to vector<8xf32>
    %22 = vector.shape_cast %21 : vector<8xf32> to vector<8x1xf32>
    %23 = vector.broadcast %22 : vector<8x1xf32> to vector<8x8xf32>
    %24 = arith.subf %20, %23 : vector<8x8xf32>
    %25 = math.exp %24 : vector<8x8xf32>
    %cst_11 = arith.constant dense<0.000000e+00> : vector<8xf32>
    %26 = vector.multi_reduction <add>, %25, %cst_11 [1] : vector<8x8xf32> to vector<8xf32>
    %27 = vector.shape_cast %26 : vector<8xf32> to vector<8x1xf32>
    %28 = vector.broadcast %27 : vector<8x1xf32> to vector<8x8xf32>
    %29 = arith.divf %25, %28 : vector<8x8xf32>
    %c0_12 = arith.constant 0 : index
    %c0_13 = arith.constant 0 : index
    %c0_14 = arith.constant 0 : index
    %c0_15 = arith.constant 0 : index
    %30 = vector.load %arg10[%c0_12, %c0_13, %c0_14, %c0_15] : memref<1x8x8x8xf32, #tpu.memory_space<vmem>>, vector<1x1x8x8xf32>
    %31 = vector.shape_cast %30 : vector<1x1x8x8xf32> to vector<8x8xf32>
    %32 = vector.shape_cast %29 : vector<8x8xf32> to vector<1x1x8x8xf32>
    tpu.vector_store %arg10[%c0_12, %c0_13, %c0_14, %c0_15], %32 {strides = array<i32>} : memref<1x8x8x8xf32, #tpu.memory_space<vmem>>, vector<1x1x8x8xf32>,
    %33 = arith.truncf %29 : vector<8x8xf32> to vector<8x8xbf16>
    %cst_16 = arith.constant dense<0.000000e+00> : vector<8x64xf32>
    %34 = tpu.matmul %33, %15, %cst_16 {dimension_numbers = #tpu.dot_dimension_numbers<[1], [0], [0], [1], [0, 0, 1, 1], [], []>} : vector<8x8xbf16>, vector<8x64xbf16>, vector<8x64xf32> -> vector<8x64xf32>
    %35 = arith.truncf %34 : vector<8x64xf32> to vector<8x64xbf16>
    %c0_17 = arith.constant 0 : index
    %c0_18 = arith.constant 0 : index
    %c0_19 = arith.constant 0 : index
    %36 = vector.load %arg5[%c0_17, %c0_18, %c0_19] : memref<1x512x512xbf16, #tpu.memory_space<vmem>>, vector<1x64x512xbf16>
    %37 = vector.shape_cast %36 : vector<1x64x512xbf16> to vector<64x512xbf16>
    %cst_20 = arith.constant dense<0.000000e+00> : vector<8x512xf32>
    %38 = tpu.matmul %35, %37, %cst_20 {dimension_numbers = #tpu.dot_dimension_numbers<[1], [0], [0], [1], [0, 0, 1, 1], [], []>} : vector<8x64xbf16>, vector<64x512xbf16>, vector<8x512xf32> -> vector<8x512xf32>
    %39 = arith.addf %5, %38 : vector<8x512xf32>
    %40 = vector.extract_strided_slice %12 {offsets = [0, 64], sizes = [8, 64], strides = [1, 1]} : vector<8x1536xbf16> to vector<8x64xbf16>
    %41 = vector.extract_strided_slice %12 {offsets = [0, 576], sizes = [8, 64], strides = [1, 1]} : vector<8x1536xbf16> to vector<8x64xbf16>
    %42 = vector.extract_strided_slice %12 {offsets = [0, 1088], sizes = [8, 64], strides = [1, 1]} : vector<8x1536xbf16> to vector<8x64xbf16>
    %cst_21 = arith.constant dense<0.000000e+00> : vector<8x8xf32>
    %43 = tpu.matmul %40, %41, %cst_21 {dimension_numbers = #tpu.dot_dimension_numbers<[1], [1], [0], [0], [0, 0, 1, 0], [], []>} : vector<8x64xbf16>, vector<8x64xbf16>, vector<8x8xf32> -> vector<8x8xf32>
    %cst_22 = arith.constant 1.250000e-01 : f32
    %44 = vector.broadcast %cst_22 : f32 to vector<8x8xf32>
    %45 = arith.mulf %43, %44 : vector<8x8xf32>
    %46 = vector.broadcast %8 : vector<1x8xf32> to vector<8x8xf32>
    %47 = arith.addf %45, %46 : vector<8x8xf32>
    %cst_23 = arith.constant dense<0xFF800000> : vector<8xf32>
    %48 = vector.multi_reduction <maximumf>, %47, %cst_23 [1] : vector<8x8xf32> to vector<8xf32>
    %49 = vector.shape_cast %48 : vector<8xf32> to vector<8x1xf32>
    %50 = vector.broadcast %49 : vector<8x1xf32> to vector<8x8xf32>
    %51 = arith.subf %47, %50 : vector<8x8xf32>
    %52 = math.exp %51 : vector<8x8xf32>
    %cst_24 = arith.constant dense<0.000000e+00> : vector<8xf32>
    %53 = vector.multi_reduction <add>, %52, %cst_24 [1] : vector<8x8xf32> to vector<8xf32>
    %54 = vector.shape_cast %53 : vector<8xf32> to vector<8x1xf32>
    %55 = vector.broadcast %54 : vector<8x1xf32> to vector<8x8xf32>
    %56 = arith.divf %52, %55 : vector<8x8xf32>
    %c0_25 = arith.constant 0 : index
    %c1 = arith.constant 1 : index
    %c0_26 = arith.constant 0 : index
    %c0_27 = arith.constant 0 : index
    %57 = vector.load %arg10[%c0_25, %c1, %c0_26, %c0_27] : memref<1x8x8x8xf32, #tpu.memory_space<vmem>>, vector<1x1x8x8xf32>
    %58 = vector.shape_cast %57 : vector<1x1x8x8xf32> to vector<8x8xf32>
    %59 = vector.shape_cast %56 : vector<8x8xf32> to vector<1x1x8x8xf32>
    tpu.vector_store %arg10[%c0_25, %c1, %c0_26, %c0_27], %59 {strides = array<i32>} : memref<1x8x8x8xf32, #tpu.memory_space<vmem>>, vector<1x1x8x8xf32>,
    %60 = arith.truncf %56 : vector<8x8xf32> to vector<8x8xbf16>
    %cst_28 = arith.constant dense<0.000000e+00> : vector<8x64xf32>
    %61 = tpu.matmul %60, %42, %cst_28 {dimension_numbers = #tpu.dot_dimension_numbers<[1], [0], [0], [1], [0, 0, 1, 1], [], []>} : vector<8x8xbf16>, vector<8x64xbf16>, vector<8x64xf32> -> vector<8x64xf32>
    %62 = arith.truncf %61 : vector<8x64xf32> to vector<8x64xbf16>
    %c0_29 = arith.constant 0 : index
    %c64 = arith.constant 64 : index
    %c0_30 = arith.constant 0 : index
    %63 = vector.load %arg5[%c0_29, %c64, %c0_30] : memref<1x512x512xbf16, #tpu.memory_space<vmem>>, vector<1x64x512xbf16>
    %64 = vector.shape_cast %63 : vector<1x64x512xbf16> to vector<64x512xbf16>
    %cst_31 = arith.constant dense<0.000000e+00> : vector<8x512xf32>
    %65 = tpu.matmul %62, %64, %cst_31 {dimension_numbers = #tpu.dot_dimension_numbers<[1], [0], [0], [1], [0, 0, 1, 1], [], []>} : vector<8x64xbf16>, vector<64x512xbf16>, vector<8x512xf32> -> vector<8x512xf32>
    %66 = arith.addf %39, %65 : vector<8x512xf32>
    %67 = vector.extract_strided_slice %12 {offsets = [0, 128], sizes = [8, 64], strides = [1, 1]} : vector<8x1536xbf16> to vector<8x64xbf16>
    %68 = vector.extract_strided_slice %12 {offsets = [0, 640], sizes = [8, 64], strides = [1, 1]} : vector<8x1536xbf16> to vector<8x64xbf16>
    %69 = vector.extract_strided_slice %12 {offsets = [0, 1152], sizes = [8, 64], strides = [1, 1]} : vector<8x1536xbf16> to vector<8x64xbf16>
    %cst_32 = arith.constant dense<0.000000e+00> : vector<8x8xf32>
    %70 = tpu.matmul %67, %68, %cst_32 {dimension_numbers = #tpu.dot_dimension_numbers<[1], [1], [0], [0], [0, 0, 1, 0], [], []>} : vector<8x64xbf16>, vector<8x64xbf16>, vector<8x8xf32> -> vector<8x8xf32>
    %cst_33 = arith.constant 1.250000e-01 : f32
    %71 = vector.broadcast %cst_33 : f32 to vector<8x8xf32>
    %72 = arith.mulf %70, %71 : vector<8x8xf32>
    %73 = vector.broadcast %8 : vector<1x8xf32> to vector<8x8xf32>
    %74 = arith.addf %72, %73 : vector<8x8xf32>
    %cst_34 = arith.constant dense<0xFF800000> : vector<8xf32>
    %75 = vector.multi_reduction <maximumf>, %74, %cst_34 [1] : vector<8x8xf32> to vector<8xf32>
    %76 = vector.shape_cast %75 : vector<8xf32> to vector<8x1xf32>
    %77 = vector.broadcast %76 : vector<8x1xf32> to vector<8x8xf32>
    %78 = arith.subf %74, %77 : vector<8x8xf32>
    %79 = math.exp %78 : vector<8x8xf32>
    %cst_35 = arith.constant dense<0.000000e+00> : vector<8xf32>
    %80 = vector.multi_reduction <add>, %79, %cst_35 [1] : vector<8x8xf32> to vector<8xf32>
    %81 = vector.shape_cast %80 : vector<8xf32> to vector<8x1xf32>
    %82 = vector.broadcast %81 : vector<8x1xf32> to vector<8x8xf32>
    %83 = arith.divf %79, %82 : vector<8x8xf32>
    %c0_36 = arith.constant 0 : index
    %c2 = arith.constant 2 : index
    %c0_37 = arith.constant 0 : index
    %c0_38 = arith.constant 0 : index
    %84 = vector.load %arg10[%c0_36, %c2, %c0_37, %c0_38] : memref<1x8x8x8xf32, #tpu.memory_space<vmem>>, vector<1x1x8x8xf32>
    %85 = vector.shape_cast %84 : vector<1x1x8x8xf32> to vector<8x8xf32>
    %86 = vector.shape_cast %83 : vector<8x8xf32> to vector<1x1x8x8xf32>
    tpu.vector_store %arg10[%c0_36, %c2, %c0_37, %c0_38], %86 {strides = array<i32>} : memref<1x8x8x8xf32, #tpu.memory_space<vmem>>, vector<1x1x8x8xf32>,
    %87 = arith.truncf %83 : vector<8x8xf32> to vector<8x8xbf16>
    %cst_39 = arith.constant dense<0.000000e+00> : vector<8x64xf32>
    %88 = tpu.matmul %87, %69, %cst_39 {dimension_numbers = #tpu.dot_dimension_numbers<[1], [0], [0], [1], [0, 0, 1, 1], [], []>} : vector<8x8xbf16>, vector<8x64xbf16>, vector<8x64xf32> -> vector<8x64xf32>
    %89 = arith.truncf %88 : vector<8x64xf32> to vector<8x64xbf16>
    %c0_40 = arith.constant 0 : index
    %c128 = arith.constant 128 : index
    %c0_41 = arith.constant 0 : index
    %90 = vector.load %arg5[%c0_40, %c128, %c0_41] : memref<1x512x512xbf16, #tpu.memory_space<vmem>>, vector<1x64x512xbf16>
    %91 = vector.shape_cast %90 : vector<1x64x512xbf16> to vector<64x512xbf16>
    %cst_42 = arith.constant dense<0.000000e+00> : vector<8x512xf32>
    %92 = tpu.matmul %89, %91, %cst_42 {dimension_numbers = #tpu.dot_dimension_numbers<[1], [0], [0], [1], [0, 0, 1, 1], [], []>} : vector<8x64xbf16>, vector<64x512xbf16>, vector<8x512xf32> -> vector<8x512xf32>
    %93 = arith.addf %66, %92 : vector<8x512xf32>
    %94 = vector.extract_strided_slice %12 {offsets = [0, 192], sizes = [8, 64], strides = [1, 1]} : vector<8x1536xbf16> to vector<8x64xbf16>
    %95 = vector.extract_strided_slice %12 {offsets = [0, 704], sizes = [8, 64], strides = [1, 1]} : vector<8x1536xbf16> to vector<8x64xbf16>
    %96 = vector.extract_strided_slice %12 {offsets = [0, 1216], sizes = [8, 64], strides = [1, 1]} : vector<8x1536xbf16> to vector<8x64xbf16>
    %cst_43 = arith.constant dense<0.000000e+00> : vector<8x8xf32>
    %97 = tpu.matmul %94, %95, %cst_43 {dimension_numbers = #tpu.dot_dimension_numbers<[1], [1], [0], [0], [0, 0, 1, 0], [], []>} : vector<8x64xbf16>, vector<8x64xbf16>, vector<8x8xf32> -> vector<8x8xf32>
    %cst_44 = arith.constant 1.250000e-01 : f32
    %98 = vector.broadcast %cst_44 : f32 to vector<8x8xf32>
    %99 = arith.mulf %97, %98 : vector<8x8xf32>
    %100 = vector.broadcast %8 : vector<1x8xf32> to vector<8x8xf32>
    %101 = arith.addf %99, %100 : vector<8x8xf32>
    %cst_45 = arith.constant dense<0xFF800000> : vector<8xf32>
    %102 = vector.multi_reduction <maximumf>, %101, %cst_45 [1] : vector<8x8xf32> to vector<8xf32>
    %103 = vector.shape_cast %102 : vector<8xf32> to vector<8x1xf32>
    %104 = vector.broadcast %103 : vector<8x1xf32> to vector<8x8xf32>
    %105 = arith.subf %101, %104 : vector<8x8xf32>
    %106 = math.exp %105 : vector<8x8xf32>
    %cst_46 = arith.constant dense<0.000000e+00> : vector<8xf32>
    %107 = vector.multi_reduction <add>, %106, %cst_46 [1] : vector<8x8xf32> to vector<8xf32>
    %108 = vector.shape_cast %107 : vector<8xf32> to vector<8x1xf32>
    %109 = vector.broadcast %108 : vector<8x1xf32> to vector<8x8xf32>
    %110 = arith.divf %106, %109 : vector<8x8xf32>
    %c0_47 = arith.constant 0 : index
    %c3 = arith.constant 3 : index
    %c0_48 = arith.constant 0 : index
    %c0_49 = arith.constant 0 : index
    %111 = vector.load %arg10[%c0_47, %c3, %c0_48, %c0_49] : memref<1x8x8x8xf32, #tpu.memory_space<vmem>>, vector<1x1x8x8xf32>
    %112 = vector.shape_cast %111 : vector<1x1x8x8xf32> to vector<8x8xf32>
    %113 = vector.shape_cast %110 : vector<8x8xf32> to vector<1x1x8x8xf32>
    tpu.vector_store %arg10[%c0_47, %c3, %c0_48, %c0_49], %113 {strides = array<i32>} : memref<1x8x8x8xf32, #tpu.memory_space<vmem>>, vector<1x1x8x8xf32>,
    %114 = arith.truncf %110 : vector<8x8xf32> to vector<8x8xbf16>
    %cst_50 = arith.constant dense<0.000000e+00> : vector<8x64xf32>
    %115 = tpu.matmul %114, %96, %cst_50 {dimension_numbers = #tpu.dot_dimension_numbers<[1], [0], [0], [1], [0, 0, 1, 1], [], []>} : vector<8x8xbf16>, vector<8x64xbf16>, vector<8x64xf32> -> vector<8x64xf32>
    %116 = arith.truncf %115 : vector<8x64xf32> to vector<8x64xbf16>
    %c0_51 = arith.constant 0 : index
    %c192 = arith.constant 192 : index
    %c0_52 = arith.constant 0 : index
    %117 = vector.load %arg5[%c0_51, %c192, %c0_52] : memref<1x512x512xbf16, #tpu.memory_space<vmem>>, vector<1x64x512xbf16>
    %118 = vector.shape_cast %117 : vector<1x64x512xbf16> to vector<64x512xbf16>
    %cst_53 = arith.constant dense<0.000000e+00> : vector<8x512xf32>
    %119 = tpu.matmul %116, %118, %cst_53 {dimension_numbers = #tpu.dot_dimension_numbers<[1], [0], [0], [1], [0, 0, 1, 1], [], []>} : vector<8x64xbf16>, vector<64x512xbf16>, vector<8x512xf32> -> vector<8x512xf32>
    %120 = arith.addf %93, %119 : vector<8x512xf32>
    %121 = vector.extract_strided_slice %12 {offsets = [0, 256], sizes = [8, 64], strides = [1, 1]} : vector<8x1536xbf16> to vector<8x64xbf16>
    %122 = vector.extract_strided_slice %12 {offsets = [0, 768], sizes = [8, 64], strides = [1, 1]} : vector<8x1536xbf16> to vector<8x64xbf16>
    %123 = vector.extract_strided_slice %12 {offsets = [0, 1280], sizes = [8, 64], strides = [1, 1]} : vector<8x1536xbf16> to vector<8x64xbf16>
    %cst_54 = arith.constant dense<0.000000e+00> : vector<8x8xf32>
    %124 = tpu.matmul %121, %122, %cst_54 {dimension_numbers = #tpu.dot_dimension_numbers<[1], [1], [0], [0], [0, 0, 1, 0], [], []>} : vector<8x64xbf16>, vector<8x64xbf16>, vector<8x8xf32> -> vector<8x8xf32>
    %cst_55 = arith.constant 1.250000e-01 : f32
    %125 = vector.broadcast %cst_55 : f32 to vector<8x8xf32>
    %126 = arith.mulf %124, %125 : vector<8x8xf32>
    %127 = vector.broadcast %8 : vector<1x8xf32> to vector<8x8xf32>
    %128 = arith.addf %126, %127 : vector<8x8xf32>
    %cst_56 = arith.constant dense<0xFF800000> : vector<8xf32>
    %129 = vector.multi_reduction <maximumf>, %128, %cst_56 [1] : vector<8x8xf32> to vector<8xf32>
    %130 = vector.shape_cast %129 : vector<8xf32> to vector<8x1xf32>
    %131 = vector.broadcast %130 : vector<8x1xf32> to vector<8x8xf32>
    %132 = arith.subf %128, %131 : vector<8x8xf32>
    %133 = math.exp %132 : vector<8x8xf32>
    %cst_57 = arith.constant dense<0.000000e+00> : vector<8xf32>
    %134 = vector.multi_reduction <add>, %133, %cst_57 [1] : vector<8x8xf32> to vector<8xf32>
    %135 = vector.shape_cast %134 : vector<8xf32> to vector<8x1xf32>
    %136 = vector.broadcast %135 : vector<8x1xf32> to vector<8x8xf32>
    %137 = arith.divf %133, %136 : vector<8x8xf32>
    %c0_58 = arith.constant 0 : index
    %c4 = arith.constant 4 : index
    %c0_59 = arith.constant 0 : index
    %c0_60 = arith.constant 0 : index
    %138 = vector.load %arg10[%c0_58, %c4, %c0_59, %c0_60] : memref<1x8x8x8xf32, #tpu.memory_space<vmem>>, vector<1x1x8x8xf32>
    %139 = vector.shape_cast %138 : vector<1x1x8x8xf32> to vector<8x8xf32>
    %140 = vector.shape_cast %137 : vector<8x8xf32> to vector<1x1x8x8xf32>
    tpu.vector_store %arg10[%c0_58, %c4, %c0_59, %c0_60], %140 {strides = array<i32>} : memref<1x8x8x8xf32, #tpu.memory_space<vmem>>, vector<1x1x8x8xf32>,
    %141 = arith.truncf %137 : vector<8x8xf32> to vector<8x8xbf16>
    %cst_61 = arith.constant dense<0.000000e+00> : vector<8x64xf32>
    %142 = tpu.matmul %141, %123, %cst_61 {dimension_numbers = #tpu.dot_dimension_numbers<[1], [0], [0], [1], [0, 0, 1, 1], [], []>} : vector<8x8xbf16>, vector<8x64xbf16>, vector<8x64xf32> -> vector<8x64xf32>
    %143 = arith.truncf %142 : vector<8x64xf32> to vector<8x64xbf16>
    %c0_62 = arith.constant 0 : index
    %c256 = arith.constant 256 : index
    %c0_63 = arith.constant 0 : index
    %144 = vector.load %arg5[%c0_62, %c256, %c0_63] : memref<1x512x512xbf16, #tpu.memory_space<vmem>>, vector<1x64x512xbf16>
    %145 = vector.shape_cast %144 : vector<1x64x512xbf16> to vector<64x512xbf16>
    %cst_64 = arith.constant dense<0.000000e+00> : vector<8x512xf32>
    %146 = tpu.matmul %143, %145, %cst_64 {dimension_numbers = #tpu.dot_dimension_numbers<[1], [0], [0], [1], [0, 0, 1, 1], [], []>} : vector<8x64xbf16>, vector<64x512xbf16>, vector<8x512xf32> -> vector<8x512xf32>
    %147 = arith.addf %120, %146 : vector<8x512xf32>
    %148 = vector.extract_strided_slice %12 {offsets = [0, 320], sizes = [8, 64], strides = [1, 1]} : vector<8x1536xbf16> to vector<8x64xbf16>
    %149 = vector.extract_strided_slice %12 {offsets = [0, 832], sizes = [8, 64], strides = [1, 1]} : vector<8x1536xbf16> to vector<8x64xbf16>
    %150 = vector.extract_strided_slice %12 {offsets = [0, 1344], sizes = [8, 64], strides = [1, 1]} : vector<8x1536xbf16> to vector<8x64xbf16>
    %cst_65 = arith.constant dense<0.000000e+00> : vector<8x8xf32>
    %151 = tpu.matmul %148, %149, %cst_65 {dimension_numbers = #tpu.dot_dimension_numbers<[1], [1], [0], [0], [0, 0, 1, 0], [], []>} : vector<8x64xbf16>, vector<8x64xbf16>, vector<8x8xf32> -> vector<8x8xf32>
    %cst_66 = arith.constant 1.250000e-01 : f32
    %152 = vector.broadcast %cst_66 : f32 to vector<8x8xf32>
    %153 = arith.mulf %151, %152 : vector<8x8xf32>
    %154 = vector.broadcast %8 : vector<1x8xf32> to vector<8x8xf32>
    %155 = arith.addf %153, %154 : vector<8x8xf32>
    %cst_67 = arith.constant dense<0xFF800000> : vector<8xf32>
    %156 = vector.multi_reduction <maximumf>, %155, %cst_67 [1] : vector<8x8xf32> to vector<8xf32>
    %157 = vector.shape_cast %156 : vector<8xf32> to vector<8x1xf32>
    %158 = vector.broadcast %157 : vector<8x1xf32> to vector<8x8xf32>
    %159 = arith.subf %155, %158 : vector<8x8xf32>
    %160 = math.exp %159 : vector<8x8xf32>
    %cst_68 = arith.constant dense<0.000000e+00> : vector<8xf32>
    %161 = vector.multi_reduction <add>, %160, %cst_68 [1] : vector<8x8xf32> to vector<8xf32>
    %162 = vector.shape_cast %161 : vector<8xf32> to vector<8x1xf32>
    %163 = vector.broadcast %162 : vector<8x1xf32> to vector<8x8xf32>
    %164 = arith.divf %160, %163 : vector<8x8xf32>
    %c0_69 = arith.constant 0 : index
    %c5 = arith.constant 5 : index
    %c0_70 = arith.constant 0 : index
    %c0_71 = arith.constant 0 : index
    %165 = vector.load %arg10[%c0_69, %c5, %c0_70, %c0_71] : memref<1x8x8x8xf32, #tpu.memory_space<vmem>>, vector<1x1x8x8xf32>
    %166 = vector.shape_cast %165 : vector<1x1x8x8xf32> to vector<8x8xf32>
    %167 = vector.shape_cast %164 : vector<8x8xf32> to vector<1x1x8x8xf32>
    tpu.vector_store %arg10[%c0_69, %c5, %c0_70, %c0_71], %167 {strides = array<i32>} : memref<1x8x8x8xf32, #tpu.memory_space<vmem>>, vector<1x1x8x8xf32>,
    %168 = arith.truncf %164 : vector<8x8xf32> to vector<8x8xbf16>
    %cst_72 = arith.constant dense<0.000000e+00> : vector<8x64xf32>
    %169 = tpu.matmul %168, %150, %cst_72 {dimension_numbers = #tpu.dot_dimension_numbers<[1], [0], [0], [1], [0, 0, 1, 1], [], []>} : vector<8x8xbf16>, vector<8x64xbf16>, vector<8x64xf32> -> vector<8x64xf32>
    %170 = arith.truncf %169 : vector<8x64xf32> to vector<8x64xbf16>
    %c0_73 = arith.constant 0 : index
    %c320 = arith.constant 320 : index
    %c0_74 = arith.constant 0 : index
    %171 = vector.load %arg5[%c0_73, %c320, %c0_74] : memref<1x512x512xbf16, #tpu.memory_space<vmem>>, vector<1x64x512xbf16>
    %172 = vector.shape_cast %171 : vector<1x64x512xbf16> to vector<64x512xbf16>
    %cst_75 = arith.constant dense<0.000000e+00> : vector<8x512xf32>
    %173 = tpu.matmul %170, %172, %cst_75 {dimension_numbers = #tpu.dot_dimension_numbers<[1], [0], [0], [1], [0, 0, 1, 1], [], []>} : vector<8x64xbf16>, vector<64x512xbf16>, vector<8x512xf32> -> vector<8x512xf32>
    %174 = arith.addf %147, %173 : vector<8x512xf32>
    %175 = vector.extract_strided_slice %12 {offsets = [0, 384], sizes = [8, 64], strides = [1, 1]} : vector<8x1536xbf16> to vector<8x64xbf16>
    %176 = vector.extract_strided_slice %12 {offsets = [0, 896], sizes = [8, 64], strides = [1, 1]} : vector<8x1536xbf16> to vector<8x64xbf16>
    %177 = vector.extract_strided_slice %12 {offsets = [0, 1408], sizes = [8, 64], strides = [1, 1]} : vector<8x1536xbf16> to vector<8x64xbf16>
    %cst_76 = arith.constant dense<0.000000e+00> : vector<8x8xf32>
    %178 = tpu.matmul %175, %176, %cst_76 {dimension_numbers = #tpu.dot_dimension_numbers<[1], [1], [0], [0], [0, 0, 1, 0], [], []>} : vector<8x64xbf16>, vector<8x64xbf16>, vector<8x8xf32> -> vector<8x8xf32>
    %cst_77 = arith.constant 1.250000e-01 : f32
    %179 = vector.broadcast %cst_77 : f32 to vector<8x8xf32>
    %180 = arith.mulf %178, %179 : vector<8x8xf32>
    %181 = vector.broadcast %8 : vector<1x8xf32> to vector<8x8xf32>
    %182 = arith.addf %180, %181 : vector<8x8xf32>
    %cst_78 = arith.constant dense<0xFF800000> : vector<8xf32>
    %183 = vector.multi_reduction <maximumf>, %182, %cst_78 [1] : vector<8x8xf32> to vector<8xf32>
    %184 = vector.shape_cast %183 : vector<8xf32> to vector<8x1xf32>
    %185 = vector.broadcast %184 : vector<8x1xf32> to vector<8x8xf32>
    %186 = arith.subf %182, %185 : vector<8x8xf32>
    %187 = math.exp %186 : vector<8x8xf32>
    %cst_79 = arith.constant dense<0.000000e+00> : vector<8xf32>
    %188 = vector.multi_reduction <add>, %187, %cst_79 [1] : vector<8x8xf32> to vector<8xf32>
    %189 = vector.shape_cast %188 : vector<8xf32> to vector<8x1xf32>
    %190 = vector.broadcast %189 : vector<8x1xf32> to vector<8x8xf32>
    %191 = arith.divf %187, %190 : vector<8x8xf32>
    %c0_80 = arith.constant 0 : index
    %c6 = arith.constant 6 : index
    %c0_81 = arith.constant 0 : index
    %c0_82 = arith.constant 0 : index
    %192 = vector.load %arg10[%c0_80, %c6, %c0_81, %c0_82] : memref<1x8x8x8xf32, #tpu.memory_space<vmem>>, vector<1x1x8x8xf32>
    %193 = vector.shape_cast %192 : vector<1x1x8x8xf32> to vector<8x8xf32>
    %194 = vector.shape_cast %191 : vector<8x8xf32> to vector<1x1x8x8xf32>
    tpu.vector_store %arg10[%c0_80, %c6, %c0_81, %c0_82], %194 {strides = array<i32>} : memref<1x8x8x8xf32, #tpu.memory_space<vmem>>, vector<1x1x8x8xf32>,
    %195 = arith.truncf %191 : vector<8x8xf32> to vector<8x8xbf16>
    %cst_83 = arith.constant dense<0.000000e+00> : vector<8x64xf32>
    %196 = tpu.matmul %195, %177, %cst_83 {dimension_numbers = #tpu.dot_dimension_numbers<[1], [0], [0], [1], [0, 0, 1, 1], [], []>} : vector<8x8xbf16>, vector<8x64xbf16>, vector<8x64xf32> -> vector<8x64xf32>
    %197 = arith.truncf %196 : vector<8x64xf32> to vector<8x64xbf16>
    %c0_84 = arith.constant 0 : index
    %c384 = arith.constant 384 : index
    %c0_85 = arith.constant 0 : index
    %198 = vector.load %arg5[%c0_84, %c384, %c0_85] : memref<1x512x512xbf16, #tpu.memory_space<vmem>>, vector<1x64x512xbf16>
    %199 = vector.shape_cast %198 : vector<1x64x512xbf16> to vector<64x512xbf16>
    %cst_86 = arith.constant dense<0.000000e+00> : vector<8x512xf32>
    %200 = tpu.matmul %197, %199, %cst_86 {dimension_numbers = #tpu.dot_dimension_numbers<[1], [0], [0], [1], [0, 0, 1, 1], [], []>} : vector<8x64xbf16>, vector<64x512xbf16>, vector<8x512xf32> -> vector<8x512xf32>
    %201 = arith.addf %174, %200 : vector<8x512xf32>
    %202 = vector.extract_strided_slice %12 {offsets = [0, 448], sizes = [8, 64], strides = [1, 1]} : vector<8x1536xbf16> to vector<8x64xbf16>
    %203 = vector.extract_strided_slice %12 {offsets = [0, 960], sizes = [8, 64], strides = [1, 1]} : vector<8x1536xbf16> to vector<8x64xbf16>
    %204 = vector.extract_strided_slice %12 {offsets = [0, 1472], sizes = [8, 64], strides = [1, 1]} : vector<8x1536xbf16> to vector<8x64xbf16>
    %cst_87 = arith.constant dense<0.000000e+00> : vector<8x8xf32>
    %205 = tpu.matmul %202, %203, %cst_87 {dimension_numbers = #tpu.dot_dimension_numbers<[1], [1], [0], [0], [0, 0, 1, 0], [], []>} : vector<8x64xbf16>, vector<8x64xbf16>, vector<8x8xf32> -> vector<8x8xf32>
    %cst_88 = arith.constant 1.250000e-01 : f32
    %206 = vector.broadcast %cst_88 : f32 to vector<8x8xf32>
    %207 = arith.mulf %205, %206 : vector<8x8xf32>
    %208 = vector.broadcast %8 : vector<1x8xf32> to vector<8x8xf32>
    %209 = arith.addf %207, %208 : vector<8x8xf32>
    %cst_89 = arith.constant dense<0xFF800000> : vector<8xf32>
    %210 = vector.multi_reduction <maximumf>, %209, %cst_89 [1] : vector<8x8xf32> to vector<8xf32>
    %211 = vector.shape_cast %210 : vector<8xf32> to vector<8x1xf32>
    %212 = vector.broadcast %211 : vector<8x1xf32> to vector<8x8xf32>
    %213 = arith.subf %209, %212 : vector<8x8xf32>
    %214 = math.exp %213 : vector<8x8xf32>
    %cst_90 = arith.constant dense<0.000000e+00> : vector<8xf32>
    %215 = vector.multi_reduction <add>, %214, %cst_90 [1] : vector<8x8xf32> to vector<8xf32>
    %216 = vector.shape_cast %215 : vector<8xf32> to vector<8x1xf32>
    %217 = vector.broadcast %216 : vector<8x1xf32> to vector<8x8xf32>
    %218 = arith.divf %214, %217 : vector<8x8xf32>
    %c0_91 = arith.constant 0 : index
    %c7 = arith.constant 7 : index
    %c0_92 = arith.constant 0 : index
    %c0_93 = arith.constant 0 : index
    %219 = vector.load %arg10[%c0_91, %c7, %c0_92, %c0_93] : memref<1x8x8x8xf32, #tpu.memory_space<vmem>>, vector<1x1x8x8xf32>
    %220 = vector.shape_cast %219 : vector<1x1x8x8xf32> to vector<8x8xf32>
    %221 = vector.shape_cast %218 : vector<8x8xf32> to vector<1x1x8x8xf32>
    tpu.vector_store %arg10[%c0_91, %c7, %c0_92, %c0_93], %221 {strides = array<i32>} : memref<1x8x8x8xf32, #tpu.memory_space<vmem>>, vector<1x1x8x8xf32>,
    %222 = arith.truncf %218 : vector<8x8xf32> to vector<8x8xbf16>
    %cst_94 = arith.constant dense<0.000000e+00> : vector<8x64xf32>
    %223 = tpu.matmul %222, %204, %cst_94 {dimension_numbers = #tpu.dot_dimension_numbers<[1], [0], [0], [1], [0, 0, 1, 1], [], []>} : vector<8x8xbf16>, vector<8x64xbf16>, vector<8x64xf32> -> vector<8x64xf32>
    %224 = arith.truncf %223 : vector<8x64xf32> to vector<8x64xbf16>
    %c0_95 = arith.constant 0 : index
    %c448 = arith.constant 448 : index
    %c0_96 = arith.constant 0 : index
    %225 = vector.load %arg5[%c0_95, %c448, %c0_96] : memref<1x512x512xbf16, #tpu.memory_space<vmem>>, vector<1x64x512xbf16>
    %226 = vector.shape_cast %225 : vector<1x64x512xbf16> to vector<64x512xbf16>
    %cst_97 = arith.constant dense<0.000000e+00> : vector<8x512xf32>
    %227 = tpu.matmul %224, %226, %cst_97 {dimension_numbers = #tpu.dot_dimension_numbers<[1], [0], [0], [1], [0, 0, 1, 1], [], []>} : vector<8x64xbf16>, vector<64x512xbf16>, vector<8x512xf32> -> vector<8x512xf32>
    %228 = arith.addf %201, %227 : vector<8x512xf32>
    %c0_98 = arith.constant 0 : index
    %c0_99 = arith.constant 0 : index
    %c0_100 = arith.constant 0 : index
    %229 = vector.load %arg8[%c0_98, %c0_99, %c0_100] : memref<1x4x512xf32, #tpu.memory_space<vmem>>, vector<1x4x512xf32>
    %230 = vector.shape_cast %229 : vector<1x4x512xf32> to vector<4x512xf32>
    %231 = vector.extract_strided_slice %230 {offsets = [0, 0], sizes = [1, 512], strides = [1, 1]} : vector<4x512xf32> to vector<1x512xf32>
    %232 = vector.extract_strided_slice %230 {offsets = [1, 0], sizes = [1, 512], strides = [1, 1]} : vector<4x512xf32> to vector<1x512xf32>
    %cst_101 = arith.constant dense<0.000000e+00> : vector<8xf32>
    %233 = vector.multi_reduction <add>, %228, %cst_101 [1] : vector<8x512xf32> to vector<8xf32>
    %234 = vector.shape_cast %233 : vector<8xf32> to vector<8x1xf32>
    %cst_102 = arith.constant 5.120000e+02 : f32
    %235 = vector.broadcast %cst_102 : f32 to vector<8x1xf32>
    %236 = arith.divf %234, %235 : vector<8x1xf32>
    %237 = vector.broadcast %236 : vector<8x1xf32> to vector<8x512xf32>
    %238 = arith.subf %228, %237 : vector<8x512xf32>
    %239 = arith.mulf %238, %238 : vector<8x512xf32>
    %cst_103 = arith.constant dense<0.000000e+00> : vector<8xf32>
    %240 = vector.multi_reduction <add>, %239, %cst_103 [1] : vector<8x512xf32> to vector<8xf32>
    %241 = vector.shape_cast %240 : vector<8xf32> to vector<8x1xf32>
    %cst_104 = arith.constant 5.120000e+02 : f32
    %242 = vector.broadcast %cst_104 : f32 to vector<8x1xf32>
    %243 = arith.divf %241, %242 : vector<8x1xf32>
    %cst_105 = arith.constant 9.99999974E-6 : f32
    %244 = vector.broadcast %cst_105 : f32 to vector<8x1xf32>
    %245 = arith.addf %243, %244 : vector<8x1xf32>
    %246 = math.rsqrt %245 : vector<8x1xf32>
    %247 = vector.broadcast %246 : vector<8x1xf32> to vector<8x512xf32>
    %248 = arith.mulf %238, %247 : vector<8x512xf32>
    %249 = vector.broadcast %231 : vector<1x512xf32> to vector<8x512xf32>
    %250 = arith.mulf %248, %249 : vector<8x512xf32>
    %251 = vector.broadcast %232 : vector<1x512xf32> to vector<8x512xf32>
    %252 = arith.addf %250, %251 : vector<8x512xf32>
    %253 = arith.truncf %252 : vector<8x512xf32> to vector<8x512xbf16>
    %c0_106 = arith.constant 0 : index
    %c0_107 = arith.constant 0 : index
    %c0_108 = arith.constant 0 : index
    %254 = vector.load %arg6[%c0_106, %c0_107, %c0_108] : memref<1x512x1024xbf16, #tpu.memory_space<vmem>>, vector<1x512x1024xbf16>
    %255 = vector.shape_cast %254 : vector<1x512x1024xbf16> to vector<512x1024xbf16>
    %cst_109 = arith.constant dense<0.000000e+00> : vector<8x1024xf32>
    %256 = tpu.matmul %253, %255, %cst_109 {dimension_numbers = #tpu.dot_dimension_numbers<[1], [0], [0], [1], [0, 0, 1, 1], [], []>} : vector<8x512xbf16>, vector<512x1024xbf16>, vector<8x1024xf32> -> vector<8x1024xf32>
    %cst_110 = arith.constant 0.000000e+00 : f32
    %257 = vector.broadcast %cst_110 : f32 to vector<8x1024xf32>
    %258 = arith.maximumf %256, %257 : vector<8x1024xf32>
    %259 = arith.truncf %258 : vector<8x1024xf32> to vector<8x1024xbf16>
    %c0_111 = arith.constant 0 : index
    %c0_112 = arith.constant 0 : index
    %c0_113 = arith.constant 0 : index
    %260 = vector.load %arg7[%c0_111, %c0_112, %c0_113] : memref<1x1024x512xbf16, #tpu.memory_space<vmem>>, vector<1x1024x512xbf16>
    %261 = vector.shape_cast %260 : vector<1x1024x512xbf16> to vector<1024x512xbf16>
    %cst_114 = arith.constant dense<0.000000e+00> : vector<8x512xf32>
    %262 = tpu.matmul %259, %261, %cst_114 {dimension_numbers = #tpu.dot_dimension_numbers<[1], [0], [0], [1], [0, 0, 1, 1], [], []>} : vector<8x1024xbf16>, vector<1024x512xbf16>, vector<8x512xf32> -> vector<8x512xf32>
    %263 = arith.addf %262, %252 : vector<8x512xf32>
    %264 = vector.extract_strided_slice %230 {offsets = [2, 0], sizes = [1, 512], strides = [1, 1]} : vector<4x512xf32> to vector<1x512xf32>
    %265 = vector.extract_strided_slice %230 {offsets = [3, 0], sizes = [1, 512], strides = [1, 1]} : vector<4x512xf32> to vector<1x512xf32>
    %cst_115 = arith.constant dense<0.000000e+00> : vector<8xf32>
    %266 = vector.multi_reduction <add>, %263, %cst_115 [1] : vector<8x512xf32> to vector<8xf32>
    %267 = vector.shape_cast %266 : vector<8xf32> to vector<8x1xf32>
    %cst_116 = arith.constant 5.120000e+02 : f32
    %268 = vector.broadcast %cst_116 : f32 to vector<8x1xf32>
    %269 = arith.divf %267, %268 : vector<8x1xf32>
    %270 = vector.broadcast %269 : vector<8x1xf32> to vector<8x512xf32>
    %271 = arith.subf %263, %270 : vector<8x512xf32>
    %272 = arith.mulf %271, %271 : vector<8x512xf32>
    %cst_117 = arith.constant dense<0.000000e+00> : vector<8xf32>
    %273 = vector.multi_reduction <add>, %272, %cst_117 [1] : vector<8x512xf32> to vector<8xf32>
    %274 = vector.shape_cast %273 : vector<8xf32> to vector<8x1xf32>
    %cst_118 = arith.constant 5.120000e+02 : f32
    %275 = vector.broadcast %cst_118 : f32 to vector<8x1xf32>
    %276 = arith.divf %274, %275 : vector<8x1xf32>
    %cst_119 = arith.constant 9.99999974E-6 : f32
    %277 = vector.broadcast %cst_119 : f32 to vector<8x1xf32>
    %278 = arith.addf %276, %277 : vector<8x1xf32>
    %279 = math.rsqrt %278 : vector<8x1xf32>
    %280 = vector.broadcast %279 : vector<8x1xf32> to vector<8x512xf32>
    %281 = arith.mulf %271, %280 : vector<8x512xf32>
    %282 = vector.broadcast %264 : vector<1x512xf32> to vector<8x512xf32>
    %283 = arith.mulf %281, %282 : vector<8x512xf32>
    %284 = vector.broadcast %265 : vector<1x512xf32> to vector<8x512xf32>
    %285 = arith.addf %283, %284 : vector<8x512xf32>
    %286 = arith.index_cast %arg1 : i32 to index
    %c0_120 = arith.constant 0 : index
    %c0_121 = arith.constant 0 : index
    %287 = vector.load %arg11[%286, %c0_120, %c0_121] : memref<2x8x512xf32, #tpu.memory_space<vmem>>, vector<1x8x512xf32>
    %288 = vector.shape_cast %287 : vector<1x8x512xf32> to vector<8x512xf32>
    %289 = vector.shape_cast %285 : vector<8x512xf32> to vector<1x8x512xf32>
    tpu.vector_store %arg11[%286, %c0_120, %c0_121], %289 {strides = array<i32>} : memref<2x8x512xf32, #tpu.memory_space<vmem>>, vector<1x8x512xf32>,
    %c0_122 = arith.constant 0 : index
    %c0_123 = arith.constant 0 : index
    %c0_124 = arith.constant 0 : index
    %290 = vector.load %arg9[%c0_122, %c0_123, %c0_124] : memref<1x8x512xf32, #tpu.memory_space<vmem>>, vector<1x8x512xf32>
    %291 = vector.shape_cast %290 : vector<1x8x512xf32> to vector<8x512xf32>
    %292 = vector.shape_cast %285 : vector<8x512xf32> to vector<1x8x512xf32>
    tpu.vector_store %arg9[%c0_122, %c0_123, %c0_124], %292 {strides = array<i32>} : memref<1x8x512xf32, #tpu.memory_space<vmem>>, vector<1x8x512xf32>,
    return
  }
  func.func @transform_0(%arg0: i32, %arg1: i32) -> (i32, i32, i32) {
    %c0_i32 = arith.constant 0 : i32
    %c0_i32_0 = arith.constant 0 : i32
    %c0_i32_1 = arith.constant 0 : i32
    return %arg1, %c0_i32, %c0_i32_0 : i32, i32, i32
  }
  func.func @transform_1(%arg0: i32, %arg1: i32) -> (i32, i32, i32) {
    %c0_i32 = arith.constant 0 : i32
    %c0_i32_0 = arith.constant 0 : i32
    %c0_i32_1 = arith.constant 0 : i32
    return %arg1, %c0_i32, %c0_i32_0 : i32, i32, i32
  }
  func.func @transform_2(%arg0: i32, %arg1: i32) -> (i32, i32, i32) {
    %c0_i32 = arith.constant 0 : i32
    %c0_i32_0 = arith.constant 0 : i32
    %c0_i32_1 = arith.constant 0 : i32
    return %arg0, %c0_i32, %c0_i32_0 : i32, i32, i32
  }
  func.func @transform_3(%arg0: i32, %arg1: i32) -> (i32, i32, i32) {
    %c0_i32 = arith.constant 0 : i32
    %c0_i32_0 = arith.constant 0 : i32
    %c0_i32_1 = arith.constant 0 : i32
    return %arg0, %c0_i32, %c0_i32_0 : i32, i32, i32
  }
  func.func @transform_4(%arg0: i32, %arg1: i32) -> (i32, i32, i32) {
    %c0_i32 = arith.constant 0 : i32
    %c0_i32_0 = arith.constant 0 : i32
    %c0_i32_1 = arith.constant 0 : i32
    return %arg0, %c0_i32, %c0_i32_0 : i32, i32, i32
  }
  func.func @transform_5(%arg0: i32, %arg1: i32) -> (i32, i32, i32) {
    %c0_i32 = arith.constant 0 : i32
    %c0_i32_0 = arith.constant 0 : i32
    %c0_i32_1 = arith.constant 0 : i32
    return %arg0, %c0_i32, %c0_i32_0 : i32, i32, i32
  }
  func.func @transform_6(%arg0: i32, %arg1: i32) -> (i32, i32, i32) {
    %c0_i32 = arith.constant 0 : i32
    %c0_i32_0 = arith.constant 0 : i32
    %c0_i32_1 = arith.constant 0 : i32
    return %arg0, %c0_i32, %c0_i32_0 : i32, i32, i32
  }
  func.func @transform_7(%arg0: i32, %arg1: i32) -> (i32, i32, i32) {
    %c0_i32 = arith.constant 0 : i32
    %c0_i32_0 = arith.constant 0 : i32
    %c0_i32_1 = arith.constant 0 : i32
    return %arg1, %c0_i32, %c0_i32_0 : i32, i32, i32
  }
  func.func @transform_8(%arg0: i32, %arg1: i32) -> (i32, i32, i32, i32) {
    %c2_i32 = arith.constant 2 : i32
    %0 = arith.muli %arg0, %c2_i32 : i32
    %1 = arith.addi %0, %arg1 : i32
    %c0_i32 = arith.constant 0 : i32
    %c0_i32_0 = arith.constant 0 : i32
    %c0_i32_1 = arith.constant 0 : i32
    %c0_i32_2 = arith.constant 0 : i32
    return %1, %c0_i32, %c0_i32_0, %c0_i32_1 : i32, i32, i32, i32
  }
}

</mosaic_0001>

<bundles_post_ra>
// kernel: contact_map_forward.1
= control target key start
LH: loop header
LB: loop body
LE: loop exit
PB: predicated region body
PF: predicated region fallthrough
CT: control target
= control target key end

     0   :  { %s14741_s0 = inlined_call_operand.vmem [shape: f32[2,8,512], index: 0, kind: input, shape index: {}]   ;;  %s14742_s1 = inlined_call_operand.vmem [shape: f32[2,1,8], index: 1, kind: input, shape index: {}]   ;;  %s14743_s2 = inlined_call_operand.hbm [shape: bf16[8,512,1536], index: 2, kind: input, shape index: {}]   ;;  %s14744_s3 = inlined_call_operand.hbm [shape: bf16[8,512,512], index: 3, kind: input, shape index: {}]   ;;  %s14745_s4 = inlined_call_operand.hbm [shape: bf16[8,512,1024], index: 4, kind: input, shape index: {}]   ;;  %s14746_s5 = inlined_call_operand.hbm [shape: bf16[8,1024,512], index: 5, kind: input, shape index: {}]   ;;  %s14747_s6 = inlined_call_operand.hbm [shape: f32[8,4,512], index: 6, kind: input, shape index: {}]   ;;  %s14748_s7 = inlined_call_operand.vmem [shape: f32[2,8,512], index: 7, kind: output, shape index: {0}]   ;;  %s14749_s8 = inlined_call_operand.vmem [shape: f32[16,8,8,8], index: 8, kind: output, shape index: {1}]  }
   0x1   :  { %14759 = sst [smem:[#allocation19_spill]] %s14741_s0 }
   0x2   :  { %14760 = sst [smem:[#allocation20_spill]] %s14743_s2 }
   0x3   :  { %14761 = sst [smem:[#allocation21_spill]] %s14744_s3 }
   0x4   :  { %14762 = sst [smem:[#allocation22_spill]] %s14745_s4 }
   0x5   :  { %14763 = sst [smem:[#allocation23_spill]] %s14746_s5 }
   0x6   :  { %14764 = sst [smem:[#allocation24_spill]] %s14748_s7 }
   0x7   :  { %14765 = sst [smem:[#allocation25_spill]] %s14749_s8 }
   0x8   :  { %14 = vsyncpa [#allocation4], 0 }
   0x9   :  { %16 = vsyncpa [#allocation4 + $0x1], 0 }
   0xa   :  { %17 = vsyncpa [#allocation6], 0 }
   0xb   :  { %19 = vsyncpa [#allocation6 + $0x1], 0 }
   0xc   :  { %20 = vsyncpa [#allocation9], 0 }
   0xd   :  { %22 = vsyncpa [#allocation9 + $0x1], 0  ;;  %s12930_s27 = smov 0   ;;  %s12932_s28 = smov 0  }
   0xe   :  { %s12934_s29 = smov 0   ;;  %s12936_s30 = smov 0  }
   0xf   :  { %s12938_s9 = smov 0   ;;  %s12940_s10 = smov 0  }
  0x10   :  { %s12942_s11 = smov 0   ;;  %s12944_s12 = smov 0  }
  0x11 LB: > { %14766 = sst [smem:[#allocation14_spill]] %s12848_s29  ;;  %s14750_s13 = sadd.s32 4294967295, %s12868_s12   ;;  %s12868_s12 = sphi %s12944_s12, %s28_s12   ;;  %s12864_s11 = sphi %s12942_s11, %s14798_s11   ;;  %s12860_s10 = sphi %s12940_s10, %s14793_s10   ;;  %s12856_s9 = sphi %s12938_s9, %s14797_s9   ;;  %s12852_s30 = sphi %s12936_s30, %s14792_s30   ;;  %s12848_s29 = sphi %s12934_s29, %s14791_s29   ;;  %s12844_s28 = sphi %s12932_s28, %s14796_s28   ;;  %s12840_s27 = sphi %s12930_s27, %s14795_s27  }
  0x12   : > { %14767 = sst [smem:[#allocation15_spill]] %s12860_s10  ;;  %s37_s14 = sadd.s32 1, %s12860_s10 }
  0x13   : > { %p38_p0 = scmp.ge.s32.totalorder %s37_s14, 2  ;;  %s40_s15 = sadd.s32 1, %s12864_s11 }
  0x14   : > { %s99_s16 = sadd.s32 1, %s12848_s29  ;;  %p106_p1 = scmp.ne.s32.totalorder %s12848_s29, %s12844_s28 }
  0x15   : > { %s14800_s14 = smov (%p38_p0, %s37_s14), 0  ;;  %s14802_s15 = smov (!%p38_p0, %s40_s15), %s12864_s11 }
  0x16   : > { %14768 = sst [smem:[#allocation16_spill]] %s14800_s14  ;;  %p107_p2 = scmp.eq.s32.totalorder %s12868_s12, 0 }
  0x17   : > { %p112_p3 = scmp.ne.s32.totalorder %s12844_s28, %s12840_s27  ;;  %p42_p4 = scmp.ge.s32.totalorder %s14802_s15, 8 }
  0x18   : > { %p113_p5 = scmp.eq.s32.totalorder %s14750_s13, 0  ;;  %p108_p6 = por %p107_p2, %p106_p1 }
  0x19   : > { %s14804_s15 = smov (%p42_p4, %s14802_s15), 0  ;;  %p11376_p8 = scmp.lt.s32.totalorder %s12868_s12, 16 }
  0x1a   : > { %14769 = sst [smem:[#allocation17_spill]] %s14804_s15  ;;  %p12983_p7 = por %p113_p5, %p112_p3 }
  0x1b   : > { %s96_s18 = ssub.s32 %s12864_s11, %s14804_s15  ;;  %s12991_s19 = sand.u32 1, %s12848_s29  }
  0x1c   : > { %s14770_s17 = scalar_select %p12983_p7, 1, 0 }
  0x1d   : > { %p97_p9 = scmp.eq.s32.totalorder %s96_s18, 0  ;;  %p12993_p10 = pnand %p11376_p8, %p108_p6 }
  0x1e   : > { %s14752_s21 = sand.u32 1, %s12868_s12   ;;  %s9987_s22 = sshll.u32 %s12991_s19, 10 }
  0x1f   : > { %s14771_s20 = scalar_select %p12993_p10, 1, 0 }
  0x20   : > { %s13000_s23 = scalar_select %p97_p9, %s12848_s29, %s99_s16  }
  0x21   : > { %s11082_s24 = sshll.u32 %s12864_s11, 14  ;;  %s14773_s3 = sld [smem:[#allocation21_spill]] }
  0x22   : > { %14772 = sst [smem:[#allocation18_spill]] %s13000_s23  ;;  %s335_s18 = scalar_lea.vmem [#allocation5], %s9987_s22 }
  0x23   : > { %s342_s13 = sshll.u32 %s335_s18, 4  ;;  %s13013_s15 = scalar_lea.sflag [#allocation6], %s14752_s21  ;;  %s13008_s13 = int_to_ptr.vmem [resolvable:$true] %s342_s13 }
  0x24   : > { %p13019_p13 = pneg %p12993_p10 }
  0x27   : > { %s13006_s27 = scalar_lea.hbm %s14773_s3, %s11082_s24  ;;  %s12649_s25 = scalar_lea.hbm %s14773_s3, 131072 }
  0x28   : > { %s12644_s16 = scalar_lea.hbm %s13006_s27, 16384  ;;  %p12650_p2 = scmp.lt.u32.totalorder %s13006_s27, %s14773_s3 }
  0x29   : > { %p12645_p12 = scmp.ne.s32.totalorder %s13006_s27, %s12644_s16  ;;  %p12651_p3 = scmp.lt.u32.totalorder %s12649_s25, %s12644_s16 }
  0x2a   : > { %p12653_p5 = scmp.lt.u32.totalorder %s12644_s16, %s13006_s27 }
  0x2b   : > { %p12647_p0 = pnand %p13019_p13, %p12645_p12  ;;  %p12652_p4 = por %p12651_p3, %p12650_p2 }
  0x2d   : > { %p12648_p1 = pneg %p12647_p0  ;;  %p12654_p6 = por %p12653_p5, %p12652_p4 }
  0x2f   : > { %p12655_p8 = pnand %p12654_p6, %p12648_p1 }
  0x31   : > { %12658 = shalt.err (!%p12655_p8)
}
  0x32   : > { %s12659_s21 = scalar_lea.vmem %s13008_s13, 16384  ;;  %s12870_s24 = smov [#allocation5]  }
  0x33   : > { %p12660_p9 = scmp.ne.s32.totalorder %s13008_s13, %s12659_s21  ;;  %s12664_s22 = sshll.u32 %s12870_s24, 4  ;;  %s12665_s22 = int_to_ptr.vmem [resolvable:$false] %s12664_s22 }
  0x34   : > { %s12666_s26 = scalar_lea.vmem %s12665_s22, 32768  ;;  %p12667_p11 = scmp.lt.s32.totalorder %s13008_s13, %s12665_s22 }
  0x35   : > { %p12662_p12 = pnand %p12660_p9, %p13019_p13  ;;  %p12668_p7 = scmp.lt.s32.totalorder %s12666_s26, %s12659_s21 }
  0x37   : > { %p12663_p0 = pneg %p12662_p12  ;;  %p12669_p2 = por %p12668_p7, %p12667_p11 }
  0x39   : > { %p12670_p3 = pnand %p12669_p2, %p12663_p0 }
  0x3b   : > { %12673 = shalt.err (!%p12670_p3)
}
  0x3c   : > { %s14756_s16 = smov 256   ;;  %s14757_s25 = smov 16  }
  0x3d   : > { %11366 = dma.hbm_to_vmem [thread:$0]  (!%p12993_p10), %s13006_s27, 16384, %s13008_s13, %s13013_s15, %s14756_s16, %s14756_s16, %s14757_s25  }
  0x3e   : > { %p411_p7 = scmp.lt.s32.totalorder %s12868_s12, 17  ;;  %s9990_s21 = sshll.u32 %s12991_s19, 11 }
  0x3f   : > { %s11083_s18 = sshll.u32 %s12864_s11, 15  ;;  %p14775_p11 = scmp.ge.s32.totalorder %s12868_s12, 1 }
  0x40   : > { %s14777_s4 = sld [smem:[#allocation22_spill]]  ;;  %s356_s10 = scalar_lea.vmem [#allocation7], %s9990_s21 }
  0x41   : > { %p13051_p1 = pnand %p14775_p11, %p411_p7  ;;  %s363_s23 = sshll.u32 %s356_s10, 4  ;;  %s13060_s23 = int_to_ptr.vmem [resolvable:$true] %s363_s23 }
  0x42   : > { %s14778_s5 = sld [smem:[#allocation23_spill]]  ;;  %s377_s16 = scalar_lea.vmem [#allocation8], %s9990_s21 }
  0x43   : > { %s14776_s24 = scalar_select %p13051_p1, 1, 0 }
  0x44   : > { %s384_s25 = sshll.u32 %s377_s16, 4  ;;  %s14779_s22 = sand.u32 1, %s12868_s12   ;;  %s13067_s25 = int_to_ptr.vmem [resolvable:$true] %s384_s25 }
  0x45   : > { %s13071_s26 = scalar_lea.sflag [#allocation9], %s14779_s22 }
  0x46   : > { %s13058_s3 = scalar_lea.hbm %s14777_s4, %s11083_s18 }
  0x48   : > { %s13065_s27 = scalar_lea.hbm %s14778_s5, %s11083_s18  ;;  %s12679_s18 = scalar_lea.hbm %s14778_s5, 262144 }
  0x49   : > { %s12674_s8 = scalar_lea.hbm %s13065_s27, 32768  ;;  %p12680_p8 = scmp.lt.u32.totalorder %s13065_s27, %s14778_s5 }
  0x4a   : > { %p12675_p4 = scmp.ne.s32.totalorder %s13065_s27, %s12674_s8  ;;  %p12681_p9 = scmp.lt.u32.totalorder %s12679_s18, %s12674_s8 }
  0x4b   : > { %p12683_p0 = scmp.lt.u32.totalorder %s12674_s8, %s13065_s27 }
  0x4c   : > { %p12677_p5 = pnand %p12675_p4, %p13019_p13  ;;  %p12682_p12 = por %p12681_p9, %p12680_p8 }
  0x4e   : > { %p12678_p6 = pneg %p12677_p5  ;;  %p12684_p2 = por %p12683_p0, %p12682_p12 }
  0x50   : > { %p12685_p3 = pnand %p12684_p2, %p12678_p6 }
  0x52   : > { %12688 = shalt.err (!%p12685_p3)
}
  0x53   : > { %s12689_s16 = scalar_lea.vmem %s13067_s25, 32768  ;;  %s12873_s21 = smov [#allocation8]  }
  0x54   : > { %p12690_p7 = scmp.ne.s32.totalorder %s13067_s25, %s12689_s16  ;;  %s12694_s22 = sshll.u32 %s12873_s21, 4  ;;  %s12695_s22 = int_to_ptr.vmem [resolvable:$false] %s12694_s22 }
  0x55   : > { %s12696_s7 = scalar_lea.vmem %s12695_s22, 65536  ;;  %p12697_p5 = scmp.lt.s32.totalorder %s13067_s25, %s12695_s22 }
  0x56   : > { %p12692_p11 = pnand %p12690_p7, %p13019_p13  ;;  %p12698_p1 = scmp.lt.s32.totalorder %s12696_s7, %s12689_s16 }
  0x58   : > { %p12693_p4 = pneg %p12692_p11  ;;  %p12699_p8 = por %p12698_p1, %p12697_p5 }
  0x5a   : > { %p12700_p9 = pnand %p12699_p8, %p12693_p4 }
  0x5c   : > { %12703 = shalt.err (!%p12700_p9)
}
  0x5d   : > { %s14780_s8 = smov 16   ;;  %s14781_s10 = smov 256  }
  0x5e   : > { %11372 = dma.hbm_to_vmem [thread:$0]  (!%p12993_p10), %s13065_s27, 32768, %s13067_s25, %s13071_s26, %s14781_s10, %s14781_s10, %s14780_s8  }
  0x5f   : > { %s11347_s29 = smul.u32 3072, %s12991_s19  ;;  %s14782_s2 = sld [smem:[#allocation20_spill]] }
  0x60   : > { %s11348_s18 = smul.u32 49152, %s12864_s11  ;;  %s311_s5 = scalar_lea.sflag [#allocation4], %s12991_s19 }
  0x61   : > { %s314_s22 = scalar_lea.vmem [#allocation3], %s11347_s29 }
  0x62   : > { %s321_s7 = sshll.u32 %s314_s22, 4  ;;  %s13105_s7 = int_to_ptr.vmem [resolvable:$true] %s321_s7 }
  0x65   : > { %s13103_s21 = scalar_lea.hbm %s14782_s2, %s11348_s18  ;;  %s12709_s8 = scalar_lea.hbm %s14782_s2, 393216 }
  0x66   : > { %s12704_s0 = scalar_lea.hbm %s13103_s21, 49152  ;;  %p12710_p0 = scmp.lt.u32.totalorder %s13103_s21, %s14782_s2 }
  0x67   : > { %p12705_p1 = scmp.ne.s32.totalorder %s13103_s21, %s12704_s0  ;;  %p12711_p2 = scmp.lt.u32.totalorder %s12709_s8, %s12704_s0 }
  0x68   : > { %p12713_p7 = scmp.lt.u32.totalorder %s12704_s0, %s13103_s21 }
  0x69   : > { %p12707_p6 = pnand %p12705_p1, %p13019_p13  ;;  %p12712_p3 = por %p12711_p2, %p12710_p0 }
  0x6b   : > { %p12708_p12 = pneg %p12707_p6  ;;  %p12714_p11 = por %p12713_p7, %p12712_p3 }
  0x6d   : > { %p12715_p4 = pnand %p12714_p11, %p12708_p12 }
  0x6f   : > { %12718 = shalt.err (!%p12715_p4)
}
  0x70   : > { %s12719_s29 = scalar_lea.vmem %s13105_s7, 49152  ;;  %s12874_s13 = smov [#allocation3]  }
  0x71   : > { %p12720_p5 = scmp.ne.s32.totalorder %s13105_s7, %s12719_s29  ;;  %s12724_s16 = sshll.u32 %s12874_s13, 4  ;;  %s12725_s16 = int_to_ptr.vmem [resolvable:$false] %s12724_s16 }
  0x72   : > { %s12726_s22 = scalar_lea.vmem %s12725_s16, 98304  ;;  %p12727_p1 = scmp.lt.s32.totalorder %s13105_s7, %s12725_s16 }
  0x73   : > { %p12722_p8 = pnand %p12720_p5, %p13019_p13  ;;  %p12728_p6 = scmp.lt.s32.totalorder %s12726_s22, %s12719_s29 }
  0x75   : > { %p12723_p9 = pneg %p12722_p8  ;;  %p12729_p0 = por %p12728_p6, %p12727_p1 }
  0x77   : > { %p12730_p2 = pnand %p12729_p0, %p12723_p9 }
  0x79   : > { %12733 = shalt.err (!%p12730_p2)
}
  0x7a   : > { %s12875_s0 = smov 768   ;;  %s12876_s25 = smov 48  }
  0x7b   : > { %11363 = dma.hbm_to_vmem [thread:$0]  (!%p12993_p10), %s13103_s21, 49152, %s13105_s7, %s311_s5, %s12875_s0, %s12875_s0, %s12876_s25  }
  0x7c   : > { %s12734_s27 = scalar_lea.hbm %s13058_s3, 32768  ;;  %s12739_s18 = scalar_lea.hbm %s14777_s4, 262144 }
  0x7d   : > { %p12735_p12 = scmp.ne.s32.totalorder %s13058_s3, %s12734_s27  ;;  %p12740_p11 = scmp.lt.u32.totalorder %s13058_s3, %s14777_s4 }
  0x7e   : > { %p12741_p4 = scmp.lt.u32.totalorder %s12739_s18, %s12734_s27  ;;  %p12743_p8 = scmp.lt.u32.totalorder %s12734_s27, %s13058_s3 }
  0x7f   : > { %p12737_p3 = pnand %p12735_p12, %p13019_p13 }
  0x80   : > { %p12742_p5 = por %p12741_p4, %p12740_p11 }
  0x81   : > { %p12738_p7 = pneg %p12737_p3 }
  0x82   : > { %p12744_p9 = por %p12743_p8, %p12742_p5 }
  0x84   : > { %p12745_p1 = pnand %p12744_p9, %p12738_p7 }
  0x86   : > { %12748 = shalt.err (!%p12745_p1)
}
  0x87   : > { %s12749_s5 = scalar_lea.vmem %s13060_s23, 32768  ;;  %s12877_s21 = smov [#allocation7]  }
  0x88   : > { %p12750_p6 = scmp.ne.s32.totalorder %s13060_s23, %s12749_s5  ;;  %s12754_s7 = sshll.u32 %s12877_s21, 4  ;;  %s12755_s7 = int_to_ptr.vmem [resolvable:$false] %s12754_s7 }
  0x89   : > { %s12756_s16 = scalar_lea.vmem %s12755_s7, 65536  ;;  %p12757_p12 = scmp.lt.s32.totalorder %s13060_s23, %s12755_s7 }
  0x8a   : > { %p12752_p0 = pnand %p12750_p6, %p13019_p13  ;;  %p12758_p3 = scmp.lt.s32.totalorder %s12756_s16, %s12749_s5 }
  0x8c   : > { %p12753_p2 = pneg %p12752_p0  ;;  %p12759_p11 = por %p12758_p3, %p12757_p12 }
  0x8e   : > { %p12760_p4 = pnand %p12759_p11, %p12753_p2 }
  0x90   : > { %12763 = shalt.err (!%p12760_p4)
}
  0x91   : > { %s12878_s22 = smov 512   ;;  %s12879_s0 = smov 32  }
  0x92   : > { %11369 = dma.hbm_to_vmem [thread:$0]  (!%p12993_p10), %s13058_s3, 32768, %s13060_s23, %s13013_s15, %s12878_s22, %s12878_s22, %s12879_s0  }
  0x93   : > { %s9996_s25 = sshll.u32 %s12991_s19, 4  ;;  %s11085_s27 = sshll.u32 %s12864_s11, 8 }
  0x94   : > { %s13158_s18 = scalar_lea.hbm %s14747_s6, %s11085_s27  ;;  %s398_s29 = scalar_lea.vmem [#allocation10], %s9996_s25 }
  0x95   : > { %s406_s13 = sshll.u32 %s398_s29, 4  ;;  %s12764_s5 = scalar_lea.hbm %s13158_s18, 256  ;;  %s407_s13 = int_to_ptr.vmem [resolvable:$true] %s406_s13 }
  0x96   : > { %p12765_p7 = scmp.ne.s32.totalorder %s13158_s18, %s12764_s5  ;;  %s12769_s19 = scalar_lea.hbm %s14747_s6, 2048 }
  0x97   : > { %p12770_p9 = scmp.lt.u32.totalorder %s13158_s18, %s14747_s6  ;;  %p12771_p1 = scmp.lt.u32.totalorder %s12769_s19, %s12764_s5 }
  0x98   : > { %p12767_p5 = pnand %p12765_p7, %p13019_p13  ;;  %p12773_p0 = scmp.lt.u32.totalorder %s12764_s5, %s13158_s18 }
  0x99   : > { %p12772_p6 = por %p12771_p1, %p12770_p9 }
  0x9a   : > { %p12768_p8 = pneg %p12767_p5 }
  0x9b   : > { %p12774_p2 = por %p12773_p0, %p12772_p6 }
  0x9d   : > { %p12775_p12 = pnand %p12774_p2, %p12768_p8 }
  0x9f   : > { %12778 = shalt.err (!%p12775_p12)
}
  0xa0   : > { %s12779_s7 = scalar_lea.vmem %s407_s13, 256  ;;  %s12880_s16 = smov [#allocation10]  }
  0xa1   : > { %p12780_p3 = scmp.ne.s32.totalorder %s407_s13, %s12779_s7  ;;  %s12784_s22 = sshll.u32 %s12880_s16, 4  ;;  %s12785_s22 = int_to_ptr.vmem [resolvable:$false] %s12784_s22 }
  0xa2   : > { %s12786_s0 = scalar_lea.vmem %s12785_s22, 512  ;;  %p12787_p7 = scmp.lt.s32.totalorder %s407_s13, %s12785_s22 }
  0xa3   : > { %p12782_p11 = pnand %p12780_p3, %p13019_p13  ;;  %p12788_p5 = scmp.lt.s32.totalorder %s12786_s0, %s12779_s7 }
  0xa5   : > { %p12783_p4 = pneg %p12782_p11  ;;  %p12789_p10 = por %p12788_p5, %p12787_p7 }
  0xa7   : > { %p12790_p1 = pnand %p12789_p10, %p12783_p4 }
  0xa9   : > { %12793 = shalt.err (!%p12790_p1)
}
  0xaa   : > { %p14783_p9 = scmp.ne.s32.totalorder %s14771_s20, 0  ;;  %p14784_p8 = scmp.ne.s32.totalorder %s14776_s24, 0 }
  0xab   : > { %s13181_s14 = sand.u32 (!%p14784_p8), 1, %s12844_s28   ;;  %p14785_p10 = scmp.ne.s32.totalorder (!%p14784_p8), %s14770_s17, 0 }
  0xac   : > { %11375 = dma.hbm_to_vmem [thread:$0]  (!%p14783_p9), %s13158_s18, 256, %s407_s13, %s13071_s26  }
  0xad   : > { %415 = sbr.rel (%p14784_p8) target bundleno = 8263 (0x2047), region = 48  ;;  %s418_s27 = scalar_lea.sflag (!%p14784_p8), [#allocation4], %s13181_s14 }
  0xae   : > { %s11349_s25 = smul.u32 (!%p14784_p8), 3072, %s13181_s14 }
  0xb0   : > { %s13185_s8 = scalar_lea.vmem (!%p14784_p8), [#allocation3], %s11349_s25 }
  0xb4   : > { %12827 = dma.done.wait (%p14785_p10), %s418_s27, 49152  }
  0xb5   : > { %12829 = vsyncadd (%p14785_p10), %s418_s27, 4294918144  ;;  %s14786_s20 = sadd.s32 4294967295, %s12868_s12   ;;  %s10000_s26 = sshll.u32 %s13181_s14, 10 }
  0xb6   : > { %s426_s24 = sand.u32 1, %s14786_s20   ;;  %s13194_s18 = scalar_lea.vmem [#allocation5], %s10000_s26 }
  0xb7   : > { %s427_s10 = scalar_lea.sflag [#allocation6], %s426_s24 }
  0xb8   : > { %12831 = dma.done.wait (%p14785_p10), %s427_s10, 49152  }
  0xb9   : > { %12833 = vsyncadd (%p14785_p10), %s427_s10, 4294918144  ;;  %s10001_s29 = sshll.u32 %s13181_s14, 11  ;;  %s445_s5 = scalar_lea.sflag [#allocation9], %s426_s24 }
  0xba   : > { %s13201_s13 = scalar_lea.vmem [#allocation7], %s10001_s29  ;;  %s13203_s3 = scalar_lea.vmem [#allocation8], %s10001_s29 }
  0xbb   : > { %12835 = dma.done.wait (%p14785_p10), %s445_s5, 33024  }
  0xbc   : > { %12837 = vsyncadd (%p14785_p10), %s445_s5, 4294934272  ;;  %s10003_s15 = sshll.u32 %s13181_s14, 4  ;;  %p525_p13 = scmp.lt.s32.totalorder %s12852_s30, 1 }
  0xbd   : > { %s10008_s19 = sshll.u32 %s12856_s9, 1  ;;  %s14787_s17 = sld [smem:[#allocation19_spill]] }
  0xbe   : > { %s526_s23 = scalar_select %p525_p13, %s12852_s30, 1 }
  0xbf   : > { %s539_s21 = sadd.s32 %s12852_s30, %s10008_s19  ;;  %s14788_s10 = sld [smem:[#allocation24_spill]] }
  0xc0   : > { %s11086_s7 = sshll.u32 %s526_s23, 5  ;;  %s13217_s0 = scalar_lea.vmem %s14742_s1, %s526_s23 }
  0xc1   : > { %p540_p6 = scmp.lt.s32.totalorder %s539_s21, 15  ;;  %s14789_s2 = sld [smem:[#allocation25_spill]] }
  0xc2   : > { %s13232_s16 = scalar_lea.vmem [#allocation10], %s10003_s15  ;;  %p10011_p0 = scmp.ne.s32.totalorder %s12856_s9, 0 }
  0xc3   : > { %s529_s20 = scalar_lea.vmem %s14787_s17, %s11086_s7  ;;  %s14806_s21 = smov (!%p540_p6, %s539_s21), 15 }
  0xc4   : > { %s11088_s14 = sshll.u32 %s14806_s21, 6  ;;  %551 = sbr.rel (%p10011_p0) target bundleno = 203 (0xcb), region = 72  ;;  %v552_v0 = vld [vmem:[%s529_s20] sm:$0xff] (!%p10011_p0)  ;;  %v553_v1 = vld [vmem:[%s529_s20 + $0x8] sm:$0xff] (!%p10011_p0)  ;;  %v554_v2 = vld [vmem:[%s529_s20 + $0x10] sm:$0xff] (!%p10011_p0) }
  0xc5   : > { %s13225_s29 = scalar_lea.vmem %s14788_s10, %s11086_s7  ;;  %s11089_s23 = sshll.u32 (!%p10011_p0), %s12852_s30, 5  ;;  %v555_v3 = vld [vmem:[%s529_s20 + $0x18] sm:$0xff] (!%p10011_p0) }
  0xc6   : > { %s558_s7 = scalar_lea.vmem (!%p10011_p0), [#allocation2], %s11089_s23 }
  0xc7   : > { %s13230_s4 = scalar_lea.vmem %s14789_s2, %s11088_s14  ;;  %559 = vst [vmem:[%s558_s7] sm:$0xff] (!%p10011_p0), %v552_v0  ;;  %560 = vst [vmem:[%s558_s7 + $0x8] sm:$0xff] (!%p10011_p0), %v553_v1 }
  0xc8   : > { %561 = vst [vmem:[%s558_s7 + $0x10] sm:$0xff] (!%p10011_p0), %v554_v2  ;;  %562 = vst [vmem:[%s558_s7 + $0x18] sm:$0xff] (!%p10011_p0), %v555_v3 }
  0xcb PF: > { %v11451_v4 = vld [vmem:[%s13185_s8 + $0x4] ss:$48 sps:$4 sm:$0xff]   ;;  %v11453_v5 = vld [vmem:[%s13185_s8] ss:$48 sps:$4 sm:$0xff]   ;;  %s11090_s2 = sshll.u32 %s12852_s30, 5  ;;  %vm12882_vm0 = vmmov 0  }
  0xcc   : > { %2879 = vmatprep.subr.bf16.mxu0 %v11451_v4  ;;  %v11454_v6 = vld [vmem:[%s13185_s8 + $0x64] ss:$48 sps:$4 sm:$0xff]   ;;  %v11456_v7 = vld [vmem:[%s13185_s8 + $0x60] ss:$48 sps:$4 sm:$0xff]   ;;  %s13250_s9 = scalar_lea.vmem [#allocation2], %s11090_s2  ;;  %vm3383_vm1 = vcmask 523264  }
  0xcd   : > { %2880 = vmatpush1.bf16.msra.mxu0 %v11453_v5  ;;  %v11457_v8 = vld [vmem:[%s13185_s8 + $0xc4] ss:$48 sps:$4 sm:$0xff]   ;;  %v11459_v9 = vld [vmem:[%s13185_s8 + $0xc0] ss:$48 sps:$4 sm:$0xff]   ;;  %v11625_v1 = vld [vmem:[%s13185_s8 + $0xc] ss:$48 sps:$4 sm:$0xff]  }
  0xce   : > { %2881 = vmatprep.subr.bf16.mxu0 %v11454_v6  ;;  %v11460_v10 = vld [vmem:[%s13185_s8 + $0x124] ss:$48 sps:$4 sm:$0xff]   ;;  %v11462_v11 = vld [vmem:[%s13185_s8 + $0x120] ss:$48 sps:$4 sm:$0xff]   ;;  %v11630_v2 = vld [vmem:[%s13185_s8 + $0x8] ss:$48 sps:$4 sm:$0xff]   ;;  %2961 = vmatprep.subr.bf16.mxu1 %v11625_v1 }
  0xcf   : > { %v11463_v12 = vld [vmem:[%s13185_s8 + $0x184] ss:$48 sps:$4 sm:$0xff]   ;;  %v11465_v13 = vld [vmem:[%s13185_s8 + $0x180] ss:$48 sps:$4 sm:$0xff]   ;;  %v567_v17 = vld [vmem:[%s13250_s9 + $0x8] sm:$0xff]  ;;  %2962 = vmatpush1.bf16.msra.mxu1 %v11630_v2  ;;  %s12883_s30 = smov 64  }
  0xd0   : > { %v11466_v14 = vld [vmem:[%s13185_s8 + $0x1e4] ss:$48 sps:$4 sm:$0xff]   ;;  %v11468_v15 = vld [vmem:[%s13185_s8 + $0x1e0] ss:$48 sps:$4 sm:$0xff]   ;;  %v13253_v18 = vpack.c.bf16 %v567_v17, %v567_v17  ;;  %v569_v40 = vld [vmem:[%s13250_s9 + $0x18] sm:$0xff]  ;;  %vm3455_vm2 = vcmask 1043456  }
  0xd1   : > { %2882 = vmatpush1.bf16.msra.mxu0 %v11456_v7  ;;  %v11469_v16 = vld [vmem:[%s13185_s8 + $0x244] ss:$48 sps:$4 sm:$0xff]   ;;  %v11471_v19 = vld [vmem:[%s13185_s8 + $0x240] ss:$48 sps:$4 sm:$0xff]   ;;  %v13282_v43 = vpack.c.bf16 %v569_v40, %v569_v40  ;;  %v11631_v5 = vld [vmem:[%s13185_s8 + $0x6c] ss:$48 sps:$4 sm:$0xff]  }
  0xd2   : > { %2883 = vmatprep.subr.bf16.mxu0 %v11457_v8  ;;  %v11472_v20 = vld [vmem:[%s13185_s8 + $0x2a4] ss:$48 sps:$4 sm:$0xff]   ;;  %2911 = vmatprep.mubr.bf16.mxu0 %v13253_v18  ;;  %v11474_v21 = vld [vmem:[%s13185_s8 + $0x2a0] ss:$48 sps:$4 sm:$0xff]   ;;  %v11636_v6 = vld [vmem:[%s13185_s8 + $0x68] ss:$48 sps:$4 sm:$0xff]  }
  0xd3   : > { %2993 = vmatprep.mubr.bf16.mxu1 %v13253_v18  ;;  %v11475_v22 = vld [vmem:[%s13185_s8 + $0x304] ss:$48 sps:$4 sm:$0xff]   ;;  %v11477_v23 = vld [vmem:[%s13185_s8 + $0x300] ss:$48 sps:$4 sm:$0xff]   ;;  %2963 = vmatprep.subr.bf16.mxu1 %v11631_v5  ;;  %v11649_v17 = vld [vmem:[%s13185_s8 + $0x18c] ss:$48 sps:$4 sm:$0xff]  }
  0xd4   : > { %v11478_v24 = vld [vmem:[%s13185_s8 + $0x364] ss:$48 sps:$4 sm:$0xff]   ;;  %v11480_v25 = vld [vmem:[%s13185_s8 + $0x360] ss:$48 sps:$4 sm:$0xff]   ;;  %2964 = vmatpush1.bf16.msra.mxu1 %v11636_v6  ;;  %vm3438_vm3 = vcmask 64512  }
  0xd5   : > { %2884 = vmatpush1.bf16.msra.mxu0 %v11459_v9  ;;  %v11481_v26 = vld [vmem:[%s13185_s8 + $0x3c4] ss:$48 sps:$4 sm:$0xff]   ;;  %v11483_v27 = vld [vmem:[%s13185_s8 + $0x3c0] ss:$48 sps:$4 sm:$0xff]   ;;  %v11637_v9 = vld [vmem:[%s13185_s8 + $0xcc] ss:$48 sps:$4 sm:$0xff]  }
  0xd6   : > { %2885 = vmatprep.subr.bf16.mxu0 %v11460_v10  ;;  %v11484_v28 = vld [vmem:[%s13185_s8 + $0x424] ss:$48 sps:$4 sm:$0xff]   ;;  %v11486_v29 = vld [vmem:[%s13185_s8 + $0x420] ss:$48 sps:$4 sm:$0xff]   ;;  %v11642_v10 = vld [vmem:[%s13185_s8 + $0xc8] ss:$48 sps:$4 sm:$0xff]   ;;  %2965 = vmatprep.subr.bf16.mxu1 %v11637_v9 }
  0xd7   : > { %v11487_v30 = vld [vmem:[%s13185_s8 + $0x484] ss:$48 sps:$4 sm:$0xff]   ;;  %v11489_v31 = vld [vmem:[%s13185_s8 + $0x480] ss:$48 sps:$4 sm:$0xff]  }
  0xd8   : > { %v11490_v32 = vld [vmem:[%s13185_s8 + $0x4e4] ss:$48 sps:$4 sm:$0xff]   ;;  %v11492_v33 = vld [vmem:[%s13185_s8 + $0x4e0] ss:$48 sps:$4 sm:$0xff]   ;;  %2966 = vmatpush1.bf16.msra.mxu1 %v11642_v10 }
  0xd9   : > { %2886 = vmatpush1.bf16.msra.mxu0 %v11462_v11  ;;  %v11493_v34 = vld [vmem:[%s13185_s8 + $0x544] ss:$48 sps:$4 sm:$0xff]   ;;  %v11495_v35 = vld [vmem:[%s13185_s8 + $0x540] ss:$48 sps:$4 sm:$0xff]  }
  0xda   : > { %2887 = vmatprep.subr.bf16.mxu0 %v11463_v12  ;;  %v11496_v36 = vld [vmem:[%s13185_s8 + $0x5a4] ss:$48 sps:$4 sm:$0xff]   ;;  %v11498_v37 = vld [vmem:[%s13185_s8 + $0x5a0] ss:$48 sps:$4 sm:$0xff]  }
  0xdb   : > { %v11501_v38 = vld [vmem:[%s13185_s8 + $0x604] ss:$48 sps:$4 sm:$0xff]   ;;  %v11499_v42 = vld [vmem:[%s13185_s8 + $0x600] ss:$48 sps:$4 sm:$0xff]  }
  0xdc   : > { %v566_v39 = vld [vmem:[%s13250_s9] sm:$0xff] }
  0xdd   : > { %2888 = vmatpush1.bf16.msra.mxu0 %v11465_v13  ;;  %v13279_v41 = vpack.c.bf16 %v566_v39, %v566_v39  ;;  %v11504_v44 = vld [vmem:[%s13185_s8 + $0x664] ss:$48 sps:$4 sm:$0xff]   ;;  %v11502_v45 = vld [vmem:[%s13185_s8 + $0x660] ss:$48 sps:$4 sm:$0xff]   ;;  %v11643_v13 = vld [vmem:[%s13185_s8 + $0x12c] ss:$48 sps:$4 sm:$0xff]  }
  0xde   : > { %2889 = vmatprep.subr.bf16.mxu0 %v11466_v14  ;;  %v11507_v46 = vld [vmem:[%s13185_s8 + $0x6c4] ss:$48 sps:$4 sm:$0xff]   ;;  %v11505_v47 = vld [vmem:[%s13185_s8 + $0x6c0] ss:$48 sps:$4 sm:$0xff]   ;;  %v11648_v14 = vld [vmem:[%s13185_s8 + $0x128] ss:$48 sps:$4 sm:$0xff]   ;;  %2967 = vmatprep.subr.bf16.mxu1 %v11643_v13 }
  0xdf   : > { %v11510_v48 = vld [vmem:[%s13185_s8 + $0x724] ss:$48 sps:$4 sm:$0xff]   ;;  %v11508_v49 = vld [vmem:[%s13185_s8 + $0x720] ss:$48 sps:$4 sm:$0xff]   ;;  %2968 = vmatpush1.bf16.msra.mxu1 %v11648_v14 }
  0xe0   : > { %v11513_v50 = vld [vmem:[%s13185_s8 + $0x784] ss:$48 sps:$4 sm:$0xff]   ;;  %v11511_v51 = vld [vmem:[%s13185_s8 + $0x780] ss:$48 sps:$4 sm:$0xff]   ;;  %2969 = vmatprep.subr.bf16.mxu1 %v11649_v17 }
  0xe1   : > { %2890 = vmatpush1.bf16.msra.mxu0 %v11468_v15  ;;  %v11516_v52 = vld [vmem:[%s13185_s8 + $0x7e4] ss:$48 sps:$4 sm:$0xff]   ;;  %v11514_v53 = vld [vmem:[%s13185_s8 + $0x7e0] ss:$48 sps:$4 sm:$0xff]  }
  0xe2   : > { %2891 = vmatprep.subr.bf16.mxu0 %v11469_v16  ;;  %v11519_v54 = vld [vmem:[%s13185_s8 + $0x844] ss:$48 sps:$4 sm:$0xff]   ;;  %v11517_v55 = vld [vmem:[%s13185_s8 + $0x840] ss:$48 sps:$4 sm:$0xff]  }
  0xe3   : > { %v11522_v56 = vld [vmem:[%s13185_s8 + $0x8a4] ss:$48 sps:$4 sm:$0xff]   ;;  %v11520_v57 = vld [vmem:[%s13185_s8 + $0x8a0] ss:$48 sps:$4 sm:$0xff]  }
  0xe4   : > { %v11525_v58 = vld [vmem:[%s13185_s8 + $0x904] ss:$48 sps:$4 sm:$0xff]   ;;  %v11523_v59 = vld [vmem:[%s13185_s8 + $0x900] ss:$48 sps:$4 sm:$0xff]  }
  0xe5   : > { %2892 = vmatpush1.bf16.msra.mxu0 %v11471_v19  ;;  %v11528_v60 = vld [vmem:[%s13185_s8 + $0x964] ss:$48 sps:$4 sm:$0xff]   ;;  %v11526_v61 = vld [vmem:[%s13185_s8 + $0x960] ss:$48 sps:$4 sm:$0xff]   ;;  %v11654_v19 = vld [vmem:[%s13185_s8 + $0x188] ss:$48 sps:$4 sm:$0xff]  }
  0xe6   : > { %2893 = vmatprep.subr.bf16.mxu0 %v11472_v20  ;;  %v11531_v62 = vld [vmem:[%s13185_s8 + $0x9c4] ss:$48 sps:$4 sm:$0xff]   ;;  %v11529_v63 = vld [vmem:[%s13185_s8 + $0x9c0] ss:$48 sps:$4 sm:$0xff]   ;;  %2970 = vmatpush1.bf16.msra.mxu1 %v11654_v19 }
  0xe7   : > { %v11534_v0 = vld [vmem:[%s13185_s8 + $0xa24] ss:$48 sps:$4 sm:$0xff]   ;;  %v11532_v3 = vld [vmem:[%s13185_s8 + $0xa20] ss:$48 sps:$4 sm:$0xff]  }
  0xe8   : > { %v11537_v4 = vld [vmem:[%s13185_s8 + $0xa84] ss:$48 sps:$4 sm:$0xff]   ;;  %v11535_v7 = vld [vmem:[%s13185_s8 + $0xa80] ss:$48 sps:$4 sm:$0xff]  }
  0xe9   : > { %2894 = vmatpush1.bf16.msra.mxu0 %v11474_v21  ;;  %v11540_v8 = vld [vmem:[%s13185_s8 + $0xae4] ss:$48 sps:$4 sm:$0xff]   ;;  %v11538_v11 = vld [vmem:[%s13185_s8 + $0xae0] ss:$48 sps:$4 sm:$0xff]  }
  0xea   : > { %2895 = vmatprep.subr.bf16.mxu0 %v11475_v22  ;;  %v11543_v12 = vld [vmem:[%s13185_s8 + $0xb44] ss:$48 sps:$4 sm:$0xff]   ;;  %v11541_v15 = vld [vmem:[%s13185_s8 + $0xb40] ss:$48 sps:$4 sm:$0xff]  }
  0xeb   : > { %v11546_v16 = vld [vmem:[%s13185_s8 + $0xba4] ss:$48 sps:$4 sm:$0xff]   ;;  %v11544_v20 = vld [vmem:[%s13185_s8 + $0xba0] ss:$48 sps:$4 sm:$0xff]  }
  0xec   : > { %v568_v21 = vld [vmem:[%s13250_s9 + $0x10] sm:$0xff] }
  0xed   : > { %2896 = vmatpush1.bf16.msra.mxu0 %v11477_v23  ;;  %v11549_v22 = vld [vmem:[%s13185_s8 + $0x14] ss:$48 sps:$4 sm:$0xff]   ;;  %v11655_v23 = vld [vmem:[%s13185_s8 + $0x1ec] ss:$48 sps:$4 sm:$0xff]   ;;  %v11556_v39 = vld [vmem:[%s13185_s8 + $0x130] ss:$48 sps:$4 sm:$0xff]  }
  0xee   : > { %2897 = vmatprep.subr.bf16.mxu0 %v11478_v24  ;;  %v11660_v24 = vld [vmem:[%s13185_s8 + $0x1e8] ss:$48 sps:$4 sm:$0xff]   ;;  %2971 = vmatprep.subr.bf16.mxu1 %v11655_v23  ;;  %v11561_v40 = vld [vmem:[%s13185_s8 + $0x194] ss:$48 sps:$4 sm:$0xff]   ;;  %v11574_v1 = vld [vmem:[%s13185_s8 + $0x370] ss:$48 sps:$4 sm:$0xff]  }
  0xef   : > { %2972 = vmatpush1.bf16.msra.mxu1 %v11660_v24  ;;  %v11579_v2 = vld [vmem:[%s13185_s8 + $0x3d4] ss:$48 sps:$4 sm:$0xff]   ;;  %v11577_v5 = vld [vmem:[%s13185_s8 + $0x3d0] ss:$48 sps:$4 sm:$0xff]   ;;  %v11736_v24 = vld [vmem:[%s13185_s8 + $0x788] ss:$48 sps:$4 sm:$0xff]  }
  0xf0   : > { %v11582_v6 = vld [vmem:[%s13185_s8 + $0x434] ss:$48 sps:$4 sm:$0xff]   ;;  %v11580_v9 = vld [vmem:[%s13185_s8 + $0x430] ss:$48 sps:$4 sm:$0xff]  }
  0xf1   : > { %2898 = vmatpush1.bf16.msra.mxu0 %v11480_v25  ;;  %v11547_v25 = vld [vmem:[%s13185_s8 + $0x10] ss:$48 sps:$4 sm:$0xff]   ;;  %v11585_v10 = vld [vmem:[%s13185_s8 + $0x494] ss:$48 sps:$4 sm:$0xff]  }
  0xf2   : > { %2899 = vmatprep.subr.bf16.mxu0 %v11481_v26  ;;  %v13331_v26 = vpack.c.bf16 %v568_v21, %v568_v21  ;;  %v11583_v13 = vld [vmem:[%s13185_s8 + $0x490] ss:$48 sps:$4 sm:$0xff]   ;;  %v11588_v14 = vld [vmem:[%s13185_s8 + $0x4f4] ss:$48 sps:$4 sm:$0xff]   ;;  %v11738_v21 = vld [vmem:[%s13185_s8 + $0x78c] ss:$48 sps:$4 sm:$0xff]  }
  0xf3   : > { %v11586_v17 = vld [vmem:[%s13185_s8 + $0x4f0] ss:$48 sps:$4 sm:$0xff]   ;;  %v11591_v19 = vld [vmem:[%s13185_s8 + $0x554] ss:$48 sps:$4 sm:$0xff]  }
  0xf4   : > { %v11594_v23 = vld [vmem:[%s13185_s8 + $0x5b4] ss:$48 sps:$4 sm:$0xff]  }
  0xf5   : > { %2900 = vmatpush1.bf16.msra.mxu0 %v11483_v27  ;;  %v11552_v27 = vld [vmem:[%s13185_s8 + $0x74] ss:$48 sps:$4 sm:$0xff]  }
  0xf6   : > { %2901 = vmatprep.subr.bf16.mxu0 %v11484_v28  ;;  %v11661_v28 = vld [vmem:[%s13185_s8 + $0x24c] ss:$48 sps:$4 sm:$0xff]  }
  0xf7   : > { %2973 = vmatprep.subr.bf16.mxu1 %v11661_v28  ;;  %v11597_v28 = vld [vmem:[%s13185_s8 + $0x614] ss:$48 sps:$4 sm:$0xff]  }
  0xf9   : > { %2902 = vmatpush1.bf16.msra.mxu0 %v11486_v29  ;;  %v11663_v29 = vld [vmem:[%s13185_s8 + $0x248] ss:$48 sps:$4 sm:$0xff]  }
  0xfa   : > { %2903 = vmatprep.subr.bf16.mxu0 %v11487_v30  ;;  %v11664_v30 = vld [vmem:[%s13185_s8 + $0x2ac] ss:$48 sps:$4 sm:$0xff]   ;;  %2974 = vmatpush1.bf16.msra.mxu1 %v11663_v29  ;;  %v11742_v29 = vld [vmem:[%s13185_s8 + $0x7e8] ss:$48 sps:$4 sm:$0xff]  }
  0xfb   : > { %2975 = vmatprep.subr.bf16.mxu1 %v11664_v30  ;;  %v11750_v30 = vld [vmem:[%s13185_s8 + $0x84c] ss:$48 sps:$4 sm:$0xff]  }
  0xfd   : > { %2904 = vmatpush1.bf16.msra.mxu0 %v11489_v31  ;;  %v11550_v31 = vld [vmem:[%s13185_s8 + $0x70] ss:$48 sps:$4 sm:$0xff]  }
  0xfe   : > { %2905 = vmatprep.subr.bf16.mxu0 %v11490_v32  ;;  %v11555_v32 = vld [vmem:[%s13185_s8 + $0xd4] ss:$48 sps:$4 sm:$0xff]  }
 0x101   : > { %2906 = vmatpush1.bf16.msra.mxu0 %v11492_v33  ;;  %v11666_v33 = vld [vmem:[%s13185_s8 + $0x2a8] ss:$48 sps:$4 sm:$0xff]  }
 0x102   : > { %2907 = vmatprep.subr.bf16.mxu0 %v11493_v34  ;;  %v11667_v34 = vld [vmem:[%s13185_s8 + $0x30c] ss:$48 sps:$4 sm:$0xff]   ;;  %2976 = vmatpush1.bf16.msra.mxu1 %v11666_v33  ;;  %v11748_v33 = vld [vmem:[%s13185_s8 + $0x848] ss:$48 sps:$4 sm:$0xff]  }
 0x103   : > { %2977 = vmatprep.subr.bf16.mxu1 %v11667_v34  ;;  %v11756_v34 = vld [vmem:[%s13185_s8 + $0x8ac] ss:$48 sps:$4 sm:$0xff]  }
 0x105   : > { %2908 = vmatpush1.bf16.msra.mxu0 %v11495_v35  ;;  %v11553_v35 = vld [vmem:[%s13185_s8 + $0xd0] ss:$48 sps:$4 sm:$0xff]  }
 0x106   : > { %2909 = vmatprep.subr.bf16.mxu0 %v11496_v36  ;;  %v11558_v36 = vld [vmem:[%s13185_s8 + $0x134] ss:$48 sps:$4 sm:$0xff]  }
 0x109   : > { %2910 = vmatpush1.bf16.msra.mxu0 %v11498_v37  ;;  %v11669_v37 = vld [vmem:[%s13185_s8 + $0x308] ss:$48 sps:$4 sm:$0xff]  }
 0x10a   : > { %2920 = vmatprep.subr.bf16.mxu0 %v11501_v38  ;;  %v11670_v38 = vld [vmem:[%s13185_s8 + $0x36c] ss:$48 sps:$4 sm:$0xff]   ;;  %2978 = vmatpush1.bf16.msra.mxu1 %v11669_v37  ;;  %v11754_v37 = vld [vmem:[%s13185_s8 + $0x8a8] ss:$48 sps:$4 sm:$0xff]  }
 0x10b   : > { %2979 = vmatprep.subr.bf16.mxu1 %v11670_v38  ;;  %v11762_v38 = vld [vmem:[%s13185_s8 + $0x90c] ss:$48 sps:$4 sm:$0xff]  }
 0x10c   : > { %2912 = vmatmul.mubr.bf16.vlgmr.msra.gmra.mrb[0].mxu0 %v13279_v41 }
 0x10d   : > { %2921 = vmatpush1.bf16.msra.mxu0 %v11499_v42  ;;  %2952 = vmatprep.mubr.bf16.mxu0 %v13282_v43  ;;  %v11672_v42 = vld [vmem:[%s13185_s8 + $0x368] ss:$48 sps:$4 sm:$0xff]  }
 0x10e   : > { %2922 = vmatprep.subr.bf16.mxu0 %v11504_v44  ;;  %v11676_v44 = vld [vmem:[%s13185_s8 + $0x3cc] ss:$48 sps:$4 sm:$0xff]   ;;  %2980 = vmatpush1.bf16.msra.mxu1 %v11672_v42  ;;  %v11760_v42 = vld [vmem:[%s13185_s8 + $0x908] ss:$48 sps:$4 sm:$0xff]  }
 0x10f   : > { %2981 = vmatprep.subr.bf16.mxu1 %v11676_v44  ;;  %v11768_v44 = vld [vmem:[%s13185_s8 + $0x96c] ss:$48 sps:$4 sm:$0xff]  }
 0x111   : > { %2923 = vmatpush1.bf16.msra.mxu0 %v11502_v45  ;;  %v11559_v45 = vld [vmem:[%s13185_s8 + $0x190] ss:$48 sps:$4 sm:$0xff]  }
 0x112   : > { %2924 = vmatprep.subr.bf16.mxu0 %v11507_v46  ;;  %v11564_v46 = vld [vmem:[%s13185_s8 + $0x1f4] ss:$48 sps:$4 sm:$0xff]  }
 0x115   : > { %2925 = vmatpush1.bf16.msra.mxu0 %v11505_v47  ;;  %v11678_v47 = vld [vmem:[%s13185_s8 + $0x3c8] ss:$48 sps:$4 sm:$0xff]  }
 0x116   : > { %2926 = vmatprep.subr.bf16.mxu0 %v11510_v48  ;;  %v11682_v48 = vld [vmem:[%s13185_s8 + $0x42c] ss:$48 sps:$4 sm:$0xff]   ;;  %2982 = vmatpush1.bf16.msra.mxu1 %v11678_v47  ;;  %v11766_v47 = vld [vmem:[%s13185_s8 + $0x968] ss:$48 sps:$4 sm:$0xff]  }
 0x117   : > { %2983 = vmatprep.subr.bf16.mxu1 %v11682_v48  ;;  %v11774_v48 = vld [vmem:[%s13185_s8 + $0x9cc] ss:$48 sps:$4 sm:$0xff]  }
 0x119   : > { %2927 = vmatpush1.bf16.msra.mxu0 %v11508_v49  ;;  %v11562_v49 = vld [vmem:[%s13185_s8 + $0x1f0] ss:$48 sps:$4 sm:$0xff]  }
 0x11a   : > { %2928 = vmatprep.subr.bf16.mxu0 %v11513_v50  ;;  %v11567_v50 = vld [vmem:[%s13185_s8 + $0x254] ss:$48 sps:$4 sm:$0xff]  }
 0x11d   : > { %2929 = vmatpush1.bf16.msra.mxu0 %v11511_v51  ;;  %v11684_v51 = vld [vmem:[%s13185_s8 + $0x428] ss:$48 sps:$4 sm:$0xff]  }
 0x11e   : > { %2930 = vmatprep.subr.bf16.mxu0 %v11516_v52  ;;  %v11688_v52 = vld [vmem:[%s13185_s8 + $0x48c] ss:$48 sps:$4 sm:$0xff]   ;;  %2984 = vmatpush1.bf16.msra.mxu1 %v11684_v51  ;;  %v11772_v51 = vld [vmem:[%s13185_s8 + $0x9c8] ss:$48 sps:$4 sm:$0xff]  }
 0x11f   : > { %2985 = vmatprep.subr.bf16.mxu1 %v11688_v52  ;;  %v11610_v52 = vld [vmem:[%s13185_s8 + $0x7f0] ss:$48 sps:$4 sm:$0xff]  }
 0x121   : > { %2931 = vmatpush1.bf16.msra.mxu0 %v11514_v53  ;;  %v11565_v53 = vld [vmem:[%s13185_s8 + $0x250] ss:$48 sps:$4 sm:$0xff]  }
 0x122   : > { %2932 = vmatprep.subr.bf16.mxu0 %v11519_v54  ;;  %v11570_v54 = vld [vmem:[%s13185_s8 + $0x2b4] ss:$48 sps:$4 sm:$0xff]  }
 0x125   : > { %2933 = vmatpush1.bf16.msra.mxu0 %v11517_v55  ;;  %v11690_v55 = vld [vmem:[%s13185_s8 + $0x488] ss:$48 sps:$4 sm:$0xff]  }
 0x126   : > { %2934 = vmatprep.subr.bf16.mxu0 %v11522_v56  ;;  %v11694_v56 = vld [vmem:[%s13185_s8 + $0x4ec] ss:$48 sps:$4 sm:$0xff]   ;;  %2986 = vmatpush1.bf16.msra.mxu1 %v11690_v55  ;;  %v11778_v55 = vld [vmem:[%s13185_s8 + $0xa28] ss:$48 sps:$4 sm:$0xff]  }
 0x127   : > { %2987 = vmatprep.subr.bf16.mxu1 %v11694_v56  ;;  %v11613_v56 = vld [vmem:[%s13185_s8 + $0x850] ss:$48 sps:$4 sm:$0xff]  }
 0x129   : > { %2935 = vmatpush1.bf16.msra.mxu0 %v11520_v57  ;;  %v11568_v57 = vld [vmem:[%s13185_s8 + $0x2b0] ss:$48 sps:$4 sm:$0xff]  }
 0x12a   : > { %2936 = vmatprep.subr.bf16.mxu0 %v11525_v58  ;;  %v11573_v58 = vld [vmem:[%s13185_s8 + $0x314] ss:$48 sps:$4 sm:$0xff]  }
 0x12d   : > { %2937 = vmatpush1.bf16.msra.mxu0 %v11523_v59  ;;  %v11696_v59 = vld [vmem:[%s13185_s8 + $0x4e8] ss:$48 sps:$4 sm:$0xff]  }
 0x12e   : > { %2938 = vmatprep.subr.bf16.mxu0 %v11528_v60  ;;  %v11700_v60 = vld [vmem:[%s13185_s8 + $0x54c] ss:$48 sps:$4 sm:$0xff]   ;;  %2988 = vmatpush1.bf16.msra.mxu1 %v11696_v59 }
 0x12f   : > { %2989 = vmatprep.subr.bf16.mxu1 %v11700_v60  ;;  %v11786_v59 = vld [vmem:[%s13185_s8 + $0xa8c] ss:$48 sps:$4 sm:$0xff]  }
 0x130   : > { %v11792_v60 = vld [vmem:[%s13185_s8 + $0xaec] ss:$48 sps:$4 sm:$0xff]  }
 0x131   : > { %2939 = vmatpush1.bf16.msra.mxu0 %v11526_v61  ;;  %v11571_v61 = vld [vmem:[%s13185_s8 + $0x310] ss:$48 sps:$4 sm:$0xff]  }
 0x132   : > { %2940 = vmatprep.subr.bf16.mxu0 %v11531_v62  ;;  %v11576_v62 = vld [vmem:[%s13185_s8 + $0x374] ss:$48 sps:$4 sm:$0xff]  }
 0x135   : > { %2941 = vmatpush1.bf16.msra.mxu0 %v11529_v63  ;;  %v11702_v63 = vld [vmem:[%s13185_s8 + $0x548] ss:$48 sps:$4 sm:$0xff]  }
 0x136   : > { %2942 = vmatprep.subr.bf16.mxu0 %v11534_v0  ;;  %v11706_v0 = vld [vmem:[%s13185_s8 + $0x5ac] ss:$48 sps:$4 sm:$0xff]   ;;  %2990 = vmatpush1.bf16.msra.mxu1 %v11702_v63  ;;  %v11790_v63 = vld [vmem:[%s13185_s8 + $0xae8] ss:$48 sps:$4 sm:$0xff]  }
 0x137   : > { %2991 = vmatprep.subr.bf16.mxu1 %v11706_v0  ;;  %v11798_v0 = vld [vmem:[%s13185_s8 + $0xb4c] ss:$48 sps:$4 sm:$0xff]  }
 0x139   : > { %2943 = vmatpush1.bf16.msra.mxu0 %v11532_v3  ;;  %v11708_v3 = vld [vmem:[%s13185_s8 + $0x5a8] ss:$48 sps:$4 sm:$0xff]  }
 0x13a   : > { %2944 = vmatprep.subr.bf16.mxu0 %v11537_v4  ;;  %v11714_v4 = vld [vmem:[%s13185_s8 + $0x60c] ss:$48 sps:$4 sm:$0xff]   ;;  %2992 = vmatpush1.bf16.msra.mxu1 %v11708_v3  ;;  %v11796_v3 = vld [vmem:[%s13185_s8 + $0xb48] ss:$48 sps:$4 sm:$0xff]  }
 0x13b   : > { %3002 = vmatprep.subr.bf16.mxu1 %v11714_v4  ;;  %v11804_v4 = vld [vmem:[%s13185_s8 + $0xbac] ss:$48 sps:$4 sm:$0xff]  }
 0x13d   : > { %2945 = vmatpush1.bf16.msra.mxu0 %v11535_v7  ;;  %v11712_v7 = vld [vmem:[%s13185_s8 + $0x608] ss:$48 sps:$4 sm:$0xff]   ;;  %2994 = vmatmul.mubr.bf16.vlgmr.msra.gmra.mrb[0].mxu1 %v13279_v41 }
 0x13e   : > { %2946 = vmatprep.subr.bf16.mxu0 %v11540_v8  ;;  %v11720_v8 = vld [vmem:[%s13185_s8 + $0x66c] ss:$48 sps:$4 sm:$0xff]   ;;  %3003 = vmatpush1.bf16.msra.mxu1 %v11712_v7  ;;  %v11802_v7 = vld [vmem:[%s13185_s8 + $0xba8] ss:$48 sps:$4 sm:$0xff]  }
 0x13f   : > { %3004 = vmatprep.subr.bf16.mxu1 %v11720_v8  ;;  %3034 = vmatprep.mubr.bf16.mxu1 %v13282_v43  ;;  %v11810_v8 = vld [vmem:[%s13185_s8 + $0x1c] ss:$48 sps:$4 sm:$0xff]  }
 0x141   : > { %2947 = vmatpush1.bf16.msra.mxu0 %v11538_v11  ;;  %v11718_v11 = vld [vmem:[%s13185_s8 + $0x668] ss:$48 sps:$4 sm:$0xff]  }
 0x142   : > { %2948 = vmatprep.subr.bf16.mxu0 %v11543_v12  ;;  %v11726_v12 = vld [vmem:[%s13185_s8 + $0x6cc] ss:$48 sps:$4 sm:$0xff]   ;;  %3005 = vmatpush1.bf16.msra.mxu1 %v11718_v11  ;;  %v11808_v11 = vld [vmem:[%s13185_s8 + $0x18] ss:$48 sps:$4 sm:$0xff]  }
 0x143   : > { %3006 = vmatprep.subr.bf16.mxu1 %v11726_v12  ;;  %v11816_v12 = vld [vmem:[%s13185_s8 + $0x7c] ss:$48 sps:$4 sm:$0xff]  }
 0x145   : > { %2949 = vmatpush1.bf16.msra.mxu0 %v11541_v15  ;;  %v11724_v15 = vld [vmem:[%s13185_s8 + $0x6c8] ss:$48 sps:$4 sm:$0xff]  }
 0x146   : > { %2950 = vmatprep.subr.bf16.mxu0 %v11546_v16  ;;  %v11732_v16 = vld [vmem:[%s13185_s8 + $0x72c] ss:$48 sps:$4 sm:$0xff]   ;;  %3007 = vmatpush1.bf16.msra.mxu1 %v11724_v15  ;;  %v11814_v15 = vld [vmem:[%s13185_s8 + $0x78] ss:$48 sps:$4 sm:$0xff]  }
 0x147   : > { %3008 = vmatprep.subr.bf16.mxu1 %v11732_v16  ;;  %v11822_v16 = vld [vmem:[%s13185_s8 + $0xdc] ss:$48 sps:$4 sm:$0xff]  }
 0x149   : > { %2951 = vmatpush1.bf16.msra.mxu0 %v11544_v20  ;;  %v11730_v20 = vld [vmem:[%s13185_s8 + $0x728] ss:$48 sps:$4 sm:$0xff]  }
 0x14a   : > { %3043 = vmatprep.subr.bf16.mxu0 %v11549_v22  ;;  %v11589_v22 = vld [vmem:[%s13185_s8 + $0x550] ss:$48 sps:$4 sm:$0xff]   ;;  %3009 = vmatpush1.bf16.msra.mxu1 %v11730_v20  ;;  %v11820_v20 = vld [vmem:[%s13185_s8 + $0xd8] ss:$48 sps:$4 sm:$0xff]  }
 0x14b   : > { %3010 = vmatprep.subr.bf16.mxu1 %v11738_v21  ;;  %v11828_v21 = vld [vmem:[%s13185_s8 + $0x13c] ss:$48 sps:$4 sm:$0xff]  }
 0x14c   : > { %2953 = vmatmul.mubr.bf16.vlgmr.msra.gmra.mrb[0].mxu0 %v13331_v26 }
 0x14d   : > { %3044 = vmatpush1.bf16.msra.mxu0 %v11547_v25  ;;  %3075 = vmatprep.mubr.bf16.mxu0 %v13253_v18  ;;  %v11744_v25 = vld [vmem:[%s13185_s8 + $0x7ec] ss:$48 sps:$4 sm:$0xff]  }
 0x14e   : > { %3045 = vmatprep.subr.bf16.mxu0 %v11552_v27  ;;  %v11592_v27 = vld [vmem:[%s13185_s8 + $0x5b0] ss:$48 sps:$4 sm:$0xff]   ;;  %3011 = vmatpush1.bf16.msra.mxu1 %v11736_v24  ;;  %v11826_v24 = vld [vmem:[%s13185_s8 + $0x138] ss:$48 sps:$4 sm:$0xff]  }
 0x14f   : > { %3012 = vmatprep.subr.bf16.mxu1 %v11744_v25  ;;  %v11834_v25 = vld [vmem:[%s13185_s8 + $0x19c] ss:$48 sps:$4 sm:$0xff]  }
 0x151   : > { %3046 = vmatpush1.bf16.msra.mxu0 %v11550_v31  ;;  %v11595_v31 = vld [vmem:[%s13185_s8 + $0x610] ss:$48 sps:$4 sm:$0xff]  }
 0x152   : > { %3047 = vmatprep.subr.bf16.mxu0 %v11555_v32  ;;  %v11600_v32 = vld [vmem:[%s13185_s8 + $0x674] ss:$48 sps:$4 sm:$0xff]   ;;  %3013 = vmatpush1.bf16.msra.mxu1 %v11742_v29  ;;  %v11832_v29 = vld [vmem:[%s13185_s8 + $0x198] ss:$48 sps:$4 sm:$0xff]  }
 0x153   : > { %3014 = vmatprep.subr.bf16.mxu1 %v11750_v30  ;;  %v11840_v30 = vld [vmem:[%s13185_s8 + $0x1fc] ss:$48 sps:$4 sm:$0xff]  }
 0x155   : > { %3048 = vmatpush1.bf16.msra.mxu0 %v11553_v35  ;;  %v11598_v35 = vld [vmem:[%s13185_s8 + $0x670] ss:$48 sps:$4 sm:$0xff]  }
 0x156   : > { %3049 = vmatprep.subr.bf16.mxu0 %v11558_v36  ;;  %v11603_v36 = vld [vmem:[%s13185_s8 + $0x6d4] ss:$48 sps:$4 sm:$0xff]   ;;  %3015 = vmatpush1.bf16.msra.mxu1 %v11748_v33  ;;  %v11838_v33 = vld [vmem:[%s13185_s8 + $0x1f8] ss:$48 sps:$4 sm:$0xff]  }
 0x157   : > { %3016 = vmatprep.subr.bf16.mxu1 %v11756_v34  ;;  %v11846_v34 = vld [vmem:[%s13185_s8 + $0x25c] ss:$48 sps:$4 sm:$0xff]  }
 0x159   : > { %3050 = vmatpush1.bf16.msra.mxu0 %v11556_v39  ;;  %v11601_v39 = vld [vmem:[%s13185_s8 + $0x6d0] ss:$48 sps:$4 sm:$0xff]  }
 0x15a   : > { %3051 = vmatprep.subr.bf16.mxu0 %v11561_v40  ;;  %v11606_v40 = vld [vmem:[%s13185_s8 + $0x734] ss:$48 sps:$4 sm:$0xff]   ;;  %3017 = vmatpush1.bf16.msra.mxu1 %v11754_v37  ;;  %v11844_v37 = vld [vmem:[%s13185_s8 + $0x258] ss:$48 sps:$4 sm:$0xff]  }
 0x15b   : > { %3018 = vmatprep.subr.bf16.mxu1 %v11762_v38  ;;  %v11852_v38 = vld [vmem:[%s13185_s8 + $0x2bc] ss:$48 sps:$4 sm:$0xff]  }
 0x15d   : > { %3052 = vmatpush1.bf16.msra.mxu0 %v11559_v45  ;;  %v11604_v45 = vld [vmem:[%s13185_s8 + $0x730] ss:$48 sps:$4 sm:$0xff]  }
 0x15e   : > { %3053 = vmatprep.subr.bf16.mxu0 %v11564_v46  ;;  %v11609_v46 = vld [vmem:[%s13185_s8 + $0x794] ss:$48 sps:$4 sm:$0xff]   ;;  %3019 = vmatpush1.bf16.msra.mxu1 %v11760_v42  ;;  %v11850_v42 = vld [vmem:[%s13185_s8 + $0x2b8] ss:$48 sps:$4 sm:$0xff]  }
 0x15f   : > { %3020 = vmatprep.subr.bf16.mxu1 %v11768_v44  ;;  %v11858_v44 = vld [vmem:[%s13185_s8 + $0x31c] ss:$48 sps:$4 sm:$0xff]  }
 0x161   : > { %3054 = vmatpush1.bf16.msra.mxu0 %v11562_v49  ;;  %v11607_v49 = vld [vmem:[%s13185_s8 + $0x790] ss:$48 sps:$4 sm:$0xff]  }
 0x162   : > { %3055 = vmatprep.subr.bf16.mxu0 %v11567_v50  ;;  %v11612_v50 = vld [vmem:[%s13185_s8 + $0x7f4] ss:$48 sps:$4 sm:$0xff]   ;;  %3021 = vmatpush1.bf16.msra.mxu1 %v11766_v47  ;;  %v11856_v47 = vld [vmem:[%s13185_s8 + $0x318] ss:$48 sps:$4 sm:$0xff]  }
 0x163   : > { %3022 = vmatprep.subr.bf16.mxu1 %v11774_v48  ;;  %v11864_v48 = vld [vmem:[%s13185_s8 + $0x37c] ss:$48 sps:$4 sm:$0xff]  }
 0x165   : > { %3056 = vmatpush1.bf16.msra.mxu0 %v11565_v53  ;;  %v11615_v53 = vld [vmem:[%s13185_s8 + $0x854] ss:$48 sps:$4 sm:$0xff]  }
 0x166   : > { %3057 = vmatprep.subr.bf16.mxu0 %v11570_v54  ;;  %3023 = vmatpush1.bf16.msra.mxu1 %v11772_v51  ;;  %v11780_v54 = vld [vmem:[%s13185_s8 + $0xa2c] ss:$48 sps:$4 sm:$0xff]   ;;  %v11862_v51 = vld [vmem:[%s13185_s8 + $0x378] ss:$48 sps:$4 sm:$0xff]  }
 0x167   : > { %3024 = vmatprep.subr.bf16.mxu1 %v11780_v54  ;;  %v11705_v54 = vld [vmem:[%s13185_s8 + $0x204] ss:$48 sps:$4 sm:$0xff]  }
 0x169   : > { %3058 = vmatpush1.bf16.msra.mxu0 %v11568_v57  ;;  %v11618_v57 = vld [vmem:[%s13185_s8 + $0x8b4] ss:$48 sps:$4 sm:$0xff]  }
 0x16a   : > { %3059 = vmatprep.subr.bf16.mxu0 %v11573_v58  ;;  %3025 = vmatpush1.bf16.msra.mxu1 %v11778_v55  ;;  %v11784_v58 = vld [vmem:[%s13185_s8 + $0xa88] ss:$48 sps:$4 sm:$0xff]  }
 0x16b   : > { %3026 = vmatprep.subr.bf16.mxu1 %v11786_v59  ;;  %v11865_v55 = vld [vmem:[%s13185_s8 + $0x3d8] ss:$48 sps:$4 sm:$0xff]  }
 0x16c   : > { %v11868_v59 = vld [vmem:[%s13185_s8 + $0x438] ss:$48 sps:$4 sm:$0xff]  }
 0x16d   : > { %3060 = vmatpush1.bf16.msra.mxu0 %v11571_v61  ;;  %v11616_v61 = vld [vmem:[%s13185_s8 + $0x8b0] ss:$48 sps:$4 sm:$0xff]  }
 0x16e   : > { %3061 = vmatprep.subr.bf16.mxu0 %v11576_v62  ;;  %v11621_v62 = vld [vmem:[%s13185_s8 + $0x914] ss:$48 sps:$4 sm:$0xff]   ;;  %3027 = vmatpush1.bf16.msra.mxu1 %v11784_v58 }
 0x16f   : > { %3028 = vmatprep.subr.bf16.mxu1 %v11792_v60  ;;  %v11711_v58 = vld [vmem:[%s13185_s8 + $0x264] ss:$48 sps:$4 sm:$0xff]   ;;  %v11873_v60 = vld [vmem:[%s13185_s8 + $0x49c] ss:$48 sps:$4 sm:$0xff]  }
 0x171   : > { %3062 = vmatpush1.bf16.msra.mxu0 %v11574_v1  ;;  %v11619_v1 = vld [vmem:[%s13185_s8 + $0x910] ss:$48 sps:$4 sm:$0xff]  }
 0x172   : > { %3063 = vmatprep.subr.bf16.mxu0 %v11579_v2  ;;  %v11624_v2 = vld [vmem:[%s13185_s8 + $0x974] ss:$48 sps:$4 sm:$0xff]   ;;  %3029 = vmatpush1.bf16.msra.mxu1 %v11790_v63  ;;  %v11871_v63 = vld [vmem:[%s13185_s8 + $0x498] ss:$48 sps:$4 sm:$0xff]  }
 0x173   : > { %3030 = vmatprep.subr.bf16.mxu1 %v11798_v0  ;;  %v11876_v0 = vld [vmem:[%s13185_s8 + $0x4fc] ss:$48 sps:$4 sm:$0xff]  }
 0x175   : > { %3064 = vmatpush1.bf16.msra.mxu0 %v11577_v5  ;;  %v11622_v5 = vld [vmem:[%s13185_s8 + $0x970] ss:$48 sps:$4 sm:$0xff]  }
 0x176   : > { %3065 = vmatprep.subr.bf16.mxu0 %v11582_v6  ;;  %v11629_v6 = vld [vmem:[%s13185_s8 + $0x9d4] ss:$48 sps:$4 sm:$0xff]   ;;  %3031 = vmatpush1.bf16.msra.mxu1 %v11796_v3  ;;  %v11874_v3 = vld [vmem:[%s13185_s8 + $0x4f8] ss:$48 sps:$4 sm:$0xff]  }
 0x177   : > { %3032 = vmatprep.subr.bf16.mxu1 %v11804_v4  ;;  %v11879_v4 = vld [vmem:[%s13185_s8 + $0x55c] ss:$48 sps:$4 sm:$0xff]  }
 0x179   : > { %3066 = vmatpush1.bf16.msra.mxu0 %v11580_v9  ;;  %v11627_v9 = vld [vmem:[%s13185_s8 + $0x9d0] ss:$48 sps:$4 sm:$0xff]  }
 0x17a   : > { %3067 = vmatprep.subr.bf16.mxu0 %v11585_v10  ;;  %v11635_v10 = vld [vmem:[%s13185_s8 + $0xa34] ss:$48 sps:$4 sm:$0xff]   ;;  %3033 = vmatpush1.bf16.msra.mxu1 %v11802_v7  ;;  %v11877_v7 = vld [vmem:[%s13185_s8 + $0x558] ss:$48 sps:$4 sm:$0xff]  }
 0x17b   : > { %3125 = vmatprep.subr.bf16.mxu1 %v11810_v8  ;;  %v11882_v8 = vld [vmem:[%s13185_s8 + $0x5bc] ss:$48 sps:$4 sm:$0xff]  }
 0x17d   : > { %3068 = vmatpush1.bf16.msra.mxu0 %v11583_v13  ;;  %v11633_v13 = vld [vmem:[%s13185_s8 + $0xa30] ss:$48 sps:$4 sm:$0xff]   ;;  %3035 = vmatmul.mubr.bf16.vlgmr.msra.gmra.mrb[0].mxu1 %v13331_v26 }
 0x17e   : > { %3069 = vmatprep.subr.bf16.mxu0 %v11588_v14  ;;  %v11641_v14 = vld [vmem:[%s13185_s8 + $0xa94] ss:$48 sps:$4 sm:$0xff]   ;;  %3126 = vmatpush1.bf16.msra.mxu1 %v11808_v11  ;;  %v11880_v11 = vld [vmem:[%s13185_s8 + $0x5b8] ss:$48 sps:$4 sm:$0xff]  }
 0x17f   : > { %3127 = vmatprep.subr.bf16.mxu1 %v11816_v12  ;;  %3157 = vmatprep.mubr.bf16.mxu1 %v13253_v18  ;;  %v11885_v12 = vld [vmem:[%s13185_s8 + $0x61c] ss:$48 sps:$4 sm:$0xff]  }
 0x181   : > { %3070 = vmatpush1.bf16.msra.mxu0 %v11586_v17  ;;  %v11639_v17 = vld [vmem:[%s13185_s8 + $0xa90] ss:$48 sps:$4 sm:$0xff]  }
 0x182   : > { %3071 = vmatprep.subr.bf16.mxu0 %v11591_v19  ;;  %v11647_v19 = vld [vmem:[%s13185_s8 + $0xaf4] ss:$48 sps:$4 sm:$0xff]   ;;  %3128 = vmatpush1.bf16.msra.mxu1 %v11814_v15  ;;  %v11883_v15 = vld [vmem:[%s13185_s8 + $0x618] ss:$48 sps:$4 sm:$0xff]  }
 0x183   : > { %3129 = vmatprep.subr.bf16.mxu1 %v11822_v16  ;;  %v11888_v16 = vld [vmem:[%s13185_s8 + $0x67c] ss:$48 sps:$4 sm:$0xff]  }
 0x185   : > { %3072 = vmatpush1.bf16.msra.mxu0 %v11589_v22  ;;  %v11645_v22 = vld [vmem:[%s13185_s8 + $0xaf0] ss:$48 sps:$4 sm:$0xff]  }
 0x186   : > { %3073 = vmatprep.subr.bf16.mxu0 %v11594_v23  ;;  %v11653_v23 = vld [vmem:[%s13185_s8 + $0xb54] ss:$48 sps:$4 sm:$0xff]   ;;  %3130 = vmatpush1.bf16.msra.mxu1 %v11820_v20  ;;  %v11886_v20 = vld [vmem:[%s13185_s8 + $0x678] ss:$48 sps:$4 sm:$0xff]  }
 0x187   : > { %3131 = vmatprep.subr.bf16.mxu1 %v11828_v21  ;;  %v11891_v21 = vld [vmem:[%s13185_s8 + $0x6dc] ss:$48 sps:$4 sm:$0xff]  }
 0x189   : > { %3074 = vmatpush1.bf16.msra.mxu0 %v11592_v27  ;;  %v11651_v27 = vld [vmem:[%s13185_s8 + $0xb50] ss:$48 sps:$4 sm:$0xff]  }
 0x18a   : > { %3084 = vmatprep.subr.bf16.mxu0 %v11597_v28  ;;  %v11659_v28 = vld [vmem:[%s13185_s8 + $0xbb4] ss:$48 sps:$4 sm:$0xff]   ;;  %3132 = vmatpush1.bf16.msra.mxu1 %v11826_v24  ;;  %v11889_v24 = vld [vmem:[%s13185_s8 + $0x6d8] ss:$48 sps:$4 sm:$0xff]  }
 0x18b   : > { %3133 = vmatprep.subr.bf16.mxu1 %v11834_v25  ;;  %v11894_v25 = vld [vmem:[%s13185_s8 + $0x73c] ss:$48 sps:$4 sm:$0xff]  }
 0x18c   : > { %3076 = vmatmul.mubr.bf16.vlgmr.msra.gmra.mrb[4].mxu0 %v13279_v41 }
 0x18d   : > { %3085 = vmatpush1.bf16.msra.mxu0 %v11595_v31  ;;  %3116 = vmatprep.mubr.bf16.mxu0 %v13282_v43  ;;  %v11657_v31 = vld [vmem:[%s13185_s8 + $0xbb0] ss:$48 sps:$4 sm:$0xff]  }
 0x18e   : > { %3086 = vmatprep.subr.bf16.mxu0 %v11600_v32  ;;  %v11675_v32 = vld [vmem:[%s13185_s8 + $0x24] ss:$48 sps:$4 sm:$0xff]   ;;  %3134 = vmatpush1.bf16.msra.mxu1 %v11832_v29  ;;  %v11892_v29 = vld [vmem:[%s13185_s8 + $0x738] ss:$48 sps:$4 sm:$0xff]  }
 0x18f   : > { %3135 = vmatprep.subr.bf16.mxu1 %v11840_v30  ;;  %v11897_v30 = vld [vmem:[%s13185_s8 + $0x79c] ss:$48 sps:$4 sm:$0xff]  }
 0x191   : > { %3087 = vmatpush1.bf16.msra.mxu0 %v11598_v35  ;;  %v11673_v35 = vld [vmem:[%s13185_s8 + $0x20] ss:$48 sps:$4 sm:$0xff]  }
 0x192   : > { %3088 = vmatprep.subr.bf16.mxu0 %v11603_v36  ;;  %v11681_v36 = vld [vmem:[%s13185_s8 + $0x84] ss:$48 sps:$4 sm:$0xff]   ;;  %3136 = vmatpush1.bf16.msra.mxu1 %v11838_v33  ;;  %v11895_v33 = vld [vmem:[%s13185_s8 + $0x798] ss:$48 sps:$4 sm:$0xff]  }
 0x193   : > { %3137 = vmatprep.subr.bf16.mxu1 %v11846_v34  ;;  %v11900_v34 = vld [vmem:[%s13185_s8 + $0x7fc] ss:$48 sps:$4 sm:$0xff]  }
 0x195   : > { %3089 = vmatpush1.bf16.msra.mxu0 %v11601_v39  ;;  %v11679_v39 = vld [vmem:[%s13185_s8 + $0x80] ss:$48 sps:$4 sm:$0xff]  }
 0x196   : > { %3090 = vmatprep.subr.bf16.mxu0 %v11606_v40  ;;  %v11687_v40 = vld [vmem:[%s13185_s8 + $0xe4] ss:$48 sps:$4 sm:$0xff]   ;;  %3138 = vmatpush1.bf16.msra.mxu1 %v11844_v37  ;;  %v11898_v37 = vld [vmem:[%s13185_s8 + $0x7f8] ss:$48 sps:$4 sm:$0xff]  }
 0x197   : > { %3139 = vmatprep.subr.bf16.mxu1 %v11852_v38  ;;  %v11903_v38 = vld [vmem:[%s13185_s8 + $0x85c] ss:$48 sps:$4 sm:$0xff]  }
 0x199   : > { %3091 = vmatpush1.bf16.msra.mxu0 %v11604_v45  ;;  %v11685_v45 = vld [vmem:[%s13185_s8 + $0xe0] ss:$48 sps:$4 sm:$0xff]  }
 0x19a   : > { %3092 = vmatprep.subr.bf16.mxu0 %v11609_v46  ;;  %v11693_v46 = vld [vmem:[%s13185_s8 + $0x144] ss:$48 sps:$4 sm:$0xff]   ;;  %3140 = vmatpush1.bf16.msra.mxu1 %v11850_v42  ;;  %v11901_v42 = vld [vmem:[%s13185_s8 + $0x858] ss:$48 sps:$4 sm:$0xff]  }
 0x19b   : > { %3141 = vmatprep.subr.bf16.mxu1 %v11858_v44  ;;  %v11906_v44 = vld [vmem:[%s13185_s8 + $0x8bc] ss:$48 sps:$4 sm:$0xff]  }
 0x19d   : > { %3093 = vmatpush1.bf16.msra.mxu0 %v11607_v49  ;;  %v11691_v49 = vld [vmem:[%s13185_s8 + $0x140] ss:$48 sps:$4 sm:$0xff]  }
 0x19e   : > { %3094 = vmatprep.subr.bf16.mxu0 %v11612_v50  ;;  %v11699_v50 = vld [vmem:[%s13185_s8 + $0x1a4] ss:$48 sps:$4 sm:$0xff]   ;;  %3142 = vmatpush1.bf16.msra.mxu1 %v11856_v47  ;;  %v11904_v47 = vld [vmem:[%s13185_s8 + $0x8b8] ss:$48 sps:$4 sm:$0xff]  }
 0x19f   : > { %3143 = vmatprep.subr.bf16.mxu1 %v11864_v48  ;;  %v11909_v48 = vld [vmem:[%s13185_s8 + $0x91c] ss:$48 sps:$4 sm:$0xff]  }
 0x1a1   : > { %3095 = vmatpush1.bf16.msra.mxu0 %v11610_v52  ;;  %v11697_v52 = vld [vmem:[%s13185_s8 + $0x1a0] ss:$48 sps:$4 sm:$0xff]  }
 0x1a2   : > { %3096 = vmatprep.subr.bf16.mxu0 %v11615_v53  ;;  %v11867_v53 = vld [vmem:[%s13185_s8 + $0x3dc] ss:$48 sps:$4 sm:$0xff]   ;;  %3144 = vmatpush1.bf16.msra.mxu1 %v11862_v51  ;;  %v11907_v51 = vld [vmem:[%s13185_s8 + $0x918] ss:$48 sps:$4 sm:$0xff]  }
 0x1a3   : > { %3145 = vmatprep.subr.bf16.mxu1 %v11867_v53  ;;  %v11787_v53 = vld [vmem:[%s13185_s8 + $0x740] ss:$48 sps:$4 sm:$0xff]  }
 0x1a5   : > { %3097 = vmatpush1.bf16.msra.mxu0 %v11613_v56  ;;  %v11870_v56 = vld [vmem:[%s13185_s8 + $0x43c] ss:$48 sps:$4 sm:$0xff]  }
 0x1a6   : > { %3098 = vmatprep.subr.bf16.mxu0 %v11618_v57  ;;  %v11703_v57 = vld [vmem:[%s13185_s8 + $0x200] ss:$48 sps:$4 sm:$0xff]   ;;  %3146 = vmatpush1.bf16.msra.mxu1 %v11865_v55  ;;  %v11910_v55 = vld [vmem:[%s13185_s8 + $0x978] ss:$48 sps:$4 sm:$0xff]  }
 0x1a7   : > { %3147 = vmatprep.subr.bf16.mxu1 %v11870_v56  ;;  %v11915_v56 = vld [vmem:[%s13185_s8 + $0x9dc] ss:$48 sps:$4 sm:$0xff]  }
 0x1a9   : > { %3099 = vmatpush1.bf16.msra.mxu0 %v11616_v61  ;;  %v11709_v61 = vld [vmem:[%s13185_s8 + $0x260] ss:$48 sps:$4 sm:$0xff]  }
 0x1aa   : > { %3100 = vmatprep.subr.bf16.mxu0 %v11621_v62  ;;  %v11717_v62 = vld [vmem:[%s13185_s8 + $0x2c4] ss:$48 sps:$4 sm:$0xff]   ;;  %3148 = vmatpush1.bf16.msra.mxu1 %v11868_v59  ;;  %v11913_v59 = vld [vmem:[%s13185_s8 + $0x9d8] ss:$48 sps:$4 sm:$0xff]  }
 0x1ab   : > { %3149 = vmatprep.subr.bf16.mxu1 %v11873_v60  ;;  %v11799_v60 = vld [vmem:[%s13185_s8 + $0x800] ss:$48 sps:$4 sm:$0xff]  }
 0x1ad   : > { %3101 = vmatpush1.bf16.msra.mxu0 %v11619_v1  ;;  %v11715_v1 = vld [vmem:[%s13185_s8 + $0x2c0] ss:$48 sps:$4 sm:$0xff]  }
 0x1ae   : > { %3102 = vmatprep.subr.bf16.mxu0 %v11624_v2  ;;  %v11723_v2 = vld [vmem:[%s13185_s8 + $0x324] ss:$48 sps:$4 sm:$0xff]   ;;  %3150 = vmatpush1.bf16.msra.mxu1 %v11871_v63 }
 0x1af   : > { %3151 = vmatprep.subr.bf16.mxu1 %v11876_v0  ;;  %v11805_v0 = vld [vmem:[%s13185_s8 + $0x860] ss:$48 sps:$4 sm:$0xff]  }
 0x1b1   : > { %3103 = vmatpush1.bf16.msra.mxu0 %v11622_v5  ;;  %v11721_v5 = vld [vmem:[%s13185_s8 + $0x320] ss:$48 sps:$4 sm:$0xff]  }
 0x1b2   : > { %3104 = vmatprep.subr.bf16.mxu0 %v11629_v6  ;;  %v11729_v6 = vld [vmem:[%s13185_s8 + $0x384] ss:$48 sps:$4 sm:$0xff]   ;;  %3152 = vmatpush1.bf16.msra.mxu1 %v11874_v3 }
 0x1b3   : > { %3153 = vmatprep.subr.bf16.mxu1 %v11879_v4  ;;  %v11813_v3 = vld [vmem:[%s13185_s8 + $0x8c4] ss:$48 sps:$4 sm:$0xff]  }
 0x1b5   : > { %3105 = vmatpush1.bf16.msra.mxu0 %v11627_v9  ;;  %v11727_v9 = vld [vmem:[%s13185_s8 + $0x380] ss:$48 sps:$4 sm:$0xff]  }
 0x1b6   : > { %3106 = vmatprep.subr.bf16.mxu0 %v11635_v10  ;;  %v11735_v10 = vld [vmem:[%s13185_s8 + $0x3e4] ss:$48 sps:$4 sm:$0xff]   ;;  %3154 = vmatpush1.bf16.msra.mxu1 %v11877_v7  ;;  %v11811_v7 = vld [vmem:[%s13185_s8 + $0x8c0] ss:$48 sps:$4 sm:$0xff]  }
 0x1b7   : > { %3155 = vmatprep.subr.bf16.mxu1 %v11882_v8  ;;  %v11919_v8 = vld [vmem:[%s13185_s8 + $0xa98] ss:$48 sps:$4 sm:$0xff]  }
 0x1b9   : > { %3107 = vmatpush1.bf16.msra.mxu0 %v11633_v13  ;;  %v11733_v13 = vld [vmem:[%s13185_s8 + $0x3e0] ss:$48 sps:$4 sm:$0xff]  }
 0x1ba   : > { %3108 = vmatprep.subr.bf16.mxu0 %v11641_v14  ;;  %v11741_v14 = vld [vmem:[%s13185_s8 + $0x444] ss:$48 sps:$4 sm:$0xff]   ;;  %3156 = vmatpush1.bf16.msra.mxu1 %v11880_v11  ;;  %v11924_v11 = vld [vmem:[%s13185_s8 + $0xafc] ss:$48 sps:$4 sm:$0xff]  }
 0x1bb   : > { %3166 = vmatprep.subr.bf16.mxu1 %v11885_v12  ;;  %v11817_v12 = vld [vmem:[%s13185_s8 + $0x920] ss:$48 sps:$4 sm:$0xff]  }
 0x1bd   : > { %3109 = vmatpush1.bf16.msra.mxu0 %v11639_v17  ;;  %v11739_v17 = vld [vmem:[%s13185_s8 + $0x440] ss:$48 sps:$4 sm:$0xff]   ;;  %3158 = vmatmul.mubr.bf16.vlgmr.msra.gmra.mrb[4].mxu1 %v13279_v41 }
 0x1be   : > { %3110 = vmatprep.subr.bf16.mxu0 %v11647_v19  ;;  %v11747_v19 = vld [vmem:[%s13185_s8 + $0x4a4] ss:$48 sps:$4 sm:$0xff]   ;;  %3167 = vmatpush1.bf16.msra.mxu1 %v11883_v15  ;;  %v11927_v15 = vld [vmem:[%s13185_s8 + $0xb5c] ss:$48 sps:$4 sm:$0xff]  }
 0x1bf   : > { %3168 = vmatprep.subr.bf16.mxu1 %v11888_v16  ;;  %3198 = vmatprep.mubr.bf16.mxu1 %v13282_v43  ;;  %v11930_v16 = vld [vmem:[%s13185_s8 + $0xbbc] ss:$48 sps:$4 sm:$0xff]  }
 0x1c1   : > { %3111 = vmatpush1.bf16.msra.mxu0 %v11645_v22  ;;  %v11745_v22 = vld [vmem:[%s13185_s8 + $0x4a0] ss:$48 sps:$4 sm:$0xff]  }
 0x1c2   : > { %3112 = vmatprep.subr.bf16.mxu0 %v11653_v23  ;;  %v11753_v23 = vld [vmem:[%s13185_s8 + $0x504] ss:$48 sps:$4 sm:$0xff]   ;;  %3169 = vmatpush1.bf16.msra.mxu1 %v11886_v20  ;;  %v11928_v20 = vld [vmem:[%s13185_s8 + $0xbb8] ss:$48 sps:$4 sm:$0xff]  }
 0x1c3   : > { %3170 = vmatprep.subr.bf16.mxu1 %v11891_v21  ;;  %v11933_v21 = vld [vmem:[%s13185_s8 + $0x2c] ss:$48 sps:$4 sm:$0xff]  }
 0x1c5   : > { %3113 = vmatpush1.bf16.msra.mxu0 %v11651_v27  ;;  %v11751_v27 = vld [vmem:[%s13185_s8 + $0x500] ss:$48 sps:$4 sm:$0xff]  }
 0x1c6   : > { %3114 = vmatprep.subr.bf16.mxu0 %v11659_v28  ;;  %v11759_v28 = vld [vmem:[%s13185_s8 + $0x564] ss:$48 sps:$4 sm:$0xff]   ;;  %3171 = vmatpush1.bf16.msra.mxu1 %v11889_v24  ;;  %v11931_v24 = vld [vmem:[%s13185_s8 + $0x28] ss:$48 sps:$4 sm:$0xff]  }
 0x1c7   : > { %3172 = vmatprep.subr.bf16.mxu1 %v11894_v25  ;;  %v11936_v25 = vld [vmem:[%s13185_s8 + $0x8c] ss:$48 sps:$4 sm:$0xff]  }
 0x1c9   : > { %3115 = vmatpush1.bf16.msra.mxu0 %v11657_v31  ;;  %v11757_v31 = vld [vmem:[%s13185_s8 + $0x560] ss:$48 sps:$4 sm:$0xff]  }
 0x1ca   : > { %3207 = vmatprep.subr.bf16.mxu0 %v11675_v32  ;;  %v11765_v32 = vld [vmem:[%s13185_s8 + $0x5c4] ss:$48 sps:$4 sm:$0xff]   ;;  %3173 = vmatpush1.bf16.msra.mxu1 %v11892_v29  ;;  %v11934_v29 = vld [vmem:[%s13185_s8 + $0x88] ss:$48 sps:$4 sm:$0xff]  }
 0x1cb   : > { %3174 = vmatprep.subr.bf16.mxu1 %v11897_v30  ;;  %v11939_v30 = vld [vmem:[%s13185_s8 + $0xec] ss:$48 sps:$4 sm:$0xff]  }
 0x1cc   : > { %3117 = vmatmul.mubr.bf16.vlgmr.msra.gmra.mrb[4].mxu0 %v13331_v26 }
 0x1cd   : > { %3208 = vmatpush1.bf16.msra.mxu0 %v11673_v35  ;;  %3239 = vmatprep.mubr.bf16.mxu0 %v13253_v18  ;;  %v11763_v35 = vld [vmem:[%s13185_s8 + $0x5c0] ss:$48 sps:$4 sm:$0xff]  }
 0x1ce   : > { %3209 = vmatprep.subr.bf16.mxu0 %v11681_v36  ;;  %v11771_v36 = vld [vmem:[%s13185_s8 + $0x624] ss:$48 sps:$4 sm:$0xff]   ;;  %3175 = vmatpush1.bf16.msra.mxu1 %v11895_v33  ;;  %v11937_v33 = vld [vmem:[%s13185_s8 + $0xe8] ss:$48 sps:$4 sm:$0xff]  }
 0x1cf   : > { %3176 = vmatprep.subr.bf16.mxu1 %v11900_v34  ;;  %v11847_v34 = vld [vmem:[%s13185_s8 + $0xb00] ss:$48 sps:$4 sm:$0xff]  }
 0x1d1   : > { %3210 = vmatpush1.bf16.msra.mxu0 %v11679_v39  ;;  %v11769_v39 = vld [vmem:[%s13185_s8 + $0x620] ss:$48 sps:$4 sm:$0xff]  }
 0x1d2   : > { %3211 = vmatprep.subr.bf16.mxu0 %v11687_v40  ;;  %v11777_v40 = vld [vmem:[%s13185_s8 + $0x684] ss:$48 sps:$4 sm:$0xff]   ;;  %3177 = vmatpush1.bf16.msra.mxu1 %v11898_v37  ;;  %v11940_v37 = vld [vmem:[%s13185_s8 + $0x148] ss:$48 sps:$4 sm:$0xff]  }
 0x1d3   : > { %3178 = vmatprep.subr.bf16.mxu1 %v11903_v38  ;;  %v11945_v38 = vld [vmem:[%s13185_s8 + $0x1ac] ss:$48 sps:$4 sm:$0xff]  }
 0x1d5   : > { %3212 = vmatpush1.bf16.msra.mxu0 %v11685_v45  ;;  %v11775_v45 = vld [vmem:[%s13185_s8 + $0x680] ss:$48 sps:$4 sm:$0xff]  }
 0x1d6   : > { %3213 = vmatprep.subr.bf16.mxu0 %v11693_v46  ;;  %v11783_v46 = vld [vmem:[%s13185_s8 + $0x6e4] ss:$48 sps:$4 sm:$0xff]   ;;  %3179 = vmatpush1.bf16.msra.mxu1 %v11901_v42  ;;  %v11948_v42 = vld [vmem:[%s13185_s8 + $0x20c] ss:$48 sps:$4 sm:$0xff]  }
 0x1d7   : > { %3180 = vmatprep.subr.bf16.mxu1 %v11906_v44  ;;  %v11859_v44 = vld [vmem:[%s13185_s8 + $0xbc0] ss:$48 sps:$4 sm:$0xff]  }
 0x1d9   : > { %3214 = vmatpush1.bf16.msra.mxu0 %v11691_v49  ;;  %v11781_v49 = vld [vmem:[%s13185_s8 + $0x6e0] ss:$48 sps:$4 sm:$0xff]  }
 0x1da   : > { %3215 = vmatprep.subr.bf16.mxu0 %v11699_v50  ;;  %v11789_v50 = vld [vmem:[%s13185_s8 + $0x744] ss:$48 sps:$4 sm:$0xff]   ;;  %3181 = vmatpush1.bf16.msra.mxu1 %v11904_v47  ;;  %v12881_v47 = vmov 0.0  }
 0x1db   : > { %3182 = vmatprep.subr.bf16.mxu1 %v11909_v48  ;;  %v11949_v48 = vld [vmem:[%s13185_s8 + $0x268] ss:$48 sps:$4 sm:$0xff]  }
 0x1dd   : > { %3216 = vmatpush1.bf16.msra.mxu0 %v11697_v52  ;;  %v11912_v52 = vld [vmem:[%s13185_s8 + $0x97c] ss:$48 sps:$4 sm:$0xff]  }
 0x1de   : > { %3217 = vmatprep.subr.bf16.mxu0 %v11705_v54  ;;  %v11795_v54 = vld [vmem:[%s13185_s8 + $0x7a4] ss:$48 sps:$4 sm:$0xff]   ;;  %3183 = vmatpush1.bf16.msra.mxu1 %v11907_v51  ;;  %v11957_v51 = vld [vmem:[%s13185_s8 + $0x32c] ss:$48 sps:$4 sm:$0xff]  }
 0x1df   : > { %3184 = vmatprep.subr.bf16.mxu1 %v11912_v52  ;;  %v11955_v52 = vld [vmem:[%s13185_s8 + $0x328] ss:$48 sps:$4 sm:$0xff]  }
 0x1e1   : > { %3218 = vmatpush1.bf16.msra.mxu0 %v11703_v57  ;;  %v11793_v57 = vld [vmem:[%s13185_s8 + $0x7a0] ss:$48 sps:$4 sm:$0xff]  }
 0x1e2   : > { %3219 = vmatprep.subr.bf16.mxu0 %v11711_v58  ;;  %v11801_v58 = vld [vmem:[%s13185_s8 + $0x804] ss:$48 sps:$4 sm:$0xff]   ;;  %3185 = vmatpush1.bf16.msra.mxu1 %v11910_v55  ;;  %v11963_v55 = vld [vmem:[%s13185_s8 + $0x3ec] ss:$48 sps:$4 sm:$0xff]  }
 0x1e3   : > { %3186 = vmatprep.subr.bf16.mxu1 %v11915_v56  ;;  %v11961_v56 = vld [vmem:[%s13185_s8 + $0x3e8] ss:$48 sps:$4 sm:$0xff]  }
 0x1e5   : > { %3220 = vmatpush1.bf16.msra.mxu0 %v11709_v61  ;;  %v11807_v61 = vld [vmem:[%s13185_s8 + $0x864] ss:$48 sps:$4 sm:$0xff]  }
 0x1e6   : > { %3221 = vmatprep.subr.bf16.mxu0 %v11717_v62  ;;  %3187 = vmatpush1.bf16.msra.mxu1 %v11913_v59  ;;  %v11918_v62 = vld [vmem:[%s13185_s8 + $0xa3c] ss:$48 sps:$4 sm:$0xff]  }
 0x1e7   : > { %3188 = vmatprep.subr.bf16.mxu1 %v11918_v62  ;;  %v11969_v59 = vld [vmem:[%s13185_s8 + $0x4ac] ss:$48 sps:$4 sm:$0xff]   ;;  %v11970_v62 = vld [vmem:[%s13185_s8 + $0x508] ss:$48 sps:$4 sm:$0xff]  }
 0x1e9   : > { %3222 = vmatpush1.bf16.msra.mxu0 %v11715_v1  ;;  %v11916_v1 = vld [vmem:[%s13185_s8 + $0xa38] ss:$48 sps:$4 sm:$0xff]  }
 0x1ea   : > { %3223 = vmatprep.subr.bf16.mxu0 %v11723_v2  ;;  %3189 = vmatpush1.bf16.msra.mxu1 %v11916_v1  ;;  %v11973_v1 = vld [vmem:[%s13185_s8 + $0x568] ss:$48 sps:$4 sm:$0xff]  }
 0x1ed   : > { %3224 = vmatpush1.bf16.msra.mxu0 %v11721_v5 }
 0x1ee   : > { %3225 = vmatprep.subr.bf16.mxu0 %v11729_v6  ;;  %v11921_v6 = vld [vmem:[%s13185_s8 + $0xa9c] ss:$48 sps:$4 sm:$0xff]  }
 0x1ef   : > { %3190 = vmatprep.subr.bf16.mxu1 %v11921_v6  ;;  %v11979_v6 = vld [vmem:[%s13185_s8 + $0x628] ss:$48 sps:$4 sm:$0xff]  }
 0x1f0   : > { %3191 = vmatpush1.bf16.msra.mxu1 %v11919_v8  ;;  %v11982_v8 = vld [vmem:[%s13185_s8 + $0x688] ss:$48 sps:$4 sm:$0xff]  }
 0x1f1   : > { %3226 = vmatpush1.bf16.msra.mxu0 %v11727_v9  ;;  %v11819_v9 = vld [vmem:[%s13185_s8 + $0x924] ss:$48 sps:$4 sm:$0xff]   ;;  %3192 = vmatprep.subr.bf16.mxu1 %v11924_v11  ;;  %v11990_v11 = vld [vmem:[%s13185_s8 + $0x74c] ss:$48 sps:$4 sm:$0xff]  }
 0x1f2   : > { %3227 = vmatprep.subr.bf16.mxu0 %v11735_v10  ;;  %v11922_v10 = vld [vmem:[%s13185_s8 + $0xaf8] ss:$48 sps:$4 sm:$0xff]  }
 0x1f4   : > { %3193 = vmatpush1.bf16.msra.mxu1 %v11922_v10  ;;  %v11985_v10 = vld [vmem:[%s13185_s8 + $0x6e8] ss:$48 sps:$4 sm:$0xff]  }
 0x1f5   : > { %3228 = vmatpush1.bf16.msra.mxu0 %v11733_v13  ;;  %v11825_v13 = vld [vmem:[%s13185_s8 + $0x984] ss:$48 sps:$4 sm:$0xff]   ;;  %3194 = vmatprep.subr.bf16.mxu1 %v11927_v15  ;;  %v11999_v15 = vld [vmem:[%s13185_s8 + $0x86c] ss:$48 sps:$4 sm:$0xff]  }
 0x1f6   : > { %3229 = vmatprep.subr.bf16.mxu0 %v11741_v14  ;;  %v11925_v14 = vld [vmem:[%s13185_s8 + $0xb58] ss:$48 sps:$4 sm:$0xff]  }
 0x1f8   : > { %3195 = vmatpush1.bf16.msra.mxu1 %v11925_v14  ;;  %v11994_v14 = vld [vmem:[%s13185_s8 + $0x808] ss:$48 sps:$4 sm:$0xff]  }
 0x1f9   : > { %3230 = vmatpush1.bf16.msra.mxu0 %v11739_v17  ;;  %v11823_v17 = vld [vmem:[%s13185_s8 + $0x980] ss:$48 sps:$4 sm:$0xff]   ;;  %3196 = vmatprep.subr.bf16.mxu1 %v11930_v16  ;;  %v11997_v16 = vld [vmem:[%s13185_s8 + $0x868] ss:$48 sps:$4 sm:$0xff]  }
 0x1fa   : > { %3231 = vmatprep.subr.bf16.mxu0 %v11747_v19  ;;  %v11831_v19 = vld [vmem:[%s13185_s8 + $0x9e4] ss:$48 sps:$4 sm:$0xff]  }
 0x1fc   : > { %3197 = vmatpush1.bf16.msra.mxu1 %v11928_v20  ;;  %v12005_v20 = vld [vmem:[%s13185_s8 + $0x92c] ss:$48 sps:$4 sm:$0xff]  }
 0x1fd   : > { %3232 = vmatpush1.bf16.msra.mxu0 %v11745_v22  ;;  %v11829_v22 = vld [vmem:[%s13185_s8 + $0x9e0] ss:$48 sps:$4 sm:$0xff]   ;;  %3289 = vmatprep.subr.bf16.mxu1 %v11933_v21  ;;  %v12003_v21 = vld [vmem:[%s13185_s8 + $0x928] ss:$48 sps:$4 sm:$0xff]  }
 0x1fe   : > { %3233 = vmatprep.subr.bf16.mxu0 %v11753_v23  ;;  %v11837_v23 = vld [vmem:[%s13185_s8 + $0xa44] ss:$48 sps:$4 sm:$0xff]  }
 0x1ff   : > { %3199 = vmatmul.mubr.bf16.vlgmr.msra.gmra.mrb[4].mxu1 %v13331_v26 }
 0x200   : > { %3290 = vmatpush1.bf16.msra.mxu1 %v11931_v24  ;;  %3321 = vmatprep.mubr.bf16.mxu1 %v13253_v18  ;;  %v11853_v18 = vld [vmem:[%s13185_s8 + $0xb60] ss:$48 sps:$4 sm:$0xff]   ;;  %v12011_v24 = vld [vmem:[%s13185_s8 + $0x9ec] ss:$48 sps:$4 sm:$0xff]  }
 0x201   : > { %3234 = vmatpush1.bf16.msra.mxu0 %v11751_v27  ;;  %v11835_v27 = vld [vmem:[%s13185_s8 + $0xa40] ss:$48 sps:$4 sm:$0xff]   ;;  %3291 = vmatprep.subr.bf16.mxu1 %v11936_v25  ;;  %v12009_v25 = vld [vmem:[%s13185_s8 + $0x9e8] ss:$48 sps:$4 sm:$0xff]  }
 0x202   : > { %3235 = vmatprep.subr.bf16.mxu0 %v11759_v28  ;;  %v11843_v28 = vld [vmem:[%s13185_s8 + $0xaa4] ss:$48 sps:$4 sm:$0xff]  }
 0x204   : > { %3292 = vmatpush1.bf16.msra.mxu1 %v11934_v29 }
 0x205   : > { %3236 = vmatpush1.bf16.msra.mxu0 %v11757_v31  ;;  %v11841_v31 = vld [vmem:[%s13185_s8 + $0xaa0] ss:$48 sps:$4 sm:$0xff]   ;;  %3293 = vmatprep.subr.bf16.mxu1 %v11939_v30  ;;  %v12017_v30 = vld [vmem:[%s13185_s8 + $0xaac] ss:$48 sps:$4 sm:$0xff]  }
 0x206   : > { %3237 = vmatprep.subr.bf16.mxu0 %v11765_v32  ;;  %v11849_v32 = vld [vmem:[%s13185_s8 + $0xb04] ss:$48 sps:$4 sm:$0xff]  }
 0x208   : > { %3294 = vmatpush1.bf16.msra.mxu1 %v11937_v33 }
 0x209   : > { %3238 = vmatpush1.bf16.msra.mxu0 %v11763_v35  ;;  %v11942_v35 = vld [vmem:[%s13185_s8 + $0x14c] ss:$48 sps:$4 sm:$0xff]  }
 0x20a   : > { %3248 = vmatprep.subr.bf16.mxu0 %v11771_v36  ;;  %v11855_v36 = vld [vmem:[%s13185_s8 + $0xb64] ss:$48 sps:$4 sm:$0xff]   ;;  %3295 = vmatprep.subr.bf16.mxu1 %v11942_v35 }
 0x20c   : > { %3240 = vmatmul.mubr.bf16.vlgmr.msra.gmra.mrb[8].mxu0 %v13279_v41  ;;  %3296 = vmatpush1.bf16.msra.mxu1 %v11940_v37  ;;  %v12020_v37 = vld [vmem:[%s13185_s8 + $0xb0c] ss:$48 sps:$4 sm:$0xff]  }
 0x20d   : > { %3249 = vmatpush1.bf16.msra.mxu0 %v11769_v39  ;;  %3280 = vmatprep.mubr.bf16.mxu0 %v13282_v43  ;;  %v11861_v39 = vld [vmem:[%s13185_s8 + $0xbc4] ss:$48 sps:$4 sm:$0xff]  }
 0x20e   : > { %3250 = vmatprep.subr.bf16.mxu0 %v11777_v40  ;;  %v11943_v40 = vld [vmem:[%s13185_s8 + $0x1a8] ss:$48 sps:$4 sm:$0xff]   ;;  %3297 = vmatprep.subr.bf16.mxu1 %v11945_v38 }
 0x210   : > { %3298 = vmatpush1.bf16.msra.mxu1 %v11943_v40  ;;  %v12021_v40 = vld [vmem:[%s13185_s8 + $0xb68] ss:$48 sps:$4 sm:$0xff]  }
 0x211   : > { %3251 = vmatpush1.bf16.msra.mxu0 %v11775_v45  ;;  %v11946_v45 = vld [vmem:[%s13185_s8 + $0x208] ss:$48 sps:$4 sm:$0xff]   ;;  %3299 = vmatprep.subr.bf16.mxu1 %v11948_v42  ;;  %v12026_v42 = vld [vmem:[%s13185_s8 + $0xbcc] ss:$48 sps:$4 sm:$0xff]  }
 0x212   : > { %3252 = vmatprep.subr.bf16.mxu0 %v11783_v46  ;;  %v11951_v46 = vld [vmem:[%s13185_s8 + $0x26c] ss:$48 sps:$4 sm:$0xff]  }
 0x214   : > { %3300 = vmatpush1.bf16.msra.mxu1 %v11946_v45 }
 0x215   : > { %3253 = vmatpush1.bf16.msra.mxu0 %v11781_v49  ;;  %3301 = vmatprep.subr.bf16.mxu1 %v11951_v46  ;;  %v11954_v49 = vld [vmem:[%s13185_s8 + $0x2cc] ss:$48 sps:$4 sm:$0xff]  }
 0x216   : > { %3254 = vmatprep.subr.bf16.mxu0 %v11789_v50  ;;  %v11952_v50 = vld [vmem:[%s13185_s8 + $0x2c8] ss:$48 sps:$4 sm:$0xff]  }
 0x218   : > { %3302 = vmatpush1.bf16.msra.mxu1 %v11949_v48 }
 0x219   : > { %3255 = vmatpush1.bf16.msra.mxu0 %v11787_v53  ;;  %3303 = vmatprep.subr.bf16.mxu1 %v11954_v49  ;;  %v11960_v53 = vld [vmem:[%s13185_s8 + $0x38c] ss:$48 sps:$4 sm:$0xff]  }
 0x21a   : > { %3256 = vmatprep.subr.bf16.mxu0 %v11795_v54  ;;  %v11958_v54 = vld [vmem:[%s13185_s8 + $0x388] ss:$48 sps:$4 sm:$0xff]  }
 0x21c   : > { %3304 = vmatpush1.bf16.msra.mxu1 %v11952_v50 }
 0x21d   : > { %3257 = vmatpush1.bf16.msra.mxu0 %v11793_v57  ;;  %3305 = vmatprep.subr.bf16.mxu1 %v11957_v51  ;;  %v11966_v57 = vld [vmem:[%s13185_s8 + $0x44c] ss:$48 sps:$4 sm:$0xff]  }
 0x21e   : > { %3258 = vmatprep.subr.bf16.mxu0 %v11801_v58  ;;  %v11964_v58 = vld [vmem:[%s13185_s8 + $0x448] ss:$48 sps:$4 sm:$0xff]  }
 0x21f   : > { %v13561_v63 = vpop.f32.mrb[0].mxu0 }
 0x220   : > { %v13565_v2 = vpop.f32.mrb[1].mxu0  ;;  %3306 = vmatpush1.bf16.msra.mxu1 %v11955_v52  ;;  %v3371_v38 = vpack.c.bf16 %v13561_v63, %v13561_v63  ;;  %v13684_v52 = vld [vmem:[%s13217_s0] ss:$0 sm:$0xff] }
 0x221   : > { %v2958_v4 = vpop.f32.mrb[2].mxu0  ;;  %3259 = vmatpush1.bf16.msra.mxu0 %v11799_v60  ;;  %3307 = vmatprep.subr.bf16.mxu1 %v11960_v53  ;;  %v11967_v60 = vld [vmem:[%s13185_s8 + $0x4a8] ss:$48 sps:$4 sm:$0xff]  }
 0x222   : > { %v2959_v5 = vpop.f32.mrb[3].mxu0  ;;  %3260 = vmatprep.subr.bf16.mxu0 %v11807_v61  ;;  %v11972_v61 = vld [vmem:[%s13185_s8 + $0x50c] ss:$48 sps:$4 sm:$0xff]   ;;  %v11976_v4 = vld [vmem:[%s13185_s8 + $0x5c8] ss:$48 sps:$4 sm:$0xff]  }
 0x223   : > { %v11981_v5 = vld [vmem:[%s13185_s8 + $0x62c] ss:$48 sps:$4 sm:$0xff]  }
 0x224   : > { %3308 = vmatpush1.bf16.msra.mxu1 %v11958_v54 }
 0x225   : > { %3261 = vmatpush1.bf16.msra.mxu0 %v11805_v0  ;;  %3309 = vmatprep.subr.bf16.mxu1 %v11963_v55  ;;  %v11975_v0 = vld [vmem:[%s13185_s8 + $0x56c] ss:$48 sps:$4 sm:$0xff]  }
 0x226   : > { %3262 = vmatprep.subr.bf16.mxu0 %v11813_v3  ;;  %v11978_v3 = vld [vmem:[%s13185_s8 + $0x5cc] ss:$48 sps:$4 sm:$0xff]  }
 0x228   : > { %3310 = vmatpush1.bf16.msra.mxu1 %v11961_v56 }
 0x229   : > { %3263 = vmatpush1.bf16.msra.mxu0 %v11811_v7  ;;  %3311 = vmatprep.subr.bf16.mxu1 %v11966_v57  ;;  %v11984_v7 = vld [vmem:[%s13185_s8 + $0x68c] ss:$48 sps:$4 sm:$0xff]  }
 0x22a   : > { %3264 = vmatprep.subr.bf16.mxu0 %v11819_v9  ;;  %v11987_v9 = vld [vmem:[%s13185_s8 + $0x6ec] ss:$48 sps:$4 sm:$0xff]  }
 0x22c   : > { %3312 = vmatpush1.bf16.msra.mxu1 %v11964_v58 }
 0x22d   : > { %3265 = vmatpush1.bf16.msra.mxu0 %v11817_v12  ;;  %3313 = vmatprep.subr.bf16.mxu1 %v11969_v59  ;;  %v11988_v12 = vld [vmem:[%s13185_s8 + $0x748] ss:$48 sps:$4 sm:$0xff]  }
 0x22e   : > { %3266 = vmatprep.subr.bf16.mxu0 %v11825_v13  ;;  %v11991_v13 = vld [vmem:[%s13185_s8 + $0x7a8] ss:$48 sps:$4 sm:$0xff]  }
 0x230   : > { %3314 = vmatpush1.bf16.msra.mxu1 %v11967_v60 }
 0x231   : > { %3267 = vmatpush1.bf16.msra.mxu0 %v11823_v17  ;;  %3315 = vmatprep.subr.bf16.mxu1 %v11972_v61  ;;  %v12002_v17 = vld [vmem:[%s13185_s8 + $0x8cc] ss:$48 sps:$4 sm:$0xff]  }
 0x232   : > { %3268 = vmatprep.subr.bf16.mxu0 %v11831_v19  ;;  %v12000_v19 = vld [vmem:[%s13185_s8 + $0x8c8] ss:$48 sps:$4 sm:$0xff]  }
 0x234   : > { %3316 = vmatpush1.bf16.msra.mxu1 %v11970_v62 }
 0x235   : > { %3269 = vmatpush1.bf16.msra.mxu0 %v11829_v22  ;;  %3317 = vmatprep.subr.bf16.mxu1 %v11975_v0  ;;  %v12008_v22 = vld [vmem:[%s13185_s8 + $0x98c] ss:$48 sps:$4 sm:$0xff]  }
 0x236   : > { %3270 = vmatprep.subr.bf16.mxu0 %v11837_v23  ;;  %v12006_v23 = vld [vmem:[%s13185_s8 + $0x988] ss:$48 sps:$4 sm:$0xff]  }
 0x238   : > { %3318 = vmatpush1.bf16.msra.mxu1 %v11973_v1 }
 0x239   : > { %3271 = vmatpush1.bf16.msra.mxu0 %v11835_v27  ;;  %3319 = vmatprep.subr.bf16.mxu1 %v11978_v3  ;;  %v12014_v27 = vld [vmem:[%s13185_s8 + $0xa4c] ss:$48 sps:$4 sm:$0xff]  }
 0x23a   : > { %3272 = vmatprep.subr.bf16.mxu0 %v11843_v28  ;;  %v12012_v28 = vld [vmem:[%s13185_s8 + $0xa48] ss:$48 sps:$4 sm:$0xff]  }
 0x23c   : > { %3320 = vmatpush1.bf16.msra.mxu1 %v11976_v4 }
 0x23d   : > { %3273 = vmatpush1.bf16.msra.mxu0 %v11841_v31  ;;  %3330 = vmatprep.subr.bf16.mxu1 %v11981_v5 }
 0x23e   : > { %3274 = vmatprep.subr.bf16.mxu0 %v11849_v32 }
 0x23f   : > { %3322 = vmatmul.mubr.bf16.vlgmr.msra.gmra.mrb[8].mxu1 %v13279_v41  ;;  %v11993_v41 = vld [vmem:[%s13185_s8 + $0x7ac] ss:$48 sps:$4 sm:$0xff]  }
 0x240   : > { %3331 = vmatpush1.bf16.msra.mxu1 %v11979_v6  ;;  %3362 = vmatprep.mubr.bf16.mxu1 %v13282_v43  ;;  %v11996_v43 = vld [vmem:[%s13185_s8 + $0x80c] ss:$48 sps:$4 sm:$0xff]   ;;  %v12027_v6 = vld [vmem:[%s13194_s18] ss:$16 sps:$4 sm:$0xff]  }
 0x241   : > { %3275 = vmatpush1.bf16.msra.mxu0 %v11847_v34  ;;  %3332 = vmatprep.subr.bf16.mxu1 %v11984_v7  ;;  %v12029_v7 = vld [vmem:[%s13194_s18 + $0x4] ss:$16 sps:$4 sm:$0xff]  }
 0x242   : > { %3276 = vmatprep.subr.bf16.mxu0 %v11855_v36  ;;  %v12015_v36 = vld [vmem:[%s13185_s8 + $0xaa8] ss:$48 sps:$4 sm:$0xff]  }
 0x244   : > { %3333 = vmatpush1.bf16.msra.mxu1 %v11982_v8 }
 0x245   : > { %3277 = vmatpush1.bf16.msra.mxu0 %v11853_v18  ;;  %3334 = vmatprep.subr.bf16.mxu1 %v11987_v9  ;;  %v12018_v18 = vld [vmem:[%s13185_s8 + $0xb08] ss:$48 sps:$4 sm:$0xff]   ;;  %v12032_v9 = vld [vmem:[%s13194_s18 + $0x24] ss:$16 sps:$4 sm:$0xff]  }
 0x246   : > { %3278 = vmatprep.subr.bf16.mxu0 %v11861_v39  ;;  %v12023_v39 = vld [vmem:[%s13185_s8 + $0xb6c] ss:$48 sps:$4 sm:$0xff]  }
 0x248   : > { %3335 = vmatpush1.bf16.msra.mxu1 %v11985_v10 }
 0x249   : > { %3279 = vmatpush1.bf16.msra.mxu0 %v11859_v44  ;;  %3336 = vmatprep.subr.bf16.mxu1 %v11990_v11  ;;  %v12024_v44 = vld [vmem:[%s13185_s8 + $0xbc8] ss:$48 sps:$4 sm:$0xff]   ;;  %v12035_v11 = vld [vmem:[%s13194_s18 + $0xc] ss:$16 sps:$4 sm:$0xff]  }
 0x24a   : > { %11123 = vmatprep.subr.bf16.mxu0 %v12881_v47 }
 0x24c   : > { %3281 = vmatmul.mubr.bf16.vlgmr.msra.gmra.mrb[8].mxu0 %v13331_v26  ;;  %3337 = vmatpush1.bf16.msra.mxu1 %v11988_v12 }
 0x24d   : > { %11125 = vmatprep.mubr.msk.bf16.mxu0 %vm12882_vm0, %v12881_v47  ;;  %3338 = vmatprep.subr.bf16.mxu1 %v11993_v41  ;;  %v12030_v41 = vld [vmem:[%s13194_s18 + $0x20] ss:$16 sps:$4 sm:$0xff]  }
 0x250   : > { %3339 = vmatpush1.bf16.msra.mxu1 %v11991_v13  ;;  %v13688_v58 = vpop.f32.mrb[0].mxu1 }
 0x251   : > { %3340 = vmatprep.subr.bf16.mxu1 %v11996_v43  ;;  %v13690_v59 = vpop.f32.mrb[1].mxu1  ;;  %v12038_v43 = vld [vmem:[%s13194_s18 + $0x44] ss:$16 sps:$4 sm:$0xff]  }
 0x252   : > { %v3040_v60 = vpop.f32.mrb[2].mxu1 }
 0x253   : > { %v3041_v61 = vpop.f32.mrb[3].mxu1 }
 0x254   : > { %3341 = vmatpush1.bf16.msra.mxu1 %v11994_v14 }
 0x255   : > { %3342 = vmatprep.subr.bf16.mxu1 %v11999_v15 }
 0x258   : > { %3343 = vmatpush1.bf16.msra.mxu1 %v11997_v16 }
 0x259   : > { %3344 = vmatprep.subr.bf16.mxu1 %v12002_v17  ;;  %v12036_v17 = vld [vmem:[%s13194_s18 + $0x40] ss:$16 sps:$4 sm:$0xff]  }
 0x25c   : > { %3345 = vmatpush1.bf16.msra.mxu1 %v12000_v19  ;;  %v12044_v19 = vld [vmem:[%s13194_s18 + $0x64] ss:$16 sps:$4 sm:$0xff]  }
 0x25d   : > { %3346 = vmatprep.subr.bf16.mxu1 %v12005_v20  ;;  %v12042_v20 = vld [vmem:[%s13194_s18 + $0x60] ss:$16 sps:$4 sm:$0xff]  }
 0x260   : > { %3347 = vmatpush1.bf16.msra.mxu1 %v12003_v21 }
 0x261   : > { %3348 = vmatprep.subr.bf16.mxu1 %v12008_v22 }
 0x264   : > { %3349 = vmatpush1.bf16.msra.mxu1 %v12006_v23 }
 0x265   : > { %3350 = vmatprep.subr.bf16.mxu1 %v12011_v24  ;;  %v12033_v24 = vld [vmem:[%s13194_s18 + $0x8] ss:$16 sps:$4 sm:$0xff]  }
 0x268   : > { %3351 = vmatpush1.bf16.msra.mxu1 %v12009_v25 }
 0x269   : > { %3352 = vmatprep.subr.bf16.mxu1 %v12014_v27  ;;  %v12041_v27 = vld [vmem:[%s13194_s18 + $0x2c] ss:$16 sps:$4 sm:$0xff]  }
 0x26c   : > { %3353 = vmatpush1.bf16.msra.mxu1 %v12012_v28  ;;  %v12039_v28 = vld [vmem:[%s13194_s18 + $0x28] ss:$16 sps:$4 sm:$0xff]  }
 0x26d   : > { %3354 = vmatprep.subr.bf16.mxu1 %v12017_v30  ;;  %v12045_v30 = vld [vmem:[%s13194_s18 + $0x48] ss:$16 sps:$4 sm:$0xff]  }
 0x270   : > { %3355 = vmatpush1.bf16.msra.mxu1 %v12015_v36 }
 0x271   : > { %3356 = vmatprep.subr.bf16.mxu1 %v12020_v37 }
 0x274   : > { %3357 = vmatpush1.bf16.msra.mxu1 %v12018_v18 }
 0x275   : > { %3358 = vmatprep.subr.bf16.mxu1 %v12023_v39 }
 0x278   : > { %3359 = vmatpush1.bf16.msra.mxu1 %v12021_v40 }
 0x279   : > { %3360 = vmatprep.subr.bf16.mxu1 %v12026_v42 }
 0x27c   : > { %3361 = vmatpush1.bf16.msra.mxu1 %v12024_v44 }
 0x27d   : > { %11129 = vmatprep.subr.bf16.mxu1 %v12881_v47 }
 0x27f   : > { %3363 = vmatmul.mubr.bf16.vlgmr.msra.gmra.mrb[8].mxu1 %v13331_v26 }
 0x280   : > { %11131 = vmatprep.mubr.msk.bf16.mxu1 %vm12882_vm0, %v12881_v47 }
 0x29f   : > { %v3118_v29 = vpop.f32.mrb[4].mxu0 }
 0x2a0   : > { %v3375_v31 = vpack.c.bf16 %v3118_v29, %v3118_v29  ;;  %v13658_v32 = vpop.f32.mrb[5].mxu0  ;;  %v12047_v29 = vld [vmem:[%s13194_s18 + $0x4c] ss:$16 sps:$4 sm:$0xff]  }
 0x2a1   : > { %v3122_v33 = vpop.f32.mrb[6].mxu0 }
 0x2a2   : > { %v3388_v34 = vsel %vm3383_vm1, %v3375_v31, 0  ;;  %3689 = vrot.lane.b32.xlu1 %v3375_v31, %s12883_s30  ;;  %v3123_v35 = vpop.f32.mrb[7].mxu0  ;;  %v12050_v31 = vld [vmem:[%s13194_s18 + $0x6c] ss:$16 sps:$4 sm:$0xff]   ;;  %v12048_v33 = vld [vmem:[%s13194_s18 + $0x68] ss:$16 sps:$4 sm:$0xff]  }
 0x2a3   : > { %11124 = vmatpush3.bf16.xpose.msra.mxu0 %v3388_v34  ;;  %v12884_v34 = vmov 0  }
 0x2a4   : > { %3599 = vmatprep.subr.bf16.mxu0 %v12029_v7  ;;  %v12068_v7 = vld [vmem:[%s13194_s18 + $0xe4] ss:$16 sps:$4 sm:$0xff]  }
 0x2a6   : > { %3686 = vrot.lane.b32.xlu1 %v3371_v38, %s12883_s30 }
 0x2aa   : > { %11126 = vmatmul.mubr.msk.bf16.vlgmr.msra.gmra.mrb[12].mxu0 %vm3383_vm1, %v3371_v38 }
 0x2ab   : > { %3600 = vmatpush1.bf16.msra.mxu0 %v12027_v6  ;;  %3631 = vmatprep.mubr.bf16.mxu0 %v12884_v34  ;;  %v12060_v6 = vld [vmem:[%s13194_s18 + $0xc0] ss:$16 sps:$4 sm:$0xff]  }
 0x2ac   : > { %3601 = vmatprep.subr.bf16.mxu0 %v12032_v9  ;;  %v12066_v9 = vld [vmem:[%s13194_s18 + $0xe0] ss:$16 sps:$4 sm:$0xff]  }
 0x2af   : > { %3602 = vmatpush1.bf16.msra.mxu0 %v12030_v41  ;;  %v12057_v41 = vld [vmem:[%s13194_s18 + $0x88] ss:$16 sps:$4 sm:$0xff]  }
 0x2b0   : > { %3603 = vmatprep.subr.bf16.mxu0 %v12038_v43 }
 0x2b3   : > { %3604 = vmatpush1.bf16.msra.mxu0 %v12036_v17  ;;  %v12071_v17 = vld [vmem:[%s13194_s18 + $0xcc] ss:$16 sps:$4 sm:$0xff]  }
 0x2b4   : > { %3605 = vmatprep.subr.bf16.mxu0 %v12044_v19  ;;  %v12069_v19 = vld [vmem:[%s13194_s18 + $0xc8] ss:$16 sps:$4 sm:$0xff]  }
 0x2b7   : > { %3606 = vmatpush1.bf16.msra.mxu0 %v12042_v20  ;;  %v12074_v20 = vld [vmem:[%s13194_s18 + $0xec] ss:$16 sps:$4 sm:$0xff]  }
 0x2b8   : > { %11135 = vmatprep.subr.bf16.mxu0 %v12881_v47 }
 0x2d2   : > { %v13693_v5 = vpop.f32.mrb[4].mxu1 }
 0x2d3   : > { %v13697_v8 = vpop.f32.mrb[5].mxu1 }
 0x2d4   : > { %v3204_v10 = vpop.f32.mrb[6].mxu1 }
 0x2d5   : > { %v3205_v12 = vpop.f32.mrb[7].mxu1 }
 0x314   : > { %v3690_v35 = vpop.permute.xlu1 %3689 }
 0x315   : > { %v3695_v39 = vsel %vm3383_vm1, %v3690_v35, 0 }
 0x318   : > { %v3687_v42 = vpop.permute.xlu1 %3686 }
 0x31f   : > { %v3282_v63 = vpop.f32.mrb[8].mxu0 }
 0x320   : > { %v13677_v45 = vpack.c.bf16 %v3282_v63, %v3282_v63  ;;  %v13679_v46 = vpop.f32.mrb[9].mxu0 }
 0x321   : > { %v3286_v48 = vpop.f32.mrb[10].mxu0 }
 0x322   : > { %v3457_v49 = vsel %vm3455_vm2, %v13677_v45, 0  ;;  %v3287_v50 = vpop.f32.mrb[11].mxu0 }
 0x323   : > { %11130 = vmatpush3.bf16.msra.mxu1 %v3457_v49 }
 0x324   : > { %3640 = vmatprep.subr.bf16.mxu1 %v12035_v11 }
 0x352   : > { %v13702_v13 = vpop.f32.mrb[8].mxu1 }
 0x353   : > { %v13705_v14 = vpop.f32.mrb[9].mxu1 }
 0x354   : > { %v3368_v15 = vpop.f32.mrb[10].mxu1 }
 0x355   : > { %v3369_v16 = vpop.f32.mrb[11].mxu1  ;;  %v12065_v15 = vld [vmem:[%s13194_s18 + $0xac] ss:$16 sps:$4 sm:$0xff]  }
 0x356   : > { %v12063_v16 = vld [vmem:[%s13194_s18 + $0xa8] ss:$16 sps:$4 sm:$0xff]  }
 0x37d   : > { %v3424_v51 = vpop.f32.mrb[12].mxu0 }
 0x37e   : > { %v3430_v53 = vmul.f32 0.125, %v3424_v51  ;;  %v11127_v26 = vpop.f32.mrb[13].mxu0 }
 0x37f   : > { %v3427_v54 = vpop.f32.mrb[14].mxu0 }
 0x380   : > { %v11128_v55 = vpop.f32.mrb[15].mxu0  ;;  %v3437_v56 = vadd.f32 %v13684_v52, %v3430_v53 }
 0x382   : > { %v3439_v57 = vsel %vm3438_vm3, %v3437_v56, -inf }
 0x383   : > { %3440 = vmax.xlane.f32.xlu0 %v3439_v57 }
 0x410   : > { %v3441_v62 = vpop.xlane.xlu0 %3440 }
 0x411   : > { %v3442_v0 = vsub.f32 %v3437_v56, %v3441_v62  ;;  %v12051_v62 = vld [vmem:[%s13194_s18 + $0x80] ss:$16 sps:$4 sm:$0xff]  }
 0x413   : > { %v3443_v1 = vmul.f32 1.442695, %v3442_v0  ;;  %v12053_v0 = vld [vmem:[%s13194_s18 + $0x84] ss:$16 sps:$4 sm:$0xff]  }
 0x415   : > { %12603 = vpow2.f32 %v3443_v1  ;;  %v12059_v1 = vld [vmem:[%s13194_s18 + $0x8c] ss:$16 sps:$4 sm:$0xff]  }
 0x41f   : > { %v12604_v3 = vpop.eup %12603 }
 0x420   : > { %v3445_v4 = vsel %vm3438_vm3, %v12604_v3, 0.0 }
 0x421   : > { %3446 = vadd.xlane.f32.xlu0 %v3445_v4  ;;  %v12062_v4 = vld [vmem:[%s13194_s18 + $0xc4] ss:$16 sps:$4 sm:$0xff]  }
 0x4ae   : > { %v3447_v21 = vpop.xlane.xlu0 %3446 }
 0x4af   : > { %12605 = vrcp.f32 %v3447_v21  ;;  %v12072_v21 = vld [vmem:[%s13194_s18 + $0xe8] ss:$16 sps:$4 sm:$0xff]  }
 0x4b9   : > { %v12606_v22 = vpop.eup %12605 }
 0x4ba   : > { %v3449_v23 = vmul.f32 %v12606_v22, %v12604_v3  ;;  %v12054_v3 = vld [vmem:[%s13194_s18 + $0xa0] ss:$16 sps:$4 sm:$0xff]   ;;  %v3376_v22 = vpack.c.bf16 %v13658_v32, %v13658_v32  ;;  %v3372_v32 = vpack.c.bf16 %v13565_v2, %v13565_v2 }
 0x4bc   : > { %3450 = vst.msk [vmem:[%s13230_s4] sm:$0xff] %vm3438_vm3, %v3449_v23  ;;  %v3451_v25 = vpack.c.bf16 %v3449_v23, %v3449_v23  ;;  %v13765_v23 = vpack.c.bf16 %v13679_v46, %v13679_v46 }
 0x4be   : > { %11132 = vmatmul.mubr.msk.bf16.vlgmr.msra.gmra.mrb[12].mxu1 %vm3438_vm3, %v3451_v25 }
 0x4bf   : > { %3641 = vmatpush1.bf16.msra.mxu1 %v12033_v24  ;;  %3672 = vmatprep.mubr.bf16.mxu1 %v12884_v34 }
 0x4c0   : > { %3642 = vmatprep.subr.bf16.mxu1 %v12041_v27 }
 0x4c3   : > { %3643 = vmatpush1.bf16.msra.mxu1 %v12039_v28 }
 0x4c4   : > { %3644 = vmatprep.subr.bf16.mxu1 %v12047_v29  ;;  %v3992_v29 = vsel %vm3383_vm1, %v3376_v22, 0 }
 0x4c7   : > { %3645 = vmatpush1.bf16.msra.mxu1 %v12045_v30  ;;  %v4054_v30 = vsel %vm3455_vm2, %v13765_v23, 0 }
 0x4c8   : > { %3646 = vmatprep.subr.bf16.mxu1 %v12050_v31 }
 0x4cb   : > { %3647 = vmatpush1.bf16.msra.mxu1 %v12048_v33 }
 0x4cc   : > { %11141 = vmatprep.subr.bf16.mxu1 %v12881_v47 }
 0x591   : > { %v3493_v36 = vpop.f32.mrb[12].mxu1 }
 0x592   : > { %v3499_v37 = vpack.c.bf16 %v3493_v36, %v3493_v36  ;;  %v11133_v38 = vpop.f32.mrb[13].mxu1 }
 0x593   : > { %v3496_v18 = vpop.f32.mrb[14].mxu1 }
 0x594   : > { %v11134_v40 = vpop.f32.mrb[15].mxu1  ;;  %10419 = vmatmul.mubr.msk.bf16.vlgmr.msra.gmra.mrb[16].mxu0 %vm3383_vm1, %v3499_v37  ;;  %10420 = vmatmul.mubr.msk.bf16.vlgmr.msra.gmra.mrb[16].mxu1 %vm3383_vm1, %v3499_v37 }
 0x595   : > { %11136 = vmatpush3.bf16.xpose.msra.mxu0 %v3695_v39  ;;  %11137 = vmatprep.mubr.msk.bf16.mxu0 %vm12882_vm0, %v12881_v47 }
 0x596   : > { %11143 = vmatprep.mubr.msk.bf16.mxu1 %vm12882_vm0, %v12881_v47  ;;  %3902 = vmatprep.subr.bf16.mxu0 %v12053_v0  ;;  %v12089_v0 = vld [vmem:[%s13194_s18 + $0x12c] ss:$16 sps:$4 sm:$0xff]  }
 0x59c   : > { %11138 = vmatmul.mubr.msk.bf16.vlgmr.msra.gmra.mrb[20].mxu0 %vm3383_vm1, %v3687_v42 }
 0x59d   : > { %3934 = vmatprep.mubr.bf16.mxu0 %v12884_v34  ;;  %3903 = vmatpush1.bf16.msra.mxu0 %v12051_v62 }
 0x66f   : > { %v3731_v44 = vpop.f32.mrb[20].mxu0 }
 0x670   : > { %v3737_v63 = vmul.f32 0.125, %v3731_v44  ;;  %v11139_v48 = vpop.f32.mrb[21].mxu0 }
 0x671   : > { %v3734_v49 = vpop.f32.mrb[22].mxu0  ;;  %v12077_v48 = vld [vmem:[%s13194_s18 + $0x104] ss:$16 sps:$4 sm:$0xff]  }
 0x672   : > { %v11140_v50 = vpop.f32.mrb[23].mxu0  ;;  %v3738_v51 = vadd.f32 %v13684_v52, %v3737_v63  ;;  %v12075_v63 = vld [vmem:[%s13194_s18 + $0x100] ss:$16 sps:$4 sm:$0xff]   ;;  %v12080_v49 = vld [vmem:[%s13194_s18 + $0x124] ss:$16 sps:$4 sm:$0xff]  }
 0x673   : > { %v12083_v50 = vld [vmem:[%s13194_s18 + $0x10c] ss:$16 sps:$4 sm:$0xff]  }
 0x674   : > { %v3739_v53 = vsel %vm3438_vm3, %v3738_v51, -inf }
 0x675   : > { %3740 = vmax.xlane.f32.xlu0 %v3739_v53  ;;  %v12086_v53 = vld [vmem:[%s13194_s18 + $0x144] ss:$16 sps:$4 sm:$0xff]  }
 0x68b   : > { %3754 = vrot.lane.b32.xlu0 %v13677_v45, %s12883_s30  ;;  %v12056_v45 = vld [vmem:[%s13194_s18 + $0xa4] ss:$16 sps:$4 sm:$0xff]  }
 0x68c   : > { %3904 = vmatprep.subr.bf16.mxu0 %v12056_v45  ;;  %v12087_v45 = vld [vmem:[%s13194_s18 + $0x128] ss:$16 sps:$4 sm:$0xff]  }
 0x68d   : > { %3905 = vmatpush1.bf16.msra.mxu0 %v12054_v3  ;;  %v12093_v3 = vld [vmem:[%s13194_s18 + $0x148] ss:$16 sps:$4 sm:$0xff]  }
 0x68e   : > { %3906 = vmatprep.subr.bf16.mxu0 %v12062_v4  ;;  %v12098_v4 = vld [vmem:[%s13194_s18 + $0x16c] ss:$16 sps:$4 sm:$0xff]  }
 0x691   : > { %3907 = vmatpush1.bf16.msra.mxu0 %v12060_v6  ;;  %v12096_v6 = vld [vmem:[%s13194_s18 + $0x168] ss:$16 sps:$4 sm:$0xff]  }
 0x692   : > { %3908 = vmatprep.subr.bf16.mxu0 %v12068_v7 }
 0x695   : > { %3909 = vmatpush1.bf16.msra.mxu0 %v12066_v9 }
 0x696   : > { %11147 = vmatprep.subr.bf16.mxu0 %v12881_v47 }
 0x702   : > { %v3741_v26 = vpop.xlane.xlu0 %3740 }
 0x703   : > { %v3742_v54 = vsub.f32 %v3738_v51, %v3741_v26  ;;  %v12078_v51 = vld [vmem:[%s13194_s18 + $0x120] ss:$16 sps:$4 sm:$0xff]  }
 0x704   : > { %v12084_v26 = vld [vmem:[%s13194_s18 + $0x140] ss:$16 sps:$4 sm:$0xff]  }
 0x705   : > { %v3743_v55 = vmul.f32 1.442695, %v3742_v54  ;;  %v12092_v54 = vld [vmem:[%s13194_s18 + $0x164] ss:$16 sps:$4 sm:$0xff]  }
 0x706   : > { %v3755_v56 = vpop.permute.xlu0 %3754 }
 0x707   : > { %12607 = vpow2.f32 %v3743_v55  ;;  %v3760_v57 = vsel %vm3455_vm2, %v3755_v56, 0  ;;  %v12090_v55 = vld [vmem:[%s13194_s18 + $0x160] ss:$16 sps:$4 sm:$0xff]  }
 0x708   : > { %11142 = vmatpush3.bf16.msra.mxu1 %v3760_v57 }
 0x709   : > { %3943 = vmatprep.subr.bf16.mxu1 %v12059_v1  ;;  %v12095_v1 = vld [vmem:[%s13194_s18 + $0x14c] ss:$16 sps:$4 sm:$0xff]  }
 0x711   : > { %v12608_v60 = vpop.eup %12607 }
 0x712   : > { %v3745_v61 = vsel %vm3438_vm3, %v12608_v60, 0.0 }
 0x713   : > { %3746 = vadd.xlane.f32.xlu1 %v3745_v61  ;;  %v12081_v61 = vld [vmem:[%s13194_s18 + $0x108] ss:$16 sps:$4 sm:$0xff]  }
 0x7a0   : > { %v3747_v10 = vpop.xlane.xlu1 %3746 }
 0x7a1   : > { %12609 = vrcp.f32 %v3747_v10 }
 0x7ab   : > { %v12610_v11 = vpop.eup %12609 }
 0x7ac   : > { %v3749_v12 = vmul.f32 %v12610_v11, %v12608_v60 }
 0x7ae   : > { %10422 = vst.msk [vmem:[%s13230_s4 + $0x8] sm:$0xff] %vm3438_vm3, %v3749_v12  ;;  %v3752_v43 = vpack.c.bf16 %v3749_v12, %v3749_v12 }
 0x7b0   : > { %11144 = vmatmul.mubr.msk.bf16.vlgmr.msra.gmra.mrb[20].mxu1 %vm3438_vm3, %v3752_v43 }
 0x7b1   : > { %3944 = vmatpush1.bf16.msra.mxu1 %v12057_v41  ;;  %3975 = vmatprep.mubr.bf16.mxu1 %v12884_v34 }
 0x7b2   : > { %3945 = vmatprep.subr.bf16.mxu1 %v12065_v15 }
 0x7b5   : > { %3946 = vmatpush1.bf16.msra.mxu1 %v12063_v16 }
 0x7b6   : > { %3947 = vmatprep.subr.bf16.mxu1 %v12071_v17 }
 0x7b9   : > { %3948 = vmatpush1.bf16.msra.mxu1 %v12069_v19 }
 0x7ba   : > { %3949 = vmatprep.subr.bf16.mxu1 %v12074_v20 }
 0x7bd   : > { %3950 = vmatpush1.bf16.msra.mxu1 %v12072_v21 }
 0x7be   : > { %11153 = vmatprep.subr.bf16.mxu1 %v12881_v47 }
 0x883   : > { %v3796_v24 = vpop.f32.mrb[20].mxu1 }
 0x884   : > { %v3802_v25 = vpack.c.bf16 %v3796_v24, %v3796_v24  ;;  %v11145_v27 = vpop.f32.mrb[21].mxu1 }
 0x885   : > { %v3799_v28 = vpop.f32.mrb[22].mxu1 }
 0x886   : > { %v11146_v31 = vpop.f32.mrb[23].mxu1  ;;  %10440 = vmatmul.mubr.msk.bf16.vlgmr.msra.gmra.mrb[16].mxu0 %vm3383_vm1, %v3802_v25  ;;  %10441 = vmatmul.mubr.msk.bf16.vlgmr.msra.gmra.mrb[16].mxu1 %vm3383_vm1, %v3802_v25 }
 0x887   : > { %11148 = vmatpush3.bf16.xpose.msra.mxu0 %v3992_v29  ;;  %11154 = vmatpush3.bf16.msra.mxu1 %v4054_v30 }
 0x888   : > { %11149 = vmatprep.mubr.msk.bf16.mxu0 %vm12882_vm0, %v12881_v47  ;;  %11155 = vmatprep.mubr.msk.bf16.mxu1 %vm12882_vm0, %v12881_v47 }
 0x889   : > { %4196 = vmatprep.subr.bf16.mxu0 %v12077_v48  ;;  %4237 = vmatprep.subr.bf16.mxu1 %v12083_v50  ;;  %v12113_v48 = vld [vmem:[%s13194_s18 + $0x1ac] ss:$16 sps:$4 sm:$0xff]  }
 0x88a   : > { %v12119_v50 = vld [vmem:[%s13194_s18 + $0x1cc] ss:$16 sps:$4 sm:$0xff]  }
 0x88e   : > { %11150 = vmatmul.mubr.msk.bf16.vlgmr.msra.gmra.mrb[24].mxu0 %vm3383_vm1, %v3372_v32 }
 0x88f   : > { %4228 = vmatprep.mubr.bf16.mxu0 %v12884_v34  ;;  %4197 = vmatpush1.bf16.msra.mxu0 %v12075_v63 }
 0x890   : > { %4198 = vmatprep.subr.bf16.mxu0 %v12080_v49  ;;  %v12111_v49 = vld [vmem:[%s13194_s18 + $0x1a8] ss:$16 sps:$4 sm:$0xff]  }
 0x893   : > { %4199 = vmatpush1.bf16.msra.mxu0 %v12078_v51  ;;  %v12117_v51 = vld [vmem:[%s13194_s18 + $0x1c8] ss:$16 sps:$4 sm:$0xff]  }
 0x894   : > { %4200 = vmatprep.subr.bf16.mxu0 %v12086_v53  ;;  %v12122_v53 = vld [vmem:[%s13194_s18 + $0x1ec] ss:$16 sps:$4 sm:$0xff]  }
 0x897   : > { %4201 = vmatpush1.bf16.msra.mxu0 %v12084_v26  ;;  %v12120_v26 = vld [vmem:[%s13194_s18 + $0x1e8] ss:$16 sps:$4 sm:$0xff]  }
 0x898   : > { %4202 = vmatprep.subr.bf16.mxu0 %v12092_v54  ;;  %v3377_v54 = vpack.c.bf16 %v13693_v5, %v13693_v5  ;;  %v3373_v5 = vpack.c.bf16 %v13688_v58, %v13688_v58 }
 0x89b   : > { %4203 = vmatpush1.bf16.msra.mxu0 %v12090_v55  ;;  %v13848_v55 = vpack.c.bf16 %v13702_v13, %v13702_v13 }
 0x89c   : > { %11159 = vmatprep.subr.bf16.mxu0 %v12881_v47 }
 0x961   : > { %v4028_v46 = vpop.f32.mrb[24].mxu0 }
 0x962   : > { %v4034_v33 = vmul.f32 0.125, %v4028_v46  ;;  %v11151_v35 = vpop.f32.mrb[25].mxu0  ;;  %v12099_v46 = vld [vmem:[%s13194_s18 + $0x180] ss:$16 sps:$4 sm:$0xff]  }
 0x963   : > { %v4031_v36 = vpop.f32.mrb[26].mxu0  ;;  %v12107_v35 = vld [vmem:[%s13194_s18 + $0x18c] ss:$16 sps:$4 sm:$0xff]  }
 0x964   : > { %v11152_v37 = vpop.f32.mrb[27].mxu0  ;;  %v4035_v38 = vadd.f32 %v13684_v52, %v4034_v33  ;;  %v12101_v33 = vld [vmem:[%s13194_s18 + $0x184] ss:$16 sps:$4 sm:$0xff]   ;;  %v12102_v36 = vld [vmem:[%s13194_s18 + $0x1a0] ss:$16 sps:$4 sm:$0xff]  }
 0x965   : > { %v12110_v37 = vld [vmem:[%s13194_s18 + $0x1c4] ss:$16 sps:$4 sm:$0xff]  }
 0x966   : > { %v4036_v18 = vsel %vm3438_vm3, %v4035_v38, -inf }
 0x967   : > { %4037 = vmax.xlane.f32.xlu0 %v4036_v18  ;;  %v12116_v18 = vld [vmem:[%s13194_s18 + $0x1e4] ss:$16 sps:$4 sm:$0xff]  }
 0x97d   : > { %4283 = vrot.lane.b32.xlu0 %v3372_v32, %s12883_s30 }
 0x9f4   : > { %v4038_v2 = vpop.xlane.xlu0 %4037 }
 0x9f5   : > { %v4039_v39 = vsub.f32 %v4035_v38, %v4038_v2  ;;  %v12108_v38 = vld [vmem:[%s13194_s18 + $0x1c0] ss:$16 sps:$4 sm:$0xff]  }
 0x9f6   : > { %v12114_v2 = vld [vmem:[%s13194_s18 + $0x1e0] ss:$16 sps:$4 sm:$0xff]  }
 0x9f7   : > { %v4040_v40 = vmul.f32 1.442695, %v4039_v39 }
 0x9f8   : > { %v4284_v15 = vpop.permute.xlu0 %4283 }
 0x9f9   : > { %12611 = vpow2.f32 %v4040_v40 }
 0xa03   : > { %v12612_v42 = vpop.eup %12611 }
 0xa04   : > { %v4042_v44 = vsel %vm3438_vm3, %v12612_v42, 0.0 }
 0xa05   : > { %4043 = vadd.xlane.f32.xlu1 %v4042_v44  ;;  %v12105_v44 = vld [vmem:[%s13194_s18 + $0x188] ss:$16 sps:$4 sm:$0xff]  }
 0xa16   : > { %4286 = vrot.lane.b32.xlu1 %v3376_v22, %s12883_s30 }
 0xa92   : > { %v4044_v56 = vpop.xlane.xlu1 %4043 }
 0xa93   : > { %12613 = vrcp.f32 %v4044_v56 }
 0xa96   : > { %v4287_v7 = vpop.permute.xlu1 %4286 }
 0xa97   : > { %v4292_v41 = vsel %vm3383_vm1, %v4287_v7, 0 }
 0xa9d   : > { %v12614_v57 = vpop.eup %12613 }
 0xa9e   : > { %v4046_v60 = vmul.f32 %v12614_v57, %v12612_v42 }
 0xaa0   : > { %10443 = vst.msk [vmem:[%s13230_s4 + $0x10] sm:$0xff] %vm3438_vm3, %v4046_v60  ;;  %v4049_v62 = vpack.c.bf16 %v4046_v60, %v4046_v60 }
 0xaa2   : > { %11156 = vmatmul.mubr.msk.bf16.vlgmr.msra.gmra.mrb[24].mxu1 %vm3438_vm3, %v4049_v62  ;;  %v4589_v62 = vsel %vm3383_vm1, %v3377_v54, 0 }
 0xaa3   : > { %4238 = vmatpush1.bf16.msra.mxu1 %v12081_v61  ;;  %4269 = vmatprep.mubr.bf16.mxu1 %v12884_v34 }
 0xaa4   : > { %4239 = vmatprep.subr.bf16.mxu1 %v12089_v0  ;;  %v4651_v0 = vsel %vm3455_vm2, %v13848_v55, 0 }
 0xaa7   : > { %4240 = vmatpush1.bf16.msra.mxu1 %v12087_v45 }
 0xaa8   : > { %4241 = vmatprep.subr.bf16.mxu1 %v12095_v1 }
 0xaab   : > { %4242 = vmatpush1.bf16.msra.mxu1 %v12093_v3 }
 0xaac   : > { %4243 = vmatprep.subr.bf16.mxu1 %v12098_v4 }
 0xaaf   : > { %4244 = vmatpush1.bf16.msra.mxu1 %v12096_v6 }
 0xab0   : > { %11165 = vmatprep.subr.bf16.mxu1 %v12881_v47 }
 0xb75   : > { %v4090_v9 = vpop.f32.mrb[24].mxu1 }
 0xb76   : > { %v4096_v10 = vpack.c.bf16 %v4090_v9, %v4090_v9  ;;  %v11157_v11 = vpop.f32.mrb[25].mxu1 }
 0xb77   : > { %v4093_v12 = vpop.f32.mrb[26].mxu1 }
 0xb78   : > { %v11158_v43 = vpop.f32.mrb[27].mxu1  ;;  %10461 = vmatmul.mubr.msk.bf16.vlgmr.msra.gmra.mrb[16].mxu0 %vm3383_vm1, %v4096_v10  ;;  %10462 = vmatmul.mubr.msk.bf16.vlgmr.msra.gmra.mrb[16].mxu1 %vm3383_vm1, %v4096_v10 }
 0xb79   : > { %11160 = vmatpush3.bf16.xpose.msra.mxu0 %v4292_v41  ;;  %11161 = vmatprep.mubr.msk.bf16.mxu0 %vm12882_vm0, %v12881_v47  ;;  %v12123_v43 = vld [vmem:[%s13194_s18 + $0x200] ss:$16 sps:$4 sm:$0xff]  }
 0xb7a   : > { %11167 = vmatprep.mubr.msk.bf16.mxu1 %vm12882_vm0, %v12881_v47  ;;  %4499 = vmatprep.subr.bf16.mxu0 %v12101_v33  ;;  %v12141_v33 = vld [vmem:[%s13194_s18 + $0x248] ss:$16 sps:$4 sm:$0xff]  }
 0xb80   : > { %11162 = vmatmul.mubr.msk.bf16.vlgmr.msra.gmra.mrb[28].mxu0 %vm3383_vm1, %v4284_v15  ;;  %v12125_v15 = vld [vmem:[%s13194_s18 + $0x204] ss:$16 sps:$4 sm:$0xff]  }
 0xb81   : > { %4531 = vmatprep.mubr.bf16.mxu0 %v12884_v34  ;;  %4500 = vmatpush1.bf16.msra.mxu0 %v12099_v46  ;;  %v12143_v46 = vld [vmem:[%s13194_s18 + $0x24c] ss:$16 sps:$4 sm:$0xff]  }
 0xc53   : > { %v4328_v16 = vpop.f32.mrb[28].mxu0 }
 0xc54   : > { %v4334_v17 = vmul.f32 0.125, %v4328_v16  ;;  %v11163_v19 = vpop.f32.mrb[29].mxu0  ;;  %v12128_v16 = vld [vmem:[%s13194_s18 + $0x224] ss:$16 sps:$4 sm:$0xff]  }
 0xc55   : > { %v4331_v20 = vpop.f32.mrb[30].mxu0  ;;  %v12126_v19 = vld [vmem:[%s13194_s18 + $0x220] ss:$16 sps:$4 sm:$0xff]  }
 0xc56   : > { %v11164_v21 = vpop.f32.mrb[31].mxu0  ;;  %v4335_v22 = vadd.f32 %v13684_v52, %v4334_v17  ;;  %v12131_v17 = vld [vmem:[%s13194_s18 + $0x20c] ss:$16 sps:$4 sm:$0xff]   ;;  %v12134_v20 = vld [vmem:[%s13194_s18 + $0x244] ss:$16 sps:$4 sm:$0xff]  }
 0xc57   : > { %v12132_v21 = vld [vmem:[%s13194_s18 + $0x240] ss:$16 sps:$4 sm:$0xff]  }
 0xc58   : > { %v4336_v24 = vsel %vm3438_vm3, %v4335_v22, -inf }
 0xc59   : > { %4337 = vmax.xlane.f32.xlu1 %v4336_v24  ;;  %v12138_v24 = vld [vmem:[%s13194_s18 + $0x260] ss:$16 sps:$4 sm:$0xff]  }
 0xc6a   : > { %4351 = vrot.lane.b32.xlu1 %v13765_v23, %s12883_s30  ;;  %v12104_v23 = vld [vmem:[%s13194_s18 + $0x1a4] ss:$16 sps:$4 sm:$0xff]  }
 0xc6b   : > { %4501 = vmatprep.subr.bf16.mxu0 %v12104_v23  ;;  %v12146_v23 = vld [vmem:[%s13194_s18 + $0x26c] ss:$16 sps:$4 sm:$0xff]  }
 0xc6c   : > { %4502 = vmatpush1.bf16.msra.mxu0 %v12102_v36 }
 0xc6d   : > { %4503 = vmatprep.subr.bf16.mxu0 %v12110_v37 }
 0xc70   : > { %4504 = vmatpush1.bf16.msra.mxu0 %v12108_v38 }
 0xc71   : > { %4505 = vmatprep.subr.bf16.mxu0 %v12116_v18 }
 0xc74   : > { %4506 = vmatpush1.bf16.msra.mxu0 %v12114_v2 }
 0xc75   : > { %11171 = vmatprep.subr.bf16.mxu0 %v12881_v47 }
 0xce6   : > { %v4338_v25 = vpop.xlane.xlu1 %4337 }
 0xce7   : > { %v4339_v27 = vsub.f32 %v4335_v22, %v4338_v25  ;;  %v12140_v22 = vld [vmem:[%s13194_s18 + $0x264] ss:$16 sps:$4 sm:$0xff]  }
 0xce9   : > { %v4340_v28 = vmul.f32 1.442695, %v4339_v27 }
 0xcea   : > { %v4352_v29 = vpop.permute.xlu1 %4351 }
 0xceb   : > { %12615 = vpow2.f32 %v4340_v28  ;;  %v4357_v30 = vsel %vm3455_vm2, %v4352_v29, 0  ;;  %v12129_v29 = vld [vmem:[%s13194_s18 + $0x208] ss:$16 sps:$4 sm:$0xff]  }
 0xcec   : > { %11166 = vmatpush3.bf16.msra.mxu1 %v4357_v30 }
 0xced   : > { %4540 = vmatprep.subr.bf16.mxu1 %v12107_v35  ;;  %v12144_v35 = vld [vmem:[%s13194_s18 + $0x268] ss:$16 sps:$4 sm:$0xff]  }
 0xcf5   : > { %v12616_v31 = vpop.eup %12615 }
 0xcf6   : > { %v4342_v32 = vsel %vm3438_vm3, %v12616_v31, 0.0 }
 0xcf7   : > { %4343 = vadd.xlane.f32.xlu0 %v4342_v32  ;;  %v12135_v32 = vld [vmem:[%s13194_s18 + $0x228] ss:$16 sps:$4 sm:$0xff]  }
 0xd84   : > { %v4344_v39 = vpop.xlane.xlu0 %4343 }
 0xd85   : > { %12617 = vrcp.f32 %v4344_v39 }
 0xd8f   : > { %v12618_v40 = vpop.eup %12617 }
 0xd90   : > { %v4346_v42 = vmul.f32 %v12618_v40, %v12616_v31  ;;  %v12137_v31 = vld [vmem:[%s13194_s18 + $0x22c] ss:$16 sps:$4 sm:$0xff]  }
 0xd92   : > { %10464 = vst.msk [vmem:[%s13230_s4 + $0x18] sm:$0xff] %vm3438_vm3, %v4346_v42  ;;  %v4349_v63 = vpack.c.bf16 %v4346_v42, %v4346_v42 }
 0xd94   : > { %11168 = vmatmul.mubr.msk.bf16.vlgmr.msra.gmra.mrb[28].mxu1 %vm3438_vm3, %v4349_v63 }
 0xd95   : > { %4541 = vmatpush1.bf16.msra.mxu1 %v12105_v44  ;;  %4572 = vmatprep.mubr.bf16.mxu1 %v12884_v34 }
 0xd96   : > { %4542 = vmatprep.subr.bf16.mxu1 %v12113_v48 }
 0xd99   : > { %4543 = vmatpush1.bf16.msra.mxu1 %v12111_v49 }
 0xd9a   : > { %4544 = vmatprep.subr.bf16.mxu1 %v12119_v50 }
 0xd9d   : > { %4545 = vmatpush1.bf16.msra.mxu1 %v12117_v51 }
 0xd9e   : > { %4546 = vmatprep.subr.bf16.mxu1 %v12122_v53 }
 0xda1   : > { %4547 = vmatpush1.bf16.msra.mxu1 %v12120_v26 }
 0xda2   : > { %11177 = vmatprep.subr.bf16.mxu1 %v12881_v47 }
 0xe67   : > { %v4393_v56 = vpop.f32.mrb[28].mxu1 }
 0xe68   : > { %v4399_v57 = vpack.c.bf16 %v4393_v56, %v4393_v56  ;;  %v11169_v60 = vpop.f32.mrb[29].mxu1 }
 0xe69   : > { %v4396_v61 = vpop.f32.mrb[30].mxu1 }
 0xe6a   : > { %v11170_v45 = vpop.f32.mrb[31].mxu1  ;;  %10482 = vmatmul.mubr.msk.bf16.vlgmr.msra.gmra.mrb[16].mxu0 %vm3383_vm1, %v4399_v57  ;;  %10483 = vmatmul.mubr.msk.bf16.vlgmr.msra.gmra.mrb[16].mxu1 %vm3383_vm1, %v4399_v57  ;;  %v12147_v61 = vld [vmem:[%s13194_s18 + $0x280] ss:$16 sps:$4 sm:$0xff]  }
 0xe6b   : > { %11172 = vmatpush3.bf16.xpose.msra.mxu0 %v4589_v62  ;;  %11178 = vmatpush3.bf16.msra.mxu1 %v4651_v0  ;;  %v12149_v62 = vld [vmem:[%s13194_s18 + $0x284] ss:$16 sps:$4 sm:$0xff]   ;;  %v12150_v45 = vld [vmem:[%s13194_s18 + $0x2a0] ss:$16 sps:$4 sm:$0xff]  }
 0xe6c   : > { %11173 = vmatprep.mubr.msk.bf16.mxu0 %vm12882_vm0, %v12881_v47  ;;  %11179 = vmatprep.mubr.msk.bf16.mxu1 %vm12882_vm0, %v12881_v47  ;;  %v12152_v0 = vld [vmem:[%s13194_s18 + $0x2a4] ss:$16 sps:$4 sm:$0xff]  }
 0xe6d   : > { %4793 = vmatprep.subr.bf16.mxu0 %v12125_v15  ;;  %4834 = vmatprep.subr.bf16.mxu1 %v12131_v17  ;;  %v12165_v15 = vld [vmem:[%s13194_s18 + $0x2c8] ss:$16 sps:$4 sm:$0xff]  }
 0xe6e   : > { %v12168_v17 = vld [vmem:[%s13194_s18 + $0x2e8] ss:$16 sps:$4 sm:$0xff]  }
 0xe72   : > { %11174 = vmatmul.mubr.msk.bf16.vlgmr.msra.gmra.mrb[32].mxu0 %vm3383_vm1, %v3373_v5 }
 0xe73   : > { %4825 = vmatprep.mubr.bf16.mxu0 %v12884_v34  ;;  %4794 = vmatpush1.bf16.msra.mxu0 %v12123_v43  ;;  %v12167_v43 = vld [vmem:[%s13194_s18 + $0x2cc] ss:$16 sps:$4 sm:$0xff]  }
 0xe74   : > { %4795 = vmatprep.subr.bf16.mxu0 %v12128_v16  ;;  %v12170_v16 = vld [vmem:[%s13194_s18 + $0x2ec] ss:$16 sps:$4 sm:$0xff]  }
 0xe77   : > { %4796 = vmatpush1.bf16.msra.mxu0 %v12126_v19  ;;  %v3378_v19 = vpack.c.bf16 %v13697_v8, %v13697_v8  ;;  %v3374_v8 = vpack.c.bf16 %v13690_v59, %v13690_v59 }
 0xe78   : > { %4797 = vmatprep.subr.bf16.mxu0 %v12134_v20  ;;  %v13931_v20 = vpack.c.bf16 %v13705_v14, %v13705_v14 }
 0xe7b   : > { %4798 = vmatpush1.bf16.msra.mxu0 %v12132_v21 }
 0xe7c   : > { %4799 = vmatprep.subr.bf16.mxu0 %v12140_v22 }
 0xe7f   : > { %4800 = vmatpush1.bf16.msra.mxu0 %v12138_v24 }
 0xe80   : > { %11183 = vmatprep.subr.bf16.mxu0 %v12881_v47 }
 0xf45   : > { %v4625_v13 = vpop.f32.mrb[32].mxu0 }
 0xf46   : > { %v4631_v1 = vmul.f32 0.125, %v4625_v13  ;;  %v11175_v3 = vpop.f32.mrb[33].mxu0  ;;  %v12156_v13 = vld [vmem:[%s13194_s18 + $0x2c0] ss:$16 sps:$4 sm:$0xff]  }
 0xf47   : > { %v4628_v4 = vpop.f32.mrb[34].mxu0  ;;  %v12162_v3 = vld [vmem:[%s13194_s18 + $0x2e0] ss:$16 sps:$4 sm:$0xff]  }
 0xf48   : > { %v11176_v6 = vpop.f32.mrb[35].mxu0  ;;  %v4632_v7 = vadd.f32 %v13684_v52, %v4631_v1  ;;  %v12164_v1 = vld [vmem:[%s13194_s18 + $0x2e4] ss:$16 sps:$4 sm:$0xff]   ;;  %v12155_v4 = vld [vmem:[%s13194_s18 + $0x28c] ss:$16 sps:$4 sm:$0xff]  }
 0xf4a   : > { %v4633_v9 = vsel %vm3438_vm3, %v4632_v7, -inf }
 0xf4b   : > { %4634 = vmax.xlane.f32.xlu0 %v4633_v9 }
 0xf61   : > { %4883 = vrot.lane.b32.xlu0 %v3377_v54, %s12883_s30 }
 0xf65   : > { %4880 = vrot.lane.b32.xlu0 %v3373_v5, %s12883_s30  ;;  %v12158_v5 = vld [vmem:[%s13194_s18 + $0x2c4] ss:$16 sps:$4 sm:$0xff]  }
 0xfd8   : > { %v4635_v58 = vpop.xlane.xlu0 %4634 }
 0xfd9   : > { %v4636_v10 = vsub.f32 %v4632_v7, %v4635_v58 }
 0xfdb   : > { %v4637_v11 = vmul.f32 1.442695, %v4636_v10  ;;  %v12153_v10 = vld [vmem:[%s13194_s18 + $0x288] ss:$16 sps:$4 sm:$0xff]  }
 0xfdc   : > { %v4884_v36 = vpop.permute.xlu0 %4883 }
 0xfdd   : > { %12619 = vpow2.f32 %v4637_v11  ;;  %v4889_v39 = vsel %vm3383_vm1, %v4884_v36, 0 }
 0xfe0   : > { %v4881_v42 = vpop.permute.xlu0 %4880 }
 0xfe7   : > { %v12620_v12 = vpop.eup %12619 }
 0xfe8   : > { %v4639_v41 = vsel %vm3438_vm3, %v12620_v12, 0.0 }
 0xfe9   : > { %4640 = vadd.xlane.f32.xlu1 %v4639_v41  ;;  %v12159_v41 = vld [vmem:[%s13194_s18 + $0x2a8] ss:$16 sps:$4 sm:$0xff]  }
0x1076   : > { %v4641_v25 = vpop.xlane.xlu1 %4640 }
0x1077   : > { %12621 = vrcp.f32 %v4641_v25 }
0x1081   : > { %v12622_v27 = vpop.eup %12621 }
0x1082   : > { %v4643_v28 = vmul.f32 %v12622_v27, %v12620_v12  ;;  %v12161_v12 = vld [vmem:[%s13194_s18 + $0x2ac] ss:$16 sps:$4 sm:$0xff]   ;;  %v5186_v27 = vsel %vm3383_vm1, %v3378_v19, 0 }
0x1084   : > { %10485 = vst.msk [vmem:[%s13230_s4 + $0x20] sm:$0xff] %vm3438_vm3, %v4643_v28  ;;  %v4646_v30 = vpack.c.bf16 %v4643_v28, %v4643_v28  ;;  %v5248_v28 = vsel %vm3455_vm2, %v13931_v20, 0 }
0x1086   : > { %11180 = vmatmul.mubr.msk.bf16.vlgmr.msra.gmra.mrb[32].mxu1 %vm3438_vm3, %v4646_v30 }
0x1087   : > { %4835 = vmatpush1.bf16.msra.mxu1 %v12129_v29  ;;  %4866 = vmatprep.mubr.bf16.mxu1 %v12884_v34 }
0x1088   : > { %4836 = vmatprep.subr.bf16.mxu1 %v12137_v31 }
0x108b   : > { %4837 = vmatpush1.bf16.msra.mxu1 %v12135_v32 }
0x108c   : > { %4838 = vmatprep.subr.bf16.mxu1 %v12143_v46 }
0x108f   : > { %4839 = vmatpush1.bf16.msra.mxu1 %v12141_v33 }
0x1090   : > { %4840 = vmatprep.subr.bf16.mxu1 %v12146_v23 }
0x1093   : > { %4841 = vmatpush1.bf16.msra.mxu1 %v12144_v35 }
0x1094   : > { %11189 = vmatprep.subr.bf16.mxu1 %v12881_v47 }
0x1159   : > { %v4687_v37 = vpop.f32.mrb[32].mxu1 }
0x115a   : > { %v4693_v38 = vpack.c.bf16 %v4687_v37, %v4687_v37  ;;  %v11181_v18 = vpop.f32.mrb[33].mxu1 }
0x115b   : > { %v4690_v2 = vpop.f32.mrb[34].mxu1  ;;  %v12173_v18 = vld [vmem:[%s13194_s18 + $0x304] ss:$16 sps:$4 sm:$0xff]  }
0x115c   : > { %v11182_v40 = vpop.f32.mrb[35].mxu1  ;;  %10503 = vmatmul.mubr.msk.bf16.vlgmr.msra.gmra.mrb[16].mxu0 %vm3383_vm1, %v4693_v38  ;;  %10504 = vmatmul.mubr.msk.bf16.vlgmr.msra.gmra.mrb[16].mxu1 %vm3383_vm1, %v4693_v38  ;;  %v12176_v2 = vld [vmem:[%s13194_s18 + $0x324] ss:$16 sps:$4 sm:$0xff]  }
0x115d   : > { %11184 = vmatpush3.bf16.xpose.msra.mxu0 %v4889_v39  ;;  %11185 = vmatprep.mubr.msk.bf16.mxu0 %vm12882_vm0, %v12881_v47  ;;  %v12179_v39 = vld [vmem:[%s13194_s18 + $0x30c] ss:$16 sps:$4 sm:$0xff]   ;;  %v12174_v40 = vld [vmem:[%s13194_s18 + $0x320] ss:$16 sps:$4 sm:$0xff]  }
0x115e   : > { %11191 = vmatprep.mubr.msk.bf16.mxu1 %vm12882_vm0, %v12881_v47  ;;  %5096 = vmatprep.subr.bf16.mxu0 %v12149_v62  ;;  %v12192_v62 = vld [vmem:[%s13194_s18 + $0x368] ss:$16 sps:$4 sm:$0xff]  }
0x1164   : > { %11186 = vmatmul.mubr.msk.bf16.vlgmr.msra.gmra.mrb[36].mxu0 %vm3383_vm1, %v4881_v42  ;;  %v12182_v42 = vld [vmem:[%s13194_s18 + $0x344] ss:$16 sps:$4 sm:$0xff]  }
0x1165   : > { %5128 = vmatprep.mubr.bf16.mxu0 %v12884_v34  ;;  %5097 = vmatpush1.bf16.msra.mxu0 %v12147_v61  ;;  %v12194_v61 = vld [vmem:[%s13194_s18 + $0x36c] ss:$16 sps:$4 sm:$0xff]  }
0x1166   : > { %5098 = vmatprep.subr.bf16.mxu0 %v12152_v0 }
0x1169   : > { %5099 = vmatpush1.bf16.msra.mxu0 %v12150_v45 }
0x116a   : > { %5100 = vmatprep.subr.bf16.mxu0 %v12158_v5 }
0x116d   : > { %5101 = vmatpush1.bf16.msra.mxu0 %v12156_v13 }
0x116e   : > { %5102 = vmatprep.subr.bf16.mxu0 %v12164_v1 }
0x1171   : > { %5103 = vmatpush1.bf16.msra.mxu0 %v12162_v3 }
0x1172   : > { %11195 = vmatprep.subr.bf16.mxu0 %v12881_v47 }
0x1237   : > { %v4925_v44 = vpop.f32.mrb[36].mxu0 }
0x1238   : > { %v4931_v63 = vmul.f32 0.125, %v4925_v44  ;;  %v11187_v48 = vpop.f32.mrb[37].mxu0  ;;  %v12180_v44 = vld [vmem:[%s13194_s18 + $0x340] ss:$16 sps:$4 sm:$0xff]  }
0x1239   : > { %v4928_v49 = vpop.f32.mrb[38].mxu0  ;;  %v12186_v48 = vld [vmem:[%s13194_s18 + $0x360] ss:$16 sps:$4 sm:$0xff]  }
0x123a   : > { %v11188_v50 = vpop.f32.mrb[39].mxu0  ;;  %v4932_v51 = vadd.f32 %v13684_v52, %v4931_v63  ;;  %v12188_v63 = vld [vmem:[%s13194_s18 + $0x364] ss:$16 sps:$4 sm:$0xff]  }
0x123c   : > { %v4933_v53 = vsel %vm3438_vm3, %v4932_v51, -inf }
0x123d   : > { %4934 = vmax.xlane.f32.xlu0 %v4933_v53  ;;  %v12177_v53 = vld [vmem:[%s13194_s18 + $0x308] ss:$16 sps:$4 sm:$0xff]  }
0x12ca   : > { %v4935_v26 = vpop.xlane.xlu0 %4934 }
0x12cb   : > { %v4936_v54 = vsub.f32 %v4932_v51, %v4935_v26 }
0x12cd   : > { %v4937_v56 = vmul.f32 1.442695, %v4936_v54  ;;  %v12185_v54 = vld [vmem:[%s13194_s18 + $0x32c] ss:$16 sps:$4 sm:$0xff]  }
0x12cf   : > { %12623 = vpow2.f32 %v4937_v56  ;;  %v12183_v56 = vld [vmem:[%s13194_s18 + $0x328] ss:$16 sps:$4 sm:$0xff]  }
0x12d9   : > { %v12624_v57 = vpop.eup %12623 }
0x12da   : > { %v4939_v60 = vsel %vm3438_vm3, %v12624_v57, 0.0 }
0x12db   : > { %4940 = vadd.xlane.f32.xlu1 %v4939_v60  ;;  %v12189_v60 = vld [vmem:[%s13194_s18 + $0x348] ss:$16 sps:$4 sm:$0xff]  }
0x12ec   : > { %4948 = vrot.lane.b32.xlu1 %v13848_v55, %s12883_s30 }
0x1368   : > { %v4941_v55 = vpop.xlane.xlu1 %4940 }
0x1369   : > { %12625 = vrcp.f32 %v4941_v55 }
0x136c   : > { %v4949_v6 = vpop.permute.xlu1 %4948 }
0x136d   : > { %v4954_v7 = vsel %vm3455_vm2, %v4949_v6, 0 }
0x136e   : > { %11190 = vmatpush3.bf16.msra.mxu1 %v4954_v7 }
0x136f   : > { %5137 = vmatprep.subr.bf16.mxu1 %v12155_v4 }
0x1373   : > { %v12626_v9 = vpop.eup %12625 }
0x1374   : > { %v4943_v58 = vmul.f32 %v12626_v9, %v12624_v57  ;;  %v12191_v57 = vld [vmem:[%s13194_s18 + $0x34c] ss:$16 sps:$4 sm:$0xff]  }
0x1376   : > { %10506 = vst.msk [vmem:[%s13230_s4 + $0x28] sm:$0xff] %vm3438_vm3, %v4943_v58  ;;  %v4946_v11 = vpack.c.bf16 %v4943_v58, %v4943_v58 }
0x1378   : > { %11192 = vmatmul.mubr.msk.bf16.vlgmr.msra.gmra.mrb[36].mxu1 %vm3438_vm3, %v4946_v11  ;;  %v12639_v11 = vld [vmem:[%s13217_s0] ss:$0 sm:$0xff] }
0x1379   : > { %5138 = vmatpush1.bf16.msra.mxu1 %v12153_v10  ;;  %5169 = vmatprep.mubr.bf16.mxu1 %v12884_v34 }
0x137a   : > { %5139 = vmatprep.subr.bf16.mxu1 %v12161_v12 }
0x137d   : > { %5140 = vmatpush1.bf16.msra.mxu1 %v12159_v41 }
0x137e   : > { %5141 = vmatprep.subr.bf16.mxu1 %v12167_v43 }
0x1381   : > { %5142 = vmatpush1.bf16.msra.mxu1 %v12165_v15 }
0x1382   : > { %5143 = vmatprep.subr.bf16.mxu1 %v12170_v16 }
0x1385   : > { %5144 = vmatpush1.bf16.msra.mxu1 %v12168_v17 }
0x1386   : > { %11201 = vmatprep.subr.bf16.mxu1 %v12881_v47 }
0x144b   : > { %v4990_v21 = vpop.f32.mrb[36].mxu1 }
0x144c   : > { %v4996_v22 = vpack.c.bf16 %v4990_v21, %v4990_v21  ;;  %v11193_v24 = vpop.f32.mrb[37].mxu1  ;;  %v12197_v21 = vld [vmem:[%s13194_s18 + $0x384] ss:$16 sps:$4 sm:$0xff]  }
0x144d   : > { %v4993_v25 = vpop.f32.mrb[38].mxu1  ;;  %v12201_v24 = vld [vmem:[%s13194_s18 + $0x3a0] ss:$16 sps:$4 sm:$0xff]  }
0x144e   : > { %v11194_v29 = vpop.f32.mrb[39].mxu1  ;;  %10524 = vmatmul.mubr.msk.bf16.vlgmr.msra.gmra.mrb[16].mxu0 %vm3383_vm1, %v4996_v22  ;;  %10525 = vmatmul.mubr.msk.bf16.vlgmr.msra.gmra.mrb[16].mxu1 %vm3383_vm1, %v4996_v22  ;;  %v12203_v22 = vld [vmem:[%s13194_s18 + $0x3a4] ss:$16 sps:$4 sm:$0xff]  }
0x144f   : > { %11196 = vmatpush3.bf16.xpose.msra.mxu0 %v5186_v27  ;;  %11202 = vmatpush3.bf16.msra.mxu1 %v5248_v28  ;;  %v12209_v25 = vld [vmem:[%s13194_s18 + $0x3c4] ss:$16 sps:$4 sm:$0xff]   ;;  %v12207_v27 = vld [vmem:[%s13194_s18 + $0x3c0] ss:$16 sps:$4 sm:$0xff]  }
0x1450   : > { %11197 = vmatprep.mubr.msk.bf16.mxu0 %vm12882_vm0, %v12881_v47  ;;  %11203 = vmatprep.mubr.msk.bf16.mxu1 %vm12882_vm0, %v12881_v47  ;;  %v12215_v28 = vld [vmem:[%s13194_s18 + $0x3e4] ss:$16 sps:$4 sm:$0xff]   ;;  %v12213_v29 = vld [vmem:[%s13194_s18 + $0x3e0] ss:$16 sps:$4 sm:$0xff]  }
0x1451   : > { %5390 = vmatprep.subr.bf16.mxu0 %v12173_v18  ;;  %5431 = vmatprep.subr.bf16.mxu1 %v12179_v39 }
0x1456   : > { %11198 = vmatmul.mubr.msk.bf16.vlgmr.msra.gmra.mrb[40].mxu0 %vm3383_vm1, %v3374_v8 }
0x1457   : > { %5422 = vmatprep.mubr.bf16.mxu0 %v12884_v34 }
0x1529   : > { %v5222_v14 = vpop.f32.mrb[40].mxu0 }
0x152a   : > { %v5228_v30 = vmul.f32 0.125, %v5222_v14  ;;  %v11199_v31 = vpop.f32.mrb[41].mxu0 }
0x152b   : > { %v5225_v32 = vpop.f32.mrb[42].mxu0 }
0x152c   : > { %v11200_v46 = vpop.f32.mrb[43].mxu0  ;;  %v5229_v33 = vadd.f32 %v13684_v52, %v5228_v30  ;;  %v12171_v52 = vld [vmem:[%s13194_s18 + $0x300] ss:$16 sps:$4 sm:$0xff]  }
0x152d   : > { %5391 = vmatpush1.bf16.msra.mxu0 %v12171_v52  ;;  %v12198_v46 = vld [vmem:[%s13194_s18 + $0x388] ss:$16 sps:$4 sm:$0xff]  }
0x152e   : > { %v5230_v23 = vsel %vm3438_vm3, %v5229_v33, -inf  ;;  %5392 = vmatprep.subr.bf16.mxu0 %v12176_v2 }
0x152f   : > { %5231 = vmax.xlane.f32.xlu1 %v5230_v23  ;;  %v12206_v23 = vld [vmem:[%s13194_s18 + $0x3ac] ss:$16 sps:$4 sm:$0xff]  }
0x1531   : > { %5393 = vmatpush1.bf16.msra.mxu0 %v12174_v40 }
0x1532   : > { %5394 = vmatprep.subr.bf16.mxu0 %v12182_v42 }
0x1535   : > { %5395 = vmatpush1.bf16.msra.mxu0 %v12180_v44  ;;  %v12640_v44 = vld [vmem:[%s13250_s9] sm:$0xff] }
0x1536   : > { %5396 = vmatprep.subr.bf16.mxu0 %v12188_v63 }
0x1539   : > { %5397 = vmatpush1.bf16.msra.mxu0 %v12186_v48 }
0x153a   : > { %11207 = vmatprep.subr.bf16.mxu0 %v12881_v47 }
0x15bc   : > { %v5232_v59 = vpop.xlane.xlu1 %5231 }
0x15bd   : > { %v5233_v35 = vsub.f32 %v5229_v33, %v5232_v59  ;;  %v12204_v59 = vld [vmem:[%s13194_s18 + $0x3a8] ss:$16 sps:$4 sm:$0xff]  }
0x15bf   : > { %v5234_v36 = vmul.f32 1.442695, %v5233_v35  ;;  %v12212_v35 = vld [vmem:[%s13194_s18 + $0x3cc] ss:$16 sps:$4 sm:$0xff]  }
0x15c1   : > { %12627 = vpow2.f32 %v5234_v36  ;;  %v12210_v36 = vld [vmem:[%s13194_s18 + $0x3c8] ss:$16 sps:$4 sm:$0xff]  }
0x15cb   : > { %v12628_v37 = vpop.eup %12627 }
0x15cc   : > { %v5236_v38 = vsel %vm3438_vm3, %v12628_v37, 0.0 }
0x15cd   : > { %5237 = vadd.xlane.f32.xlu0 %v5236_v38  ;;  %v12216_v38 = vld [vmem:[%s13194_s18 + $0x3e8] ss:$16 sps:$4 sm:$0xff]  }
0x15e3   : > { %5480 = vrot.lane.b32.xlu0 %v3378_v19, %s12883_s30  ;;  %v12195_v19 = vld [vmem:[%s13194_s18 + $0x380] ss:$16 sps:$4 sm:$0xff]  }
0x15e7   : > { %5477 = vrot.lane.b32.xlu0 %v3374_v8, %s12883_s30  ;;  %v12200_v8 = vld [vmem:[%s13194_s18 + $0x38c] ss:$16 sps:$4 sm:$0xff]  }
0x165a   : > { %v5238_v49 = vpop.xlane.xlu0 %5237 }
0x165b   : > { %12629 = vrcp.f32 %v5238_v49 }
0x165e   : > { %v5481_v0 = vpop.permute.xlu0 %5480 }
0x165f   : > { %v5486_v3 = vsel %vm3383_vm1, %v5481_v0, 0 }
0x1662   : > { %v5478_v4 = vpop.permute.xlu0 %5477 }
0x1665   : > { %v12630_v50 = vpop.eup %12629 }
0x1666   : > { %v5240_v51 = vmul.f32 %v12630_v50, %v12628_v37  ;;  %v12218_v37 = vld [vmem:[%s13194_s18 + $0x3ec] ss:$16 sps:$4 sm:$0xff]  }
0x1667   : > { %v12641_v50 = vld [vmem:[%s13250_s9 + $0x8] sm:$0xff] }
0x1668   : > { %10527 = vst.msk [vmem:[%s13230_s4 + $0x30] sm:$0xff] %vm3438_vm3, %v5240_v51  ;;  %v5243_v26 = vpack.c.bf16 %v5240_v51, %v5240_v51 }
0x166a   : > { %11204 = vmatmul.mubr.msk.bf16.vlgmr.msra.gmra.mrb[40].mxu1 %vm3438_vm3, %v5243_v26 }
0x166b   : > { %5432 = vmatpush1.bf16.msra.mxu1 %v12177_v53  ;;  %5463 = vmatprep.mubr.bf16.mxu1 %v12884_v34 }
0x166c   : > { %5433 = vmatprep.subr.bf16.mxu1 %v12185_v54 }
0x166f   : > { %5434 = vmatpush1.bf16.msra.mxu1 %v12183_v56 }
0x1670   : > { %5435 = vmatprep.subr.bf16.mxu1 %v12191_v57  ;;  %v12642_v57 = vld [vmem:[%s13250_s9 + $0x10] sm:$0xff] }
0x1673   : > { %5436 = vmatpush1.bf16.msra.mxu1 %v12189_v60 }
0x1674   : > { %5437 = vmatprep.subr.bf16.mxu1 %v12194_v61 }
0x1677   : > { %5438 = vmatpush1.bf16.msra.mxu1 %v12192_v62  ;;  %v12643_v62 = vld [vmem:[%s13250_s9 + $0x18] sm:$0xff] }
0x1678   : > { %11213 = vmatprep.subr.bf16.mxu1 %v12881_v47 }
0x173d   : > { %v5284_v45 = vpop.f32.mrb[40].mxu1 }
0x173e   : > { %v5290_v5 = vpack.c.bf16 %v5284_v45, %v5284_v45  ;;  %v11205_v13 = vpop.f32.mrb[41].mxu1 }
0x173f   : > { %v5287_v1 = vpop.f32.mrb[42].mxu1  ;;  %v5894_v13 = vld [vmem:[%s13201_s13] sm:$0xff] }
0x1740   : > { %v11206_v55 = vpop.f32.mrb[43].mxu1  ;;  %10545 = vmatmul.mubr.msk.bf16.vlgmr.msra.gmra.mrb[16].mxu0 %vm3383_vm1, %v5290_v5  ;;  %10546 = vmatmul.mubr.msk.bf16.vlgmr.msra.gmra.mrb[16].mxu1 %vm3383_vm1, %v5290_v5  ;;  %v5898_v1 = vld [vmem:[%s13201_s13 + $0x20] sm:$0xff] }
0x1741   : > { %11208 = vmatpush3.bf16.xpose.msra.mxu0 %v5486_v3  ;;  %11209 = vmatprep.mubr.msk.bf16.mxu0 %vm12882_vm0, %v12881_v47  ;;  %v5895_v3 = vld [vmem:[%s13201_s13 + $0x8] sm:$0xff]  ;;  %v10568_v55 = vcombine.low %v5894_v13, %v5898_v1 }
0x1742   : > { %11215 = vmatprep.mubr.msk.bf16.mxu1 %vm12882_vm0, %v12881_v47  ;;  %5693 = vmatprep.subr.bf16.mxu0 %v12197_v21 }
0x1748   : > { %11210 = vmatmul.mubr.msk.bf16.vlgmr.msra.gmra.mrb[44].mxu0 %vm3383_vm1, %v5478_v4  ;;  %v10569_v4 = vcombine.high %v5894_v13, %v5898_v1 }
0x1749   : > { %5725 = vmatprep.mubr.bf16.mxu0 %v12884_v34  ;;  %5694 = vmatpush1.bf16.msra.mxu0 %v12195_v19 }
0x174a   : > { %5695 = vmatprep.subr.bf16.mxu0 %v12203_v22 }
0x174d   : > { %5696 = vmatpush1.bf16.msra.mxu0 %v12201_v24 }
0x174e   : > { %5697 = vmatprep.subr.bf16.mxu0 %v12209_v25  ;;  %v5918_v25 = vld [vmem:[%s13201_s13 + $0xc0] sm:$0xff] }
0x1751   : > { %5698 = vmatpush1.bf16.msra.mxu0 %v12207_v27  ;;  %v5922_v27 = vld [vmem:[%s13201_s13 + $0xe0] sm:$0xff] }
0x1752   : > { %5699 = vmatprep.subr.bf16.mxu0 %v12215_v28  ;;  %v5919_v28 = vld [vmem:[%s13201_s13 + $0xc8] sm:$0xff] }
0x1755   : > { %5700 = vmatpush1.bf16.msra.mxu0 %v12213_v29  ;;  %v5923_v29 = vld [vmem:[%s13201_s13 + $0xe8] sm:$0xff] }
0x1756   : > { %7430 = vmatprep.subr.bf16.mxu0 %v10569_v4  ;;  %v5959_v4 = vld [vmem:[%s13201_s13 + $0x208] sm:$0xff] }
0x181b   : > { %v5522_v6 = vpop.f32.mrb[44].mxu0 }
0x181c   : > { %v5528_v7 = vmul.f32 0.125, %v5522_v6  ;;  %v11211_v9 = vpop.f32.mrb[45].mxu0  ;;  %v5899_v6 = vld [vmem:[%s13201_s13 + $0x28] sm:$0xff] }
0x181d   : > { %v5525_v58 = vpop.f32.mrb[46].mxu0  ;;  %v5906_v9 = vld [vmem:[%s13201_s13 + $0x60] sm:$0xff] }
0x181e   : > { %v11212_v10 = vpop.f32.mrb[47].mxu0  ;;  %v5529_v12 = vadd.f32 %v12639_v11, %v5528_v7  ;;  %v5902_v7 = vld [vmem:[%s13201_s13 + $0x40] sm:$0xff]  ;;  %v10570_v58 = vcombine.low %v5895_v3, %v5899_v6 }
0x181f   : > { %v10571_v10 = vcombine.high %v5895_v3, %v5899_v6  ;;  %v10577_v11 = vcombine.high %v5902_v7, %v5906_v9  ;;  %v10576_v19 = vcombine.low %v5902_v7, %v5906_v9  ;;  %v5958_v3 = vld [vmem:[%s13201_s13 + $0x200] sm:$0xff]  ;;  %v5963_v6 = vld [vmem:[%s13201_s13 + $0x228] sm:$0xff] }
0x1820   : > { %v5530_v41 = vsel %vm3438_vm3, %v5529_v12, -inf }
0x1821   : > { %5531 = vmax.xlane.f32.xlu0 %v5530_v41  ;;  %v5907_v41 = vld [vmem:[%s13201_s13 + $0x68] sm:$0xff] }
0x18ae   : > { %v5532_v47 = vpop.xlane.xlu0 %5531 }
0x18af   : > { %v5533_v43 = vsub.f32 %v5529_v12, %v5532_v47  ;;  %v5903_v12 = vld [vmem:[%s13201_s13 + $0x48] sm:$0xff]  ;;  %v5910_v47 = vld [vmem:[%s13201_s13 + $0x80] sm:$0xff] }
0x18b0   : > { %v10578_v21 = vcombine.low %v5903_v12, %v5907_v41 }
0x18b1   : > { %v5534_v15 = vmul.f32 1.442695, %v5533_v43  ;;  %v10579_v43 = vcombine.high %v5903_v12, %v5907_v41  ;;  %v5970_v12 = vld [vmem:[%s13201_s13 + $0x260] sm:$0xff]  ;;  %v5967_v41 = vld [vmem:[%s13201_s13 + $0x248] sm:$0xff] }
0x18b3   : > { %12631 = vpow2.f32 %v5534_v15  ;;  %v5914_v15 = vld [vmem:[%s13201_s13 + $0xa0] sm:$0xff] }
0x18b4   : > { %v10585_v22 = vcombine.high %v5910_v47, %v5914_v15 }
0x18bd   : > { %v12632_v16 = vpop.eup %12631 }
0x18be   : > { %v5536_v17 = vsel %vm3438_vm3, %v12632_v16, 0.0 }
0x18bf   : > { %5537 = vadd.xlane.f32.xlu1 %v5536_v17  ;;  %v5915_v17 = vld [vmem:[%s13201_s13 + $0xa8] sm:$0xff] }
0x18d0   : > { %5545 = vrot.lane.b32.xlu1 %v13931_v20, %s12883_s30 }
0x194c   : > { %v5538_v20 = vpop.xlane.xlu1 %5537 }
0x194d   : > { %12633 = vrcp.f32 %v5538_v20  ;;  %v10584_v20 = vcombine.low %v5910_v47, %v5914_v15  ;;  %v5971_v47 = vld [vmem:[%s13201_s13 + $0x268] sm:$0xff]  ;;  %v10634_v15 = vcombine.low %v5959_v4, %v5963_v6 }
0x1950   : > { %v5546_v14 = vpop.permute.xlu1 %5545 }
0x1951   : > { %v5551_v30 = vsel %vm3455_vm2, %v5546_v14, 0  ;;  %v10593_v14 = vcombine.high %v5918_v25, %v5922_v27 }
0x1952   : > { %11214 = vmatpush3.bf16.msra.mxu1 %v5551_v30  ;;  %v10595_v30 = vcombine.high %v5919_v28, %v5923_v29 }
0x1953   : > { %5734 = vmatprep.subr.bf16.mxu1 %v12200_v8 }
0x1957   : > { %v12634_v31 = vpop.eup %12633 }
0x1958   : > { %v5540_v32 = vmul.f32 %v12634_v31, %v12632_v16  ;;  %v5911_v16 = vld [vmem:[%s13201_s13 + $0x88] sm:$0xff]  ;;  %v5926_v31 = vld [vmem:[%s13201_s13 + $0x100] sm:$0xff] }
0x1959   : > { %v10587_v24 = vcombine.high %v5911_v16, %v5915_v17  ;;  %v10586_v8 = vcombine.low %v5911_v16, %v5915_v17  ;;  %v10643_v17 = vcombine.high %v5967_v41, %v5971_v47 }
0x195a   : > { %10548 = vst.msk [vmem:[%s13230_s4 + $0x38] sm:$0xff] %vm3438_vm3, %v5540_v32  ;;  %v5543_v33 = vpack.c.bf16 %v5540_v32, %v5540_v32  ;;  %v5930_v32 = vld [vmem:[%s13201_s13 + $0x120] sm:$0xff] }
0x195c   : > { %11216 = vmatmul.mubr.msk.bf16.vlgmr.msra.gmra.mrb[44].mxu1 %vm3438_vm3, %v5543_v33  ;;  %v5931_v33 = vld [vmem:[%s13201_s13 + $0x128] sm:$0xff] }
0x195d   : > { %5735 = vmatpush1.bf16.msra.mxu1 %v12198_v46  ;;  %5766 = vmatprep.mubr.bf16.mxu1 %v12884_v34  ;;  %v5927_v46 = vld [vmem:[%s13201_s13 + $0x108] sm:$0xff] }
0x195e   : > { %5736 = vmatprep.subr.bf16.mxu1 %v12206_v23  ;;  %v10592_v23 = vcombine.low %v5918_v25, %v5922_v27  ;;  %v10642_v27 = vcombine.low %v5967_v41, %v5971_v47 }
0x1961   : > { %5737 = vmatpush1.bf16.msra.mxu1 %v12204_v59  ;;  %v10594_v59 = vcombine.low %v5919_v28, %v5923_v29 }
0x1962   : > { %5738 = vmatprep.subr.bf16.mxu1 %v12212_v35  ;;  %v10601_v35 = vcombine.high %v5926_v31, %v5930_v32 }
0x1965   : > { %5739 = vmatpush1.bf16.msra.mxu1 %v12210_v36  ;;  %v10603_v36 = vcombine.high %v5927_v46, %v5931_v33 }
0x1966   : > { %5740 = vmatprep.subr.bf16.mxu1 %v12218_v37  ;;  %v5934_v37 = vld [vmem:[%s13201_s13 + $0x140] sm:$0xff] }
0x1969   : > { %5741 = vmatpush1.bf16.msra.mxu1 %v12216_v38  ;;  %v5938_v38 = vld [vmem:[%s13201_s13 + $0x160] sm:$0xff] }
0x196a   : > { %7512 = vmatprep.subr.bf16.mxu1 %v10571_v10  ;;  %v10635_v10 = vcombine.high %v5959_v4, %v5963_v6  ;;  %v5810_v4 = vlaneseq }
0x196c   : > { %v14110_v41 = vshrl.u32 %v5810_v4, 7 }
0x1a2f   : > { %v5587_v52 = vpop.f32.mrb[44].mxu1 }
0x1a30   : > { %v5593_v18 = vpack.c.bf16 %v5587_v52, %v5587_v52  ;;  %v11217_v2 = vpop.f32.mrb[45].mxu1  ;;  %v5935_v52 = vld [vmem:[%s13201_s13 + $0x148] sm:$0xff] }
0x1a31   : > { %v5590_v39 = vpop.f32.mrb[46].mxu1  ;;  %v10600_v2 = vcombine.low %v5926_v31, %v5930_v32 }
0x1a32   : > { %v11218_v40 = vpop.f32.mrb[47].mxu1  ;;  %10566 = vmatmul.mubr.msk.bf16.vlgmr.msra.gmra.mrb[16].mxu0 %vm3383_vm1, %v5593_v18  ;;  %10567 = vmatmul.mubr.msk.bf16.vlgmr.msra.gmra.mrb[16].mxu1 %vm3383_vm1, %v5593_v18  ;;  %v5939_v18 = vld [vmem:[%s13201_s13 + $0x168] sm:$0xff]  ;;  %v10602_v39 = vcombine.low %v5927_v46, %v5931_v33 }
0x1a33   : > { %7431 = vmatpush1.bf16.msra.mxu0 %v10568_v55  ;;  %7513 = vmatpush1.bf16.msra.mxu1 %v10570_v58  ;;  %v10609_v40 = vcombine.high %v5934_v37, %v5938_v38  ;;  %v5962_v55 = vld [vmem:[%s13201_s13 + $0x220] sm:$0xff] }
0x1a34   : > { %7432 = vmatprep.subr.bf16.mxu0 %v10577_v11  ;;  %7514 = vmatprep.subr.bf16.mxu1 %v10579_v43  ;;  %v10633_v58 = vcombine.high %v5958_v3, %v5962_v55  ;;  %v5966_v11 = vld [vmem:[%s13201_s13 + $0x240] sm:$0xff]  ;;  %v10632_v43 = vcombine.low %v5958_v3, %v5962_v55  ;;  %v6011_v3 = vld [vmem:[%s13201_s13 + $0x3a8] sm:$0xff] }
0x1a35   : > { %v10641_v16 = vcombine.high %v5966_v11, %v5970_v12  ;;  %v10640_v25 = vcombine.low %v5966_v11, %v5970_v12  ;;  %v6015_v11 = vld [vmem:[%s13201_s13 + $0x3c8] sm:$0xff] }
0x1a36   : > { %v6019_v12 = vld [vmem:[%s13201_s13 + $0x3e8] sm:$0xff] }
0x1a37   : > { %7433 = vmatpush1.bf16.msra.mxu0 %v10576_v19  ;;  %7515 = vmatpush1.bf16.msra.mxu1 %v10578_v21  ;;  %v5974_v19 = vld [vmem:[%s13201_s13 + $0x280] sm:$0xff] }
0x1a38   : > { %7434 = vmatprep.subr.bf16.mxu0 %v10585_v22  ;;  %7516 = vmatprep.subr.bf16.mxu1 %v10587_v24  ;;  %v5978_v21 = vld [vmem:[%s13201_s13 + $0x2a0] sm:$0xff]  ;;  %v5975_v22 = vld [vmem:[%s13201_s13 + $0x288] sm:$0xff] }
0x1a39   : > { %v5979_v24 = vld [vmem:[%s13201_s13 + $0x2a8] sm:$0xff]  ;;  %v10649_v28 = vcombine.high %v5974_v19, %v5978_v21 }
0x1a3a   : > { %v10651_v29 = vcombine.high %v5975_v22, %v5979_v24 }
0x1a3b   : > { %7435 = vmatpush1.bf16.msra.mxu0 %v10584_v20  ;;  %7517 = vmatpush1.bf16.msra.mxu1 %v10586_v8  ;;  %v10648_v20 = vcombine.low %v5974_v19, %v5978_v21  ;;  %v10650_v8 = vcombine.low %v5975_v22, %v5979_v24  ;;  %v5780_v19 = vld [vmem:[%s13232_s16 + $0x8] sm:$0xff]  ;;  %v10690_v24 = vcombine.low %v6015_v11, %v6019_v12 }
0x1a3c   : > { %7436 = vmatprep.subr.bf16.mxu0 %v10593_v14  ;;  %7518 = vmatprep.subr.bf16.mxu1 %v10595_v30 }
0x1a3f   : > { %7437 = vmatpush1.bf16.msra.mxu0 %v10592_v23  ;;  %7519 = vmatpush1.bf16.msra.mxu1 %v10594_v59 }
0x1a40   : > { %7438 = vmatprep.subr.bf16.mxu0 %v10601_v35  ;;  %7520 = vmatprep.subr.bf16.mxu1 %v10603_v36 }
0x1a43   : > { %7439 = vmatpush1.bf16.msra.mxu0 %v10600_v2  ;;  %7521 = vmatpush1.bf16.msra.mxu1 %v10602_v39 }
0x1a44   : > { %7440 = vmatprep.subr.bf16.mxu0 %v10609_v40 }
0x1b05   : > { %v5727_v34 = vpop.f32.mrb[16].mxu0  ;;  %v5768_v42 = vpop.f32.mrb[16].mxu1 }
0x1b06   : > { %v14011_v63 = vadd.f32 %v12640_v44, %v5727_v34  ;;  %v5729_v48 = vpop.f32.mrb[17].mxu0  ;;  %v5770_v49 = vpop.f32.mrb[17].mxu1  ;;  %v14017_v60 = vadd.f32 %v12642_v57, %v5768_v42  ;;  %v10611_v34 = vcombine.high %v5935_v52, %v5939_v18  ;;  %v5942_v42 = vld [vmem:[%s13201_s13 + $0x180] sm:$0xff] }
0x1b07   : > { %v14014_v51 = vadd.f32 %v12641_v50, %v5729_v48  ;;  %v5731_v53 = vpop.f32.mrb[18].mxu0  ;;  %v5772_v26 = vpop.f32.mrb[18].mxu1  ;;  %v14022_v0 = vadd.f32 %v12643_v62, %v5770_v49  ;;  %v5946_v44 = vld [vmem:[%s13201_s13 + $0x1a0] sm:$0xff]  ;;  %v5943_v48 = vld [vmem:[%s13201_s13 + $0x188] sm:$0xff]  ;;  %v10608_v50 = vcombine.low %v5934_v37, %v5938_v38 }
0x1b08   : > { %v5732_v54 = vpop.f32.mrb[19].mxu0  ;;  %v5773_v56 = vpop.f32.mrb[19].mxu1  ;;  %v5947_v49 = vld [vmem:[%s13201_s13 + $0x1a8] sm:$0xff]  ;;  %v10610_v53 = vcombine.low %v5935_v52, %v5939_v18  ;;  %v10617_v26 = vcombine.high %v5942_v42, %v5946_v44  ;;  %7522 = vmatprep.subr.bf16.mxu1 %v10611_v34  ;;  %v5954_v57 = vld [vmem:[%s13201_s13 + $0x1e0] sm:$0xff] }
0x1b09   : > { %v5781_v61 = vadd.f32 %v14014_v51, %v14011_v63  ;;  %v10619_v54 = vcombine.high %v5943_v48, %v5947_v49  ;;  %v5950_v56 = vld [vmem:[%s13201_s13 + $0x1c0] sm:$0xff]  ;;  %v5955_v62 = vld [vmem:[%s13201_s13 + $0x1e8] sm:$0xff]  ;;  %7441 = vmatpush1.bf16.msra.mxu0 %v10608_v50 }
0x1b0a   : > { %7523 = vmatpush1.bf16.msra.mxu1 %v10610_v53  ;;  %7442 = vmatprep.subr.bf16.mxu0 %v10617_v26  ;;  %v10625_v13 = vcombine.high %v5950_v56, %v5954_v57  ;;  %v10624_v7 = vcombine.low %v5950_v56, %v5954_v57  ;;  %v5986_v37 = vld [vmem:[%s13201_s13 + $0x2e0] sm:$0xff]  ;;  %v5983_v38 = vld [vmem:[%s13201_s13 + $0x2c8] sm:$0xff] }
0x1b0b   : > { %v5782_v45 = vadd.f32 %v14017_v60, %v5781_v61  ;;  %v5951_v61 = vld [vmem:[%s13201_s13 + $0x1c8] sm:$0xff]  ;;  %7524 = vmatprep.subr.bf16.mxu1 %v10619_v54  ;;  %v5990_v34 = vld [vmem:[%s13201_s13 + $0x300] sm:$0xff] }
0x1b0c   : > { %v10627_v1 = vcombine.high %v5951_v61, %v5955_v62  ;;  %v10626_v9 = vcombine.low %v5951_v61, %v5955_v62  ;;  %v5987_v18 = vld [vmem:[%s13201_s13 + $0x2e8] sm:$0xff]  ;;  %v5998_v53 = vld [vmem:[%s13201_s13 + $0x340] sm:$0xff] }
0x1b0d   : > { %v5783_v5 = vadd.f32 %v14022_v0, %v5782_v45  ;;  %v10616_v45 = vcombine.low %v5942_v42, %v5946_v44  ;;  %v10658_v39 = vcombine.low %v5983_v38, %v5987_v18  ;;  %v10659_v40 = vcombine.high %v5983_v38, %v5987_v18  ;;  %v5994_v42 = vld [vmem:[%s13201_s13 + $0x320] sm:$0xff]  ;;  %v5991_v44 = vld [vmem:[%s13201_s13 + $0x308] sm:$0xff] }
0x1b0e   : > { %v5995_v50 = vld [vmem:[%s13201_s13 + $0x328] sm:$0xff]  ;;  %v6002_v26 = vld [vmem:[%s13201_s13 + $0x360] sm:$0xff] }
0x1b0f   : > { %5784 = vadd.xlane.f32.xlu1 %v5783_v5  ;;  %v10618_v5 = vcombine.low %v5943_v48, %v5947_v49  ;;  %7443 = vmatpush1.bf16.msra.mxu0 %v10616_v45  ;;  %v10664_v48 = vcombine.low %v5990_v34, %v5994_v42  ;;  %v10665_v49 = vcombine.high %v5990_v34, %v5994_v42  ;;  %v5999_v61 = vld [vmem:[%s13201_s13 + $0x348] sm:$0xff] }
0x1b10   : > { %7444 = vmatprep.subr.bf16.mxu0 %v10625_v13  ;;  %v10666_v54 = vcombine.low %v5991_v44, %v5995_v50  ;;  %v10667_v56 = vcombine.high %v5991_v44, %v5995_v50  ;;  %v10673_v57 = vcombine.high %v5998_v53, %v6002_v26  ;;  %v6003_v62 = vld [vmem:[%s13201_s13 + $0x368] sm:$0xff]  ;;  %v6010_v13 = vld [vmem:[%s13201_s13 + $0x3a0] sm:$0xff]  ;;  %v10672_v55 = vcombine.low %v5998_v53, %v6002_v26 }
0x1b11   : > { %7525 = vmatpush1.bf16.msra.mxu1 %v10618_v5  ;;  %v10675_v45 = vcombine.high %v5999_v61, %v6003_v62  ;;  %v6006_v5 = vld [vmem:[%s13201_s13 + $0x380] sm:$0xff]  ;;  %v10674_v6 = vcombine.low %v5999_v61, %v6003_v62  ;;  %v5816_v61 = vsub.s32 4, %v14110_v41  ;;  %v5856_v62 = vsub.s32 5, %v14110_v41 }
0x1b12   : > { %7526 = vmatprep.subr.bf16.mxu1 %v10627_v1  ;;  %v6007_v1 = vld [vmem:[%s13201_s13 + $0x388] sm:$0xff]  ;;  %v10680_v47 = vcombine.low %v6006_v5, %v6010_v13 }
0x1b13   : > { %7445 = vmatpush1.bf16.msra.mxu0 %v10624_v7  ;;  %v10681_v7 = vcombine.high %v6006_v5, %v6010_v13  ;;  %v5825_v13 = vrot.slane %v5780_v19, %v5816_v61  ;;  %v5865_v4 = vrot.slane %v5780_v19, %v5856_v62 }
0x1b14   : > { %7446 = vmatprep.subr.bf16.mxu0 %v10633_v58  ;;  %v6014_v58 = vld [vmem:[%s13201_s13 + $0x3c0] sm:$0xff] }
0x1b15   : > { %7527 = vmatpush1.bf16.msra.mxu1 %v10626_v9  ;;  %v10683_v9 = vcombine.high %v6007_v1, %v6011_v3 }
0x1b16   : > { %7528 = vmatprep.subr.bf16.mxu1 %v10635_v10  ;;  %v6018_v10 = vld [vmem:[%s13201_s13 + $0x3e0] sm:$0xff] }
0x1b17   : > { %7447 = vmatpush1.bf16.msra.mxu0 %v10632_v43  ;;  %v10682_v43 = vcombine.low %v6007_v1, %v6011_v3  ;;  %v10688_v22 = vcombine.low %v6014_v58, %v6018_v10 }
0x1b18   : > { %7448 = vmatprep.subr.bf16.mxu0 %v10641_v16  ;;  %v14113_v16 = vsub.s32 1, %v14110_v41 }
0x1b19   : > { %7529 = vmatpush1.bf16.msra.mxu1 %v10634_v15  ;;  %v10689_v15 = vcombine.high %v6014_v58, %v6018_v10 }
0x1b1a   : > { %7530 = vmatprep.subr.bf16.mxu1 %v10643_v17  ;;  %v10691_v17 = vcombine.high %v6015_v11, %v6019_v12  ;;  %v5861_v21 = vrot.slane %v5780_v19, %v14113_v16 }
0x1b1b   : > { %7449 = vmatpush1.bf16.msra.mxu0 %v10640_v25 }
0x1b1c   : > { %7450 = vmatprep.subr.bf16.mxu0 %v10649_v28  ;;  %v14118_v25 = vrot.slane %v5861_v21, %v14113_v16  ;;  %v14124_v28 = vld [vmem:[%s13201_s13 + $0x420] sm:$0xff] }
0x1b1d   : > { %7531 = vmatpush1.bf16.msra.mxu1 %v10642_v27  ;;  %v14121_v27 = vld [vmem:[%s13201_s13 + $0x400] sm:$0xff] }
0x1b1e   : > { %7532 = vmatprep.subr.bf16.mxu1 %v10651_v29  ;;  %v14127_v29 = vld [vmem:[%s13201_s13 + $0x408] sm:$0xff] }
0x1b1f   : > { %7451 = vmatpush1.bf16.msra.mxu0 %v10648_v20  ;;  %v10697_v20 = vcombine.high %v14121_v27, %v14124_v28 }
0x1b21   : > { %7533 = vmatpush1.bf16.msra.mxu1 %v10650_v8  ;;  %v14132_v8 = vld [vmem:[%s13201_s13 + $0x428] sm:$0xff] }
0x1b22   : > { %7534 = vmatprep.subr.bf16.mxu1 %v10659_v40 }
0x1b25   : > { %7535 = vmatpush1.bf16.msra.mxu1 %v10658_v39 }
0x1b26   : > { %7536 = vmatprep.subr.bf16.mxu1 %v10667_v56 }
0x1b29   : > { %7537 = vmatpush1.bf16.msra.mxu1 %v10666_v54 }
0x1b2a   : > { %7538 = vmatprep.subr.bf16.mxu1 %v10675_v45 }
0x1b2d   : > { %7539 = vmatpush1.bf16.msra.mxu1 %v10674_v6 }
0x1b2e   : > { %7540 = vmatprep.subr.bf16.mxu1 %v10683_v9 }
0x1b31   : > { %7541 = vmatpush1.bf16.msra.mxu1 %v10682_v43 }
0x1b32   : > { %7542 = vmatprep.subr.bf16.mxu1 %v10691_v17  ;;  %v5885_v17 = vrot.slane %v5865_v4, %v14113_v16 }
0x1b35   : > { %7543 = vmatpush1.bf16.msra.mxu1 %v10690_v24 }
0x1b9c   : > { %v5785_v14 = vpop.xlane.xlu1 %5784 }
0x1b9d   : > { %v5787_v30 = vmul.f32 0.001953125, %v5785_v14  ;;  %v14135_v14 = vsub.s32 2, %v14110_v41 }
0x1b9f   : > { %v14071_v31 = vsub.f32 %v14011_v63, %v5787_v30  ;;  %v14074_v32 = vsub.f32 %v14014_v51, %v5787_v30  ;;  %v14077_v46 = vsub.f32 %v14017_v60, %v5787_v30  ;;  %v14080_v33 = vsub.f32 %v14022_v0, %v5787_v30  ;;  %v5982_v0 = vld [vmem:[%s13201_s13 + $0x2c0] sm:$0xff] }
0x1ba0   : > { %v10657_v52 = vcombine.high %v5982_v0, %v5986_v37  ;;  %v10656_v2 = vcombine.low %v5982_v0, %v5986_v37  ;;  %v9670_v30 = vsub.s32 6, %v14110_v41 }
0x1ba1   : > { %v5792_v23 = vmul.f32 %v14071_v31, %v14071_v31  ;;  %v5793_v59 = vmul.f32 %v14074_v32, %v14074_v32  ;;  %v5794_v63 = vmul.f32 %v14077_v46, %v14077_v46  ;;  %v5795_v51 = vmul.f32 %v14080_v33, %v14080_v33 }
0x1ba2   : > { %7452 = vmatprep.subr.bf16.mxu0 %v10657_v52  ;;  %v9675_v52 = vrot.slane %v5780_v19, %v14135_v14  ;;  %v14156_v18 = vrot.slane %v5780_v19, %v9670_v30 }
0x1ba3   : > { %v5796_v35 = vadd.f32 %v5793_v59, %v5792_v23  ;;  %7453 = vmatpush1.bf16.msra.mxu0 %v10656_v2  ;;  %v14139_v23 = vsub.s32 3, %v14110_v41  ;;  %v9710_v59 = vsub.s32 7, %v14110_v41 }
0x1ba4   : > { %7454 = vmatprep.subr.bf16.mxu0 %v10665_v49  ;;  %v9699_v49 = vrot.slane %v14156_v18, %v14135_v14 }
0x1ba5   : > { %v5797_v60 = vadd.f32 %v5796_v35, %v5794_v63  ;;  %v5779_v63 = vld [vmem:[%s13232_s16] sm:$0xff]  ;;  %v10696_v35 = vcombine.low %v14121_v27, %v14124_v28  ;;  %v9715_v2 = vrot.slane %v5780_v19, %v14139_v23  ;;  %v14159_v39 = vrot.slane %v5780_v19, %v9710_v59  ;;  %v6047_v28 = vld [vmem:[%s13201_s13 + $0x4c8] sm:$0xff] }
0x1ba6   : > { %v14150_v0 = vrot.slane %v5779_v63, %v9670_v30  ;;  %v9707_v37 = vrot.slane %v5779_v63, %v14139_v23  ;;  %v14153_v38 = vrot.slane %v5779_v63, %v9710_v59  ;;  %v5817_v45 = vrot.slane %v5779_v63, %v5816_v61  ;;  %v6031_v59 = vld [vmem:[%s13201_s13 + $0x448] sm:$0xff]  ;;  %v6050_v27 = vld [vmem:[%s13201_s13 + $0x4e0] sm:$0xff] }
0x1ba7   : > { %v5798_v36 = vadd.f32 %v5797_v60, %v5795_v51  ;;  %7455 = vmatpush1.bf16.msra.mxu0 %v10664_v48  ;;  %v10698_v51 = vcombine.low %v14127_v29, %v14132_v8  ;;  %v10699_v60 = vcombine.high %v14127_v29, %v14132_v8  ;;  %v14172_v48 = vrot.slane %v9675_v52, %v14135_v14  ;;  %v6042_v52 = vld [vmem:[%s13201_s13 + $0x4a0] sm:$0xff] }
0x1ba8   : > { %7456 = vmatprep.subr.bf16.mxu0 %v10673_v57  ;;  %v9691_v34 = vrot.slane %v14150_v0, %v14135_v14  ;;  %v14167_v42 = vrot.slane %v9707_v37, %v14139_v23  ;;  %v9731_v44 = vrot.slane %v14153_v38, %v14139_v23  ;;  %v14177_v50 = vrot.slane %v9715_v2, %v14139_v23  ;;  %v6039_v2 = vld [vmem:[%s13201_s13 + $0x488] sm:$0xff] }
0x1ba9   : > { %5799 = vadd.xlane.f32.xlu0 %v5798_v36  ;;  %v9667_v36 = vrot.slane %v5779_v63, %v14135_v14  ;;  %7553 = vmatprep.subr.bf16.mxu1 %v10699_v60  ;;  %v9739_v53 = vrot.slane %v14159_v39, %v14139_v23  ;;  %v5812_v57 = vsub.s32 0, %v14110_v41  ;;  %v5857_v3 = vrot.slane %v5779_v63, %v5856_v62 }
0x1bab   : > { %7457 = vmatpush1.bf16.msra.mxu0 %v10672_v55  ;;  %v14162_v40 = vrot.slane %v9667_v36, %v14135_v14  ;;  %v5813_v5 = vrot.slane %v5779_v63, %v5812_v57  ;;  %v5821_v1 = vrot.slane %v5780_v19, %v5812_v57  ;;  %v5853_v55 = vrot.slane %v5779_v63, %v14113_v16  ;;  %v6038_v36 = vld [vmem:[%s13201_s13 + $0x480] sm:$0xff] }
0x1bac   : > { %7458 = vmatprep.subr.bf16.mxu0 %v10681_v7  ;;  %v5837_v6 = vrot.slane %v5817_v45, %v5812_v57  ;;  %v5845_v9 = vrot.slane %v5825_v13, %v5812_v57  ;;  %v5877_v11 = vrot.slane %v5857_v3, %v14113_v16  ;;  %v10713_v61 = vcombine.high %v6038_v36, %v6042_v52  ;;  %v6046_v45 = vld [vmem:[%s13201_s13 + $0x4c0] sm:$0xff]  ;;  %v6055_v3 = vld [vmem:[%s13201_s13 + $0x508] sm:$0xff] }
0x1bad   : > { %v5833_v7 = vrot.slane %v5813_v5, %v5812_v57  ;;  %v5841_v58 = vrot.slane %v5821_v1, %v5812_v57  ;;  %v5873_v12 = vrot.slane %v5853_v55, %v14113_v16  ;;  %v6035_v16 = vld [vmem:[%s13201_s13 + $0x468] sm:$0xff]  ;;  %v10712_v29 = vcombine.low %v6038_v36, %v6042_v52  ;;  %v6054_v13 = vld [vmem:[%s13201_s13 + $0x500] sm:$0xff] }
0x1bae   : > { %v10707_v37 = vcombine.high %v6031_v59, %v6035_v16  ;;  %v10706_v57 = vcombine.low %v6031_v59, %v6035_v16  ;;  %v6058_v1 = vld [vmem:[%s13201_s13 + $0x520] sm:$0xff]  ;;  %v6059_v55 = vld [vmem:[%s13201_s13 + $0x528] sm:$0xff]  ;;  %v10720_v4 = vcombine.low %v6046_v45, %v6050_v27 }
0x1baf   : > { %7459 = vmatpush1.bf16.msra.mxu0 %v10680_v47  ;;  %v6078_v16 = vld [vmem:[%s13201_s13 + $0x5c0] sm:$0xff] }
0x1bb0   : > { %7460 = vmatprep.subr.bf16.mxu0 %v10689_v15  ;;  %v6082_v36 = vld [vmem:[%s13201_s13 + $0x5e0] sm:$0xff] }
0x1bb3   : > { %7461 = vmatpush1.bf16.msra.mxu0 %v10688_v22 }
0x1bb4   : > { %7471 = vmatprep.subr.bf16.mxu0 %v10697_v20 }
0x1c36   : > { %v5800_v26 = vpop.xlane.xlu0 %5799 }
0x1c37   : > { %v5801_v54 = vmul.f32 0.001953125, %v5800_v26  ;;  %v6043_v26 = vld [vmem:[%s13201_s13 + $0x4a8] sm:$0xff] }
0x1c38   : > { %v10715_v62 = vcombine.high %v6039_v2, %v6043_v26  ;;  %v10714_v8 = vcombine.low %v6039_v2, %v6043_v26  ;;  %v10753_v26 = vcombine.high %v6078_v16, %v6082_v36 }
0x1c39   : > { %v5802_v56 = vadd.f32 1e-05, %v5801_v54 }
0x1c3b   : > { %12635 = vrsqrt.f32 %v5802_v56 }
0x1c45   : > { %v12636_v10 = vpop.eup %12635 }
0x1c46   : > { %v5805_v41 = vmul.f32 %v12636_v10, %v14074_v32  ;;  %v5804_v47 = vmul.f32 %v12636_v10, %v14071_v31  ;;  %v5807_v43 = vmul.f32 %v12636_v10, %v14080_v33  ;;  %v5806_v15 = vmul.f32 %v12636_v10, %v14077_v46  ;;  %v6030_v32 = vld [vmem:[%s13201_s13 + $0x440] sm:$0xff] }
0x1c47   : > { %v6034_v46 = vld [vmem:[%s13201_s13 + $0x460] sm:$0xff] }
0x1c48   : > { %v5847_v19 = vmul.f32 %v5837_v6, %v5805_v41  ;;  %v5846_v21 = vmul.f32 %v5833_v7, %v5804_v47  ;;  %v5849_v22 = vmul.f32 %v5845_v9, %v5807_v43  ;;  %v5848_v24 = vmul.f32 %v5841_v58, %v5806_v15  ;;  %v6062_v58 = vld [vmem:[%s13201_s13 + $0x540] sm:$0xff] }
0x1c49   : > { %v10704_v56 = vcombine.low %v6030_v32, %v6034_v46  ;;  %v10729_v7 = vcombine.high %v6054_v13, %v6058_v1  ;;  %v10731_v9 = vcombine.high %v6055_v3, %v6059_v55  ;;  %v6066_v10 = vld [vmem:[%s13201_s13 + $0x560] sm:$0xff]  ;;  %v10728_v41 = vcombine.low %v6054_v13, %v6058_v1  ;;  %v6099_v13 = vld [vmem:[%s13201_s13 + $0x668] sm:$0xff] }
0x1c4a   : > { %v14192_v20 = vadd.f32 %v5877_v11, %v5847_v19  ;;  %v14194_v30 = vadd.f32 %v5873_v12, %v5846_v21  ;;  %v14198_v31 = vadd.f32 %v14118_v25, %v5848_v24  ;;  %v14200_v33 = vadd.f32 %v5885_v17, %v5849_v22  ;;  %v6063_v11 = vld [vmem:[%s13201_s13 + $0x548] sm:$0xff]  ;;  %v6070_v17 = vld [vmem:[%s13201_s13 + $0x580] sm:$0xff] }
0x1c4b   : > { %v10705_v25 = vcombine.high %v6030_v32, %v6034_v46  ;;  %v6067_v12 = vld [vmem:[%s13201_s13 + $0x568] sm:$0xff]  ;;  %v10730_v47 = vcombine.low %v6055_v3, %v6059_v55  ;;  %v10737_v43 = vcombine.high %v6062_v58, %v6066_v10  ;;  %v6074_v19 = vld [vmem:[%s13201_s13 + $0x5a0] sm:$0xff]  ;;  %v10736_v24 = vcombine.low %v6062_v58, %v6066_v10 }
0x1c4c   : > { %v14207_v63 = vpack.c.bf16 %v14192_v20, %v14192_v20  ;;  %v14211_v60 = vpack.c.bf16 %v14194_v30, %v14194_v30  ;;  %v14223_v54 = vpack.c.bf16 %v14200_v33, %v14200_v33  ;;  %v10739_v15 = vcombine.high %v6063_v11, %v6067_v12  ;;  %v6071_v21 = vld [vmem:[%s13201_s13 + $0x588] sm:$0xff] }
0x1c4d   : > { %v6075_v22 = vld [vmem:[%s13201_s13 + $0x5a8] sm:$0xff]  ;;  %v10738_v32 = vcombine.low %v6063_v11, %v6067_v12  ;;  %v10745_v46 = vcombine.high %v6070_v17, %v6074_v19  ;;  %v10744_v52 = vcombine.low %v6070_v17, %v6074_v19 }
0x1c4e   : > { %7462 = vmatprep.mubr.bf16.mxu0 %v14207_v63  ;;  %7544 = vmatprep.mubr.bf16.mxu1 %v14207_v63  ;;  %v10747_v59 = vcombine.high %v6071_v21, %v6075_v22  ;;  %v10746_v2 = vcombine.low %v6071_v21, %v6075_v22  ;;  %v6107_v58 = vld [vmem:[%s13201_s13 + $0x6a8] sm:$0xff] }
0x1c4f   : > { %7463 = vmatmul.mubr.bf16.vlgmr.msra.gmra.mrb[48].mxu0 %v14211_v60  ;;  %7545 = vmatmul.mubr.bf16.vlgmr.msra.gmra.mrb[48].mxu1 %v14211_v60  ;;  %v6115_v17 = vld [vmem:[%s13201_s13 + $0x6e8] sm:$0xff] }
0x1c50   : > { %7472 = vmatpush1.bf16.msra.mxu0 %v10696_v35  ;;  %7554 = vmatpush1.bf16.msra.mxu1 %v10698_v51  ;;  %v6051_v35 = vld [vmem:[%s13201_s13 + $0x4e8] sm:$0xff]  ;;  %v10721_v51 = vcombine.high %v6046_v45, %v6050_v27  ;;  %v10752_v27 = vcombine.low %v6078_v16, %v6082_v36 }
0x1c51   : > { %7503 = vmatprep.mubr.bf16.mxu0 %v14223_v54  ;;  %7585 = vmatprep.mubr.bf16.mxu1 %v14223_v54  ;;  %v10723_v5 = vcombine.high %v6047_v28, %v6051_v35  ;;  %v10722_v6 = vcombine.low %v6047_v28, %v6051_v35  ;;  %v6091_v45 = vld [vmem:[%s13201_s13 + $0x628] sm:$0xff] }
0x1c52   : > { %7473 = vmatprep.subr.bf16.mxu0 %v10705_v25  ;;  %7555 = vmatprep.subr.bf16.mxu1 %v10707_v37  ;;  %v6079_v25 = vld [vmem:[%s13201_s13 + $0x5c8] sm:$0xff] }
0x1c53   : > { %v6083_v37 = vld [vmem:[%s13201_s13 + $0x5e8] sm:$0xff] }
0x1c54   : > { %7474 = vmatpush1.bf16.msra.mxu0 %v10704_v56  ;;  %7556 = vmatpush1.bf16.msra.mxu1 %v10706_v57  ;;  %v10755_v56 = vcombine.high %v6079_v25, %v6083_v37  ;;  %v6086_v57 = vld [vmem:[%s13201_s13 + $0x600] sm:$0xff]  ;;  %v10754_v28 = vcombine.low %v6079_v25, %v6083_v37  ;;  %v6123_v16 = vld [vmem:[%s13201_s13 + $0x728] sm:$0xff] }
0x1c55   : > { %7475 = vmatprep.subr.bf16.mxu0 %v10713_v61  ;;  %7557 = vmatprep.subr.bf16.mxu1 %v10715_v62  ;;  %v6090_v61 = vld [vmem:[%s13201_s13 + $0x620] sm:$0xff]  ;;  %v6087_v62 = vld [vmem:[%s13201_s13 + $0x608] sm:$0xff] }
0x1c56   : > { %v10761_v35 = vcombine.high %v6086_v57, %v6090_v61  ;;  %v10760_v1 = vcombine.low %v6086_v57, %v6090_v61  ;;  %v10762_v3 = vcombine.low %v6087_v62, %v6091_v45  ;;  %v6131_v57 = vld [vmem:[%s13201_s13 + $0x768] sm:$0xff] }
0x1c58   : > { %7476 = vmatpush1.bf16.msra.mxu0 %v10712_v29  ;;  %7558 = vmatpush1.bf16.msra.mxu1 %v10714_v8  ;;  %v10763_v29 = vcombine.high %v6087_v62, %v6091_v45  ;;  %v6094_v8 = vld [vmem:[%s13201_s13 + $0x640] sm:$0xff] }
0x1c59   : > { %7477 = vmatprep.subr.bf16.mxu0 %v10721_v51  ;;  %7559 = vmatprep.subr.bf16.mxu1 %v10723_v5  ;;  %v6098_v51 = vld [vmem:[%s13201_s13 + $0x660] sm:$0xff]  ;;  %v6095_v5 = vld [vmem:[%s13201_s13 + $0x648] sm:$0xff] }
0x1c5a   : > { %v10769_v55 = vcombine.high %v6094_v8, %v6098_v51  ;;  %v10768_v10 = vcombine.low %v6094_v8, %v6098_v51  ;;  %v10770_v11 = vcombine.low %v6095_v5, %v6099_v13  ;;  %v6139_v8 = vld [vmem:[%s13201_s13 + $0x7a8] sm:$0xff] }
0x1c5c   : > { %7478 = vmatpush1.bf16.msra.mxu0 %v10720_v4  ;;  %7560 = vmatpush1.bf16.msra.mxu1 %v10722_v6  ;;  %v10771_v4 = vcombine.high %v6095_v5, %v6099_v13  ;;  %v6102_v6 = vld [vmem:[%s13201_s13 + $0x680] sm:$0xff] }
0x1c5d   : > { %7479 = vmatprep.subr.bf16.mxu0 %v10729_v7  ;;  %7561 = vmatprep.subr.bf16.mxu1 %v10731_v9  ;;  %v6106_v7 = vld [vmem:[%s13201_s13 + $0x6a0] sm:$0xff]  ;;  %v6103_v9 = vld [vmem:[%s13201_s13 + $0x688] sm:$0xff] }
0x1c5e   : > { %v10777_v12 = vcombine.high %v6102_v6, %v6106_v7  ;;  %v10776_v19 = vcombine.low %v6102_v6, %v6106_v7  ;;  %v10778_v21 = vcombine.low %v6103_v9, %v6107_v58  ;;  %v6147_v6 = vld [vmem:[%s13201_s13 + $0x7e8] sm:$0xff] }
0x1c60   : > { %7480 = vmatpush1.bf16.msra.mxu0 %v10728_v41  ;;  %7562 = vmatpush1.bf16.msra.mxu1 %v10730_v47  ;;  %v10779_v41 = vcombine.high %v6103_v9, %v6107_v58  ;;  %v6110_v47 = vld [vmem:[%s13201_s13 + $0x6c0] sm:$0xff] }
0x1c61   : > { %7481 = vmatprep.subr.bf16.mxu0 %v10737_v43  ;;  %7563 = vmatprep.subr.bf16.mxu1 %v10739_v15  ;;  %v6114_v43 = vld [vmem:[%s13201_s13 + $0x6e0] sm:$0xff]  ;;  %v6111_v15 = vld [vmem:[%s13201_s13 + $0x6c8] sm:$0xff] }
0x1c62   : > { %v10785_v22 = vcombine.high %v6110_v47, %v6114_v43  ;;  %v10784_v36 = vcombine.low %v6110_v47, %v6114_v43  ;;  %v10786_v25 = vcombine.low %v6111_v15, %v6115_v17  ;;  %v5901_v47 = vld [vmem:[%s13201_s13 + $0x38] sm:$0xff] }
0x1c64   : > { %7482 = vmatpush1.bf16.msra.mxu0 %v10736_v24  ;;  %7564 = vmatpush1.bf16.msra.mxu1 %v10738_v32  ;;  %v10787_v24 = vcombine.high %v6111_v15, %v6115_v17  ;;  %v6118_v32 = vld [vmem:[%s13201_s13 + $0x700] sm:$0xff] }
0x1c65   : > { %7483 = vmatprep.subr.bf16.mxu0 %v10745_v46  ;;  %7565 = vmatprep.subr.bf16.mxu1 %v10747_v59  ;;  %v6122_v46 = vld [vmem:[%s13201_s13 + $0x720] sm:$0xff]  ;;  %v6119_v59 = vld [vmem:[%s13201_s13 + $0x708] sm:$0xff] }
0x1c66   : > { %v10793_v37 = vcombine.high %v6118_v32, %v6122_v46  ;;  %v10792_v61 = vcombine.low %v6118_v32, %v6122_v46  ;;  %v10794_v62 = vcombine.low %v6119_v59, %v6123_v16  ;;  %v5909_v32 = vld [vmem:[%s13201_s13 + $0x78] sm:$0xff] }
0x1c68   : > { %7484 = vmatpush1.bf16.msra.mxu0 %v10744_v52  ;;  %7566 = vmatpush1.bf16.msra.mxu1 %v10746_v2  ;;  %v10795_v52 = vcombine.high %v6119_v59, %v6123_v16  ;;  %v6126_v2 = vld [vmem:[%s13201_s13 + $0x740] sm:$0xff]  ;;  %v14295_v59 = vpack.c.bf16 %v14198_v31, %v14198_v31 }
0x1c69   : > { %7485 = vmatprep.subr.bf16.mxu0 %v10753_v26  ;;  %7567 = vmatprep.subr.bf16.mxu1 %v10755_v56  ;;  %v6130_v26 = vld [vmem:[%s13201_s13 + $0x760] sm:$0xff]  ;;  %v6127_v56 = vld [vmem:[%s13201_s13 + $0x748] sm:$0xff] }
0x1c6a   : > { %v10801_v45 = vcombine.high %v6126_v2, %v6130_v26  ;;  %v10800_v51 = vcombine.low %v6126_v2, %v6130_v26  ;;  %v10802_v5 = vcombine.low %v6127_v56, %v6131_v57  ;;  %v5913_v2 = vld [vmem:[%s13201_s13 + $0x98] sm:$0xff] }
0x1c6b   : > { %v5917_v26 = vld [vmem:[%s13201_s13 + $0xb8] sm:$0xff] }
0x1c6c   : > { %7486 = vmatpush1.bf16.msra.mxu0 %v10752_v27  ;;  %7568 = vmatpush1.bf16.msra.mxu1 %v10754_v28  ;;  %v10803_v27 = vcombine.high %v6127_v56, %v6131_v57  ;;  %v6134_v28 = vld [vmem:[%s13201_s13 + $0x780] sm:$0xff] }
0x1c6d   : > { %7487 = vmatprep.subr.bf16.mxu0 %v10761_v35  ;;  %7569 = vmatprep.subr.bf16.mxu1 %v10763_v29  ;;  %v6138_v35 = vld [vmem:[%s13201_s13 + $0x7a0] sm:$0xff]  ;;  %v6135_v29 = vld [vmem:[%s13201_s13 + $0x788] sm:$0xff] }
0x1c6e   : > { %v10809_v13 = vcombine.high %v6134_v28, %v6138_v35  ;;  %v10808_v7 = vcombine.low %v6134_v28, %v6138_v35  ;;  %v10810_v9 = vcombine.low %v6135_v29, %v6139_v8  ;;  %v5921_v28 = vld [vmem:[%s13201_s13 + $0xd8] sm:$0xff] }
0x1c6f   : > { %v5925_v35 = vld [vmem:[%s13201_s13 + $0xf8] sm:$0xff] }
0x1c70   : > { %7488 = vmatpush1.bf16.msra.mxu0 %v10760_v1  ;;  %7570 = vmatpush1.bf16.msra.mxu1 %v10762_v3  ;;  %v10811_v1 = vcombine.high %v6135_v29, %v6139_v8  ;;  %v6142_v3 = vld [vmem:[%s13201_s13 + $0x7c0] sm:$0xff]  ;;  %v10590_v8 = vcombine.low %v5913_v2, %v5917_v26 }
0x1c71   : > { %7489 = vmatprep.subr.bf16.mxu0 %v10769_v55  ;;  %7571 = vmatprep.subr.bf16.mxu1 %v10771_v4  ;;  %v6146_v55 = vld [vmem:[%s13201_s13 + $0x7e0] sm:$0xff]  ;;  %v6143_v4 = vld [vmem:[%s13201_s13 + $0x7c8] sm:$0xff] }
0x1c72   : > { %v10817_v58 = vcombine.high %v6142_v3, %v6146_v55  ;;  %v10816_v43 = vcombine.low %v6142_v3, %v6146_v55  ;;  %v10818_v15 = vcombine.low %v6143_v4, %v6147_v6  ;;  %v5933_v3 = vld [vmem:[%s13201_s13 + $0x138] sm:$0xff] }
0x1c74   : > { %7490 = vmatpush1.bf16.msra.mxu0 %v10768_v10  ;;  %7572 = vmatpush1.bf16.msra.mxu1 %v10770_v11  ;;  %v10819_v10 = vcombine.high %v6143_v4, %v6147_v6  ;;  %v5896_v11 = vld [vmem:[%s13201_s13 + $0x10] sm:$0xff]  ;;  %v10598_v4 = vcombine.low %v5921_v28, %v5925_v35 }
0x1c75   : > { %7491 = vmatprep.subr.bf16.mxu0 %v10777_v12  ;;  %7573 = vmatprep.subr.bf16.mxu1 %v10779_v41  ;;  %v5900_v12 = vld [vmem:[%s13201_s13 + $0x30] sm:$0xff]  ;;  %v5897_v41 = vld [vmem:[%s13201_s13 + $0x18] sm:$0xff] }
0x1c76   : > { %v10573_v17 = vcombine.high %v5896_v11, %v5900_v12  ;;  %v10572_v46 = vcombine.low %v5896_v11, %v5900_v12  ;;  %v10574_v16 = vcombine.low %v5897_v41, %v5901_v47  ;;  %v5941_v11 = vld [vmem:[%s13201_s13 + $0x178] sm:$0xff] }
0x1c78   : > { %7492 = vmatpush1.bf16.msra.mxu0 %v10776_v19  ;;  %7574 = vmatpush1.bf16.msra.mxu1 %v10778_v21  ;;  %v10575_v19 = vcombine.high %v5897_v41, %v5901_v47  ;;  %v5904_v21 = vld [vmem:[%s13201_s13 + $0x50] sm:$0xff] }
0x1c79   : > { %7493 = vmatprep.subr.bf16.mxu0 %v10785_v22  ;;  %7575 = vmatprep.subr.bf16.mxu1 %v10787_v24  ;;  %v5908_v22 = vld [vmem:[%s13201_s13 + $0x70] sm:$0xff]  ;;  %v5905_v24 = vld [vmem:[%s13201_s13 + $0x58] sm:$0xff] }
0x1c7a   : > { %v10580_v56 = vcombine.low %v5904_v21, %v5908_v22  ;;  %v10582_v57 = vcombine.low %v5905_v24, %v5909_v32 }
0x1c7c   : > { %7494 = vmatpush1.bf16.msra.mxu0 %v10784_v36  ;;  %7576 = vmatpush1.bf16.msra.mxu1 %v10786_v25  ;;  %v10581_v36 = vcombine.high %v5904_v21, %v5908_v22  ;;  %v10583_v25 = vcombine.high %v5905_v24, %v5909_v32  ;;  %v5949_v21 = vld [vmem:[%s13201_s13 + $0x1b8] sm:$0xff] }
0x1c7d   : > { %7495 = vmatprep.subr.bf16.mxu0 %v10793_v37  ;;  %7577 = vmatprep.subr.bf16.mxu1 %v10795_v52  ;;  %v5912_v37 = vld [vmem:[%s13201_s13 + $0x90] sm:$0xff] }
0x1c7e   : > { %v5916_v52 = vld [vmem:[%s13201_s13 + $0xb0] sm:$0xff] }
0x1c7f   : > { %v10588_v29 = vcombine.low %v5912_v37, %v5916_v52 }
0x1c80   : > { %7496 = vmatpush1.bf16.msra.mxu0 %v10792_v61  ;;  %7578 = vmatpush1.bf16.msra.mxu1 %v10794_v62  ;;  %v10589_v61 = vcombine.high %v5912_v37, %v5916_v52  ;;  %v10591_v62 = vcombine.high %v5913_v2, %v5917_v26  ;;  %v5957_v37 = vld [vmem:[%s13201_s13 + $0x1f8] sm:$0xff] }
0x1c81   : > { %7497 = vmatprep.subr.bf16.mxu0 %v10801_v45  ;;  %7579 = vmatprep.subr.bf16.mxu1 %v10803_v27  ;;  %v5920_v45 = vld [vmem:[%s13201_s13 + $0xd0] sm:$0xff] }
0x1c82   : > { %v5924_v27 = vld [vmem:[%s13201_s13 + $0xf0] sm:$0xff] }
0x1c83   : > { %v10596_v55 = vcombine.low %v5920_v45, %v5924_v27 }
0x1c84   : > { %7498 = vmatpush1.bf16.msra.mxu0 %v10800_v51  ;;  %7580 = vmatpush1.bf16.msra.mxu1 %v10802_v5  ;;  %v10599_v51 = vcombine.high %v5921_v28, %v5925_v35  ;;  %v5928_v5 = vld [vmem:[%s13201_s13 + $0x110] sm:$0xff] }
0x1c85   : > { %7499 = vmatprep.subr.bf16.mxu0 %v10809_v13  ;;  %7581 = vmatprep.subr.bf16.mxu1 %v10811_v1  ;;  %v5932_v13 = vld [vmem:[%s13201_s13 + $0x130] sm:$0xff]  ;;  %v5929_v1 = vld [vmem:[%s13201_s13 + $0x118] sm:$0xff] }
0x1c86   : > { %v10605_v6 = vcombine.high %v5928_v5, %v5932_v13  ;;  %v10604_v12 = vcombine.low %v5928_v5, %v5932_v13  ;;  %v10606_v41 = vcombine.low %v5929_v1, %v5933_v3  ;;  %v5973_v5 = vld [vmem:[%s13201_s13 + $0x278] sm:$0xff] }
0x1c88   : > { %7500 = vmatpush1.bf16.msra.mxu0 %v10808_v7  ;;  %7582 = vmatpush1.bf16.msra.mxu1 %v10810_v9  ;;  %v10607_v7 = vcombine.high %v5929_v1, %v5933_v3  ;;  %v5936_v9 = vld [vmem:[%s13201_s13 + $0x150] sm:$0xff] }
0x1c89   : > { %7501 = vmatprep.subr.bf16.mxu0 %v10817_v58  ;;  %7583 = vmatprep.subr.bf16.mxu1 %v10819_v10  ;;  %v5940_v58 = vld [vmem:[%s13201_s13 + $0x170] sm:$0xff]  ;;  %v5937_v10 = vld [vmem:[%s13201_s13 + $0x158] sm:$0xff] }
0x1c8a   : > { %v10613_v47 = vcombine.high %v5936_v9, %v5940_v58  ;;  %v10612_v22 = vcombine.low %v5936_v9, %v5940_v58  ;;  %v10614_v24 = vcombine.low %v5937_v10, %v5941_v11  ;;  %v5981_v9 = vld [vmem:[%s13201_s13 + $0x2b8] sm:$0xff] }
0x1c8c   : > { %7502 = vmatpush1.bf16.msra.mxu0 %v10816_v43  ;;  %7584 = vmatpush1.bf16.msra.mxu1 %v10818_v15  ;;  %v10615_v43 = vcombine.high %v5937_v10, %v5941_v11  ;;  %v5944_v15 = vld [vmem:[%s13201_s13 + $0x190] sm:$0xff] }
0x1c8d   : > { %7594 = vmatprep.subr.bf16.mxu0 %v10573_v17  ;;  %7676 = vmatprep.subr.bf16.mxu1 %v10575_v19  ;;  %v5948_v17 = vld [vmem:[%s13201_s13 + $0x1b0] sm:$0xff]  ;;  %v5945_v19 = vld [vmem:[%s13201_s13 + $0x198] sm:$0xff] }
0x1c8e   : > { %v10621_v32 = vcombine.high %v5944_v15, %v5948_v17  ;;  %v10620_v52 = vcombine.low %v5944_v15, %v5948_v17  ;;  %v10622_v2 = vcombine.low %v5945_v19, %v5949_v21  ;;  %v5989_v15 = vld [vmem:[%s13201_s13 + $0x2f8] sm:$0xff] }
0x1c8f   : > { %7504 = vmatmul.mubr.bf16.vlgmr.msra.gmra.mrb[48].mxu0 %v14295_v59  ;;  %7586 = vmatmul.mubr.bf16.vlgmr.msra.gmra.mrb[48].mxu1 %v14295_v59 }
0x1c90   : > { %7595 = vmatpush1.bf16.msra.mxu0 %v10572_v46  ;;  %7626 = vmatprep.mubr.bf16.mxu0 %v14207_v63  ;;  %v10623_v46 = vcombine.high %v5945_v19, %v5949_v21 }
0x1c91   : > { %7677 = vmatpush1.bf16.msra.mxu1 %v10574_v16  ;;  %7708 = vmatprep.mubr.bf16.mxu1 %v14207_v63  ;;  %v10597_v63 = vcombine.high %v5920_v45, %v5924_v27  ;;  %v5952_v16 = vld [vmem:[%s13201_s13 + $0x1d0] sm:$0xff]  ;;  %v5965_v45 = vld [vmem:[%s13201_s13 + $0x238] sm:$0xff] }
0x1c92   : > { %7596 = vmatprep.subr.bf16.mxu0 %v10581_v36  ;;  %7678 = vmatprep.subr.bf16.mxu1 %v10583_v25  ;;  %v5956_v36 = vld [vmem:[%s13201_s13 + $0x1f0] sm:$0xff]  ;;  %v5953_v25 = vld [vmem:[%s13201_s13 + $0x1d8] sm:$0xff] }
0x1c93   : > { %v10629_v26 = vcombine.high %v5952_v16, %v5956_v36  ;;  %v10628_v27 = vcombine.low %v5952_v16, %v5956_v36  ;;  %v10630_v28 = vcombine.low %v5953_v25, %v5957_v37  ;;  %v5997_v16 = vld [vmem:[%s13201_s13 + $0x338] sm:$0xff] }
0x1c94   : > { %7597 = vmatpush1.bf16.msra.mxu0 %v10580_v56  ;;  %v10631_v56 = vcombine.high %v5953_v25, %v5957_v37 }
0x1c95   : > { %7679 = vmatpush1.bf16.msra.mxu1 %v10582_v57  ;;  %7598 = vmatprep.subr.bf16.mxu0 %v10589_v61  ;;  %v5960_v57 = vld [vmem:[%s13201_s13 + $0x210] sm:$0xff] }
0x1c96   : > { %7680 = vmatprep.subr.bf16.mxu1 %v10591_v62  ;;  %v5964_v61 = vld [vmem:[%s13201_s13 + $0x230] sm:$0xff]  ;;  %v5961_v62 = vld [vmem:[%s13201_s13 + $0x218] sm:$0xff] }
0x1c97   : > { %v10637_v35 = vcombine.high %v5960_v57, %v5964_v61  ;;  %v10636_v13 = vcombine.low %v5960_v57, %v5964_v61  ;;  %v10638_v1 = vcombine.low %v5961_v62, %v5965_v45  ;;  %v6005_v57 = vld [vmem:[%s13201_s13 + $0x378] sm:$0xff] }
0x1c98   : > { %7599 = vmatpush1.bf16.msra.mxu0 %v10588_v29  ;;  %v10639_v29 = vcombine.high %v5961_v62, %v5965_v45 }
0x1c99   : > { %7681 = vmatpush1.bf16.msra.mxu1 %v10590_v8  ;;  %7600 = vmatprep.subr.bf16.mxu0 %v10597_v63  ;;  %v5968_v8 = vld [vmem:[%s13201_s13 + $0x250] sm:$0xff] }
0x1c9a   : > { %7682 = vmatprep.subr.bf16.mxu1 %v10599_v51  ;;  %v5972_v63 = vld [vmem:[%s13201_s13 + $0x270] sm:$0xff]  ;;  %v5969_v51 = vld [vmem:[%s13201_s13 + $0x258] sm:$0xff] }
0x1c9b   : > { %v10645_v3 = vcombine.high %v5968_v8, %v5972_v63  ;;  %v10644_v58 = vcombine.low %v5968_v8, %v5972_v63  ;;  %v10646_v10 = vcombine.low %v5969_v51, %v5973_v5  ;;  %v6013_v8 = vld [vmem:[%s13201_s13 + $0x3b8] sm:$0xff] }
0x1c9c   : > { %7601 = vmatpush1.bf16.msra.mxu0 %v10596_v55  ;;  %v10647_v55 = vcombine.high %v5969_v51, %v5973_v5 }
0x1c9d   : > { %7683 = vmatpush1.bf16.msra.mxu1 %v10598_v4  ;;  %7602 = vmatprep.subr.bf16.mxu0 %v10605_v6  ;;  %v5976_v4 = vld [vmem:[%s13201_s13 + $0x290] sm:$0xff] }
0x1c9e   : > { %7684 = vmatprep.subr.bf16.mxu1 %v10607_v7  ;;  %v5980_v6 = vld [vmem:[%s13201_s13 + $0x2b0] sm:$0xff]  ;;  %v5977_v7 = vld [vmem:[%s13201_s13 + $0x298] sm:$0xff] }
0x1c9f   : > { %v10653_v11 = vcombine.high %v5976_v4, %v5980_v6  ;;  %v10652_v17 = vcombine.low %v5976_v4, %v5980_v6  ;;  %v10654_v19 = vcombine.low %v5977_v7, %v5981_v9  ;;  %v6021_v4 = vld [vmem:[%s13201_s13 + $0x3f8] sm:$0xff] }
0x1ca0   : > { %7603 = vmatpush1.bf16.msra.mxu0 %v10604_v12  ;;  %v10655_v12 = vcombine.high %v5977_v7, %v5981_v9 }
0x1ca1   : > { %7685 = vmatpush1.bf16.msra.mxu1 %v10606_v41  ;;  %7604 = vmatprep.subr.bf16.mxu0 %v10613_v47  ;;  %v5984_v41 = vld [vmem:[%s13201_s13 + $0x2d0] sm:$0xff] }
0x1ca2   : > { %7686 = vmatprep.subr.bf16.mxu1 %v10615_v43  ;;  %v5988_v47 = vld [vmem:[%s13201_s13 + $0x2f0] sm:$0xff]  ;;  %v5985_v43 = vld [vmem:[%s13201_s13 + $0x2d8] sm:$0xff] }
0x1ca3   : > { %v10661_v21 = vcombine.high %v5984_v41, %v5988_v47  ;;  %v10660_v36 = vcombine.low %v5984_v41, %v5988_v47  ;;  %v10662_v25 = vcombine.low %v5985_v43, %v5989_v15  ;;  %v6029_v41 = vld [vmem:[%s13201_s13 + $0x438] sm:$0xff] }
0x1ca4   : > { %7605 = vmatpush1.bf16.msra.mxu0 %v10612_v22  ;;  %v10663_v22 = vcombine.high %v5985_v43, %v5989_v15 }
0x1ca5   : > { %7687 = vmatpush1.bf16.msra.mxu1 %v10614_v24  ;;  %7606 = vmatprep.subr.bf16.mxu0 %v10621_v32  ;;  %v5992_v24 = vld [vmem:[%s13201_s13 + $0x310] sm:$0xff] }
0x1ca6   : > { %7688 = vmatprep.subr.bf16.mxu1 %v10623_v46  ;;  %v5996_v32 = vld [vmem:[%s13201_s13 + $0x330] sm:$0xff]  ;;  %v5993_v46 = vld [vmem:[%s13201_s13 + $0x318] sm:$0xff] }
0x1ca7   : > { %v10669_v37 = vcombine.high %v5992_v24, %v5996_v32  ;;  %v10668_v61 = vcombine.low %v5992_v24, %v5996_v32  ;;  %v10670_v62 = vcombine.low %v5993_v46, %v5997_v16  ;;  %v6033_v24 = vld [vmem:[%s13201_s13 + $0x458] sm:$0xff] }
0x1ca8   : > { %7607 = vmatpush1.bf16.msra.mxu0 %v10620_v52  ;;  %v10671_v52 = vcombine.high %v5993_v46, %v5997_v16  ;;  %v6037_v32 = vld [vmem:[%s13201_s13 + $0x478] sm:$0xff] }
0x1ca9   : > { %7689 = vmatpush1.bf16.msra.mxu1 %v10622_v2  ;;  %7608 = vmatprep.subr.bf16.mxu0 %v10629_v26  ;;  %v6000_v2 = vld [vmem:[%s13201_s13 + $0x350] sm:$0xff] }
0x1caa   : > { %7690 = vmatprep.subr.bf16.mxu1 %v10631_v56  ;;  %v6004_v26 = vld [vmem:[%s13201_s13 + $0x370] sm:$0xff]  ;;  %v6001_v56 = vld [vmem:[%s13201_s13 + $0x358] sm:$0xff] }
0x1cab   : > { %v10677_v45 = vcombine.high %v6000_v2, %v6004_v26  ;;  %v10676_v63 = vcombine.low %v6000_v2, %v6004_v26  ;;  %v10678_v51 = vcombine.low %v6001_v56, %v6005_v57  ;;  %v6045_v2 = vld [vmem:[%s13201_s13 + $0x4b8] sm:$0xff] }
0x1cac   : > { %7609 = vmatpush1.bf16.msra.mxu0 %v10628_v27  ;;  %v10679_v27 = vcombine.high %v6001_v56, %v6005_v57  ;;  %v10710_v56 = vcombine.low %v6033_v24, %v6037_v32 }
0x1cad   : > { %7691 = vmatpush1.bf16.msra.mxu1 %v10630_v28  ;;  %7610 = vmatprep.subr.bf16.mxu0 %v10637_v35  ;;  %v6008_v28 = vld [vmem:[%s13201_s13 + $0x390] sm:$0xff] }
0x1cae   : > { %7692 = vmatprep.subr.bf16.mxu1 %v10639_v29  ;;  %v6012_v35 = vld [vmem:[%s13201_s13 + $0x3b0] sm:$0xff]  ;;  %v6009_v29 = vld [vmem:[%s13201_s13 + $0x398] sm:$0xff] }
0x1caf   : > { %v10685_v5 = vcombine.high %v6008_v28, %v6012_v35  ;;  %v10684_v6 = vcombine.low %v6008_v28, %v6012_v35  ;;  %v10686_v7 = vcombine.low %v6009_v29, %v6013_v8 }
0x1cb0   : > { %7611 = vmatpush1.bf16.msra.mxu0 %v10636_v13  ;;  %v10687_v13 = vcombine.high %v6009_v29, %v6013_v8  ;;  %v6056_v8 = vld [vmem:[%s13201_s13 + $0x510] sm:$0xff] }
0x1cb1   : > { %7693 = vmatpush1.bf16.msra.mxu1 %v10638_v1  ;;  %7612 = vmatprep.subr.bf16.mxu0 %v10645_v3  ;;  %v6016_v1 = vld [vmem:[%s13201_s13 + $0x3d0] sm:$0xff] }
0x1cb2   : > { %7694 = vmatprep.subr.bf16.mxu1 %v10647_v55  ;;  %v6020_v3 = vld [vmem:[%s13201_s13 + $0x3f0] sm:$0xff]  ;;  %v6017_v55 = vld [vmem:[%s13201_s13 + $0x3d8] sm:$0xff] }
0x1cb3   : > { %v10693_v9 = vcombine.high %v6016_v1, %v6020_v3  ;;  %v10692_v47 = vcombine.low %v6016_v1, %v6020_v3  ;;  %v10694_v43 = vcombine.low %v6017_v55, %v6021_v4 }
0x1cb4   : > { %7613 = vmatpush1.bf16.msra.mxu0 %v10644_v58  ;;  %v10695_v58 = vcombine.high %v6017_v55, %v6021_v4  ;;  %v6064_v4 = vld [vmem:[%s13201_s13 + $0x550] sm:$0xff] }
0x1cb5   : > { %7695 = vmatpush1.bf16.msra.mxu1 %v10646_v10  ;;  %7614 = vmatprep.subr.bf16.mxu0 %v10653_v11  ;;  %v6024_v10 = vld [vmem:[%s13201_s13 + $0x410] sm:$0xff] }
0x1cb6   : > { %7696 = vmatprep.subr.bf16.mxu1 %v10655_v12  ;;  %v6028_v11 = vld [vmem:[%s13201_s13 + $0x430] sm:$0xff]  ;;  %v6025_v12 = vld [vmem:[%s13201_s13 + $0x418] sm:$0xff] }
0x1cb7   : > { %v10701_v15 = vcombine.high %v6024_v10, %v6028_v11  ;;  %v10702_v46 = vcombine.low %v6025_v12, %v6029_v41 }
0x1cb8   : > { %7615 = vmatpush1.bf16.msra.mxu0 %v10652_v17  ;;  %v10703_v17 = vcombine.high %v6025_v12, %v6029_v41  ;;  %v6072_v41 = vld [vmem:[%s13201_s13 + $0x590] sm:$0xff] }
0x1cb9   : > { %7697 = vmatpush1.bf16.msra.mxu1 %v10654_v19  ;;  %7616 = vmatprep.subr.bf16.mxu0 %v10661_v21  ;;  %v6032_v19 = vld [vmem:[%s13201_s13 + $0x450] sm:$0xff] }
0x1cba   : > { %7698 = vmatprep.subr.bf16.mxu1 %v10663_v22  ;;  %v6036_v21 = vld [vmem:[%s13201_s13 + $0x470] sm:$0xff]  ;;  %v10700_v22 = vcombine.low %v6024_v10, %v6028_v11 }
0x1cbb   : > { %v10709_v16 = vcombine.high %v6032_v19, %v6036_v21  ;;  %v10708_v26 = vcombine.low %v6032_v19, %v6036_v21 }
0x1cbc   : > { %7617 = vmatpush1.bf16.msra.mxu0 %v10660_v36  ;;  %v6040_v36 = vld [vmem:[%s13201_s13 + $0x490] sm:$0xff] }
0x1cbd   : > { %7699 = vmatpush1.bf16.msra.mxu1 %v10662_v25  ;;  %7618 = vmatprep.subr.bf16.mxu0 %v10669_v37  ;;  %v6044_v25 = vld [vmem:[%s13201_s13 + $0x4b0] sm:$0xff]  ;;  %v10711_v37 = vcombine.high %v6033_v24, %v6037_v32 }
0x1cbe   : > { %7700 = vmatprep.subr.bf16.mxu1 %v10671_v52  ;;  %v6041_v52 = vld [vmem:[%s13201_s13 + $0x498] sm:$0xff]  ;;  %v10717_v57 = vcombine.high %v6040_v36, %v6044_v25  ;;  %v10716_v28 = vcombine.low %v6040_v36, %v6044_v25  ;;  %v6080_v24 = vld [vmem:[%s13201_s13 + $0x5d0] sm:$0xff] }
0x1cbf   : > { %v10718_v35 = vcombine.low %v6041_v52, %v6045_v2  ;;  %v6084_v32 = vld [vmem:[%s13201_s13 + $0x5f0] sm:$0xff] }
0x1cc0   : > { %7619 = vmatpush1.bf16.msra.mxu0 %v10668_v61  ;;  %v10719_v61 = vcombine.high %v6041_v52, %v6045_v2  ;;  %v6088_v2 = vld [vmem:[%s13201_s13 + $0x610] sm:$0xff] }
0x1cc1   : > { %7701 = vmatpush1.bf16.msra.mxu1 %v10670_v62  ;;  %7620 = vmatprep.subr.bf16.mxu0 %v10677_v45  ;;  %v6048_v62 = vld [vmem:[%s13201_s13 + $0x4d0] sm:$0xff] }
0x1cc2   : > { %7702 = vmatprep.subr.bf16.mxu1 %v10679_v27  ;;  %v6052_v45 = vld [vmem:[%s13201_s13 + $0x4f0] sm:$0xff]  ;;  %v6049_v27 = vld [vmem:[%s13201_s13 + $0x4d8] sm:$0xff] }
0x1cc3   : > { %v10725_v29 = vcombine.high %v6048_v62, %v6052_v45 }
0x1cc4   : > { %7621 = vmatpush1.bf16.msra.mxu0 %v10676_v63  ;;  %v6060_v63 = vld [vmem:[%s13201_s13 + $0x530] sm:$0xff] }
0x1cc5   : > { %7703 = vmatpush1.bf16.msra.mxu1 %v10678_v51  ;;  %7622 = vmatprep.subr.bf16.mxu0 %v10685_v5  ;;  %v6057_v51 = vld [vmem:[%s13201_s13 + $0x518] sm:$0xff]  ;;  %v10733_v3 = vcombine.high %v6056_v8, %v6060_v63 }
0x1cc6   : > { %7704 = vmatprep.subr.bf16.mxu1 %v10687_v13  ;;  %v6061_v5 = vld [vmem:[%s13201_s13 + $0x538] sm:$0xff]  ;;  %v10724_v13 = vcombine.low %v6048_v62, %v6052_v45 }
0x1cc7   : > { %v10735_v55 = vcombine.high %v6057_v51, %v6061_v5  ;;  %v10734_v10 = vcombine.low %v6057_v51, %v6061_v5  ;;  %v6104_v5 = vld [vmem:[%s13201_s13 + $0x690] sm:$0xff] }
0x1cc8   : > { %7623 = vmatpush1.bf16.msra.mxu0 %v10684_v6  ;;  %v6068_v6 = vld [vmem:[%s13201_s13 + $0x570] sm:$0xff] }
0x1cc9   : > { %7705 = vmatpush1.bf16.msra.mxu1 %v10686_v7  ;;  %7624 = vmatprep.subr.bf16.mxu0 %v10693_v9  ;;  %v6065_v7 = vld [vmem:[%s13201_s13 + $0x558] sm:$0xff]  ;;  %v10741_v11 = vcombine.high %v6064_v4, %v6068_v6 }
0x1cca   : > { %7706 = vmatprep.subr.bf16.mxu1 %v10695_v58  ;;  %v6069_v9 = vld [vmem:[%s13201_s13 + $0x578] sm:$0xff]  ;;  %v10732_v58 = vcombine.low %v6056_v8, %v6060_v63 }
0x1ccb   : > { %v10743_v12 = vcombine.high %v6065_v7, %v6069_v9  ;;  %v10742_v19 = vcombine.low %v6065_v7, %v6069_v9  ;;  %v6112_v9 = vld [vmem:[%s13201_s13 + $0x6d0] sm:$0xff] }
0x1ccc   : > { %7625 = vmatpush1.bf16.msra.mxu0 %v10692_v47  ;;  %v6076_v47 = vld [vmem:[%s13201_s13 + $0x5b0] sm:$0xff] }
0x1ccd   : > { %7707 = vmatpush1.bf16.msra.mxu1 %v10694_v43  ;;  %7635 = vmatprep.subr.bf16.mxu0 %v10701_v15  ;;  %v6073_v43 = vld [vmem:[%s13201_s13 + $0x598] sm:$0xff]  ;;  %v10749_v21 = vcombine.high %v6072_v41, %v6076_v47  ;;  %v10748_v36 = vcombine.low %v6072_v41, %v6076_v47 }
0x1cce   : > { %7717 = vmatprep.subr.bf16.mxu1 %v10703_v17  ;;  %v6077_v15 = vld [vmem:[%s13201_s13 + $0x5b8] sm:$0xff]  ;;  %v10740_v17 = vcombine.low %v6064_v4, %v6068_v6 }
0x1ccf   : > { %7627 = vmatmul.mubr.bf16.vlgmr.msra.gmra.mrb[52].mxu0 %v14211_v60  ;;  %v10750_v25 = vcombine.low %v6073_v43, %v6077_v15 }
0x1cd0   : > { %7709 = vmatmul.mubr.bf16.vlgmr.msra.gmra.mrb[52].mxu1 %v14211_v60  ;;  %7636 = vmatpush1.bf16.msra.mxu0 %v10700_v22  ;;  %v6053_v60 = vld [vmem:[%s13201_s13 + $0x4f8] sm:$0xff]  ;;  %v10751_v22 = vcombine.high %v6073_v43, %v6077_v15  ;;  %v6120_v15 = vld [vmem:[%s13201_s13 + $0x710] sm:$0xff] }
0x1cd1   : > { %7667 = vmatprep.mubr.bf16.mxu0 %v14223_v54  ;;  %7718 = vmatpush1.bf16.msra.mxu1 %v10702_v46  ;;  %v10726_v1 = vcombine.low %v6049_v27, %v6053_v60  ;;  %v6081_v46 = vld [vmem:[%s13201_s13 + $0x5d8] sm:$0xff] }
0x1cd2   : > { %7749 = vmatprep.mubr.bf16.mxu1 %v14223_v54  ;;  %7637 = vmatprep.subr.bf16.mxu0 %v10709_v16  ;;  %v10727_v54 = vcombine.high %v6049_v27, %v6053_v60  ;;  %v6085_v16 = vld [vmem:[%s13201_s13 + $0x5f8] sm:$0xff]  ;;  %v6096_v60 = vld [vmem:[%s13201_s13 + $0x650] sm:$0xff] }
0x1cd3   : > { %7719 = vmatprep.subr.bf16.mxu1 %v10711_v37  ;;  %v10757_v37 = vcombine.high %v6080_v24, %v6084_v32  ;;  %v10759_v52 = vcombine.high %v6081_v46, %v6085_v16  ;;  %v10758_v62 = vcombine.low %v6081_v46, %v6085_v16  ;;  %v6128_v16 = vld [vmem:[%s13201_s13 + $0x750] sm:$0xff] }
0x1cd4   : > { %7638 = vmatpush1.bf16.msra.mxu0 %v10708_v26  ;;  %v6092_v26 = vld [vmem:[%s13201_s13 + $0x630] sm:$0xff] }
0x1cd5   : > { %7720 = vmatpush1.bf16.msra.mxu1 %v10710_v56  ;;  %7639 = vmatprep.subr.bf16.mxu0 %v10717_v57  ;;  %v6089_v56 = vld [vmem:[%s13201_s13 + $0x618] sm:$0xff]  ;;  %v10765_v45 = vcombine.high %v6088_v2, %v6092_v26 }
0x1cd6   : > { %7721 = vmatprep.subr.bf16.mxu1 %v10719_v61  ;;  %v6093_v57 = vld [vmem:[%s13201_s13 + $0x638] sm:$0xff]  ;;  %v10756_v61 = vcombine.low %v6080_v24, %v6084_v32 }
0x1cd7   : > { %v10767_v27 = vcombine.high %v6089_v56, %v6093_v57  ;;  %v10766_v8 = vcombine.low %v6089_v56, %v6093_v57  ;;  %v6136_v57 = vld [vmem:[%s13201_s13 + $0x790] sm:$0xff] }
0x1cd8   : > { %7640 = vmatpush1.bf16.msra.mxu0 %v10716_v28  ;;  %v6100_v28 = vld [vmem:[%s13201_s13 + $0x670] sm:$0xff] }
0x1cd9   : > { %7722 = vmatpush1.bf16.msra.mxu1 %v10718_v35  ;;  %7641 = vmatprep.subr.bf16.mxu0 %v10725_v29  ;;  %v6097_v35 = vld [vmem:[%s13201_s13 + $0x658] sm:$0xff]  ;;  %v10773_v63 = vcombine.high %v6096_v60, %v6100_v28 }
0x1cda   : > { %7723 = vmatprep.subr.bf16.mxu1 %v10727_v54  ;;  %v6101_v29 = vld [vmem:[%s13201_s13 + $0x678] sm:$0xff]  ;;  %v10764_v54 = vcombine.low %v6088_v2, %v6092_v26 }
0x1cdb   : > { %v10775_v51 = vcombine.high %v6097_v35, %v6101_v29  ;;  %v10774_v4 = vcombine.low %v6097_v35, %v6101_v29  ;;  %v6144_v29 = vld [vmem:[%s13201_s13 + $0x7d0] sm:$0xff] }
0x1cdc   : > { %7642 = vmatpush1.bf16.msra.mxu0 %v10724_v13  ;;  %v6108_v13 = vld [vmem:[%s13201_s13 + $0x6b0] sm:$0xff] }
0x1cdd   : > { %7724 = vmatpush1.bf16.msra.mxu1 %v10726_v1  ;;  %7643 = vmatprep.subr.bf16.mxu0 %v10733_v3  ;;  %v6105_v1 = vld [vmem:[%s13201_s13 + $0x698] sm:$0xff]  ;;  %v10781_v6 = vcombine.high %v6104_v5, %v6108_v13 }
0x1cde   : > { %7725 = vmatprep.subr.bf16.mxu1 %v10735_v55  ;;  %v6109_v3 = vld [vmem:[%s13201_s13 + $0x6b8] sm:$0xff]  ;;  %v10772_v55 = vcombine.low %v6096_v60, %v6100_v28 }
0x1cdf   : > { %v10783_v7 = vcombine.high %v6105_v1, %v6109_v3  ;;  %v10782_v41 = vcombine.low %v6105_v1, %v6109_v3 }
0x1ce0   : > { %7644 = vmatpush1.bf16.msra.mxu0 %v10732_v58  ;;  %v6116_v58 = vld [vmem:[%s13201_s13 + $0x6f0] sm:$0xff] }
0x1ce1   : > { %7726 = vmatpush1.bf16.msra.mxu1 %v10734_v10  ;;  %7645 = vmatprep.subr.bf16.mxu0 %v10741_v11  ;;  %v6113_v10 = vld [vmem:[%s13201_s13 + $0x6d8] sm:$0xff]  ;;  %v10789_v47 = vcombine.high %v6112_v9, %v6116_v58 }
0x1ce2   : > { %7727 = vmatprep.subr.bf16.mxu1 %v10743_v12  ;;  %v6117_v11 = vld [vmem:[%s13201_s13 + $0x6f8] sm:$0xff]  ;;  %v10780_v12 = vcombine.low %v6104_v5, %v6108_v13 }
0x1ce3   : > { %v10791_v43 = vcombine.high %v6113_v10, %v6117_v11  ;;  %v10790_v24 = vcombine.low %v6113_v10, %v6117_v11  ;;  %v12230_v10 = vld [vmem:[%s13203_s3 + $0x2c] ss:$16 sps:$4 sm:$0xff]   ;;  %v12225_v11 = vld [vmem:[%s13203_s3 + $0x20] ss:$16 sps:$4 sm:$0xff]  }
0x1ce4   : > { %7646 = vmatpush1.bf16.msra.mxu0 %v10740_v17  ;;  %v6124_v17 = vld [vmem:[%s13201_s13 + $0x730] sm:$0xff] }
0x1ce5   : > { %7728 = vmatpush1.bf16.msra.mxu1 %v10742_v19  ;;  %7647 = vmatprep.subr.bf16.mxu0 %v10749_v21  ;;  %v6121_v19 = vld [vmem:[%s13201_s13 + $0x718] sm:$0xff]  ;;  %v10797_v32 = vcombine.high %v6120_v15, %v6124_v17 }
0x1ce6   : > { %7729 = vmatprep.subr.bf16.mxu1 %v10751_v22  ;;  %v6125_v21 = vld [vmem:[%s13201_s13 + $0x738] sm:$0xff]  ;;  %v10788_v22 = vcombine.low %v6112_v9, %v6116_v58  ;;  %v12227_v58 = vld [vmem:[%s13203_s3 + $0x24] ss:$16 sps:$4 sm:$0xff]  }
0x1ce7   : > { %v10799_v46 = vcombine.high %v6121_v19, %v6125_v21  ;;  %v10798_v2 = vcombine.low %v6121_v19, %v6125_v21  ;;  %v12222_v9 = vld [vmem:[%s13203_s3 + $0x8] ss:$16 sps:$4 sm:$0xff]   ;;  %v12237_v19 = vld [vmem:[%s13203_s3 + $0x60] ss:$16 sps:$4 sm:$0xff]  }
0x1ce8   : > { %7648 = vmatpush1.bf16.msra.mxu0 %v10748_v36  ;;  %v6132_v36 = vld [vmem:[%s13201_s13 + $0x770] sm:$0xff]  ;;  %v12240_v21 = vld [vmem:[%s13203_s3 + $0x68] ss:$16 sps:$4 sm:$0xff]  }
0x1ce9   : > { %7730 = vmatpush1.bf16.msra.mxu1 %v10750_v25  ;;  %7649 = vmatprep.subr.bf16.mxu0 %v10757_v37  ;;  %v6129_v25 = vld [vmem:[%s13201_s13 + $0x758] sm:$0xff]  ;;  %v10805_v26 = vcombine.high %v6128_v16, %v6132_v36 }
0x1cea   : > { %7731 = vmatprep.subr.bf16.mxu1 %v10759_v52  ;;  %v6133_v37 = vld [vmem:[%s13201_s13 + $0x778] sm:$0xff]  ;;  %v10796_v52 = vcombine.low %v6120_v15, %v6124_v17 }
0x1ceb   : > { %v10807_v56 = vcombine.high %v6129_v25, %v6133_v37  ;;  %v10806_v60 = vcombine.low %v6129_v25, %v6133_v37  ;;  %v12234_v15 = vld [vmem:[%s13203_s3 + $0x48] ss:$16 sps:$4 sm:$0xff]   ;;  %v12242_v17 = vld [vmem:[%s13203_s3 + $0x6c] ss:$16 sps:$4 sm:$0xff]   ;;  %v12249_v25 = vld [vmem:[%s13203_s3 + $0xa0] ss:$16 sps:$4 sm:$0xff]  }
0x1cec   : > { %7650 = vmatpush1.bf16.msra.mxu0 %v10756_v61  ;;  %v6140_v61 = vld [vmem:[%s13201_s13 + $0x7b0] sm:$0xff]  ;;  %v12252_v37 = vld [vmem:[%s13203_s3 + $0xa8] ss:$16 sps:$4 sm:$0xff]  }
0x1ced   : > { %7732 = vmatpush1.bf16.msra.mxu1 %v10758_v62  ;;  %7651 = vmatprep.subr.bf16.mxu0 %v10765_v45  ;;  %v6137_v62 = vld [vmem:[%s13201_s13 + $0x798] sm:$0xff]  ;;  %v10813_v28 = vcombine.high %v6136_v57, %v6140_v61 }
0x1cee   : > { %7733 = vmatprep.subr.bf16.mxu1 %v10767_v27  ;;  %v6141_v45 = vld [vmem:[%s13201_s13 + $0x7b8] sm:$0xff]  ;;  %v10804_v27 = vcombine.low %v6128_v16, %v6132_v36  ;;  %v12251_v16 = vld [vmem:[%s13203_s3 + $0xa4] ss:$16 sps:$4 sm:$0xff]  }
0x1cef   : > { %v10815_v35 = vcombine.high %v6137_v62, %v6141_v45  ;;  %v10814_v5 = vcombine.low %v6137_v62, %v6141_v45  ;;  %v12254_v36 = vld [vmem:[%s13203_s3 + $0xac] ss:$16 sps:$4 sm:$0xff]   ;;  %v12261_v62 = vld [vmem:[%s13203_s3 + $0xe0] ss:$16 sps:$4 sm:$0xff]   ;;  %v12264_v45 = vld [vmem:[%s13203_s3 + $0xe8] ss:$16 sps:$4 sm:$0xff]  }
0x1cf0   : > { %7652 = vmatpush1.bf16.msra.mxu0 %v10764_v54  ;;  %v6148_v54 = vld [vmem:[%s13201_s13 + $0x7f0] sm:$0xff] }
0x1cf1   : > { %7734 = vmatpush1.bf16.msra.mxu1 %v10766_v8  ;;  %7653 = vmatprep.subr.bf16.mxu0 %v10773_v63  ;;  %v6145_v8 = vld [vmem:[%s13201_s13 + $0x7d8] sm:$0xff]  ;;  %v10821_v13 = vcombine.high %v6144_v29, %v6148_v54  ;;  %v10820_v3 = vcombine.low %v6144_v29, %v6148_v54  ;;  %v12275_v29 = vld [vmem:[%s13203_s3 + $0x124] ss:$16 sps:$4 sm:$0xff]  }
0x1cf2   : > { %7735 = vmatprep.subr.bf16.mxu1 %v10775_v51  ;;  %v6149_v63 = vld [vmem:[%s13201_s13 + $0x7f8] sm:$0xff]  ;;  %v10812_v51 = vcombine.low %v6136_v57, %v6140_v61  ;;  %v12263_v57 = vld [vmem:[%s13203_s3 + $0xe4] ss:$16 sps:$4 sm:$0xff]  }
0x1cf3   : > { %v10823_v1 = vcombine.high %v6145_v8, %v6149_v63  ;;  %v12266_v61 = vld [vmem:[%s13203_s3 + $0xec] ss:$16 sps:$4 sm:$0xff]  }
0x1cf4   : > { %7654 = vmatpush1.bf16.msra.mxu0 %v10772_v55  ;;  %v10822_v55 = vcombine.low %v6145_v8, %v6149_v63  ;;  %v12278_v54 = vld [vmem:[%s13203_s3 + $0x12c] ss:$16 sps:$4 sm:$0xff]   ;;  %v12273_v8 = vld [vmem:[%s13203_s3 + $0x120] ss:$16 sps:$4 sm:$0xff]   ;;  %v12276_v63 = vld [vmem:[%s13203_s3 + $0x128] ss:$16 sps:$4 sm:$0xff]  }
0x1cf5   : > { %7736 = vmatpush1.bf16.msra.mxu1 %v10774_v4  ;;  %7655 = vmatprep.subr.bf16.mxu0 %v10781_v6  ;;  %v12221_v4 = vld [vmem:[%s13203_s3 + $0x4] ss:$16 sps:$4 sm:$0xff]   ;;  %v12224_v6 = vld [vmem:[%s13203_s3 + $0xc] ss:$16 sps:$4 sm:$0xff]  }
0x1cf6   : > { %7737 = vmatprep.subr.bf16.mxu1 %v10783_v7  ;;  %v12219_v7 = vld [vmem:[%s13203_s3] ss:$16 sps:$4 sm:$0xff]  }
0x1cf8   : > { %7656 = vmatpush1.bf16.msra.mxu0 %v10780_v12  ;;  %v12228_v12 = vld [vmem:[%s13203_s3 + $0x28] ss:$16 sps:$4 sm:$0xff]  }
0x1cf9   : > { %7738 = vmatpush1.bf16.msra.mxu1 %v10782_v41  ;;  %7657 = vmatprep.subr.bf16.mxu0 %v10789_v47  ;;  %v12233_v41 = vld [vmem:[%s13203_s3 + $0x44] ss:$16 sps:$4 sm:$0xff]   ;;  %v12236_v47 = vld [vmem:[%s13203_s3 + $0x4c] ss:$16 sps:$4 sm:$0xff]  }
0x1cfa   : > { %7739 = vmatprep.subr.bf16.mxu1 %v10791_v43  ;;  %v12231_v43 = vld [vmem:[%s13203_s3 + $0x40] ss:$16 sps:$4 sm:$0xff]  }
0x1cfc   : > { %7658 = vmatpush1.bf16.msra.mxu0 %v10788_v22  ;;  %v12245_v22 = vld [vmem:[%s13203_s3 + $0x84] ss:$16 sps:$4 sm:$0xff]  }
0x1cfd   : > { %7740 = vmatpush1.bf16.msra.mxu1 %v10790_v24  ;;  %7659 = vmatprep.subr.bf16.mxu0 %v10797_v32  ;;  %v12248_v24 = vld [vmem:[%s13203_s3 + $0x8c] ss:$16 sps:$4 sm:$0xff]   ;;  %v12243_v32 = vld [vmem:[%s13203_s3 + $0x80] ss:$16 sps:$4 sm:$0xff]  }
0x1cfe   : > { %7741 = vmatprep.subr.bf16.mxu1 %v10799_v46  ;;  %v12246_v46 = vld [vmem:[%s13203_s3 + $0x88] ss:$16 sps:$4 sm:$0xff]  }
0x1d00   : > { %7660 = vmatpush1.bf16.msra.mxu0 %v10796_v52  ;;  %v12257_v52 = vld [vmem:[%s13203_s3 + $0xc4] ss:$16 sps:$4 sm:$0xff]  }
0x1d01   : > { %7742 = vmatpush1.bf16.msra.mxu1 %v10798_v2  ;;  %7661 = vmatprep.subr.bf16.mxu0 %v10805_v26  ;;  %v12260_v2 = vld [vmem:[%s13203_s3 + $0xcc] ss:$16 sps:$4 sm:$0xff]   ;;  %v12255_v26 = vld [vmem:[%s13203_s3 + $0xc0] ss:$16 sps:$4 sm:$0xff]  }
0x1d02   : > { %7743 = vmatprep.subr.bf16.mxu1 %v10807_v56  ;;  %v12258_v56 = vld [vmem:[%s13203_s3 + $0xc8] ss:$16 sps:$4 sm:$0xff]  }
0x1d04   : > { %7662 = vmatpush1.bf16.msra.mxu0 %v10804_v27  ;;  %v12269_v27 = vld [vmem:[%s13203_s3 + $0x104] ss:$16 sps:$4 sm:$0xff]  }
0x1d05   : > { %7744 = vmatpush1.bf16.msra.mxu1 %v10806_v60  ;;  %7663 = vmatprep.subr.bf16.mxu0 %v10813_v28  ;;  %v12272_v60 = vld [vmem:[%s13203_s3 + $0x10c] ss:$16 sps:$4 sm:$0xff]   ;;  %v12267_v28 = vld [vmem:[%s13203_s3 + $0x100] ss:$16 sps:$4 sm:$0xff]  }
0x1d06   : > { %7745 = vmatprep.subr.bf16.mxu1 %v10815_v35  ;;  %v12270_v35 = vld [vmem:[%s13203_s3 + $0x108] ss:$16 sps:$4 sm:$0xff]  }
0x1d08   : > { %7664 = vmatpush1.bf16.msra.mxu0 %v10812_v51  ;;  %v12281_v51 = vld [vmem:[%s13203_s3 + $0x144] ss:$16 sps:$4 sm:$0xff]  }
0x1d09   : > { %7746 = vmatpush1.bf16.msra.mxu1 %v10814_v5  ;;  %7665 = vmatprep.subr.bf16.mxu0 %v10821_v13  ;;  %v12284_v5 = vld [vmem:[%s13203_s3 + $0x14c] ss:$16 sps:$4 sm:$0xff]   ;;  %v12279_v13 = vld [vmem:[%s13203_s3 + $0x140] ss:$16 sps:$4 sm:$0xff]  }
0x1d0a   : > { %7747 = vmatprep.subr.bf16.mxu1 %v10823_v1  ;;  %v12282_v1 = vld [vmem:[%s13203_s3 + $0x148] ss:$16 sps:$4 sm:$0xff]  }
0x1d0c   : > { %7666 = vmatpush1.bf16.msra.mxu0 %v10820_v3  ;;  %v12287_v3 = vld [vmem:[%s13203_s3 + $0x164] ss:$16 sps:$4 sm:$0xff]  }
0x1d0d   : > { %7748 = vmatpush1.bf16.msra.mxu1 %v10822_v55  ;;  %9310 = vmatprep.subr.bf16.mxu0 %v12221_v4  ;;  %v12290_v55 = vld [vmem:[%s13203_s3 + $0x16c] ss:$16 sps:$4 sm:$0xff]   ;;  %v12285_v4 = vld [vmem:[%s13203_s3 + $0x160] ss:$16 sps:$4 sm:$0xff]  }
0x1d0e   : > { %9474 = vmatprep.subr.bf16.mxu1 %v12224_v6  ;;  %v12288_v6 = vld [vmem:[%s13203_s3 + $0x168] ss:$16 sps:$4 sm:$0xff]  }
0x1d0f   : > { %7668 = vmatmul.mubr.bf16.vlgmr.msra.gmra.mrb[52].mxu0 %v14295_v59 }
0x1d10   : > { %7750 = vmatmul.mubr.bf16.vlgmr.msra.gmra.mrb[52].mxu1 %v14295_v59  ;;  %9311 = vmatpush1.bf16.msra.mxu0 %v12219_v7  ;;  %v12239_v59 = vld [vmem:[%s13203_s3 + $0x64] ss:$16 sps:$4 sm:$0xff]  }
0x1d11   : > { %9475 = vmatpush1.bf16.msra.mxu1 %v12222_v9  ;;  %9312 = vmatprep.subr.bf16.mxu0 %v12227_v58  ;;  %v12293_v7 = vld [vmem:[%s13203_s3 + $0x184] ss:$16 sps:$4 sm:$0xff]   ;;  %v12296_v9 = vld [vmem:[%s13203_s3 + $0x18c] ss:$16 sps:$4 sm:$0xff]   ;;  %v12291_v58 = vld [vmem:[%s13203_s3 + $0x180] ss:$16 sps:$4 sm:$0xff]  }
0x1d12   : > { %9476 = vmatprep.subr.bf16.mxu1 %v12230_v10  ;;  %v12294_v10 = vld [vmem:[%s13203_s3 + $0x188] ss:$16 sps:$4 sm:$0xff]  }
0x1d14   : > { %9313 = vmatpush1.bf16.msra.mxu0 %v12225_v11  ;;  %v12299_v11 = vld [vmem:[%s13203_s3 + $0x1a4] ss:$16 sps:$4 sm:$0xff]  }
0x1d15   : > { %9477 = vmatpush1.bf16.msra.mxu1 %v12228_v12  ;;  %9314 = vmatprep.subr.bf16.mxu0 %v12233_v41  ;;  %v12302_v12 = vld [vmem:[%s13203_s3 + $0x1ac] ss:$16 sps:$4 sm:$0xff]   ;;  %v12297_v41 = vld [vmem:[%s13203_s3 + $0x1a0] ss:$16 sps:$4 sm:$0xff]  }
0x1d16   : > { %9478 = vmatprep.subr.bf16.mxu1 %v12236_v47  ;;  %v12300_v47 = vld [vmem:[%s13203_s3 + $0x1a8] ss:$16 sps:$4 sm:$0xff]  }
0x1d18   : > { %9315 = vmatpush1.bf16.msra.mxu0 %v12231_v43  ;;  %v12305_v43 = vld [vmem:[%s13203_s3 + $0x1c4] ss:$16 sps:$4 sm:$0xff]  }
0x1d19   : > { %9479 = vmatpush1.bf16.msra.mxu1 %v12234_v15  ;;  %9316 = vmatprep.subr.bf16.mxu0 %v12239_v59  ;;  %v12308_v15 = vld [vmem:[%s13203_s3 + $0x1cc] ss:$16 sps:$4 sm:$0xff]   ;;  %v12303_v59 = vld [vmem:[%s13203_s3 + $0x1c0] ss:$16 sps:$4 sm:$0xff]  }
0x1d1a   : > { %9480 = vmatprep.subr.bf16.mxu1 %v12242_v17  ;;  %v12306_v17 = vld [vmem:[%s13203_s3 + $0x1c8] ss:$16 sps:$4 sm:$0xff]  }
0x1d1c   : > { %9317 = vmatpush1.bf16.msra.mxu0 %v12237_v19  ;;  %v12311_v19 = vld [vmem:[%s13203_s3 + $0x1e4] ss:$16 sps:$4 sm:$0xff]  }
0x1d1d   : > { %9481 = vmatpush1.bf16.msra.mxu1 %v12240_v21  ;;  %9318 = vmatprep.subr.bf16.mxu0 %v12245_v22  ;;  %v12314_v21 = vld [vmem:[%s13203_s3 + $0x1ec] ss:$16 sps:$4 sm:$0xff]   ;;  %v12309_v22 = vld [vmem:[%s13203_s3 + $0x1e0] ss:$16 sps:$4 sm:$0xff]  }
0x1d1e   : > { %9482 = vmatprep.subr.bf16.mxu1 %v12248_v24  ;;  %v12312_v24 = vld [vmem:[%s13203_s3 + $0x1e8] ss:$16 sps:$4 sm:$0xff]  }
0x1d20   : > { %9319 = vmatpush1.bf16.msra.mxu0 %v12243_v32  ;;  %v12317_v32 = vld [vmem:[%s13203_s3 + $0x204] ss:$16 sps:$4 sm:$0xff]  }
0x1d21   : > { %9483 = vmatpush1.bf16.msra.mxu1 %v12246_v46  ;;  %9320 = vmatprep.subr.bf16.mxu0 %v12251_v16  ;;  %v12320_v46 = vld [vmem:[%s13203_s3 + $0x20c] ss:$16 sps:$4 sm:$0xff]  }
0x1d22   : > { %9484 = vmatprep.subr.bf16.mxu1 %v12254_v36 }
0x1d24   : > { %9321 = vmatpush1.bf16.msra.mxu0 %v12249_v25 }
0x1d25   : > { %9485 = vmatpush1.bf16.msra.mxu1 %v12252_v37  ;;  %9322 = vmatprep.subr.bf16.mxu0 %v12257_v52 }
0x1d26   : > { %9486 = vmatprep.subr.bf16.mxu1 %v12260_v2 }
0x1d28   : > { %9323 = vmatpush1.bf16.msra.mxu0 %v12255_v26 }
0x1d29   : > { %9487 = vmatpush1.bf16.msra.mxu1 %v12258_v56  ;;  %9324 = vmatprep.subr.bf16.mxu0 %v12263_v57 }
0x1d2a   : > { %9488 = vmatprep.subr.bf16.mxu1 %v12266_v61 }
0x1d2c   : > { %9325 = vmatpush1.bf16.msra.mxu0 %v12261_v62 }
0x1d2d   : > { %9489 = vmatpush1.bf16.msra.mxu1 %v12264_v45  ;;  %9326 = vmatprep.subr.bf16.mxu0 %v12269_v27  ;;  %v12315_v27 = vld [vmem:[%s13203_s3 + $0x200] ss:$16 sps:$4 sm:$0xff]  }
0x1d2e   : > { %9490 = vmatprep.subr.bf16.mxu1 %v12272_v60  ;;  %v12318_v60 = vld [vmem:[%s13203_s3 + $0x208] ss:$16 sps:$4 sm:$0xff]  }
0x1d30   : > { %9327 = vmatpush1.bf16.msra.mxu0 %v12267_v28 }
0x1d31   : > { %9491 = vmatpush1.bf16.msra.mxu1 %v12270_v35  ;;  %9328 = vmatprep.subr.bf16.mxu0 %v12275_v29  ;;  %v12323_v35 = vld [vmem:[%s13203_s3 + $0x224] ss:$16 sps:$4 sm:$0xff]   ;;  %v12326_v29 = vld [vmem:[%s13203_s3 + $0x22c] ss:$16 sps:$4 sm:$0xff]  }
0x1d32   : > { %9492 = vmatprep.subr.bf16.mxu1 %v12278_v54 }
0x1d34   : > { %9329 = vmatpush1.bf16.msra.mxu0 %v12273_v8  ;;  %v12321_v8 = vld [vmem:[%s13203_s3 + $0x220] ss:$16 sps:$4 sm:$0xff]  }
0x1d35   : > { %9493 = vmatpush1.bf16.msra.mxu1 %v12276_v63  ;;  %9330 = vmatprep.subr.bf16.mxu0 %v12281_v51  ;;  %v12324_v63 = vld [vmem:[%s13203_s3 + $0x228] ss:$16 sps:$4 sm:$0xff]   ;;  %v12329_v51 = vld [vmem:[%s13203_s3 + $0x244] ss:$16 sps:$4 sm:$0xff]  }
0x1d36   : > { %9494 = vmatprep.subr.bf16.mxu1 %v12284_v5  ;;  %v12332_v5 = vld [vmem:[%s13203_s3 + $0x24c] ss:$16 sps:$4 sm:$0xff]  }
0x1d38   : > { %9331 = vmatpush1.bf16.msra.mxu0 %v12279_v13  ;;  %v12327_v13 = vld [vmem:[%s13203_s3 + $0x240] ss:$16 sps:$4 sm:$0xff]  }
0x1d39   : > { %9495 = vmatpush1.bf16.msra.mxu1 %v12282_v1  ;;  %9332 = vmatprep.subr.bf16.mxu0 %v12287_v3  ;;  %v12330_v1 = vld [vmem:[%s13203_s3 + $0x248] ss:$16 sps:$4 sm:$0xff]   ;;  %v12335_v3 = vld [vmem:[%s13203_s3 + $0x264] ss:$16 sps:$4 sm:$0xff]  }
0x1d3a   : > { %9496 = vmatprep.subr.bf16.mxu1 %v12290_v55  ;;  %v12338_v55 = vld [vmem:[%s13203_s3 + $0x26c] ss:$16 sps:$4 sm:$0xff]  }
0x1d3c   : > { %9333 = vmatpush1.bf16.msra.mxu0 %v12285_v4  ;;  %v12333_v4 = vld [vmem:[%s13203_s3 + $0x260] ss:$16 sps:$4 sm:$0xff]  }
0x1d3d   : > { %9497 = vmatpush1.bf16.msra.mxu1 %v12288_v6  ;;  %9334 = vmatprep.subr.bf16.mxu0 %v12293_v7  ;;  %v12336_v6 = vld [vmem:[%s13203_s3 + $0x268] ss:$16 sps:$4 sm:$0xff]   ;;  %v12341_v7 = vld [vmem:[%s13203_s3 + $0x284] ss:$16 sps:$4 sm:$0xff]  }
0x1d3e   : > { %9498 = vmatprep.subr.bf16.mxu1 %v12296_v9  ;;  %v12344_v9 = vld [vmem:[%s13203_s3 + $0x28c] ss:$16 sps:$4 sm:$0xff]  }
0x1d40   : > { %9335 = vmatpush1.bf16.msra.mxu0 %v12291_v58  ;;  %v12339_v58 = vld [vmem:[%s13203_s3 + $0x280] ss:$16 sps:$4 sm:$0xff]  }
0x1d41   : > { %9499 = vmatpush1.bf16.msra.mxu1 %v12294_v10  ;;  %9336 = vmatprep.subr.bf16.mxu0 %v12299_v11  ;;  %v12342_v10 = vld [vmem:[%s13203_s3 + $0x288] ss:$16 sps:$4 sm:$0xff]   ;;  %v12347_v11 = vld [vmem:[%s13203_s3 + $0x2a4] ss:$16 sps:$4 sm:$0xff]  }
0x1d42   : > { %9500 = vmatprep.subr.bf16.mxu1 %v12302_v12  ;;  %v12350_v12 = vld [vmem:[%s13203_s3 + $0x2ac] ss:$16 sps:$4 sm:$0xff]  }
0x1d44   : > { %9337 = vmatpush1.bf16.msra.mxu0 %v12297_v41  ;;  %v12345_v41 = vld [vmem:[%s13203_s3 + $0x2a0] ss:$16 sps:$4 sm:$0xff]  }
0x1d45   : > { %9501 = vmatpush1.bf16.msra.mxu1 %v12300_v47  ;;  %9338 = vmatprep.subr.bf16.mxu0 %v12305_v43  ;;  %v12348_v47 = vld [vmem:[%s13203_s3 + $0x2a8] ss:$16 sps:$4 sm:$0xff]   ;;  %v12353_v43 = vld [vmem:[%s13203_s3 + $0x2c4] ss:$16 sps:$4 sm:$0xff]  }
0x1d46   : > { %9502 = vmatprep.subr.bf16.mxu1 %v12308_v15  ;;  %v12356_v15 = vld [vmem:[%s13203_s3 + $0x2cc] ss:$16 sps:$4 sm:$0xff]  }
0x1d48   : > { %9339 = vmatpush1.bf16.msra.mxu0 %v12303_v59  ;;  %v12351_v59 = vld [vmem:[%s13203_s3 + $0x2c0] ss:$16 sps:$4 sm:$0xff]  }
0x1d49   : > { %9503 = vmatpush1.bf16.msra.mxu1 %v12306_v17  ;;  %9340 = vmatprep.subr.bf16.mxu0 %v12311_v19  ;;  %v12354_v17 = vld [vmem:[%s13203_s3 + $0x2c8] ss:$16 sps:$4 sm:$0xff]   ;;  %v12359_v19 = vld [vmem:[%s13203_s3 + $0x2e4] ss:$16 sps:$4 sm:$0xff]  }
0x1d4a   : > { %9504 = vmatprep.subr.bf16.mxu1 %v12314_v21  ;;  %v12362_v21 = vld [vmem:[%s13203_s3 + $0x2ec] ss:$16 sps:$4 sm:$0xff]  }
0x1d4c   : > { %9341 = vmatpush1.bf16.msra.mxu0 %v12309_v22  ;;  %v12357_v22 = vld [vmem:[%s13203_s3 + $0x2e0] ss:$16 sps:$4 sm:$0xff]  }
0x1d4d   : > { %9505 = vmatpush1.bf16.msra.mxu1 %v12312_v24  ;;  %9351 = vmatprep.subr.bf16.mxu0 %v12317_v32  ;;  %v12360_v24 = vld [vmem:[%s13203_s3 + $0x2e8] ss:$16 sps:$4 sm:$0xff]   ;;  %v12365_v32 = vld [vmem:[%s13203_s3 + $0x304] ss:$16 sps:$4 sm:$0xff]  }
0x1d4e   : > { %9515 = vmatprep.subr.bf16.mxu1 %v12320_v46  ;;  %v12368_v46 = vld [vmem:[%s13203_s3 + $0x30c] ss:$16 sps:$4 sm:$0xff]  }
0x1d62   : > { %v7505_v16 = vpop.f32.mrb[48].mxu0  ;;  %v14493_v36 = vpop.f32.mrb[48].mxu1 }
0x1d63   : > { %v7758_v25 = vmax.f32 %v7505_v16, 0.0  ;;  %v7507_v37 = vpop.f32.mrb[49].mxu0  ;;  %v7589_v52 = vpop.f32.mrb[49].mxu1  ;;  %v12363_v16 = vld [vmem:[%s13203_s3 + $0x300] ss:$16 sps:$4 sm:$0xff]  }
0x1d64   : > { %v7759_v2 = vmax.f32 %v7507_v37, 0.0  ;;  %v7509_v26 = vpop.f32.mrb[50].mxu0  ;;  %v7591_v56 = vpop.f32.mrb[50].mxu1  ;;  %v7761_v57 = vmax.f32 %v7589_v52, 0.0  ;;  %v12371_v37 = vld [vmem:[%s13203_s3 + $0x324] ss:$16 sps:$4 sm:$0xff]  }
0x1d65   : > { %v7510_v61 = vpop.f32.mrb[51].mxu0  ;;  %v7592_v62 = vpop.f32.mrb[51].mxu1  ;;  %v7766_v28 = vpack.c.bf16 %v7758_v25, %v7758_v25  ;;  %v12366_v25 = vld [vmem:[%s13203_s3 + $0x308] ss:$16 sps:$4 sm:$0xff]   ;;  %v12374_v52 = vld [vmem:[%s13203_s3 + $0x32c] ss:$16 sps:$4 sm:$0xff]  }
0x1d66   : > { %v7767_v45 = vpack.c.bf16 %v7759_v2, %v7759_v2  ;;  %v7769_v54 = vpack.c.bf16 %v7761_v57, %v7761_v57  ;;  %v12369_v2 = vld [vmem:[%s13203_s3 + $0x320] ss:$16 sps:$4 sm:$0xff]   ;;  %v12372_v26 = vld [vmem:[%s13203_s3 + $0x328] ss:$16 sps:$4 sm:$0xff]   ;;  %v12377_v56 = vld [vmem:[%s13203_s3 + $0x344] ss:$16 sps:$4 sm:$0xff]  }
0x1d67   : > { %v12380_v57 = vld [vmem:[%s13203_s3 + $0x34c] ss:$16 sps:$4 sm:$0xff]   ;;  %v12375_v61 = vld [vmem:[%s13203_s3 + $0x340] ss:$16 sps:$4 sm:$0xff]   ;;  %v12378_v62 = vld [vmem:[%s13203_s3 + $0x348] ss:$16 sps:$4 sm:$0xff]  }
0x1d68   : > { %9342 = vmatprep.mubr.bf16.mxu0 %v7767_v45  ;;  %9506 = vmatprep.mubr.bf16.mxu1 %v7767_v45  ;;  %v12383_v45 = vld [vmem:[%s13203_s3 + $0x364] ss:$16 sps:$4 sm:$0xff]  }
0x1d69   : > { %9343 = vmatmul.mubr.bf16.vlgmr.msra.gmra.mrb[56].mxu0 %v7766_v28  ;;  %9507 = vmatmul.mubr.bf16.vlgmr.msra.gmra.mrb[56].mxu1 %v7766_v28  ;;  %v12384_v28 = vld [vmem:[%s13203_s3 + $0x368] ss:$16 sps:$4 sm:$0xff]  }
0x1d6a   : > { %9352 = vmatpush1.bf16.msra.mxu0 %v12315_v27  ;;  %9516 = vmatpush1.bf16.msra.mxu1 %v12318_v60  ;;  %v12386_v27 = vld [vmem:[%s13203_s3 + $0x36c] ss:$16 sps:$4 sm:$0xff]   ;;  %v12381_v60 = vld [vmem:[%s13203_s3 + $0x360] ss:$16 sps:$4 sm:$0xff]  }
0x1d6b   : > { %9383 = vmatprep.mubr.bf16.mxu0 %v7769_v54  ;;  %9547 = vmatprep.mubr.bf16.mxu1 %v7769_v54  ;;  %v12387_v54 = vld [vmem:[%s13203_s3 + $0x380] ss:$16 sps:$4 sm:$0xff]  }
0x1d6c   : > { %9353 = vmatprep.subr.bf16.mxu0 %v12323_v35  ;;  %9517 = vmatprep.subr.bf16.mxu1 %v12326_v29  ;;  %v12389_v35 = vld [vmem:[%s13203_s3 + $0x384] ss:$16 sps:$4 sm:$0xff]   ;;  %v12392_v29 = vld [vmem:[%s13203_s3 + $0x38c] ss:$16 sps:$4 sm:$0xff]  }
0x1d6e   : > { %9354 = vmatpush1.bf16.msra.mxu0 %v12321_v8  ;;  %9518 = vmatpush1.bf16.msra.mxu1 %v12324_v63  ;;  %v12390_v8 = vld [vmem:[%s13203_s3 + $0x388] ss:$16 sps:$4 sm:$0xff]   ;;  %v12395_v63 = vld [vmem:[%s13203_s3 + $0x3a4] ss:$16 sps:$4 sm:$0xff]  }
0x1d6f   : > { %9355 = vmatprep.subr.bf16.mxu0 %v12329_v51  ;;  %9519 = vmatprep.subr.bf16.mxu1 %v12332_v5  ;;  %v12398_v51 = vld [vmem:[%s13203_s3 + $0x3ac] ss:$16 sps:$4 sm:$0xff]   ;;  %v12393_v5 = vld [vmem:[%s13203_s3 + $0x3a0] ss:$16 sps:$4 sm:$0xff]  }
0x1d72   : > { %9356 = vmatpush1.bf16.msra.mxu0 %v12327_v13  ;;  %9520 = vmatpush1.bf16.msra.mxu1 %v12330_v1  ;;  %v12396_v13 = vld [vmem:[%s13203_s3 + $0x3a8] ss:$16 sps:$4 sm:$0xff]   ;;  %v12401_v1 = vld [vmem:[%s13203_s3 + $0x3c4] ss:$16 sps:$4 sm:$0xff]  }
0x1d73   : > { %9357 = vmatprep.subr.bf16.mxu0 %v12335_v3  ;;  %9521 = vmatprep.subr.bf16.mxu1 %v12338_v55  ;;  %v12404_v3 = vld [vmem:[%s13203_s3 + $0x3cc] ss:$16 sps:$4 sm:$0xff]   ;;  %v12399_v55 = vld [vmem:[%s13203_s3 + $0x3c0] ss:$16 sps:$4 sm:$0xff]  }
0x1d76   : > { %9358 = vmatpush1.bf16.msra.mxu0 %v12333_v4  ;;  %9522 = vmatpush1.bf16.msra.mxu1 %v12336_v6  ;;  %v12402_v4 = vld [vmem:[%s13203_s3 + $0x3c8] ss:$16 sps:$4 sm:$0xff]   ;;  %v12407_v6 = vld [vmem:[%s13203_s3 + $0x3e4] ss:$16 sps:$4 sm:$0xff]  }
0x1d77   : > { %9359 = vmatprep.subr.bf16.mxu0 %v12341_v7  ;;  %9523 = vmatprep.subr.bf16.mxu1 %v12344_v9  ;;  %v12410_v7 = vld [vmem:[%s13203_s3 + $0x3ec] ss:$16 sps:$4 sm:$0xff]   ;;  %v12405_v9 = vld [vmem:[%s13203_s3 + $0x3e0] ss:$16 sps:$4 sm:$0xff]  }
0x1d7a   : > { %9360 = vmatpush1.bf16.msra.mxu0 %v12339_v58  ;;  %9524 = vmatpush1.bf16.msra.mxu1 %v12342_v10  ;;  %v12408_v58 = vld [vmem:[%s13203_s3 + $0x3e8] ss:$16 sps:$4 sm:$0xff]   ;;  %v7760_v10 = vmax.f32 %v14493_v36, 0.0  ;;  %v12417_v36 = vld [vmem:[%s13203_s3 + $0x420] ss:$16 sps:$4 sm:$0xff]  }
0x1d7b   : > { %9361 = vmatprep.subr.bf16.mxu0 %v12347_v11  ;;  %9525 = vmatprep.subr.bf16.mxu1 %v12350_v12  ;;  %v12413_v11 = vld [vmem:[%s13203_s3 + $0x404] ss:$16 sps:$4 sm:$0xff]   ;;  %v12416_v12 = vld [vmem:[%s13203_s3 + $0x40c] ss:$16 sps:$4 sm:$0xff]  }
0x1d7e   : > { %9362 = vmatpush1.bf16.msra.mxu0 %v12345_v41  ;;  %9526 = vmatpush1.bf16.msra.mxu1 %v12348_v47  ;;  %v12411_v41 = vld [vmem:[%s13203_s3 + $0x400] ss:$16 sps:$4 sm:$0xff]   ;;  %v12414_v47 = vld [vmem:[%s13203_s3 + $0x408] ss:$16 sps:$4 sm:$0xff]  }
0x1d7f   : > { %9363 = vmatprep.subr.bf16.mxu0 %v12353_v43  ;;  %9527 = vmatprep.subr.bf16.mxu1 %v12356_v15  ;;  %v7768_v43 = vpack.c.bf16 %v7760_v10, %v7760_v10  ;;  %v12419_v15 = vld [vmem:[%s13203_s3 + $0x424] ss:$16 sps:$4 sm:$0xff]  }
0x1d80   : > { %v12479_v10 = vld [vmem:[%s13203_s3 + $0x564] ss:$16 sps:$4 sm:$0xff]  }
0x1d82   : > { %9364 = vmatpush1.bf16.msra.mxu0 %v12351_v59  ;;  %9528 = vmatpush1.bf16.msra.mxu1 %v12354_v17  ;;  %v12422_v59 = vld [vmem:[%s13203_s3 + $0x42c] ss:$16 sps:$4 sm:$0xff]   ;;  %v12420_v17 = vld [vmem:[%s13203_s3 + $0x428] ss:$16 sps:$4 sm:$0xff]  }
0x1d83   : > { %9365 = vmatprep.subr.bf16.mxu0 %v12359_v19  ;;  %9529 = vmatprep.subr.bf16.mxu1 %v12362_v21  ;;  %v12425_v19 = vld [vmem:[%s13203_s3 + $0x444] ss:$16 sps:$4 sm:$0xff]   ;;  %v12428_v21 = vld [vmem:[%s13203_s3 + $0x44c] ss:$16 sps:$4 sm:$0xff]  }
0x1d86   : > { %9366 = vmatpush1.bf16.msra.mxu0 %v12357_v22  ;;  %9530 = vmatpush1.bf16.msra.mxu1 %v12360_v24  ;;  %v12423_v22 = vld [vmem:[%s13203_s3 + $0x440] ss:$16 sps:$4 sm:$0xff]   ;;  %v12426_v24 = vld [vmem:[%s13203_s3 + $0x448] ss:$16 sps:$4 sm:$0xff]  }
0x1d87   : > { %9367 = vmatprep.subr.bf16.mxu0 %v12365_v32  ;;  %9531 = vmatprep.subr.bf16.mxu1 %v12368_v46  ;;  %v12431_v32 = vld [vmem:[%s13203_s3 + $0x464] ss:$16 sps:$4 sm:$0xff]   ;;  %v12434_v46 = vld [vmem:[%s13203_s3 + $0x46c] ss:$16 sps:$4 sm:$0xff]  }
0x1d8a   : > { %9368 = vmatpush1.bf16.msra.mxu0 %v12363_v16  ;;  %9532 = vmatpush1.bf16.msra.mxu1 %v12366_v25  ;;  %v12429_v16 = vld [vmem:[%s13203_s3 + $0x460] ss:$16 sps:$4 sm:$0xff]   ;;  %v12432_v25 = vld [vmem:[%s13203_s3 + $0x468] ss:$16 sps:$4 sm:$0xff]  }
0x1d8b   : > { %9369 = vmatprep.subr.bf16.mxu0 %v12371_v37  ;;  %9533 = vmatprep.subr.bf16.mxu1 %v12374_v52  ;;  %v12437_v37 = vld [vmem:[%s13203_s3 + $0x484] ss:$16 sps:$4 sm:$0xff]   ;;  %v12440_v52 = vld [vmem:[%s13203_s3 + $0x48c] ss:$16 sps:$4 sm:$0xff]  }
0x1d8e   : > { %9370 = vmatpush1.bf16.msra.mxu0 %v12369_v2  ;;  %9534 = vmatpush1.bf16.msra.mxu1 %v12372_v26  ;;  %v12435_v2 = vld [vmem:[%s13203_s3 + $0x480] ss:$16 sps:$4 sm:$0xff]   ;;  %v12438_v26 = vld [vmem:[%s13203_s3 + $0x488] ss:$16 sps:$4 sm:$0xff]  }
0x1d8f   : > { %9371 = vmatprep.subr.bf16.mxu0 %v12377_v56  ;;  %9535 = vmatprep.subr.bf16.mxu1 %v12380_v57  ;;  %v12443_v56 = vld [vmem:[%s13203_s3 + $0x4a4] ss:$16 sps:$4 sm:$0xff]   ;;  %v12446_v57 = vld [vmem:[%s13203_s3 + $0x4ac] ss:$16 sps:$4 sm:$0xff]  }
0x1d92   : > { %9372 = vmatpush1.bf16.msra.mxu0 %v12375_v61  ;;  %9536 = vmatpush1.bf16.msra.mxu1 %v12378_v62  ;;  %v12441_v61 = vld [vmem:[%s13203_s3 + $0x4a0] ss:$16 sps:$4 sm:$0xff]   ;;  %v12444_v62 = vld [vmem:[%s13203_s3 + $0x4a8] ss:$16 sps:$4 sm:$0xff]  }
0x1d93   : > { %9373 = vmatprep.subr.bf16.mxu0 %v12383_v45  ;;  %9537 = vmatprep.subr.bf16.mxu1 %v12386_v27  ;;  %v12449_v45 = vld [vmem:[%s13203_s3 + $0x4c4] ss:$16 sps:$4 sm:$0xff]   ;;  %v12452_v27 = vld [vmem:[%s13203_s3 + $0x4cc] ss:$16 sps:$4 sm:$0xff]  }
0x1d96   : > { %9374 = vmatpush1.bf16.msra.mxu0 %v12381_v60  ;;  %9538 = vmatpush1.bf16.msra.mxu1 %v12384_v28  ;;  %v12447_v60 = vld [vmem:[%s13203_s3 + $0x4c0] ss:$16 sps:$4 sm:$0xff]   ;;  %v12450_v28 = vld [vmem:[%s13203_s3 + $0x4c8] ss:$16 sps:$4 sm:$0xff]  }
0x1d97   : > { %9375 = vmatprep.subr.bf16.mxu0 %v12389_v35  ;;  %9539 = vmatprep.subr.bf16.mxu1 %v12392_v29  ;;  %v12455_v35 = vld [vmem:[%s13203_s3 + $0x4e4] ss:$16 sps:$4 sm:$0xff]   ;;  %v12458_v29 = vld [vmem:[%s13203_s3 + $0x4ec] ss:$16 sps:$4 sm:$0xff]  }
0x1d9a   : > { %9376 = vmatpush1.bf16.msra.mxu0 %v12387_v54  ;;  %9540 = vmatpush1.bf16.msra.mxu1 %v12390_v8  ;;  %v12453_v54 = vld [vmem:[%s13203_s3 + $0x4e0] ss:$16 sps:$4 sm:$0xff]   ;;  %v12456_v8 = vld [vmem:[%s13203_s3 + $0x4e8] ss:$16 sps:$4 sm:$0xff]  }
0x1d9b   : > { %9377 = vmatprep.subr.bf16.mxu0 %v12395_v63  ;;  %9541 = vmatprep.subr.bf16.mxu1 %v12398_v51  ;;  %v12461_v63 = vld [vmem:[%s13203_s3 + $0x504] ss:$16 sps:$4 sm:$0xff]   ;;  %v12464_v51 = vld [vmem:[%s13203_s3 + $0x50c] ss:$16 sps:$4 sm:$0xff]  }
0x1d9e   : > { %9378 = vmatpush1.bf16.msra.mxu0 %v12393_v5  ;;  %9542 = vmatpush1.bf16.msra.mxu1 %v12396_v13  ;;  %v12459_v5 = vld [vmem:[%s13203_s3 + $0x500] ss:$16 sps:$4 sm:$0xff]   ;;  %v12462_v13 = vld [vmem:[%s13203_s3 + $0x508] ss:$16 sps:$4 sm:$0xff]  }
0x1d9f   : > { %9379 = vmatprep.subr.bf16.mxu0 %v12401_v1  ;;  %9543 = vmatprep.subr.bf16.mxu1 %v12404_v3  ;;  %v12467_v1 = vld [vmem:[%s13203_s3 + $0x524] ss:$16 sps:$4 sm:$0xff]   ;;  %v12470_v3 = vld [vmem:[%s13203_s3 + $0x52c] ss:$16 sps:$4 sm:$0xff]  }
0x1da2   : > { %9380 = vmatpush1.bf16.msra.mxu0 %v12399_v55  ;;  %9544 = vmatpush1.bf16.msra.mxu1 %v12402_v4  ;;  %v12465_v55 = vld [vmem:[%s13203_s3 + $0x520] ss:$16 sps:$4 sm:$0xff]   ;;  %v12468_v4 = vld [vmem:[%s13203_s3 + $0x528] ss:$16 sps:$4 sm:$0xff]  }
0x1da3   : > { %9381 = vmatprep.subr.bf16.mxu0 %v12407_v6  ;;  %9545 = vmatprep.subr.bf16.mxu1 %v12410_v7  ;;  %v12473_v6 = vld [vmem:[%s13203_s3 + $0x544] ss:$16 sps:$4 sm:$0xff]   ;;  %v12476_v7 = vld [vmem:[%s13203_s3 + $0x54c] ss:$16 sps:$4 sm:$0xff]  }
0x1da6   : > { %9382 = vmatpush1.bf16.msra.mxu0 %v12405_v9  ;;  %9546 = vmatpush1.bf16.msra.mxu1 %v12408_v58  ;;  %v12471_v9 = vld [vmem:[%s13203_s3 + $0x540] ss:$16 sps:$4 sm:$0xff]   ;;  %v12474_v58 = vld [vmem:[%s13203_s3 + $0x548] ss:$16 sps:$4 sm:$0xff]  }
0x1da7   : > { %9392 = vmatprep.subr.bf16.mxu0 %v12413_v11  ;;  %9556 = vmatprep.subr.bf16.mxu1 %v12416_v12  ;;  %v12482_v11 = vld [vmem:[%s13203_s3 + $0x56c] ss:$16 sps:$4 sm:$0xff]   ;;  %v12477_v12 = vld [vmem:[%s13203_s3 + $0x560] ss:$16 sps:$4 sm:$0xff]  }
0x1da9   : > { %9384 = vmatmul.mubr.bf16.vlgmr.msra.gmra.mrb[56].mxu0 %v7768_v43  ;;  %9548 = vmatmul.mubr.bf16.vlgmr.msra.gmra.mrb[56].mxu1 %v7768_v43  ;;  %v12488_v43 = vld [vmem:[%s13203_s3 + $0x58c] ss:$16 sps:$4 sm:$0xff]  }
0x1daa   : > { %9393 = vmatpush1.bf16.msra.mxu0 %v12411_v41  ;;  %9557 = vmatpush1.bf16.msra.mxu1 %v12414_v47  ;;  %v12480_v41 = vld [vmem:[%s13203_s3 + $0x568] ss:$16 sps:$4 sm:$0xff]   ;;  %v12485_v47 = vld [vmem:[%s13203_s3 + $0x584] ss:$16 sps:$4 sm:$0xff]  }
0x1dab   : > { %9394 = vmatprep.subr.bf16.mxu0 %v12419_v15  ;;  %9558 = vmatprep.subr.bf16.mxu1 %v12422_v59  ;;  %v12483_v15 = vld [vmem:[%s13203_s3 + $0x580] ss:$16 sps:$4 sm:$0xff]   ;;  %v12486_v59 = vld [vmem:[%s13203_s3 + $0x588] ss:$16 sps:$4 sm:$0xff]  }
0x1dae   : > { %9395 = vmatpush1.bf16.msra.mxu0 %v12417_v36  ;;  %9559 = vmatpush1.bf16.msra.mxu1 %v12420_v17  ;;  %v12491_v36 = vld [vmem:[%s13203_s3 + $0x5a4] ss:$16 sps:$4 sm:$0xff]   ;;  %v12494_v17 = vld [vmem:[%s13203_s3 + $0x5ac] ss:$16 sps:$4 sm:$0xff]  }
0x1daf   : > { %9396 = vmatprep.subr.bf16.mxu0 %v12425_v19  ;;  %9560 = vmatprep.subr.bf16.mxu1 %v12428_v21  ;;  %v12489_v19 = vld [vmem:[%s13203_s3 + $0x5a0] ss:$16 sps:$4 sm:$0xff]   ;;  %v12492_v21 = vld [vmem:[%s13203_s3 + $0x5a8] ss:$16 sps:$4 sm:$0xff]  }
0x1db2   : > { %9397 = vmatpush1.bf16.msra.mxu0 %v12423_v22  ;;  %9561 = vmatpush1.bf16.msra.mxu1 %v12426_v24  ;;  %v12497_v22 = vld [vmem:[%s13203_s3 + $0x5c4] ss:$16 sps:$4 sm:$0xff]   ;;  %v12500_v24 = vld [vmem:[%s13203_s3 + $0x5cc] ss:$16 sps:$4 sm:$0xff]  }
0x1db3   : > { %9398 = vmatprep.subr.bf16.mxu0 %v12431_v32  ;;  %9562 = vmatprep.subr.bf16.mxu1 %v12434_v46  ;;  %v12495_v32 = vld [vmem:[%s13203_s3 + $0x5c0] ss:$16 sps:$4 sm:$0xff]   ;;  %v12498_v46 = vld [vmem:[%s13203_s3 + $0x5c8] ss:$16 sps:$4 sm:$0xff]  }
0x1db6   : > { %9399 = vmatpush1.bf16.msra.mxu0 %v12429_v16  ;;  %9563 = vmatpush1.bf16.msra.mxu1 %v12432_v25  ;;  %v12503_v16 = vld [vmem:[%s13203_s3 + $0x5e4] ss:$16 sps:$4 sm:$0xff]   ;;  %v12506_v25 = vld [vmem:[%s13203_s3 + $0x5ec] ss:$16 sps:$4 sm:$0xff]  }
0x1db7   : > { %9400 = vmatprep.subr.bf16.mxu0 %v12437_v37  ;;  %9564 = vmatprep.subr.bf16.mxu1 %v12440_v52  ;;  %v12501_v37 = vld [vmem:[%s13203_s3 + $0x5e0] ss:$16 sps:$4 sm:$0xff]  }
0x1dba   : > { %9401 = vmatpush1.bf16.msra.mxu0 %v12435_v2  ;;  %9565 = vmatpush1.bf16.msra.mxu1 %v12438_v26  ;;  %v12504_v2 = vld [vmem:[%s13203_s3 + $0x5e8] ss:$16 sps:$4 sm:$0xff]   ;;  %v12509_v26 = vld [vmem:[%s13203_s3 + $0x604] ss:$16 sps:$4 sm:$0xff]  }
0x1dbb   : > { %9402 = vmatprep.subr.bf16.mxu0 %v12443_v56  ;;  %9566 = vmatprep.subr.bf16.mxu1 %v12446_v57 }
0x1dbe   : > { %9403 = vmatpush1.bf16.msra.mxu0 %v12441_v61  ;;  %9567 = vmatpush1.bf16.msra.mxu1 %v12444_v62  ;;  %v12512_v62 = vld [vmem:[%s13203_s3 + $0x60c] ss:$16 sps:$4 sm:$0xff]  }
0x1dbf   : > { %9404 = vmatprep.subr.bf16.mxu0 %v12449_v45  ;;  %9568 = vmatprep.subr.bf16.mxu1 %v12452_v27 }
0x1dc2   : > { %9405 = vmatpush1.bf16.msra.mxu0 %v12447_v60  ;;  %9569 = vmatpush1.bf16.msra.mxu1 %v12450_v28 }
0x1dc3   : > { %9406 = vmatprep.subr.bf16.mxu0 %v12455_v35  ;;  %9570 = vmatprep.subr.bf16.mxu1 %v12458_v29 }
0x1dc6   : > { %9407 = vmatpush1.bf16.msra.mxu0 %v12453_v54  ;;  %9571 = vmatpush1.bf16.msra.mxu1 %v12456_v8 }
0x1dc7   : > { %9408 = vmatprep.subr.bf16.mxu0 %v12461_v63  ;;  %9572 = vmatprep.subr.bf16.mxu1 %v12464_v51  ;;  %v12507_v63 = vld [vmem:[%s13203_s3 + $0x600] ss:$16 sps:$4 sm:$0xff]   ;;  %v12510_v51 = vld [vmem:[%s13203_s3 + $0x608] ss:$16 sps:$4 sm:$0xff]  }
0x1dca   : > { %9409 = vmatpush1.bf16.msra.mxu0 %v12459_v5  ;;  %9573 = vmatpush1.bf16.msra.mxu1 %v12462_v13  ;;  %v12515_v13 = vld [vmem:[%s13203_s3 + $0x624] ss:$16 sps:$4 sm:$0xff]  }
0x1dcb   : > { %9410 = vmatprep.subr.bf16.mxu0 %v12467_v1  ;;  %9574 = vmatprep.subr.bf16.mxu1 %v12470_v3  ;;  %v12518_v1 = vld [vmem:[%s13203_s3 + $0x62c] ss:$16 sps:$4 sm:$0xff]  }
0x1dce   : > { %9411 = vmatpush1.bf16.msra.mxu0 %v12465_v55  ;;  %9575 = vmatpush1.bf16.msra.mxu1 %v12468_v4  ;;  %v12513_v55 = vld [vmem:[%s13203_s3 + $0x620] ss:$16 sps:$4 sm:$0xff]   ;;  %v12516_v4 = vld [vmem:[%s13203_s3 + $0x628] ss:$16 sps:$4 sm:$0xff]  }
0x1dcf   : > { %9412 = vmatprep.subr.bf16.mxu0 %v12473_v6  ;;  %9576 = vmatprep.subr.bf16.mxu1 %v12476_v7  ;;  %v12521_v6 = vld [vmem:[%s13203_s3 + $0x644] ss:$16 sps:$4 sm:$0xff]   ;;  %v12524_v7 = vld [vmem:[%s13203_s3 + $0x64c] ss:$16 sps:$4 sm:$0xff]  }
0x1dd2   : > { %9413 = vmatpush1.bf16.msra.mxu0 %v12471_v9  ;;  %9577 = vmatpush1.bf16.msra.mxu1 %v12474_v58  ;;  %v12519_v9 = vld [vmem:[%s13203_s3 + $0x640] ss:$16 sps:$4 sm:$0xff]   ;;  %v12522_v58 = vld [vmem:[%s13203_s3 + $0x648] ss:$16 sps:$4 sm:$0xff]  }
0x1dd3   : > { %9414 = vmatprep.subr.bf16.mxu0 %v12479_v10  ;;  %9578 = vmatprep.subr.bf16.mxu1 %v12482_v11  ;;  %v12527_v10 = vld [vmem:[%s13203_s3 + $0x664] ss:$16 sps:$4 sm:$0xff]   ;;  %v12530_v11 = vld [vmem:[%s13203_s3 + $0x66c] ss:$16 sps:$4 sm:$0xff]  }
0x1dd6   : > { %9415 = vmatpush1.bf16.msra.mxu0 %v12477_v12  ;;  %9579 = vmatpush1.bf16.msra.mxu1 %v12480_v41  ;;  %v12525_v12 = vld [vmem:[%s13203_s3 + $0x660] ss:$16 sps:$4 sm:$0xff]   ;;  %v12528_v41 = vld [vmem:[%s13203_s3 + $0x668] ss:$16 sps:$4 sm:$0xff]  }
0x1dd7   : > { %9416 = vmatprep.subr.bf16.mxu0 %v12485_v47  ;;  %9580 = vmatprep.subr.bf16.mxu1 %v12488_v43  ;;  %v12533_v47 = vld [vmem:[%s13203_s3 + $0x684] ss:$16 sps:$4 sm:$0xff]   ;;  %v12536_v43 = vld [vmem:[%s13203_s3 + $0x68c] ss:$16 sps:$4 sm:$0xff]  }
0x1dda   : > { %9417 = vmatpush1.bf16.msra.mxu0 %v12483_v15  ;;  %9581 = vmatpush1.bf16.msra.mxu1 %v12486_v59  ;;  %v12531_v15 = vld [vmem:[%s13203_s3 + $0x680] ss:$16 sps:$4 sm:$0xff]   ;;  %v12534_v59 = vld [vmem:[%s13203_s3 + $0x688] ss:$16 sps:$4 sm:$0xff]  }
0x1ddb   : > { %9418 = vmatprep.subr.bf16.mxu0 %v12491_v36  ;;  %9582 = vmatprep.subr.bf16.mxu1 %v12494_v17  ;;  %v12539_v36 = vld [vmem:[%s13203_s3 + $0x6a4] ss:$16 sps:$4 sm:$0xff]   ;;  %v12542_v17 = vld [vmem:[%s13203_s3 + $0x6ac] ss:$16 sps:$4 sm:$0xff]  }
0x1dde   : > { %9419 = vmatpush1.bf16.msra.mxu0 %v12489_v19  ;;  %9583 = vmatpush1.bf16.msra.mxu1 %v12492_v21  ;;  %v12537_v19 = vld [vmem:[%s13203_s3 + $0x6a0] ss:$16 sps:$4 sm:$0xff]   ;;  %v12540_v21 = vld [vmem:[%s13203_s3 + $0x6a8] ss:$16 sps:$4 sm:$0xff]  }
0x1ddf   : > { %9420 = vmatprep.subr.bf16.mxu0 %v12497_v22  ;;  %9584 = vmatprep.subr.bf16.mxu1 %v12500_v24  ;;  %v12545_v22 = vld [vmem:[%s13203_s3 + $0x6c4] ss:$16 sps:$4 sm:$0xff]   ;;  %v12548_v24 = vld [vmem:[%s13203_s3 + $0x6cc] ss:$16 sps:$4 sm:$0xff]  }
0x1de2   : > { %9421 = vmatpush1.bf16.msra.mxu0 %v12495_v32  ;;  %9585 = vmatpush1.bf16.msra.mxu1 %v12498_v46  ;;  %v7669_v52 = vpop.f32.mrb[52].mxu0  ;;  %v12543_v32 = vld [vmem:[%s13203_s3 + $0x6c0] ss:$16 sps:$4 sm:$0xff]   ;;  %v12546_v46 = vld [vmem:[%s13203_s3 + $0x6c8] ss:$16 sps:$4 sm:$0xff]  }
0x1de3   : > { %v7762_v56 = vmax.f32 %v7669_v52, 0.0  ;;  %v14623_v57 = vpop.f32.mrb[52].mxu1  ;;  %v7671_v61 = vpop.f32.mrb[53].mxu0  ;;  %9422 = vmatprep.subr.bf16.mxu0 %v12503_v16  ;;  %9586 = vmatprep.subr.bf16.mxu1 %v12506_v25  ;;  %v12551_v16 = vld [vmem:[%s13203_s3 + $0x6e4] ss:$16 sps:$4 sm:$0xff]  }
0x1de4   : > { %v7763_v45 = vmax.f32 %v7671_v61, 0.0  ;;  %v7753_v27 = vpop.f32.mrb[53].mxu1  ;;  %v7673_v60 = vpop.f32.mrb[54].mxu0  ;;  %v12554_v25 = vld [vmem:[%s13203_s3 + $0x6ec] ss:$16 sps:$4 sm:$0xff]  }
0x1de5   : > { %v7765_v28 = vmax.f32 %v7753_v27, 0.0  ;;  %v7755_v35 = vpop.f32.mrb[54].mxu1  ;;  %v7674_v29 = vpop.f32.mrb[55].mxu0  ;;  %v7770_v5 = vpack.c.bf16 %v7762_v56, %v7762_v56  ;;  %v12552_v52 = vld [vmem:[%s13203_s3 + $0x6e8] ss:$16 sps:$4 sm:$0xff]  }
0x1de6   : > { %v7771_v54 = vpack.c.bf16 %v7763_v45, %v7763_v45  ;;  %v7756_v8 = vpop.f32.mrb[55].mxu1  ;;  %9423 = vmatpush1.bf16.msra.mxu0 %v12501_v37  ;;  %9587 = vmatpush1.bf16.msra.mxu1 %v12504_v2  ;;  %v12549_v37 = vld [vmem:[%s13203_s3 + $0x6e0] ss:$16 sps:$4 sm:$0xff]   ;;  %v12557_v2 = vld [vmem:[%s13203_s3 + $0x704] ss:$16 sps:$4 sm:$0xff]  }
0x1de7   : > { %9433 = vmatprep.subr.bf16.mxu0 %v12509_v26  ;;  %9597 = vmatprep.subr.bf16.mxu1 %v12512_v62  ;;  %v7773_v3 = vpack.c.bf16 %v7765_v28, %v7765_v28  ;;  %v12560_v26 = vld [vmem:[%s13203_s3 + $0x70c] ss:$16 sps:$4 sm:$0xff]   ;;  %v12555_v56 = vld [vmem:[%s13203_s3 + $0x700] ss:$16 sps:$4 sm:$0xff]   ;;  %v12558_v61 = vld [vmem:[%s13203_s3 + $0x708] ss:$16 sps:$4 sm:$0xff]  }
0x1de8   : > { %9424 = vmatprep.mubr.bf16.mxu0 %v7771_v54  ;;  %9588 = vmatprep.mubr.bf16.mxu1 %v7771_v54  ;;  %v12563_v62 = vld [vmem:[%s13203_s3 + $0x724] ss:$16 sps:$4 sm:$0xff]   ;;  %v12566_v45 = vld [vmem:[%s13203_s3 + $0x72c] ss:$16 sps:$4 sm:$0xff]   ;;  %v12561_v27 = vld [vmem:[%s13203_s3 + $0x720] ss:$16 sps:$4 sm:$0xff]  }
0x1de9   : > { %9425 = vmatmul.mubr.bf16.vlgmr.msra.gmra.mrb[56].mxu0 %v7770_v5  ;;  %9589 = vmatmul.mubr.bf16.vlgmr.msra.gmra.mrb[56].mxu1 %v7770_v5  ;;  %v12564_v60 = vld [vmem:[%s13203_s3 + $0x728] ss:$16 sps:$4 sm:$0xff]   ;;  %v12569_v28 = vld [vmem:[%s13203_s3 + $0x744] ss:$16 sps:$4 sm:$0xff]   ;;  %v12572_v35 = vld [vmem:[%s13203_s3 + $0x74c] ss:$16 sps:$4 sm:$0xff]  }
0x1dea   : > { %9434 = vmatpush1.bf16.msra.mxu0 %v12507_v63  ;;  %9598 = vmatpush1.bf16.msra.mxu1 %v12510_v51  ;;  %v12567_v29 = vld [vmem:[%s13203_s3 + $0x740] ss:$16 sps:$4 sm:$0xff]   ;;  %v12570_v54 = vld [vmem:[%s13203_s3 + $0x748] ss:$16 sps:$4 sm:$0xff]   ;;  %v12575_v8 = vld [vmem:[%s13203_s3 + $0x764] ss:$16 sps:$4 sm:$0xff]  }
0x1deb   : > { %9465 = vmatprep.mubr.bf16.mxu0 %v7773_v3  ;;  %9629 = vmatprep.mubr.bf16.mxu1 %v7773_v3  ;;  %v12578_v63 = vld [vmem:[%s13203_s3 + $0x76c] ss:$16 sps:$4 sm:$0xff]   ;;  %v12573_v51 = vld [vmem:[%s13203_s3 + $0x760] ss:$16 sps:$4 sm:$0xff]   ;;  %v12576_v5 = vld [vmem:[%s13203_s3 + $0x768] ss:$16 sps:$4 sm:$0xff]  }
0x1dec   : > { %9435 = vmatprep.subr.bf16.mxu0 %v12515_v13  ;;  %9599 = vmatprep.subr.bf16.mxu1 %v12518_v1  ;;  %v12581_v13 = vld [vmem:[%s13203_s3 + $0x784] ss:$16 sps:$4 sm:$0xff]   ;;  %v12584_v1 = vld [vmem:[%s13203_s3 + $0x78c] ss:$16 sps:$4 sm:$0xff]   ;;  %v12579_v3 = vld [vmem:[%s13203_s3 + $0x780] ss:$16 sps:$4 sm:$0xff]  }
0x1dee   : > { %9436 = vmatpush1.bf16.msra.mxu0 %v12513_v55  ;;  %9600 = vmatpush1.bf16.msra.mxu1 %v12516_v4  ;;  %v12582_v55 = vld [vmem:[%s13203_s3 + $0x788] ss:$16 sps:$4 sm:$0xff]   ;;  %v12587_v4 = vld [vmem:[%s13203_s3 + $0x7a4] ss:$16 sps:$4 sm:$0xff]  }
0x1def   : > { %9437 = vmatprep.subr.bf16.mxu0 %v12521_v6  ;;  %9601 = vmatprep.subr.bf16.mxu1 %v12524_v7  ;;  %v12590_v6 = vld [vmem:[%s13203_s3 + $0x7ac] ss:$16 sps:$4 sm:$0xff]   ;;  %v12585_v7 = vld [vmem:[%s13203_s3 + $0x7a0] ss:$16 sps:$4 sm:$0xff]  }
0x1df2   : > { %9438 = vmatpush1.bf16.msra.mxu0 %v12519_v9  ;;  %9602 = vmatpush1.bf16.msra.mxu1 %v12522_v58  ;;  %v12588_v9 = vld [vmem:[%s13203_s3 + $0x7a8] ss:$16 sps:$4 sm:$0xff]   ;;  %v12593_v58 = vld [vmem:[%s13203_s3 + $0x7c4] ss:$16 sps:$4 sm:$0xff]  }
0x1df3   : > { %9439 = vmatprep.subr.bf16.mxu0 %v12527_v10  ;;  %9603 = vmatprep.subr.bf16.mxu1 %v12530_v11  ;;  %v12596_v10 = vld [vmem:[%s13203_s3 + $0x7cc] ss:$16 sps:$4 sm:$0xff]   ;;  %v12591_v11 = vld [vmem:[%s13203_s3 + $0x7c0] ss:$16 sps:$4 sm:$0xff]  }
0x1df6   : > { %9440 = vmatpush1.bf16.msra.mxu0 %v12525_v12  ;;  %9604 = vmatpush1.bf16.msra.mxu1 %v12528_v41  ;;  %v12594_v12 = vld [vmem:[%s13203_s3 + $0x7c8] ss:$16 sps:$4 sm:$0xff]   ;;  %v12599_v41 = vld [vmem:[%s13203_s3 + $0x7e4] ss:$16 sps:$4 sm:$0xff]  }
0x1df7   : > { %9441 = vmatprep.subr.bf16.mxu0 %v12533_v47  ;;  %9605 = vmatprep.subr.bf16.mxu1 %v12536_v43  ;;  %v12602_v47 = vld [vmem:[%s13203_s3 + $0x7ec] ss:$16 sps:$4 sm:$0xff]   ;;  %v12597_v43 = vld [vmem:[%s13203_s3 + $0x7e0] ss:$16 sps:$4 sm:$0xff]  }
0x1dfa   : > { %9442 = vmatpush1.bf16.msra.mxu0 %v12531_v15  ;;  %9606 = vmatpush1.bf16.msra.mxu1 %v12534_v59  ;;  %v12600_v15 = vld [vmem:[%s13203_s3 + $0x7e8] ss:$16 sps:$4 sm:$0xff]   ;;  %v7764_v59 = vmax.f32 %v14623_v57, 0.0 }
0x1dfb   : > { %9443 = vmatprep.subr.bf16.mxu0 %v12539_v36  ;;  %9607 = vmatprep.subr.bf16.mxu1 %v12542_v17 }
0x1dfc   : > { %v7772_v36 = vpack.c.bf16 %v7764_v59, %v7764_v59 }
0x1dfe   : > { %9444 = vmatpush1.bf16.msra.mxu0 %v12537_v19  ;;  %9608 = vmatpush1.bf16.msra.mxu1 %v12540_v21 }
0x1dff   : > { %9445 = vmatprep.subr.bf16.mxu0 %v12545_v22  ;;  %9609 = vmatprep.subr.bf16.mxu1 %v12548_v24 }
0x1e02   : > { %9446 = vmatpush1.bf16.msra.mxu0 %v12543_v32  ;;  %9610 = vmatpush1.bf16.msra.mxu1 %v12546_v46 }
0x1e03   : > { %9447 = vmatprep.subr.bf16.mxu0 %v12551_v16  ;;  %9611 = vmatprep.subr.bf16.mxu1 %v12554_v25 }
0x1e06   : > { %9448 = vmatpush1.bf16.msra.mxu0 %v12549_v37  ;;  %9612 = vmatpush1.bf16.msra.mxu1 %v12552_v52 }
0x1e07   : > { %9449 = vmatprep.subr.bf16.mxu0 %v12557_v2  ;;  %9613 = vmatprep.subr.bf16.mxu1 %v12560_v26 }
0x1e0a   : > { %9450 = vmatpush1.bf16.msra.mxu0 %v12555_v56  ;;  %9614 = vmatpush1.bf16.msra.mxu1 %v12558_v61 }
0x1e0b   : > { %9451 = vmatprep.subr.bf16.mxu0 %v12563_v62  ;;  %9615 = vmatprep.subr.bf16.mxu1 %v12566_v45 }
0x1e0e   : > { %9452 = vmatpush1.bf16.msra.mxu0 %v12561_v27  ;;  %9616 = vmatpush1.bf16.msra.mxu1 %v12564_v60 }
0x1e0f   : > { %9453 = vmatprep.subr.bf16.mxu0 %v12569_v28  ;;  %9617 = vmatprep.subr.bf16.mxu1 %v12572_v35 }
0x1e12   : > { %9454 = vmatpush1.bf16.msra.mxu0 %v12567_v29  ;;  %9618 = vmatpush1.bf16.msra.mxu1 %v12570_v54 }
0x1e13   : > { %9455 = vmatprep.subr.bf16.mxu0 %v12575_v8  ;;  %9619 = vmatprep.subr.bf16.mxu1 %v12578_v63 }
0x1e16   : > { %9456 = vmatpush1.bf16.msra.mxu0 %v12573_v51  ;;  %9620 = vmatpush1.bf16.msra.mxu1 %v12576_v5 }
0x1e17   : > { %9457 = vmatprep.subr.bf16.mxu0 %v12581_v13  ;;  %9621 = vmatprep.subr.bf16.mxu1 %v12584_v1 }
0x1e1a   : > { %9458 = vmatpush1.bf16.msra.mxu0 %v12579_v3  ;;  %9622 = vmatpush1.bf16.msra.mxu1 %v12582_v55 }
0x1e1b   : > { %9459 = vmatprep.subr.bf16.mxu0 %v12587_v4  ;;  %9623 = vmatprep.subr.bf16.mxu1 %v12590_v6 }
0x1e1e   : > { %9460 = vmatpush1.bf16.msra.mxu0 %v12585_v7  ;;  %9624 = vmatpush1.bf16.msra.mxu1 %v12588_v9 }
0x1e1f   : > { %9461 = vmatprep.subr.bf16.mxu0 %v12593_v58  ;;  %9625 = vmatprep.subr.bf16.mxu1 %v12596_v10 }
0x1e22   : > { %9462 = vmatpush1.bf16.msra.mxu0 %v12591_v11  ;;  %9626 = vmatpush1.bf16.msra.mxu1 %v12594_v12 }
0x1e23   : > { %9463 = vmatprep.subr.bf16.mxu0 %v12599_v41  ;;  %9627 = vmatprep.subr.bf16.mxu1 %v12602_v47 }
0x1e26   : > { %9464 = vmatpush1.bf16.msra.mxu0 %v12597_v43  ;;  %9628 = vmatpush1.bf16.msra.mxu1 %v12600_v15 }
0x1e29   : > { %9466 = vmatmul.mubr.bf16.vlgmr.msra.gmra.mrb[56].mxu0 %v7772_v36  ;;  %9630 = vmatmul.mubr.bf16.vlgmr.msra.gmra.mrb[56].mxu1 %v7772_v36 }
0x1efc   : > { %v9467_v17 = vpop.f32.mrb[56].mxu0  ;;  %v9631_v19 = vpop.f32.mrb[56].mxu1 }
0x1efd   : > { %v11223_v21 = vadd.f32 %v9467_v17, %v14194_v30  ;;  %v9469_v22 = vpop.f32.mrb[57].mxu0  ;;  %v9633_v24 = vpop.f32.mrb[57].mxu1  ;;  %v11225_v57 = vadd.f32 %v9631_v19, %v14198_v31 }
0x1efe   : > { %v11224_v32 = vadd.f32 %v9469_v22, %v14192_v20  ;;  %v9471_v46 = vpop.f32.mrb[58].mxu0  ;;  %v9635_v16 = vpop.f32.mrb[58].mxu1  ;;  %v11226_v2 = vadd.f32 %v9633_v24, %v14200_v33 }
0x1eff   : > { %v9472_v25 = vpop.f32.mrb[59].mxu0  ;;  %v9636_v37 = vpop.f32.mrb[59].mxu1 }
0x1f00   : > { %v9638_v52 = vadd.f32 %v11224_v32, %v11223_v21 }
0x1f02   : > { %v9639_v26 = vadd.f32 %v11225_v57, %v9638_v52 }
0x1f04   : > { %v9640_v56 = vadd.f32 %v11226_v2, %v9639_v26 }
0x1f06   : > { %9641 = vadd.xlane.f32.xlu0 %v9640_v56 }
0x1f93   : > { %v9642_v61 = vpop.xlane.xlu0 %9641 }
0x1f94   : > { %v9643_v62 = vmul.f32 0.001953125, %v9642_v61 }
0x1f96   : > { %v9644_v45 = vsub.f32 %v11223_v21, %v9643_v62  ;;  %v9645_v30 = vsub.f32 %v11224_v32, %v9643_v62  ;;  %v9646_v27 = vsub.f32 %v11225_v57, %v9643_v62  ;;  %v9647_v60 = vsub.f32 %v11226_v2, %v9643_v62 }
0x1f98   : > { %v9648_v28 = vmul.f32 %v9644_v45, %v9644_v45  ;;  %v9649_v20 = vmul.f32 %v9645_v30, %v9645_v30  ;;  %v9650_v35 = vmul.f32 %v9646_v27, %v9646_v27  ;;  %v9651_v54 = vmul.f32 %v9647_v60, %v9647_v60 }
0x1f9a   : > { %v9652_v29 = vadd.f32 %v9649_v20, %v9648_v28 }
0x1f9c   : > { %v9653_v8 = vadd.f32 %v9652_v29, %v9650_v35 }
0x1f9e   : > { %v9654_v63 = vadd.f32 %v9653_v8, %v9651_v54 }
0x1fa0   : > { %9655 = vadd.xlane.f32.xlu0 %v9654_v63 }
0x202d   : > { %v9656_v31 = vpop.xlane.xlu0 %9655 }
0x202e   : > { %v9657_v51 = vmul.f32 0.001953125, %v9656_v31 }
0x2030   : > { %v9658_v33 = vadd.f32 1e-05, %v9657_v51 }
0x2032   : > { %12637 = vrsqrt.f32 %v9658_v33 }
0x203c   : > { %v12638_v5 = vpop.eup %12637 }
0x203d   : > { %v9660_v13 = vmul.f32 %v12638_v5, %v9644_v45  ;;  %v9661_v1 = vmul.f32 %v12638_v5, %v9645_v30  ;;  %v9662_v3 = vmul.f32 %v12638_v5, %v9646_v27  ;;  %v9663_v55 = vmul.f32 %v12638_v5, %v9647_v60 }
0x203f   : > { %v9700_v4 = vmul.f32 %v14162_v40, %v9660_v13  ;;  %v9701_v6 = vmul.f32 %v9691_v34, %v9661_v1  ;;  %v9702_v7 = vmul.f32 %v14172_v48, %v9662_v3  ;;  %v9703_v9 = vmul.f32 %v9699_v49, %v9663_v55 }
0x2041   : > { %v9740_v58 = vadd.f32 %v14167_v42, %v9700_v4  ;;  %v9741_v10 = vadd.f32 %v9731_v44, %v9701_v6  ;;  %v9742_v11 = vadd.f32 %v14177_v50, %v9702_v7  ;;  %v9743_v40 = vadd.f32 %v9739_v53, %v9703_v9 }
0x2043   : > { %9744 = vst [vmem:[%s13250_s9] sm:$0xff] %v9740_v58  ;;  %9745 = vst [vmem:[%s13250_s9 + $0x8] sm:$0xff] %v9741_v10 }
0x2044   : > { %9746 = vst [vmem:[%s13250_s9 + $0x10] sm:$0xff] %v9742_v11  ;;  %9747 = vst [vmem:[%s13250_s9 + $0x18] sm:$0xff] %v9743_v40 }
0x2045   : > { %9748 = vst [vmem:[%s13225_s29] sm:$0xff] %v9740_v58  ;;  %9749 = vst [vmem:[%s13225_s29 + $0x8] sm:$0xff] %v9741_v10 }
0x2046   : > { %9750 = vst [vmem:[%s13225_s29 + $0x10] sm:$0xff] %v9742_v11  ;;  %9751 = vst [vmem:[%s13225_s29 + $0x18] sm:$0xff] %v9743_v40 }
0x2047 PF: > { %s28_s12 = sadd.s32 1, %s12868_s12   ;;  %s14790_s4 = sld [smem:[#allocation14_spill]] }
0x2048   : > { %p25_p2 = scmp.ge.s32.totalorder %s28_s12, 18   ;;  %s14791_s29 = sld [smem:[#allocation18_spill]] }
0x2049   : > { %s14792_s30 = sld [smem:[#allocation15_spill]]  ;;  %s14793_s10 = sld [smem:[#allocation16_spill]] }
0x204a   : > { %s14794_s8 = sld [smem:[#allocation17_spill]]  ;;  %s14795_s27 = smov %s12844_s28 }
0x204b   : > { %s14797_s9 = smov %s12864_s11  ;;  %27 = sbr.rel (!%p25_p2) target bundleno = 17 (0x11), region = 167 }
0x204d   : > { %s14796_s28 = smov %s14790_s4 }
0x2050   : > { %s14798_s11 = smov %s14794_s8 }
0x2052   :  { %9795 = vsyncpa [#allocation4], 1 }
0x2053   :  { %9797 = vsyncpa [#allocation4 + $0x1], 1 }
0x2054   :  { %9798 = vsyncpa [#allocation6], 1 }
0x2055   :  { %9800 = vsyncpa [#allocation6 + $0x1], 1 }
0x2056   :  { %9801 = vsyncpa [#allocation9], 1 }
0x2057   :  { %9803 = vsyncpa [#allocation9 + $0x1], 1 }

</bundles_post_ra>
